<compile_context>
chip_gen: v5e
topology: v5e:2x2
jax: 0.10.0
libtpu: 0.0.40
codegen_flags: <defaults>
</compile_context>

<pallas_src>
import functools

import jax
import jax.numpy as jnp
from jax.experimental import pallas as pl
from jax.experimental.pallas import tpu as pltpu


def _round_up(x, m):
    return (x + m - 1) // m * m


def _residual_block_kernel(*refs, s, th, ho, wo, wos, woe1,
                           has_downsample, lane_dense):
    # refs: x, w1, w2, [wd], out
    #   x_ref : (s*s, Hs, Ws, Cin)  polyphase-split, zero-padded NHWC input for
    #                               one image: phase p = py*s+px holds
    #                               x_pad[s*u+py, s*v+px].
    #   w1_ref: (9*Cin, Cout)       conv1 weights, (ky, kx, ci) fused into K
    #   w2_ref: (9*Cout, Cout)      conv2 weights, (ky, kx, ci) fused into K
    #   wd_ref: (Cin, Cout)         1x1 downsample weight (only if used)
    #   o_ref : (1, th, wos*Cout) or (1, th, wos, Cout)   one H-tile of output
    if has_downsample:
        x_ref, w1_ref, w2_ref, wd_ref, o_ref = refs
    else:
        x_ref, w1_ref, w2_ref, o_ref = refs
        wd_ref = None

    cin = x_ref.shape[-1]
    cout = w1_ref.shape[-1]
    the = th + 2                      # conv1 rows computed per tile (incl. halo)

    r0 = pl.multiple_of(pl.program_id(1) * th, th)   # first output row of tile

    # ---- conv1: 3x3 stride s as ONE matmul, K = 9*Cin ----------------------
    # Tap (ky, kx) of extended conv1 output (r', c') reads padded input
    # (s*(r'+1)+ky, s*(c'+1)+kx) = phase (ky%s, kx%s) at contiguous coords
    # (r'+1+ky//s, c'+1+kx//s): contiguous loads for any stride.
    def tap(ky, kx):
        py, qy = ky % s, ky // s
        px, qx = kx % s, kx // s
        return x_ref[py * s + px, pl.ds(r0 + qy, the), qx:qx + woe1, :]

    patch1 = jnp.concatenate(
        [tap(ky, kx) for ky in range(3) for kx in range(3)],
        axis=-1)                                            # (the, woe1, 9*Cin)
    out1 = jnp.dot(patch1.reshape(the * woe1, 9 * cin), w1_ref[...],
                   preferred_element_type=jnp.float32)
    out1 = jnp.maximum(out1, 0.0).reshape(the, woe1, cout)  # ReLU

    # conv2's zero padding: zero the rows/cols of the extended conv1 window
    # that fall outside the real (ho, wo) conv1 output (incl. the width pad).
    row_pos = r0 - 1 + jax.lax.broadcasted_iota(jnp.int32, (the, woe1, 1), 0)
    col_pos = jax.lax.broadcasted_iota(jnp.int32, (the, woe1, 1), 1) - 1
    valid = (row_pos >= 0) & (row_pos < ho) & (col_pos >= 0) & (col_pos < wo)
    y = jnp.where(valid, out1, 0.0).astype(jnp.bfloat16)    # (the, woe1, Cout)

    # ---- conv2: 3x3 stride 1 as ONE matmul, K = 9*Cout ---------------------
    patch2 = jnp.concatenate(
        [y[ky:ky + th, kx:kx + wos, :] for ky in range(3) for kx in range(3)],
        axis=-1)                                            # (th, wos, 9*Cout)
    out2 = jnp.dot(patch2.reshape(th * wos, 9 * cout), w2_ref[...],
                   preferred_element_type=jnp.float32)      # (th*wos, Cout)

    # ---- identity branch (optional 1x1 conv with stride) -------------------
    pi, qi = 1 % s, 1 // s
    center = x_ref[pi * s + pi, pl.ds(r0 + 1 + qi, th), 1 + qi:1 + qi + wos, :]
    if has_downsample:
        ident = jnp.dot(center.reshape(th * wos, cin), wd_ref[...],
                        preferred_element_type=jnp.float32)
    else:
        # NOTE: skip tap is the bf16-rounded input (MXU operand copy); error is
        # within the bf16 budget used by the checker below.
        ident = center.reshape(th * wos, cout).astype(jnp.float32)

    res = jnp.maximum(out2 + ident, 0.0)                    # add + ReLU
    if lane_dense:
        # Cout < 128: one relayout to a fully lane-dense (th, wos*Cout) slab so
        # the writeback is unmasked full-width stores instead of vst.msk.
        o_ref[...] = res.reshape(1, th, wos * cout).astype(o_ref.dtype)
    else:
        o_ref[...] = res.reshape(1, th, wos, cout).astype(o_ref.dtype)


def _pick_h_tile(ho, wos, woe1, cin, cout):
    """Output-height tile: a divisor of ho that is a multiple of 8 (or ho
    itself), targeting matmul M = th*wos of roughly 512-2048 rows while keeping
    a rough per-step VMEM estimate bounded (v7x's 64 MiB is the tight case)."""
    cands = sorted({t for t in range(8, ho + 1, 8) if ho % t == 0} | {ho})

    def step_bytes(th):
        the = th + 2
        return (the * woe1 * 9 * cin * 2          # conv1 im2col patch (bf16)
                + the * woe1 * cout * 6           # conv1 f32 out + bf16 y
                + th * wos * 9 * cout * 2         # conv2 im2col patch (bf16)
                + th * wos * cout * 12)           # conv2/identity/result (f32)

    best = cands[0]
    for th in cands:
        if step_bytes(th) > 8 * 1024 * 1024:
            break
        best = th
        if th * wos >= 2048:
            break
    return best


def residual_block_pallas(x_nchw, w1, w2, wd=None, *, stride=1):
    """ResidualBlock forward.  x_nchw: (B, Cin, H, W) f32; w1: (Cout, Cin, 3, 3);
    w2: (Cout, Cout, 3, 3); wd: (Cout, Cin, 1, 1) or None.
    Returns (B, Cout, Ho, Wo) f32 NCHW (MXU operands bf16, f32 accumulation)."""
    b, cin, h, w = (int(d) for d in x_nchw.shape)
    cout = int(w1.shape[0])
    s = int(stride)
    ho = (h - 1) // s + 1             # = floor((H + 2 - 3)/s) + 1
    wo = (w - 1) // s + 1
    has_downsample = wd is not None
    if not has_downsample and (cin != cout or s != 1):
        raise ValueError("identity skip requires in_channels == out_channels "
                         "and stride == 1 (pass the 1x1 downsample weight)")

    # Tile-aligned computed widths so every im2col merge reshape is layout-free.
    wos = _round_up(wo, 8)            # conv2 / output columns computed per tile
    woe1 = _round_up(wos + 2, 8)      # conv1 columns computed per tile
    th = _pick_h_tile(ho, wos, woe1, cin, cout)
    n_ht = ho // th
    lane_dense = cout < 128

    # ---- layout glue (one fused XLA pass each way) --------------------------
    # NCHW -> NHWC (channels on lanes), bf16 MXU operands, zero padding that
    # covers every tap of every tile, then a polyphase (space-to-depth) split
    # so the kernel only does contiguous loads even for stride > 1:
    #   x_ph[b*s*s + py*s + px, u, v, ci] = x_pad[b, s*u + py, s*v + px, ci]
    q2 = 2 // s                       # max tap offset inside a phase plane
    hs = ho + 2 + q2
    ws = woe1 + q2
    hp, wp = s * hs, s * ws
    pad_lo = s + 1
    x = jnp.transpose(x_nchw, (0, 2, 3, 1)).astype(jnp.bfloat16)
    x = jnp.pad(x, ((0, 0), (pad_lo, hp - h - pad_lo),
                    (pad_lo, wp - w - pad_lo), (0, 0)))
    x = x.reshape(b, hs, s, ws, s, cin).transpose(0, 2, 4, 1, 3, 5)
    x = x.reshape(b * s * s, hs, ws, cin)

    # 3x3 weights OIHW -> row (ky*3 + kx)*Cin + ci, col co: all nine taps live
    # in the matmul contraction dimension.
    w1_k = jnp.transpose(w1, (2, 3, 1, 0)).reshape(9 * cin, cout).astype(jnp.bfloat16)
    w2_k = jnp.transpose(w2, (2, 3, 1, 0)).reshape(9 * cout, cout).astype(jnp.bfloat16)

    operands = [x, w1_k, w2_k]
    if has_downsample:
        operands.append(jnp.transpose(wd[:, :, 0, 0], (1, 0)).astype(jnp.bfloat16))

    def build_call(single_buffer_weights, use_lane_dense):
        wkw = {}
        if single_buffer_weights:
            # Weight block indices never change -> one VMEM buffer is enough.
            wkw = dict(pipeline_mode=pl.Buffered(1))
        # TODO(synk): for large images/channels, switch x to memory_space=pl.ANY
        # and DMA only the (s*th + 2) halo rows per H-tile (manual double
        # buffering) instead of shipping the whole phase-split image per step.
        in_specs = [
            pl.BlockSpec((s * s, hs, ws, cin), lambda i, j: (i, 0, 0, 0)),
            pl.BlockSpec((9 * cin, cout), lambda i, j: (0, 0), **wkw),
            pl.BlockSpec((9 * cout, cout), lambda i, j: (0, 0), **wkw),
        ]
        if has_downsample:
            in_specs.append(pl.BlockSpec((cin, cout), lambda i, j: (0, 0), **wkw))
        if use_lane_dense:
            out_shape = jax.ShapeDtypeStruct((b, ho, wos * cout), jnp.float32)
            out_spec = pl.BlockSpec((1, th, wos * cout), lambda i, j: (i, j, 0))
        else:
            out_shape = jax.ShapeDtypeStruct((b, ho, wos, cout), jnp.float32)
            out_spec = pl.BlockSpec((1, th, wos, cout), lambda i, j: (i, j, 0, 0))
        kfn = functools.partial(
            _residual_block_kernel, s=s, th=th, ho=ho, wo=wo, wos=wos,
            woe1=woe1, has_downsample=has_downsample, lane_dense=use_lane_dense)
        return pl.pallas_call(
            kfn,
            out_shape=out_shape,
            grid_spec=pltpu.PrefetchScalarGridSpec(
                num_scalar_prefetch=0,
                grid=(b, n_ht),
                in_specs=in_specs,
                out_specs=out_spec),
            compiler_params=pltpu.CompilerParams(
                dimension_semantics=("parallel", "parallel"),
                vmem_limit_bytes=64 * 1024 * 1024),
        )

    # Preferred configuration first; degrade gracefully if this JAX/Mosaic
    # build rejects single-buffered weight blocks or the lane-dense relayout.
    attempts = []
    for cfg in ((True, lane_dense), (False, lane_dense), (False, False)):
        if cfg not in attempts:
            attempts.append(cfg)
    out = None
    lane_dense_used = False
    last_err = None
    for single_buf, ld in attempts:
        try:
            out = build_call(single_buf, ld)(*operands)
            lane_dense_used = ld
            break
        except Exception as e:  # fall back; re-raised below if all fail
            last_err = e
    if out is None:
        raise last_err

    if lane_dense_used:
        out = out.reshape(b, ho, wos, cout)
    out = out[:, :, :wo, :]
    # TODO(synk): if adjacent layers are also NHWC Pallas kernels, keep NHWC
    # (and optionally bf16) end-to-end and drop this transpose and the input one.
    return jnp.transpose(out, (0, 3, 1, 2))


def residual_block_ref(x, w1, w2, wd, *, stride=1):
    """Pure-JAX f32 reference (NCHW / OIHW), mirrors the PyTorch forward."""
    def conv(inp, wgt, s, pad):
        dn = jax.lax.conv_dimension_numbers(inp.shape, wgt.shape,
                                            ('NCHW', 'OIHW', 'NCHW'))
        return jax.lax.conv_general_dilated(inp, wgt, (s, s),
                                            ((pad, pad), (pad, pad)),
                                            dimension_numbers=dn)
    out = jnp.maximum(conv(x, w1, stride, 1), 0.0)
    out = conv(out, w2, 1, 1)
    ident = conv(x, wd, stride, 0) if wd is not None else x
    return jnp.maximum(out + ident, 0.0)


def _init_conv_weight(key, cout, cin, k):
    # Deterministic kaiming-uniform-like init (synthetic; not a checkpoint).
    bound = 1.0 / jnp.sqrt(cin * k * k)
    return jax.random.uniform(key, (cout, cin, k, k), jnp.float32,
                              minval=-bound, maxval=bound)


if __name__ == "__main__":
    key = jax.random.PRNGKey(0)
    keys = jax.random.split(key, 8)

    def check(out, ref, name):
        assert out.shape == ref.shape, (name, out.shape, ref.shape)
        err = float(jnp.max(jnp.abs(out - ref)))
        # Error budget scaled to bf16 MXU operands (f32 accumulation).
        tol = 4e-2 * (1.0 + float(jnp.max(jnp.abs(ref))))
        assert err <= tol, f"{name}: max abs err {err:.4f} > tol {tol:.4f}"

    # Case 1: in_channels != out_channels -> 1x1 downsample branch, stride 1.
    b, cin, cout, h, w = 2, 4, 8, 16, 16
    x = jax.random.normal(keys[0], (b, cin, h, w), jnp.float32)
    w1 = _init_conv_weight(keys[1], cout, cin, 3)
    w2 = _init_conv_weight(keys[2], cout, cout, 3)
    wd = _init_conv_weight(keys[3], cout, cin, 1)
    out1 = jax.block_until_ready(residual_block_pallas(x, w1, w2, wd, stride=1))
    check(out1, residual_block_ref(x, w1, w2, wd, stride=1), "downsample/s1")

    # Case 2: in_channels == out_channels, stride 1 -> plain identity skip.
    x2 = jax.random.normal(keys[4], (b, cout, h, w), jnp.float32)
    w1b = _init_conv_weight(keys[5], cout, cout, 3)
    w2b = _init_conv_weight(keys[6], cout, cout, 3)
    out2 = jax.block_until_ready(residual_block_pallas(x2, w1b, w2b, None,
                                                       stride=1))
    check(out2, residual_block_ref(x2, w1b, w2b, None, stride=1), "identity/s1")

    # Case 3: stride 2 (polyphase path) with the 1x1 downsample branch.
    out3 = jax.block_until_ready(residual_block_pallas(x, w1, w2, wd, stride=2))
    check(out3, residual_block_ref(x, w1, w2, wd, stride=2), "downsample/s2")

    print("KERNEL_OK")
</pallas_src>

<mosaic_0001>
module attributes {stable_mosaic.version = 11 : i64} {
  func.func @_residual_block_kernel(%arg0: i32, %arg1: i32, %arg2: memref<1x20x26x4xbf16, #tpu.memory_space<vmem>>, %arg3: memref<36x8xbf16, #tpu.memory_space<vmem>>, %arg4: memref<72x8xbf16, #tpu.memory_space<vmem>>, %arg5: memref<4x8xbf16, #tpu.memory_space<vmem>>, %arg6: memref<1x16x128xf32, #tpu.memory_space<vmem>>) attributes {dimension_semantics = [#tpu.dimension_semantics<parallel>, #tpu.dimension_semantics<parallel>], iteration_bounds = array<i64: 2, 1>, scalar_prefetch = 0 : i64, scratch_operands = 0 : i64, tpu.core_type = #tpu.core_type<tc>, window_params = [{transform_indices = @transform_0, window_bounds = array<i64: 1, 20, 26, 4>}, {pipeline_mode = #tpu.pipeline_mode<synchronous>, transform_indices = @transform_1, window_bounds = array<i64: 36, 8>}, {pipeline_mode = #tpu.pipeline_mode<synchronous>, transform_indices = @transform_2, window_bounds = array<i64: 72, 8>}, {pipeline_mode = #tpu.pipeline_mode<synchronous>, transform_indices = @transform_3, window_bounds = array<i64: 4, 8>}, {transform_indices = @transform_4, window_bounds = array<i64: 1, 16, 128>}]} {
    %c16_i32 = arith.constant 16 : i32
    %0 = arith.muli %arg1, %c16_i32 : i32
    %1 = tpu.assume_multiple %0, 16 : i32
    %c0_i32 = arith.constant 0 : i32
    %2 = arith.addi %1, %c0_i32 : i32
    %c0 = arith.constant 0 : index
    %3 = arith.index_cast %2 : i32 to index
    %c0_0 = arith.constant 0 : index
    %c0_1 = arith.constant 0 : index
    %4 = vector.load %arg2[%c0, %3, %c0_0, %c0_1] : memref<1x20x26x4xbf16, #tpu.memory_space<vmem>>, vector<1x18x24x4xbf16>
    %5 = vector.shape_cast %4 : vector<1x18x24x4xbf16> to vector<18x24x4xbf16>
    %c0_i32_2 = arith.constant 0 : i32
    %6 = arith.addi %1, %c0_i32_2 : i32
    %c0_3 = arith.constant 0 : index
    %7 = arith.index_cast %6 : i32 to index
    %c1 = arith.constant 1 : index
    %c0_4 = arith.constant 0 : index
    %8 = vector.load %arg2[%c0_3, %7, %c1, %c0_4] : memref<1x20x26x4xbf16, #tpu.memory_space<vmem>>, vector<1x18x24x4xbf16>
    %9 = vector.shape_cast %8 : vector<1x18x24x4xbf16> to vector<18x24x4xbf16>
    %c0_i32_5 = arith.constant 0 : i32
    %10 = arith.addi %1, %c0_i32_5 : i32
    %c0_6 = arith.constant 0 : index
    %11 = arith.index_cast %10 : i32 to index
    %c2 = arith.constant 2 : index
    %c0_7 = arith.constant 0 : index
    %12 = vector.load %arg2[%c0_6, %11, %c2, %c0_7] : memref<1x20x26x4xbf16, #tpu.memory_space<vmem>>, vector<1x18x24x4xbf16>
    %13 = vector.shape_cast %12 : vector<1x18x24x4xbf16> to vector<18x24x4xbf16>
    %c1_i32 = arith.constant 1 : i32
    %14 = arith.addi %1, %c1_i32 : i32
    %c0_8 = arith.constant 0 : index
    %15 = arith.index_cast %14 : i32 to index
    %c0_9 = arith.constant 0 : index
    %c0_10 = arith.constant 0 : index
    %16 = vector.load %arg2[%c0_8, %15, %c0_9, %c0_10] : memref<1x20x26x4xbf16, #tpu.memory_space<vmem>>, vector<1x18x24x4xbf16>
    %17 = vector.shape_cast %16 : vector<1x18x24x4xbf16> to vector<18x24x4xbf16>
    %c1_i32_11 = arith.constant 1 : i32
    %18 = arith.addi %1, %c1_i32_11 : i32
    %c0_12 = arith.constant 0 : index
    %19 = arith.index_cast %18 : i32 to index
    %c1_13 = arith.constant 1 : index
    %c0_14 = arith.constant 0 : index
    %20 = vector.load %arg2[%c0_12, %19, %c1_13, %c0_14] : memref<1x20x26x4xbf16, #tpu.memory_space<vmem>>, vector<1x18x24x4xbf16>
    %21 = vector.shape_cast %20 : vector<1x18x24x4xbf16> to vector<18x24x4xbf16>
    %c1_i32_15 = arith.constant 1 : i32
    %22 = arith.addi %1, %c1_i32_15 : i32
    %c0_16 = arith.constant 0 : index
    %23 = arith.index_cast %22 : i32 to index
    %c2_17 = arith.constant 2 : index
    %c0_18 = arith.constant 0 : index
    %24 = vector.load %arg2[%c0_16, %23, %c2_17, %c0_18] : memref<1x20x26x4xbf16, #tpu.memory_space<vmem>>, vector<1x18x24x4xbf16>
    %25 = vector.shape_cast %24 : vector<1x18x24x4xbf16> to vector<18x24x4xbf16>
    %c2_i32 = arith.constant 2 : i32
    %26 = arith.addi %1, %c2_i32 : i32
    %c0_19 = arith.constant 0 : index
    %27 = arith.index_cast %26 : i32 to index
    %c0_20 = arith.constant 0 : index
    %c0_21 = arith.constant 0 : index
    %28 = vector.load %arg2[%c0_19, %27, %c0_20, %c0_21] : memref<1x20x26x4xbf16, #tpu.memory_space<vmem>>, vector<1x18x24x4xbf16>
    %29 = vector.shape_cast %28 : vector<1x18x24x4xbf16> to vector<18x24x4xbf16>
    %c2_i32_22 = arith.constant 2 : i32
    %30 = arith.addi %1, %c2_i32_22 : i32
    %c0_23 = arith.constant 0 : index
    %31 = arith.index_cast %30 : i32 to index
    %c1_24 = arith.constant 1 : index
    %c0_25 = arith.constant 0 : index
    %32 = vector.load %arg2[%c0_23, %31, %c1_24, %c0_25] : memref<1x20x26x4xbf16, #tpu.memory_space<vmem>>, vector<1x18x24x4xbf16>
    %33 = vector.shape_cast %32 : vector<1x18x24x4xbf16> to vector<18x24x4xbf16>
    %c2_i32_26 = arith.constant 2 : i32
    %34 = arith.addi %1, %c2_i32_26 : i32
    %c0_27 = arith.constant 0 : index
    %35 = arith.index_cast %34 : i32 to index
    %c2_28 = arith.constant 2 : index
    %c0_29 = arith.constant 0 : index
    %36 = vector.load %arg2[%c0_27, %35, %c2_28, %c0_29] : memref<1x20x26x4xbf16, #tpu.memory_space<vmem>>, vector<1x18x24x4xbf16>
    %37 = vector.shape_cast %36 : vector<1x18x24x4xbf16> to vector<18x24x4xbf16>
    %38 = tpu.concatenate %5, %9, %13, %17, %21, %25, %29, %33, %37 in 2 : vector<18x24x4xbf16>, vector<18x24x4xbf16>, vector<18x24x4xbf16>, vector<18x24x4xbf16>, vector<18x24x4xbf16>, vector<18x24x4xbf16>, vector<18x24x4xbf16>, vector<18x24x4xbf16>, vector<18x24x4xbf16> -> vector<18x24x36xbf16>
    %39 = vector.shape_cast %38 : vector<18x24x36xbf16> to vector<432x36xbf16>
    %c0_30 = arith.constant 0 : index
    %c0_31 = arith.constant 0 : index
    %40 = vector.load %arg3[%c0_30, %c0_31] : memref<36x8xbf16, #tpu.memory_space<vmem>>, vector<36x8xbf16>
    %cst = arith.constant dense<0.000000e+00> : vector<432x8xf32>
    %41 = tpu.matmul %39, %40, %cst {dimension_numbers = #tpu.dot_dimension_numbers<[1], [0], [0], [1], [0, 0, 1, 1], [], []>} : vector<432x36xbf16>, vector<36x8xbf16>, vector<432x8xf32> -> vector<432x8xf32>
    %cst_32 = arith.constant 0.000000e+00 : f32
    %42 = vector.broadcast %cst_32 : f32 to vector<432x8xf32>
    %43 = arith.maximumf %41, %42 : vector<432x8xf32>
    %44 = vector.shape_cast %43 : vector<432x8xf32> to vector<18x24x8xf32>
    %c1_i32_33 = arith.constant 1 : i32
    %45 = arith.subi %1, %c1_i32_33 : i32
    %46 = tpu.iota {dimensions = array<i32: 0>} : vector<18x24x1xi32>
    %47 = vector.broadcast %45 : i32 to vector<18x24x1xi32>
    %48 = arith.addi %47, %46 : vector<18x24x1xi32>
    %49 = tpu.iota {dimensions = array<i32: 1>} : vector<18x24x1xi32>
    %c1_i32_34 = arith.constant 1 : i32
    %50 = vector.broadcast %c1_i32_34 : i32 to vector<18x24x1xi32>
    %51 = arith.subi %49, %50 : vector<18x24x1xi32>
    %c0_i32_35 = arith.constant 0 : i32
    %52 = vector.broadcast %c0_i32_35 : i32 to vector<18x24x1xi32>
    %53 = arith.cmpi sge, %48, %52 : vector<18x24x1xi32>
    %c16_i32_36 = arith.constant 16 : i32
    %54 = vector.broadcast %c16_i32_36 : i32 to vector<18x24x1xi32>
    %55 = arith.cmpi slt, %48, %54 : vector<18x24x1xi32>
    %56 = arith.andi %53, %55 : vector<18x24x1xi1>
    %c0_i32_37 = arith.constant 0 : i32
    %57 = vector.broadcast %c0_i32_37 : i32 to vector<18x24x1xi32>
    %58 = arith.cmpi sge, %51, %57 : vector<18x24x1xi32>
    %59 = arith.andi %56, %58 : vector<18x24x1xi1>
    %c16_i32_38 = arith.constant 16 : i32
    %60 = vector.broadcast %c16_i32_38 : i32 to vector<18x24x1xi32>
    %61 = arith.cmpi slt, %51, %60 : vector<18x24x1xi32>
    %62 = arith.andi %59, %61 : vector<18x24x1xi1>
    %cst_39 = arith.constant 0.000000e+00 : f32
    %63 = vector.shape_cast %62 : vector<18x24x1xi1> to vector<18x24x1xi1>
    %64 = vector.broadcast %63 : vector<18x24x1xi1> to vector<18x24x8xi1>
    %65 = vector.broadcast %cst_39 : f32 to vector<18x24x8xf32>
    %66 = arith.select %64, %44, %65 : vector<18x24x8xi1>, vector<18x24x8xf32>
    %67 = arith.truncf %66 : vector<18x24x8xf32> to vector<18x24x8xbf16>
    %68 = vector.extract_strided_slice %67 {offsets = [0, 0, 0], sizes = [16, 16, 8], strides = [1, 1, 1]} : vector<18x24x8xbf16> to vector<16x16x8xbf16>
    %69 = vector.extract_strided_slice %67 {offsets = [0, 1, 0], sizes = [16, 16, 8], strides = [1, 1, 1]} : vector<18x24x8xbf16> to vector<16x16x8xbf16>
    %70 = vector.extract_strided_slice %67 {offsets = [0, 2, 0], sizes = [16, 16, 8], strides = [1, 1, 1]} : vector<18x24x8xbf16> to vector<16x16x8xbf16>
    %71 = vector.extract_strided_slice %67 {offsets = [1, 0, 0], sizes = [16, 16, 8], strides = [1, 1, 1]} : vector<18x24x8xbf16> to vector<16x16x8xbf16>
    %72 = vector.extract_strided_slice %67 {offsets = [1, 1, 0], sizes = [16, 16, 8], strides = [1, 1, 1]} : vector<18x24x8xbf16> to vector<16x16x8xbf16>
    %73 = vector.extract_strided_slice %67 {offsets = [1, 2, 0], sizes = [16, 16, 8], strides = [1, 1, 1]} : vector<18x24x8xbf16> to vector<16x16x8xbf16>
    %74 = vector.extract_strided_slice %67 {offsets = [2, 0, 0], sizes = [16, 16, 8], strides = [1, 1, 1]} : vector<18x24x8xbf16> to vector<16x16x8xbf16>
    %75 = vector.extract_strided_slice %67 {offsets = [2, 1, 0], sizes = [16, 16, 8], strides = [1, 1, 1]} : vector<18x24x8xbf16> to vector<16x16x8xbf16>
    %76 = vector.extract_strided_slice %67 {offsets = [2, 2, 0], sizes = [16, 16, 8], strides = [1, 1, 1]} : vector<18x24x8xbf16> to vector<16x16x8xbf16>
    %77 = tpu.concatenate %68, %69, %70, %71, %72, %73, %74, %75, %76 in 2 : vector<16x16x8xbf16>, vector<16x16x8xbf16>, vector<16x16x8xbf16>, vector<16x16x8xbf16>, vector<16x16x8xbf16>, vector<16x16x8xbf16>, vector<16x16x8xbf16>, vector<16x16x8xbf16>, vector<16x16x8xbf16> -> vector<16x16x72xbf16>
    %78 = vector.shape_cast %77 : vector<16x16x72xbf16> to vector<256x72xbf16>
    %c0_40 = arith.constant 0 : index
    %c0_41 = arith.constant 0 : index
    %79 = vector.load %arg4[%c0_40, %c0_41] : memref<72x8xbf16, #tpu.memory_space<vmem>>, vector<72x8xbf16>
    %cst_42 = arith.constant dense<0.000000e+00> : vector<256x8xf32>
    %80 = tpu.matmul %78, %79, %cst_42 {dimension_numbers = #tpu.dot_dimension_numbers<[1], [0], [0], [1], [0, 0, 1, 1], [], []>} : vector<256x72xbf16>, vector<72x8xbf16>, vector<256x8xf32> -> vector<256x8xf32>
    %c1_i32_43 = arith.constant 1 : i32
    %81 = arith.addi %1, %c1_i32_43 : i32
    %c1_i32_44 = arith.constant 1 : i32
    %82 = arith.addi %81, %c1_i32_44 : i32
    %c0_45 = arith.constant 0 : index
    %83 = arith.index_cast %82 : i32 to index
    %c2_46 = arith.constant 2 : index
    %c0_47 = arith.constant 0 : index
    %84 = vector.load %arg2[%c0_45, %83, %c2_46, %c0_47] : memref<1x20x26x4xbf16, #tpu.memory_space<vmem>>, vector<1x16x16x4xbf16>
    %85 = vector.shape_cast %84 : vector<1x16x16x4xbf16> to vector<16x16x4xbf16>
    %86 = vector.shape_cast %85 : vector<16x16x4xbf16> to vector<256x4xbf16>
    %c0_48 = arith.constant 0 : index
    %c0_49 = arith.constant 0 : index
    %87 = vector.load %arg5[%c0_48, %c0_49] : memref<4x8xbf16, #tpu.memory_space<vmem>>, vector<4x8xbf16>
    %cst_50 = arith.constant dense<0.000000e+00> : vector<256x8xf32>
    %88 = tpu.matmul %86, %87, %cst_50 {dimension_numbers = #tpu.dot_dimension_numbers<[1], [0], [0], [1], [0, 0, 1, 1], [], []>} : vector<256x4xbf16>, vector<4x8xbf16>, vector<256x8xf32> -> vector<256x8xf32>
    %89 = arith.addf %80, %88 : vector<256x8xf32>
    %cst_51 = arith.constant 0.000000e+00 : f32
    %90 = vector.broadcast %cst_51 : f32 to vector<256x8xf32>
    %91 = arith.maximumf %89, %90 : vector<256x8xf32>
    %92 = vector.shape_cast %91 : vector<256x8xf32> to vector<1x16x128xf32>
    %c0_52 = arith.constant 0 : index
    %c0_53 = arith.constant 0 : index
    %c0_54 = arith.constant 0 : index
    %93 = vector.load %arg6[%c0_52, %c0_53, %c0_54] : memref<1x16x128xf32, #tpu.memory_space<vmem>>, vector<1x16x128xf32>
    tpu.vector_store %arg6[%c0_52, %c0_53, %c0_54], %92 {strides = array<i32>} : memref<1x16x128xf32, #tpu.memory_space<vmem>>, vector<1x16x128xf32>,
    return
  }
  func.func @transform_0(%arg0: i32, %arg1: i32) -> (i32, i32, i32, i32) {
    %c0_i32 = arith.constant 0 : i32
    %c0_i32_0 = arith.constant 0 : i32
    %c0_i32_1 = arith.constant 0 : i32
    %c0_i32_2 = arith.constant 0 : i32
    return %arg0, %c0_i32, %c0_i32_0, %c0_i32_1 : i32, i32, i32, i32
  }
  func.func @transform_1(%arg0: i32, %arg1: i32) -> (i32, i32) {
    %c0_i32 = arith.constant 0 : i32
    %c0_i32_0 = arith.constant 0 : i32
    %c0_i32_1 = arith.constant 0 : i32
    return %c0_i32, %c0_i32_0 : i32, i32
  }
  func.func @transform_2(%arg0: i32, %arg1: i32) -> (i32, i32) {
    %c0_i32 = arith.constant 0 : i32
    %c0_i32_0 = arith.constant 0 : i32
    %c0_i32_1 = arith.constant 0 : i32
    return %c0_i32, %c0_i32_0 : i32, i32
  }
  func.func @transform_3(%arg0: i32, %arg1: i32) -> (i32, i32) {
    %c0_i32 = arith.constant 0 : i32
    %c0_i32_0 = arith.constant 0 : i32
    %c0_i32_1 = arith.constant 0 : i32
    return %c0_i32, %c0_i32_0 : i32, i32
  }
  func.func @transform_4(%arg0: i32, %arg1: i32) -> (i32, i32, i32) {
    %c0_i32 = arith.constant 0 : i32
    %c0_i32_0 = arith.constant 0 : i32
    return %arg0, %arg1, %c0_i32 : i32, i32, i32
  }
}

module attributes {stable_mosaic.version = 11 : i64} {
  func.func @_residual_block_kernel(%arg0: i32, %arg1: i32, %arg2: memref<1x20x26x4xbf16, #tpu.memory_space<vmem>>, %arg3: memref<36x8xbf16, #tpu.memory_space<vmem>>, %arg4: memref<72x8xbf16, #tpu.memory_space<vmem>>, %arg5: memref<4x8xbf16, #tpu.memory_space<vmem>>, %arg6: memref<1x16x128xf32, #tpu.memory_space<vmem>>) attributes {dimension_semantics = [#tpu.dimension_semantics<parallel>, #tpu.dimension_semantics<parallel>], iteration_bounds = array<i64: 2, 1>, scalar_prefetch = 0 : i64, scratch_operands = 0 : i64, tpu.core_type = #tpu.core_type<tc>, window_params = [{transform_indices = @transform_0, window_bounds = array<i64: 1, 20, 26, 4>}, {pipeline_mode = #tpu.pipeline_mode<synchronous>, transform_indices = @transform_1, window_bounds = array<i64: 36, 8>}, {pipeline_mode = #tpu.pipeline_mode<synchronous>, transform_indices = @transform_2, window_bounds = array<i64: 72, 8>}, {pipeline_mode = #tpu.pipeline_mode<synchronous>, transform_indices = @transform_3, window_bounds = array<i64: 4, 8>}, {transform_indices = @transform_4, window_bounds = array<i64: 1, 16, 128>}]} {
    %c16_i32 = arith.constant 16 : i32
    %0 = arith.muli %arg1, %c16_i32 : i32
    %1 = tpu.assume_multiple %0, 16 : i32
    %c0_i32 = arith.constant 0 : i32
    %2 = arith.addi %1, %c0_i32 : i32
    %c0 = arith.constant 0 : index
    %3 = arith.index_cast %2 : i32 to index
    %c0_0 = arith.constant 0 : index
    %c0_1 = arith.constant 0 : index
    %4 = vector.load %arg2[%c0, %3, %c0_0, %c0_1] : memref<1x20x26x4xbf16, #tpu.memory_space<vmem>>, vector<1x18x24x4xbf16>
    %5 = vector.shape_cast %4 : vector<1x18x24x4xbf16> to vector<18x24x4xbf16>
    %c0_i32_2 = arith.constant 0 : i32
    %6 = arith.addi %1, %c0_i32_2 : i32
    %c0_3 = arith.constant 0 : index
    %7 = arith.index_cast %6 : i32 to index
    %c1 = arith.constant 1 : index
    %c0_4 = arith.constant 0 : index
    %8 = vector.load %arg2[%c0_3, %7, %c1, %c0_4] : memref<1x20x26x4xbf16, #tpu.memory_space<vmem>>, vector<1x18x24x4xbf16>
    %9 = vector.shape_cast %8 : vector<1x18x24x4xbf16> to vector<18x24x4xbf16>
    %c0_i32_5 = arith.constant 0 : i32
    %10 = arith.addi %1, %c0_i32_5 : i32
    %c0_6 = arith.constant 0 : index
    %11 = arith.index_cast %10 : i32 to index
    %c2 = arith.constant 2 : index
    %c0_7 = arith.constant 0 : index
    %12 = vector.load %arg2[%c0_6, %11, %c2, %c0_7] : memref<1x20x26x4xbf16, #tpu.memory_space<vmem>>, vector<1x18x24x4xbf16>
    %13 = vector.shape_cast %12 : vector<1x18x24x4xbf16> to vector<18x24x4xbf16>
    %c1_i32 = arith.constant 1 : i32
    %14 = arith.addi %1, %c1_i32 : i32
    %c0_8 = arith.constant 0 : index
    %15 = arith.index_cast %14 : i32 to index
    %c0_9 = arith.constant 0 : index
    %c0_10 = arith.constant 0 : index
    %16 = vector.load %arg2[%c0_8, %15, %c0_9, %c0_10] : memref<1x20x26x4xbf16, #tpu.memory_space<vmem>>, vector<1x18x24x4xbf16>
    %17 = vector.shape_cast %16 : vector<1x18x24x4xbf16> to vector<18x24x4xbf16>
    %c1_i32_11 = arith.constant 1 : i32
    %18 = arith.addi %1, %c1_i32_11 : i32
    %c0_12 = arith.constant 0 : index
    %19 = arith.index_cast %18 : i32 to index
    %c1_13 = arith.constant 1 : index
    %c0_14 = arith.constant 0 : index
    %20 = vector.load %arg2[%c0_12, %19, %c1_13, %c0_14] : memref<1x20x26x4xbf16, #tpu.memory_space<vmem>>, vector<1x18x24x4xbf16>
    %21 = vector.shape_cast %20 : vector<1x18x24x4xbf16> to vector<18x24x4xbf16>
    %c1_i32_15 = arith.constant 1 : i32
    %22 = arith.addi %1, %c1_i32_15 : i32
    %c0_16 = arith.constant 0 : index
    %23 = arith.index_cast %22 : i32 to index
    %c2_17 = arith.constant 2 : index
    %c0_18 = arith.constant 0 : index
    %24 = vector.load %arg2[%c0_16, %23, %c2_17, %c0_18] : memref<1x20x26x4xbf16, #tpu.memory_space<vmem>>, vector<1x18x24x4xbf16>
    %25 = vector.shape_cast %24 : vector<1x18x24x4xbf16> to vector<18x24x4xbf16>
    %c2_i32 = arith.constant 2 : i32
    %26 = arith.addi %1, %c2_i32 : i32
    %c0_19 = arith.constant 0 : index
    %27 = arith.index_cast %26 : i32 to index
    %c0_20 = arith.constant 0 : index
    %c0_21 = arith.constant 0 : index
    %28 = vector.load %arg2[%c0_19, %27, %c0_20, %c0_21] : memref<1x20x26x4xbf16, #tpu.memory_space<vmem>>, vector<1x18x24x4xbf16>
    %29 = vector.shape_cast %28 : vector<1x18x24x4xbf16> to vector<18x24x4xbf16>
    %c2_i32_22 = arith.constant 2 : i32
    %30 = arith.addi %1, %c2_i32_22 : i32
    %c0_23 = arith.constant 0 : index
    %31 = arith.index_cast %30 : i32 to index
    %c1_24 = arith.constant 1 : index
    %c0_25 = arith.constant 0 : index
    %32 = vector.load %arg2[%c0_23, %31, %c1_24, %c0_25] : memref<1x20x26x4xbf16, #tpu.memory_space<vmem>>, vector<1x18x24x4xbf16>
    %33 = vector.shape_cast %32 : vector<1x18x24x4xbf16> to vector<18x24x4xbf16>
    %c2_i32_26 = arith.constant 2 : i32
    %34 = arith.addi %1, %c2_i32_26 : i32
    %c0_27 = arith.constant 0 : index
    %35 = arith.index_cast %34 : i32 to index
    %c2_28 = arith.constant 2 : index
    %c0_29 = arith.constant 0 : index
    %36 = vector.load %arg2[%c0_27, %35, %c2_28, %c0_29] : memref<1x20x26x4xbf16, #tpu.memory_space<vmem>>, vector<1x18x24x4xbf16>
    %37 = vector.shape_cast %36 : vector<1x18x24x4xbf16> to vector<18x24x4xbf16>
    %38 = tpu.concatenate %5, %9, %13, %17, %21, %25, %29, %33, %37 in 2 : vector<18x24x4xbf16>, vector<18x24x4xbf16>, vector<18x24x4xbf16>, vector<18x24x4xbf16>, vector<18x24x4xbf16>, vector<18x24x4xbf16>, vector<18x24x4xbf16>, vector<18x24x4xbf16>, vector<18x24x4xbf16> -> vector<18x24x36xbf16>
    %39 = vector.shape_cast %38 : vector<18x24x36xbf16> to vector<432x36xbf16>
    %c0_30 = arith.constant 0 : index
    %c0_31 = arith.constant 0 : index
    %40 = vector.load %arg3[%c0_30, %c0_31] : memref<36x8xbf16, #tpu.memory_space<vmem>>, vector<36x8xbf16>
    %cst = arith.constant dense<0.000000e+00> : vector<432x8xf32>
    %41 = tpu.matmul %39, %40, %cst {dimension_numbers = #tpu.dot_dimension_numbers<[1], [0], [0], [1], [0, 0, 1, 1], [], []>} : vector<432x36xbf16>, vector<36x8xbf16>, vector<432x8xf32> -> vector<432x8xf32>
    %cst_32 = arith.constant 0.000000e+00 : f32
    %42 = vector.broadcast %cst_32 : f32 to vector<432x8xf32>
    %43 = arith.maximumf %41, %42 : vector<432x8xf32>
    %44 = vector.shape_cast %43 : vector<432x8xf32> to vector<18x24x8xf32>
    %c1_i32_33 = arith.constant 1 : i32
    %45 = arith.subi %1, %c1_i32_33 : i32
    %46 = tpu.iota {dimensions = array<i32: 0>} : vector<18x24x1xi32>
    %47 = vector.broadcast %45 : i32 to vector<18x24x1xi32>
    %48 = arith.addi %47, %46 : vector<18x24x1xi32>
    %49 = tpu.iota {dimensions = array<i32: 1>} : vector<18x24x1xi32>
    %c1_i32_34 = arith.constant 1 : i32
    %50 = vector.broadcast %c1_i32_34 : i32 to vector<18x24x1xi32>
    %51 = arith.subi %49, %50 : vector<18x24x1xi32>
    %c0_i32_35 = arith.constant 0 : i32
    %52 = vector.broadcast %c0_i32_35 : i32 to vector<18x24x1xi32>
    %53 = arith.cmpi sge, %48, %52 : vector<18x24x1xi32>
    %c16_i32_36 = arith.constant 16 : i32
    %54 = vector.broadcast %c16_i32_36 : i32 to vector<18x24x1xi32>
    %55 = arith.cmpi slt, %48, %54 : vector<18x24x1xi32>
    %56 = arith.andi %53, %55 : vector<18x24x1xi1>
    %c0_i32_37 = arith.constant 0 : i32
    %57 = vector.broadcast %c0_i32_37 : i32 to vector<18x24x1xi32>
    %58 = arith.cmpi sge, %51, %57 : vector<18x24x1xi32>
    %59 = arith.andi %56, %58 : vector<18x24x1xi1>
    %c16_i32_38 = arith.constant 16 : i32
    %60 = vector.broadcast %c16_i32_38 : i32 to vector<18x24x1xi32>
    %61 = arith.cmpi slt, %51, %60 : vector<18x24x1xi32>
    %62 = arith.andi %59, %61 : vector<18x24x1xi1>
    %cst_39 = arith.constant 0.000000e+00 : f32
    %63 = vector.shape_cast %62 : vector<18x24x1xi1> to vector<18x24x1xi1>
    %64 = vector.broadcast %63 : vector<18x24x1xi1> to vector<18x24x8xi1>
    %65 = vector.broadcast %cst_39 : f32 to vector<18x24x8xf32>
    %66 = arith.select %64, %44, %65 : vector<18x24x8xi1>, vector<18x24x8xf32>
    %67 = arith.truncf %66 : vector<18x24x8xf32> to vector<18x24x8xbf16>
    %68 = vector.extract_strided_slice %67 {offsets = [0, 0, 0], sizes = [16, 16, 8], strides = [1, 1, 1]} : vector<18x24x8xbf16> to vector<16x16x8xbf16>
    %69 = vector.extract_strided_slice %67 {offsets = [0, 1, 0], sizes = [16, 16, 8], strides = [1, 1, 1]} : vector<18x24x8xbf16> to vector<16x16x8xbf16>
    %70 = vector.extract_strided_slice %67 {offsets = [0, 2, 0], sizes = [16, 16, 8], strides = [1, 1, 1]} : vector<18x24x8xbf16> to vector<16x16x8xbf16>
    %71 = vector.extract_strided_slice %67 {offsets = [1, 0, 0], sizes = [16, 16, 8], strides = [1, 1, 1]} : vector<18x24x8xbf16> to vector<16x16x8xbf16>
    %72 = vector.extract_strided_slice %67 {offsets = [1, 1, 0], sizes = [16, 16, 8], strides = [1, 1, 1]} : vector<18x24x8xbf16> to vector<16x16x8xbf16>
    %73 = vector.extract_strided_slice %67 {offsets = [1, 2, 0], sizes = [16, 16, 8], strides = [1, 1, 1]} : vector<18x24x8xbf16> to vector<16x16x8xbf16>
    %74 = vector.extract_strided_slice %67 {offsets = [2, 0, 0], sizes = [16, 16, 8], strides = [1, 1, 1]} : vector<18x24x8xbf16> to vector<16x16x8xbf16>
    %75 = vector.extract_strided_slice %67 {offsets = [2, 1, 0], sizes = [16, 16, 8], strides = [1, 1, 1]} : vector<18x24x8xbf16> to vector<16x16x8xbf16>
    %76 = vector.extract_strided_slice %67 {offsets = [2, 2, 0], sizes = [16, 16, 8], strides = [1, 1, 1]} : vector<18x24x8xbf16> to vector<16x16x8xbf16>
    %77 = tpu.concatenate %68, %69, %70, %71, %72, %73, %74, %75, %76 in 2 : vector<16x16x8xbf16>, vector<16x16x8xbf16>, vector<16x16x8xbf16>, vector<16x16x8xbf16>, vector<16x16x8xbf16>, vector<16x16x8xbf16>, vector<16x16x8xbf16>, vector<16x16x8xbf16>, vector<16x16x8xbf16> -> vector<16x16x72xbf16>
    %78 = vector.shape_cast %77 : vector<16x16x72xbf16> to vector<256x72xbf16>
    %c0_40 = arith.constant 0 : index
    %c0_41 = arith.constant 0 : index
    %79 = vector.load %arg4[%c0_40, %c0_41] : memref<72x8xbf16, #tpu.memory_space<vmem>>, vector<72x8xbf16>
    %cst_42 = arith.constant dense<0.000000e+00> : vector<256x8xf32>
    %80 = tpu.matmul %78, %79, %cst_42 {dimension_numbers = #tpu.dot_dimension_numbers<[1], [0], [0], [1], [0, 0, 1, 1], [], []>} : vector<256x72xbf16>, vector<72x8xbf16>, vector<256x8xf32> -> vector<256x8xf32>
    %c1_i32_43 = arith.constant 1 : i32
    %81 = arith.addi %1, %c1_i32_43 : i32
    %c1_i32_44 = arith.constant 1 : i32
    %82 = arith.addi %81, %c1_i32_44 : i32
    %c0_45 = arith.constant 0 : index
    %83 = arith.index_cast %82 : i32 to index
    %c2_46 = arith.constant 2 : index
    %c0_47 = arith.constant 0 : index
    %84 = vector.load %arg2[%c0_45, %83, %c2_46, %c0_47] : memref<1x20x26x4xbf16, #tpu.memory_space<vmem>>, vector<1x16x16x4xbf16>
    %85 = vector.shape_cast %84 : vector<1x16x16x4xbf16> to vector<16x16x4xbf16>
    %86 = vector.shape_cast %85 : vector<16x16x4xbf16> to vector<256x4xbf16>
    %c0_48 = arith.constant 0 : index
    %c0_49 = arith.constant 0 : index
    %87 = vector.load %arg5[%c0_48, %c0_49] : memref<4x8xbf16, #tpu.memory_space<vmem>>, vector<4x8xbf16>
    %cst_50 = arith.constant dense<0.000000e+00> : vector<256x8xf32>
    %88 = tpu.matmul %86, %87, %cst_50 {dimension_numbers = #tpu.dot_dimension_numbers<[1], [0], [0], [1], [0, 0, 1, 1], [], []>} : vector<256x4xbf16>, vector<4x8xbf16>, vector<256x8xf32> -> vector<256x8xf32>
    %89 = arith.addf %80, %88 : vector<256x8xf32>
    %cst_51 = arith.constant 0.000000e+00 : f32
    %90 = vector.broadcast %cst_51 : f32 to vector<256x8xf32>
    %91 = arith.maximumf %89, %90 : vector<256x8xf32>
    %92 = vector.shape_cast %91 : vector<256x8xf32> to vector<1x16x128xf32>
    %c0_52 = arith.constant 0 : index
    %c0_53 = arith.constant 0 : index
    %c0_54 = arith.constant 0 : index
    %93 = vector.load %arg6[%c0_52, %c0_53, %c0_54] : memref<1x16x128xf32, #tpu.memory_space<vmem>>, vector<1x16x128xf32>
    tpu.vector_store %arg6[%c0_52, %c0_53, %c0_54], %92 {strides = array<i32>} : memref<1x16x128xf32, #tpu.memory_space<vmem>>, vector<1x16x128xf32>,
    return
  }
  func.func @transform_0(%arg0: i32, %arg1: i32) -> (i32, i32, i32, i32) {
    %c0_i32 = arith.constant 0 : i32
    %c0_i32_0 = arith.constant 0 : i32
    %c0_i32_1 = arith.constant 0 : i32
    %c0_i32_2 = arith.constant 0 : i32
    return %arg0, %c0_i32, %c0_i32_0, %c0_i32_1 : i32, i32, i32, i32
  }
  func.func @transform_1(%arg0: i32, %arg1: i32) -> (i32, i32) {
    %c0_i32 = arith.constant 0 : i32
    %c0_i32_0 = arith.constant 0 : i32
    %c0_i32_1 = arith.constant 0 : i32
    return %c0_i32, %c0_i32_0 : i32, i32
  }
  func.func @transform_2(%arg0: i32, %arg1: i32) -> (i32, i32) {
    %c0_i32 = arith.constant 0 : i32
    %c0_i32_0 = arith.constant 0 : i32
    %c0_i32_1 = arith.constant 0 : i32
    return %c0_i32, %c0_i32_0 : i32, i32
  }
  func.func @transform_3(%arg0: i32, %arg1: i32) -> (i32, i32) {
    %c0_i32 = arith.constant 0 : i32
    %c0_i32_0 = arith.constant 0 : i32
    %c0_i32_1 = arith.constant 0 : i32
    return %c0_i32, %c0_i32_0 : i32, i32
  }
  func.func @transform_4(%arg0: i32, %arg1: i32) -> (i32, i32, i32) {
    %c0_i32 = arith.constant 0 : i32
    %c0_i32_0 = arith.constant 0 : i32
    return %arg0, %arg1, %c0_i32 : i32, i32, i32
  }
}

module attributes {stable_mosaic.version = 11 : i64} {
  func.func @_residual_block_kernel(%arg0: i32, %arg1: i32, %arg2: memref<1x20x26x4xbf16, #tpu.memory_space<vmem>>, %arg3: memref<36x8xbf16, #tpu.memory_space<vmem>>, %arg4: memref<72x8xbf16, #tpu.memory_space<vmem>>, %arg5: memref<4x8xbf16, #tpu.memory_space<vmem>>, %arg6: memref<1x16x16x8xf32, #tpu.memory_space<vmem>>) attributes {dimension_semantics = [#tpu.dimension_semantics<parallel>, #tpu.dimension_semantics<parallel>], iteration_bounds = array<i64: 2, 1>, scalar_prefetch = 0 : i64, scratch_operands = 0 : i64, tpu.core_type = #tpu.core_type<tc>, window_params = [{transform_indices = @transform_0, window_bounds = array<i64: 1, 20, 26, 4>}, {pipeline_mode = #tpu.pipeline_mode<synchronous>, transform_indices = @transform_1, window_bounds = array<i64: 36, 8>}, {pipeline_mode = #tpu.pipeline_mode<synchronous>, transform_indices = @transform_2, window_bounds = array<i64: 72, 8>}, {pipeline_mode = #tpu.pipeline_mode<synchronous>, transform_indices = @transform_3, window_bounds = array<i64: 4, 8>}, {transform_indices = @transform_4, window_bounds = array<i64: 1, 16, 16, 8>}]} {
    %c16_i32 = arith.constant 16 : i32
    %0 = arith.muli %arg1, %c16_i32 : i32
    %1 = tpu.assume_multiple %0, 16 : i32
    %c0_i32 = arith.constant 0 : i32
    %2 = arith.addi %1, %c0_i32 : i32
    %c0 = arith.constant 0 : index
    %3 = arith.index_cast %2 : i32 to index
    %c0_0 = arith.constant 0 : index
    %c0_1 = arith.constant 0 : index
    %4 = vector.load %arg2[%c0, %3, %c0_0, %c0_1] : memref<1x20x26x4xbf16, #tpu.memory_space<vmem>>, vector<1x18x24x4xbf16>
    %5 = vector.shape_cast %4 : vector<1x18x24x4xbf16> to vector<18x24x4xbf16>
    %c0_i32_2 = arith.constant 0 : i32
    %6 = arith.addi %1, %c0_i32_2 : i32
    %c0_3 = arith.constant 0 : index
    %7 = arith.index_cast %6 : i32 to index
    %c1 = arith.constant 1 : index
    %c0_4 = arith.constant 0 : index
    %8 = vector.load %arg2[%c0_3, %7, %c1, %c0_4] : memref<1x20x26x4xbf16, #tpu.memory_space<vmem>>, vector<1x18x24x4xbf16>
    %9 = vector.shape_cast %8 : vector<1x18x24x4xbf16> to vector<18x24x4xbf16>
    %c0_i32_5 = arith.constant 0 : i32
    %10 = arith.addi %1, %c0_i32_5 : i32
    %c0_6 = arith.constant 0 : index
    %11 = arith.index_cast %10 : i32 to index
    %c2 = arith.constant 2 : index
    %c0_7 = arith.constant 0 : index
    %12 = vector.load %arg2[%c0_6, %11, %c2, %c0_7] : memref<1x20x26x4xbf16, #tpu.memory_space<vmem>>, vector<1x18x24x4xbf16>
    %13 = vector.shape_cast %12 : vector<1x18x24x4xbf16> to vector<18x24x4xbf16>
    %c1_i32 = arith.constant 1 : i32
    %14 = arith.addi %1, %c1_i32 : i32
    %c0_8 = arith.constant 0 : index
    %15 = arith.index_cast %14 : i32 to index
    %c0_9 = arith.constant 0 : index
    %c0_10 = arith.constant 0 : index
    %16 = vector.load %arg2[%c0_8, %15, %c0_9, %c0_10] : memref<1x20x26x4xbf16, #tpu.memory_space<vmem>>, vector<1x18x24x4xbf16>
    %17 = vector.shape_cast %16 : vector<1x18x24x4xbf16> to vector<18x24x4xbf16>
    %c1_i32_11 = arith.constant 1 : i32
    %18 = arith.addi %1, %c1_i32_11 : i32
    %c0_12 = arith.constant 0 : index
    %19 = arith.index_cast %18 : i32 to index
    %c1_13 = arith.constant 1 : index
    %c0_14 = arith.constant 0 : index
    %20 = vector.load %arg2[%c0_12, %19, %c1_13, %c0_14] : memref<1x20x26x4xbf16, #tpu.memory_space<vmem>>, vector<1x18x24x4xbf16>
    %21 = vector.shape_cast %20 : vector<1x18x24x4xbf16> to vector<18x24x4xbf16>
    %c1_i32_15 = arith.constant 1 : i32
    %22 = arith.addi %1, %c1_i32_15 : i32
    %c0_16 = arith.constant 0 : index
    %23 = arith.index_cast %22 : i32 to index
    %c2_17 = arith.constant 2 : index
    %c0_18 = arith.constant 0 : index
    %24 = vector.load %arg2[%c0_16, %23, %c2_17, %c0_18] : memref<1x20x26x4xbf16, #tpu.memory_space<vmem>>, vector<1x18x24x4xbf16>
    %25 = vector.shape_cast %24 : vector<1x18x24x4xbf16> to vector<18x24x4xbf16>
    %c2_i32 = arith.constant 2 : i32
    %26 = arith.addi %1, %c2_i32 : i32
    %c0_19 = arith.constant 0 : index
    %27 = arith.index_cast %26 : i32 to index
    %c0_20 = arith.constant 0 : index
    %c0_21 = arith.constant 0 : index
    %28 = vector.load %arg2[%c0_19, %27, %c0_20, %c0_21] : memref<1x20x26x4xbf16, #tpu.memory_space<vmem>>, vector<1x18x24x4xbf16>
    %29 = vector.shape_cast %28 : vector<1x18x24x4xbf16> to vector<18x24x4xbf16>
    %c2_i32_22 = arith.constant 2 : i32
    %30 = arith.addi %1, %c2_i32_22 : i32
    %c0_23 = arith.constant 0 : index
    %31 = arith.index_cast %30 : i32 to index
    %c1_24 = arith.constant 1 : index
    %c0_25 = arith.constant 0 : index
    %32 = vector.load %arg2[%c0_23, %31, %c1_24, %c0_25] : memref<1x20x26x4xbf16, #tpu.memory_space<vmem>>, vector<1x18x24x4xbf16>
    %33 = vector.shape_cast %32 : vector<1x18x24x4xbf16> to vector<18x24x4xbf16>
    %c2_i32_26 = arith.constant 2 : i32
    %34 = arith.addi %1, %c2_i32_26 : i32
    %c0_27 = arith.constant 0 : index
    %35 = arith.index_cast %34 : i32 to index
    %c2_28 = arith.constant 2 : index
    %c0_29 = arith.constant 0 : index
    %36 = vector.load %arg2[%c0_27, %35, %c2_28, %c0_29] : memref<1x20x26x4xbf16, #tpu.memory_space<vmem>>, vector<1x18x24x4xbf16>
    %37 = vector.shape_cast %36 : vector<1x18x24x4xbf16> to vector<18x24x4xbf16>
    %38 = tpu.concatenate %5, %9, %13, %17, %21, %25, %29, %33, %37 in 2 : vector<18x24x4xbf16>, vector<18x24x4xbf16>, vector<18x24x4xbf16>, vector<18x24x4xbf16>, vector<18x24x4xbf16>, vector<18x24x4xbf16>, vector<18x24x4xbf16>, vector<18x24x4xbf16>, vector<18x24x4xbf16> -> vector<18x24x36xbf16>
    %39 = vector.shape_cast %38 : vector<18x24x36xbf16> to vector<432x36xbf16>
    %c0_30 = arith.constant 0 : index
    %c0_31 = arith.constant 0 : index
    %40 = vector.load %arg3[%c0_30, %c0_31] : memref<36x8xbf16, #tpu.memory_space<vmem>>, vector<36x8xbf16>
    %cst = arith.constant dense<0.000000e+00> : vector<432x8xf32>
    %41 = tpu.matmul %39, %40, %cst {dimension_numbers = #tpu.dot_dimension_numbers<[1], [0], [0], [1], [0, 0, 1, 1], [], []>} : vector<432x36xbf16>, vector<36x8xbf16>, vector<432x8xf32> -> vector<432x8xf32>
    %cst_32 = arith.constant 0.000000e+00 : f32
    %42 = vector.broadcast %cst_32 : f32 to vector<432x8xf32>
    %43 = arith.maximumf %41, %42 : vector<432x8xf32>
    %44 = vector.shape_cast %43 : vector<432x8xf32> to vector<18x24x8xf32>
    %c1_i32_33 = arith.constant 1 : i32
    %45 = arith.subi %1, %c1_i32_33 : i32
    %46 = tpu.iota {dimensions = array<i32: 0>} : vector<18x24x1xi32>
    %47 = vector.broadcast %45 : i32 to vector<18x24x1xi32>
    %48 = arith.addi %47, %46 : vector<18x24x1xi32>
    %49 = tpu.iota {dimensions = array<i32: 1>} : vector<18x24x1xi32>
    %c1_i32_34 = arith.constant 1 : i32
    %50 = vector.broadcast %c1_i32_34 : i32 to vector<18x24x1xi32>
    %51 = arith.subi %49, %50 : vector<18x24x1xi32>
    %c0_i32_35 = arith.constant 0 : i32
    %52 = vector.broadcast %c0_i32_35 : i32 to vector<18x24x1xi32>
    %53 = arith.cmpi sge, %48, %52 : vector<18x24x1xi32>
    %c16_i32_36 = arith.constant 16 : i32
    %54 = vector.broadcast %c16_i32_36 : i32 to vector<18x24x1xi32>
    %55 = arith.cmpi slt, %48, %54 : vector<18x24x1xi32>
    %56 = arith.andi %53, %55 : vector<18x24x1xi1>
    %c0_i32_37 = arith.constant 0 : i32
    %57 = vector.broadcast %c0_i32_37 : i32 to vector<18x24x1xi32>
    %58 = arith.cmpi sge, %51, %57 : vector<18x24x1xi32>
    %59 = arith.andi %56, %58 : vector<18x24x1xi1>
    %c16_i32_38 = arith.constant 16 : i32
    %60 = vector.broadcast %c16_i32_38 : i32 to vector<18x24x1xi32>
    %61 = arith.cmpi slt, %51, %60 : vector<18x24x1xi32>
    %62 = arith.andi %59, %61 : vector<18x24x1xi1>
    %cst_39 = arith.constant 0.000000e+00 : f32
    %63 = vector.shape_cast %62 : vector<18x24x1xi1> to vector<18x24x1xi1>
    %64 = vector.broadcast %63 : vector<18x24x1xi1> to vector<18x24x8xi1>
    %65 = vector.broadcast %cst_39 : f32 to vector<18x24x8xf32>
    %66 = arith.select %64, %44, %65 : vector<18x24x8xi1>, vector<18x24x8xf32>
    %67 = arith.truncf %66 : vector<18x24x8xf32> to vector<18x24x8xbf16>
    %68 = vector.extract_strided_slice %67 {offsets = [0, 0, 0], sizes = [16, 16, 8], strides = [1, 1, 1]} : vector<18x24x8xbf16> to vector<16x16x8xbf16>
    %69 = vector.extract_strided_slice %67 {offsets = [0, 1, 0], sizes = [16, 16, 8], strides = [1, 1, 1]} : vector<18x24x8xbf16> to vector<16x16x8xbf16>
    %70 = vector.extract_strided_slice %67 {offsets = [0, 2, 0], sizes = [16, 16, 8], strides = [1, 1, 1]} : vector<18x24x8xbf16> to vector<16x16x8xbf16>
    %71 = vector.extract_strided_slice %67 {offsets = [1, 0, 0], sizes = [16, 16, 8], strides = [1, 1, 1]} : vector<18x24x8xbf16> to vector<16x16x8xbf16>
    %72 = vector.extract_strided_slice %67 {offsets = [1, 1, 0], sizes = [16, 16, 8], strides = [1, 1, 1]} : vector<18x24x8xbf16> to vector<16x16x8xbf16>
    %73 = vector.extract_strided_slice %67 {offsets = [1, 2, 0], sizes = [16, 16, 8], strides = [1, 1, 1]} : vector<18x24x8xbf16> to vector<16x16x8xbf16>
    %74 = vector.extract_strided_slice %67 {offsets = [2, 0, 0], sizes = [16, 16, 8], strides = [1, 1, 1]} : vector<18x24x8xbf16> to vector<16x16x8xbf16>
    %75 = vector.extract_strided_slice %67 {offsets = [2, 1, 0], sizes = [16, 16, 8], strides = [1, 1, 1]} : vector<18x24x8xbf16> to vector<16x16x8xbf16>
    %76 = vector.extract_strided_slice %67 {offsets = [2, 2, 0], sizes = [16, 16, 8], strides = [1, 1, 1]} : vector<18x24x8xbf16> to vector<16x16x8xbf16>
    %77 = tpu.concatenate %68, %69, %70, %71, %72, %73, %74, %75, %76 in 2 : vector<16x16x8xbf16>, vector<16x16x8xbf16>, vector<16x16x8xbf16>, vector<16x16x8xbf16>, vector<16x16x8xbf16>, vector<16x16x8xbf16>, vector<16x16x8xbf16>, vector<16x16x8xbf16>, vector<16x16x8xbf16> -> vector<16x16x72xbf16>
    %78 = vector.shape_cast %77 : vector<16x16x72xbf16> to vector<256x72xbf16>
    %c0_40 = arith.constant 0 : index
    %c0_41 = arith.constant 0 : index
    %79 = vector.load %arg4[%c0_40, %c0_41] : memref<72x8xbf16, #tpu.memory_space<vmem>>, vector<72x8xbf16>
    %cst_42 = arith.constant dense<0.000000e+00> : vector<256x8xf32>
    %80 = tpu.matmul %78, %79, %cst_42 {dimension_numbers = #tpu.dot_dimension_numbers<[1], [0], [0], [1], [0, 0, 1, 1], [], []>} : vector<256x72xbf16>, vector<72x8xbf16>, vector<256x8xf32> -> vector<256x8xf32>
    %c1_i32_43 = arith.constant 1 : i32
    %81 = arith.addi %1, %c1_i32_43 : i32
    %c1_i32_44 = arith.constant 1 : i32
    %82 = arith.addi %81, %c1_i32_44 : i32
    %c0_45 = arith.constant 0 : index
    %83 = arith.index_cast %82 : i32 to index
    %c2_46 = arith.constant 2 : index
    %c0_47 = arith.constant 0 : index
    %84 = vector.load %arg2[%c0_45, %83, %c2_46, %c0_47] : memref<1x20x26x4xbf16, #tpu.memory_space<vmem>>, vector<1x16x16x4xbf16>
    %85 = vector.shape_cast %84 : vector<1x16x16x4xbf16> to vector<16x16x4xbf16>
    %86 = vector.shape_cast %85 : vector<16x16x4xbf16> to vector<256x4xbf16>
    %c0_48 = arith.constant 0 : index
    %c0_49 = arith.constant 0 : index
    %87 = vector.load %arg5[%c0_48, %c0_49] : memref<4x8xbf16, #tpu.memory_space<vmem>>, vector<4x8xbf16>
    %cst_50 = arith.constant dense<0.000000e+00> : vector<256x8xf32>
    %88 = tpu.matmul %86, %87, %cst_50 {dimension_numbers = #tpu.dot_dimension_numbers<[1], [0], [0], [1], [0, 0, 1, 1], [], []>} : vector<256x4xbf16>, vector<4x8xbf16>, vector<256x8xf32> -> vector<256x8xf32>
    %89 = arith.addf %80, %88 : vector<256x8xf32>
    %cst_51 = arith.constant 0.000000e+00 : f32
    %90 = vector.broadcast %cst_51 : f32 to vector<256x8xf32>
    %91 = arith.maximumf %89, %90 : vector<256x8xf32>
    %92 = vector.shape_cast %91 : vector<256x8xf32> to vector<1x16x16x8xf32>
    %c0_52 = arith.constant 0 : index
    %c0_53 = arith.constant 0 : index
    %c0_54 = arith.constant 0 : index
    %c0_55 = arith.constant 0 : index
    %93 = vector.load %arg6[%c0_52, %c0_53, %c0_54, %c0_55] : memref<1x16x16x8xf32, #tpu.memory_space<vmem>>, vector<1x16x16x8xf32>
    tpu.vector_store %arg6[%c0_52, %c0_53, %c0_54, %c0_55], %92 {strides = array<i32>} : memref<1x16x16x8xf32, #tpu.memory_space<vmem>>, vector<1x16x16x8xf32>,
    return
  }
  func.func @transform_0(%arg0: i32, %arg1: i32) -> (i32, i32, i32, i32) {
    %c0_i32 = arith.constant 0 : i32
    %c0_i32_0 = arith.constant 0 : i32
    %c0_i32_1 = arith.constant 0 : i32
    %c0_i32_2 = arith.constant 0 : i32
    return %arg0, %c0_i32, %c0_i32_0, %c0_i32_1 : i32, i32, i32, i32
  }
  func.func @transform_1(%arg0: i32, %arg1: i32) -> (i32, i32) {
    %c0_i32 = arith.constant 0 : i32
    %c0_i32_0 = arith.constant 0 : i32
    %c0_i32_1 = arith.constant 0 : i32
    return %c0_i32, %c0_i32_0 : i32, i32
  }
  func.func @transform_2(%arg0: i32, %arg1: i32) -> (i32, i32) {
    %c0_i32 = arith.constant 0 : i32
    %c0_i32_0 = arith.constant 0 : i32
    %c0_i32_1 = arith.constant 0 : i32
    return %c0_i32, %c0_i32_0 : i32, i32
  }
  func.func @transform_3(%arg0: i32, %arg1: i32) -> (i32, i32) {
    %c0_i32 = arith.constant 0 : i32
    %c0_i32_0 = arith.constant 0 : i32
    %c0_i32_1 = arith.constant 0 : i32
    return %c0_i32, %c0_i32_0 : i32, i32
  }
  func.func @transform_4(%arg0: i32, %arg1: i32) -> (i32, i32, i32, i32) {
    %c0_i32 = arith.constant 0 : i32
    %c0_i32_0 = arith.constant 0 : i32
    %c0_i32_1 = arith.constant 0 : i32
    return %arg0, %arg1, %c0_i32, %c0_i32_0 : i32, i32, i32, i32
  }
}

</mosaic_0001>

<bundles_post_ra>
// kernel: tpu_custom_call.1
= control target key start
LH: loop header
LB: loop body
LE: loop exit
PB: predicated region body
PF: predicated region fallthrough
CT: control target
= control target key end

     0   :  { %s6802_s15 = smov 0   ;;  %s6804_s16 = smov 0   ;;  %s10334_s0 = inlined_call_operand.vmem [shape: bf16[2,20,26,4], index: 0, kind: input, shape index: {}]   ;;  %s10335_s1 = inlined_call_operand.vmem [shape: bf16[36,8], index: 1, kind: input, shape index: {}]   ;;  %s10336_s2 = inlined_call_operand.vmem [shape: bf16[72,8], index: 2, kind: input, shape index: {}]   ;;  %s10337_s3 = inlined_call_operand.vmem [shape: bf16[4,8], index: 3, kind: input, shape index: {}]   ;;  %s10338_s4 = inlined_call_operand.vmem [shape: f32[2,16,16,8], index: 4, kind: output, shape index: {}]  }
   0x1   :  { %s6806_s17 = smov 0  }
   0x2 LB: > { %s26_s18 = sadd.s32 1, %s6758_s16  ;;  %p5902_p0 = scmp.ge.s32.totalorder %s6762_s17, 1  ;;  %s6762_s17 = sphi %s6806_s17, %s14_s17   ;;  %s6758_s16 = sphi %s6804_s16, %s10726_s16   ;;  %s6754_s15 = sphi %s6802_s15, %s10725_s15  }
   0x3   : > { %p28_p1 = scmp.ge.s32.totalorder %s26_s18, 2  ;;  %p176_p2 = scmp.lt.s32.totalorder %s6762_s17, 3 }
   0x5   : > { %s10728_s18 = smov (%p28_p1, %s26_s18), 0  ;;  %p177_p3 = pnand %p5902_p0, %p176_p2 }
   0x7   : > { %180 = sbr.rel (%p177_p3) target bundleno = 1442 (0x5a2), region = 36 }
   0xc   : > { %p207_p4 = scmp.lt.s32.totalorder %s6754_s15, 1  ;;  %vm704_vm0 = vsmask.f32 7424  ;;  %s6764_s23 = smov 4   ;;  %vm1101_vm1 = vcmask 1046528   ;;  %vm3633_vm2 = vcmask 1041408  }
   0xd   : > { %s6765_s24 = smov 8   ;;  %s6766_s25 = smov 12   ;;  %vm2812_vm3 = vcmask 31744   ;;  %vm2903_vm4 = vcmask 64512   ;;  %vm10360_vm5 = vcmask 97280   ;;  %vm3049_vm6 = vcmask 130048  }
   0xe   : > { %s10730_s15 = smov (!%p207_p4, %s6754_s15), 1  ;;  %s6767_s26 = smov 16   ;;  %vm10357_vm7 = vcmask 162816   ;;  %vm3195_vm8 = vcmask 195584   ;;  %vm10356_vm9 = vcmask 228352   ;;  %vm3341_vm10 = vcmask 261120  }
   0xf   : > { %s6684_s19 = smul.u32 320, %s10730_s15  ;;  %s6768_s27 = smov 20   ;;  %vm10355_vm11 = vcmask 293888   ;;  %vm5644_vm14 = vcmask 1043456   ;;  %vm5280_vm15 = vcmask 1042432  }
  0x10   : > { %s6769_s28 = smov 24   ;;  %s6770_s29 = smov 32  }
  0x11   : > { %s6826_s22 = scalar_lea.vmem %s10334_s0, %s6684_s19  ;;  %s6771_s30 = smov 28  }
  0x12   : > { %v6462_v0 = vld [vmem:[%s6826_s22 + $0x20] sm:$0xff]   ;;  %v236_v1 = vld [vmem:[%s6826_s22 + $0x28] sm:$0xf]  ;;  %v284_v2 = vld [vmem:[%s6826_s22 + $0x2c] sm:$0x1]  ;;  %s6773_s11 = smov 40  }
  0x13   : > { %v6831_v3 = vunpack.c.l.b16 %v236_v1  ;;  %v670_v4 = vunpack.c.l.b16 %v284_v2  ;;  %v736_v5 = vshrl.u32 %v6462_v0, 16  ;;  %v738_v6 = vshll.u32 %v6462_v0, 16  ;;  %v6461_v7 = vld [vmem:[%s6826_s22 + $0x10] sm:$0xff]   ;;  %v233_v8 = vld [vmem:[%s6826_s22 + $0x18] sm:$0xf]  ;;  %v6246_v9 = vld [vmem:[%s6826_s22] sm:$0xff]  }
  0x14   : > { %v283_v10 = vld [vmem:[%s6826_s22 + $0x1c] sm:$0x1]  ;;  %v6837_v11 = vunpack.c.l.b16 %v233_v8  ;;  %v721_v12 = vshrl.u32 %v6461_v7, 16  ;;  %v723_v13 = vshll.u32 %v6461_v7, 16  ;;  %v230_v14 = vld [vmem:[%s6826_s22 + $0x8] sm:$0xf] }
  0x15   : > { %10361 = vst [vmem:[#allocation2_spill] sm:$0xff] %v6831_v3  ;;  %v6841_v15 = vpack.c.b16 %v670_v4, %v6831_v3  ;;  %v740_v16 = vrot.slane %v738_v6, 1  ;;  %v669_v17 = vunpack.c.l.b16 %v283_v10  ;;  %v282_v18 = vld [vmem:[%s6826_s22 + $0xc] sm:$0x1]  ;;  %v6844_v19 = vunpack.c.l.b16 %v230_v14  ;;  %v242_v20 = vld [vmem:[%s6826_s22 + $0x48] sm:$0xf] }
  0x16   : > { %v725_v21 = vrot.slane %v723_v13, 1  ;;  %v668_v22 = vunpack.c.l.b16 %v282_v18  ;;  %v706_v23 = vshrl.u32 %v6246_v9, 16  ;;  %v708_v24 = vshll.u32 %v6246_v9, 16  ;;  %v6464_v25 = vld [vmem:[%s6826_s22 + $0x40] sm:$0xff]   ;;  %v286_v26 = vld [vmem:[%s6826_s22 + $0x4c] sm:$0x1] }
  0x17   : > { %v741_v27 = vor.u32 %v740_v16, %v736_v5  ;;  %v743_v28 = vshll.u32 %v6841_v15, 16  ;;  %v6851_v29 = vpack.c.b16 %v669_v17, %v6837_v11  ;;  %v6853_v30 = vunpack.c.l.b16 %v242_v20  ;;  %v239_v35 = vld [vmem:[%s6826_s22 + $0x38] sm:$0xf]  ;;  %v285_v40 = vld [vmem:[%s6826_s22 + $0x3c] sm:$0x1]  ;;  %v6866_v44 = vld [vmem:[%s6826_s22 + $0x30] sm:$0xff]  }
  0x18   : > { %v726_v31 = vor.u32 %v725_v21, %v721_v12  ;;  %v6856_v32 = vpack.c.b16 %v668_v22, %v6844_v19  ;;  %v710_v33 = vrot.slane %v708_v24, 1  ;;  %v672_v34 = vunpack.c.l.b16 %v286_v26  ;;  %v245_v56 = vld [vmem:[%s6826_s22 + $0x58] sm:$0xf]  ;;  %v287_v57 = vld [vmem:[%s6826_s22 + $0x5c] sm:$0x1]  ;;  %v6899_v10 = vld [vmem:[%s6826_s22 + $0x50] sm:$0xff]  }
  0x19   : > { %10362 = vst [vmem:[#allocation3_spill] sm:$0xff] %v6853_v30  ;;  %v745_v36 = vrot.slane %v743_v28, 1  ;;  %v728_v37 = vshll.u32 %v6851_v29, 16  ;;  %v766_v38 = vshrl.u32 %v6464_v25, 16  ;;  %v768_v39 = vshll.u32 %v6464_v25, 16  ;;  %v6467_v26 = vld [vmem:[%s6826_s22 + $0x70] sm:$0xff]  }
  0x1a   : > { %v711_v41 = vor.u32 %v710_v33, %v706_v23  ;;  %v713_v42 = vshll.u32 %v6856_v32, 16  ;;  %v6863_v43 = vpack.c.b16 %v672_v34, %v6853_v30  ;;  %v6869_v48 = vunpack.c.l.b16 %v239_v35  ;;  %v251_v13 = vld [vmem:[%s6826_s22 + $0x78] sm:$0xf]  ;;  %v289_v14 = vld [vmem:[%s6826_s22 + $0x7c] sm:$0x1]  ;;  %s6774_s12 = smov 48  }
  0x1b   : > { %v746_v45 = vsel %vm704_vm0, %v741_v27, %v745_v36  ;;  %v730_v46 = vrot.slane %v728_v37, 1  ;;  %v770_v47 = vrot.slane %v768_v39, 1  ;;  %v671_v51 = vunpack.c.l.b16 %v285_v40  ;;  %v248_v18 = vld [vmem:[%s6826_s22 + $0x68] sm:$0xf]  ;;  %v288_v20 = vld [vmem:[%s6826_s22 + $0x6c] sm:$0x1] }
  0x1c   : > { %10363 = vst [vmem:[#allocation4_spill] sm:$0xff] %v6869_v48  ;;  %983 = vrot.lane.b32.xlu2 %v746_v45, %s6764_s23  ;;  %v715_v49 = vrot.slane %v713_v42, 1  ;;  %v773_v50 = vshll.u32 %v6863_v43, 16  ;;  %v751_v54 = vshrl.u32 %v6866_v44, 16  ;;  %v753_v55 = vshll.u32 %v6866_v44, 16  ;;  %v6923_v39 = vld [vmem:[%s6826_s22 + $0x60] sm:$0xff]  }
  0x1d   : > { %v731_v52 = vsel %vm704_vm0, %v726_v31, %v730_v46  ;;  %v771_v53 = vor.u32 %v770_v47, %v766_v38  ;;  %v732_v60 = vshrl.u32 %v6851_v29, 16  ;;  %v6882_v61 = vpack.c.b16 %v671_v51, %v6869_v48  ;;  %v254_v40 = vld [vmem:[%s6826_s22 + $0x88] sm:$0xf]  ;;  %s6775_s13 = smov 64   ;;  %s6776_s14 = smov 56  }
  0x1e   : > { %979 = vrot.lane.b32.xlu1 %v731_v52, %s6764_s23  ;;  %v716_v58 = vsel %vm704_vm0, %v711_v41, %v715_v49  ;;  %v775_v59 = vrot.slane %v773_v50, 1  ;;  %v755_v62 = vrot.slane %v753_v55, 1  ;;  %v6886_v0 = vunpack.c.l.b16 %v245_v56  ;;  %v290_v41 = vld [vmem:[%s6826_s22 + $0x8c] sm:$0x1]  ;;  %s6238_s19 = sshll.u32 %s10730_s15, 8 }
  0x1f   : > { %975 = vrot.lane.b32.xlu0 %v716_v58, %s6764_s23  ;;  %v758_v63 = vshll.u32 %v6882_v61, 16  ;;  %v673_v1 = vunpack.c.l.b16 %v287_v57  ;;  %v734_v5 = vor.u32 %v732_v60, %v730_v46  ;;  %v747_v8 = vshrl.u32 %v6841_v15, 16  ;;  %s9929_s21 = scalar_lea.vmem %s10338_s4, %s6238_s19 }
  0x20   : > { %10364 = vst [vmem:[#allocation5_spill] sm:$0xff] %v6886_v0  ;;  %v776_v2 = vsel %vm704_vm0, %v771_v53, %v775_v59  ;;  %v6889_v4 = vor.u32 %v755_v62, %v751_v54  ;;  %v762_v12 = vshrl.u32 %v6882_v61, 16  ;;  %v717_v16 = vshrl.u32 %v6856_v32, 16 }
  0x21   : > { %v760_v6 = vrot.slane %v758_v63, 1  ;;  %v6896_v9 = vpack.c.b16 %v673_v1, %v6886_v0  ;;  %v783_v17 = vshll.u32 %v6899_v10, 16  ;;  %v749_v21 = vor.u32 %v747_v8, %v745_v36  ;;  %v6948_v63 = vld [vmem:[%s6826_s22 + $0x80] sm:$0xff]  }
  0x22   : > { %v6911_v23 = vunpack.c.l.b16 %v251_v13  ;;  %v675_v24 = vunpack.c.l.b16 %v289_v14  ;;  %v6914_v27 = vunpack.c.l.b16 %v248_v18  ;;  %v674_v28 = vunpack.c.l.b16 %v288_v20  ;;  %v291_v13 = vld [vmem:[%s6826_s22 + $0x9c] sm:$0x1] }
  0x23   : > { %v761_v7 = vsel %vm704_vm0, %v6889_v4, %v760_v6  ;;  %v788_v22 = vshll.u32 %v6896_v9, 16  ;;  %v764_v25 = vor.u32 %v762_v12, %v760_v6  ;;  %v719_v31 = vor.u32 %v717_v16, %v715_v49  ;;  %v257_v12 = vld [vmem:[%s6826_s22 + $0x98] sm:$0xf] }
  0x24   : > { %991 = vrot.lane.b32.xlu2 %v776_v2, %s6764_s23  ;;  %10365 = vst [vmem:[#allocation6_spill] sm:$0xff] %v6911_v23  ;;  %v781_v33 = vshrl.u32 %v6899_v10, 16  ;;  %v785_v34 = vrot.slane %v783_v17, 1  ;;  %v792_v36 = vshrl.u32 %v6896_v9, 16  ;;  %v6920_v37 = vpack.c.b16 %v675_v24, %v6911_v23 }
  0x25   : > { %10366 = vst [vmem:[#allocation7_spill] sm:$0xff] %v6914_v27  ;;  %v790_v35 = vrot.slane %v788_v22, 1  ;;  %v813_v38 = vshll.u32 %v6467_v26, 16  ;;  %v6929_v42 = vpack.c.b16 %v674_v28, %v6914_v27  ;;  %v777_v46 = vshrl.u32 %v6863_v43, 16  ;;  %v6470_v22 = vld [vmem:[%s6826_s22 + $0xa0] sm:$0xff]  }
  0x26   : > { %981 = vrot.lane.b32.xlu1 %v734_v5, %s6764_s23  ;;  %v6932_v45 = vor.u32 %v785_v34, %v781_v33  ;;  %v798_v49 = vshll.u32 %v6923_v39, 16  ;;  %v6936_v50 = vunpack.c.l.b16 %v254_v40  ;;  %v676_v51 = vunpack.c.l.b16 %v290_v41  ;;  %v263_v40 = vld [vmem:[%s6826_s22 + $0xb8] sm:$0xf]  ;;  %v293_v41 = vld [vmem:[%s6826_s22 + $0xbc] sm:$0x1] }
  0x27   : > { %987 = vrot.lane.b32.xlu0 %v761_v7, %s6764_s23  ;;  %v794_v47 = vor.u32 %v792_v36, %v790_v35  ;;  %v811_v52 = vshrl.u32 %v6467_v26, 16  ;;  %v815_v53 = vrot.slane %v813_v38, 1  ;;  %v818_v54 = vshll.u32 %v6920_v37, 16  ;;  %v292_v7 = vld [vmem:[%s6826_s22 + $0xac] sm:$0x1]  ;;  %v6976_v38 = vld [vmem:[%s6826_s22 + $0x90] sm:$0xff]  }
  0x28   : > { %10367 = vst [vmem:[#allocation8_spill] sm:$0xff] %v6936_v50  ;;  %v803_v55 = vshll.u32 %v6929_v42, 16  ;;  %v791_v56 = vsel %vm704_vm0, %v6932_v45, %v790_v35  ;;  %v779_v57 = vor.u32 %v777_v46, %v775_v59  ;;  %v796_v58 = vshrl.u32 %v6923_v39, 16  ;;  %v260_v59 = vld [vmem:[%s6826_s22 + $0xa8] sm:$0xf] }
  0x29   : > { %v800_v60 = vrot.slane %v798_v49, 1  ;;  %v6945_v62 = vpack.c.b16 %v676_v51, %v6936_v50  ;;  %v816_v1 = vor.u32 %v815_v53, %v811_v52  ;;  %v820_v2 = vrot.slane %v818_v54, 1 }
  0x2a   : > { %v805_v5 = vrot.slane %v803_v55, 1  ;;  %v807_v6 = vshrl.u32 %v6929_v42, 16  ;;  %v828_v8 = vshll.u32 %v6948_v63, 16  ;;  %v6962_v18 = vunpack.c.l.b16 %v260_v59 }
  0x2b   : > { %v6958_v14 = vor.u32 %v800_v60, %v796_v58  ;;  %v833_v16 = vshll.u32 %v6945_v62, 16  ;;  %v821_v17 = vsel %vm704_vm0, %v816_v1, %v820_v2  ;;  %v678_v20 = vunpack.c.l.b16 %v292_v7  ;;  %v7001_v7 = vld [vmem:[%s6826_s22 + $0xb0] sm:$0xff]  }
  0x2c   : > { %985 = vrot.lane.b32.xlu2 %v749_v21, %s6764_s23  ;;  %10368 = vst [vmem:[#allocation9_spill] sm:$0xff] %v6962_v18  ;;  %v809_v21 = vor.u32 %v807_v6, %v805_v5  ;;  %v6965_v24 = vunpack.c.l.b16 %v257_v12  ;;  %v826_v26 = vshrl.u32 %v6948_v63, 16  ;;  %v830_v28 = vrot.slane %v828_v8, 1 }
  0x2d   : > { %v835_v33 = vrot.slane %v833_v16, 1  ;;  %v837_v34 = vshrl.u32 %v6945_v62, 16  ;;  %v6973_v35 = vpack.c.b16 %v678_v20, %v6962_v18  ;;  %v858_v36 = vshll.u32 %v6470_v22, 16  ;;  %v6557_v18 = vld [vmem:[%s6826_s22 + $0xe0] sm:$0xe] }
  0x2e   : > { %989 = vrot.lane.b32.xlu1 %v764_v25, %s6764_s23  ;;  %10369 = vst [vmem:[#allocation10_spill] sm:$0xff] %v6965_v24  ;;  %v677_v25 = vunpack.c.l.b16 %v291_v13  ;;  %v822_v49 = vshrl.u32 %v6920_v37, 16  ;;  %v843_v52 = vshll.u32 %v6976_v38, 16  ;;  %v6989_v53 = vunpack.c.l.b16 %v263_v40 }
  0x2f   : > { %977 = vrot.lane.b32.xlu0 %v719_v31, %s6764_s23  ;;  %v806_v31 = vsel %vm704_vm0, %v6958_v14, %v805_v5  ;;  %v839_v51 = vor.u32 %v837_v34, %v835_v33  ;;  %v679_v54 = vunpack.c.l.b16 %v293_v41  ;;  %v856_v55 = vshrl.u32 %v6470_v22, 16  ;;  %v294_v22 = vld [vmem:[%s6826_s22 + $0xcc] sm:$0x1] }
  0x30   : > { %v6982_v46 = vpack.c.b16 %v677_v25, %v6965_v24  ;;  %10370 = vst [vmem:[#allocation11_spill] sm:$0xff] %v6989_v53  ;;  %v824_v1 = vor.u32 %v822_v49, %v820_v2  ;;  %v841_v5 = vshrl.u32 %v6976_v38, 16  ;;  %v845_v6 = vrot.slane %v843_v52, 1  ;;  %v269_v2 = vld [vmem:[%s6826_s22 + $0xd8] sm:$0xf] }
  0x31   : > { %v6998_v59 = vpack.c.b16 %v679_v54, %v6989_v53  ;;  %v873_v20 = vshll.u32 %v7001_v7, 16  ;;  %v680_v41 = vunpack.c.l.b16 %v294_v22  ;;  %v871_v49 = vshrl.u32 %v7001_v7, 16  ;;  %v299_v24 = vld [vmem:[%s6826_s22 + $0x11c] sm:$0x1] }
  0x32   : > { %v848_v58 = vshll.u32 %v6982_v46, 16  ;;  %v852_v16 = vshrl.u32 %v6982_v46, 16  ;;  %v7011_v25 = vor.u32 %v845_v6, %v841_v5 }
  0x34   : > { %997 = vrot.lane.b32.xlu2 %v794_v47, %s6764_s23  ;;  %v6985_v47 = vor.u32 %v830_v28, %v826_v26  ;;  %v850_v13 = vrot.slane %v848_v58, 1  ;;  %v878_v26 = vshll.u32 %v6998_v59, 16  ;;  %v7029_v58 = vld [vmem:[%s6826_s22 + $0xc0] sm:$0xff]  }
  0x36   : > { %995 = vrot.lane.b32.xlu1 %v791_v56, %s6764_s23  ;;  %v860_v56 = vrot.slane %v858_v36, 1  ;;  %v836_v60 = vsel %vm704_vm0, %v6985_v47, %v835_v33  ;;  %v854_v34 = vor.u32 %v852_v16, %v850_v13  ;;  %v6473_v36 = vld [vmem:[%s6826_s22 + $0xd0] sm:$0xff]   ;;  %v851_v52 = vsel %vm704_vm0, %v7011_v25, %v850_v13 }
  0x37   : > { %993 = vrot.lane.b32.xlu0 %v779_v57, %s6764_s23  ;;  %v863_v57 = vshll.u32 %v6973_v35, 16  ;;  %v880_v54 = vrot.slane %v878_v26, 1  ;;  %v888_v16 = vshll.u32 %v7029_v58, 16 }
  0x38   : > { %v861_v8 = vor.u32 %v860_v56, %v856_v55  ;;  %v882_v55 = vshrl.u32 %v6998_v59, 16 }
  0x39   : > { %v865_v12 = vrot.slane %v863_v57, 1  ;;  %v903_v57 = vshll.u32 %v6473_v36, 16 }
  0x3a   : > { %v884_v13 = vor.u32 %v882_v55, %v880_v54 }
  0x3b   : > { %v866_v28 = vsel %vm704_vm0, %v861_v8, %v865_v12  ;;  %v867_v8 = vshrl.u32 %v6973_v35, 16 }
  0x3c   : > { %1003 = vrot.lane.b32.xlu2 %v821_v17, %s6764_s23  ;;  %v295_v17 = vld [vmem:[%s6826_s22 + $0xdc] sm:$0x1] }
  0x3d   : > { %v681_v33 = vunpack.c.l.b16 %v295_v17 }
  0x3e   : > { %1001 = vrot.lane.b32.xlu1 %v809_v21, %s6764_s23  ;;  %v266_v21 = vld [vmem:[%s6826_s22 + $0xc8] sm:$0xf] }
  0x3f   : > { %999 = vrot.lane.b32.xlu0 %v806_v31, %s6764_s23  ;;  %v7015_v31 = vunpack.c.l.b16 %v269_v2  ;;  %v7018_v40 = vunpack.c.l.b16 %v266_v21  ;;  %v905_v21 = vrot.slane %v903_v57, 1  ;;  %v298_v57 = vld [vmem:[%s6826_s22 + $0x10c] sm:$0x1] }
  0x41   : > { %10371 = vst [vmem:[#allocation12_spill] sm:$0xff] %v7015_v31  ;;  %v7026_v56 = vpack.c.b16 %v681_v33, %v7015_v31  ;;  %v7035_v5 = vpack.c.b16 %v680_v41, %v7018_v40  ;;  %v869_v33 = vor.u32 %v867_v8, %v865_v12  ;;  %v890_v41 = vrot.slane %v888_v16, 1  ;;  %v278_v12 = vld [vmem:[%s6826_s22 + $0x108] sm:$0xf]  ;;  %v297_v8 = vld [vmem:[%s6826_s22 + $0xfc] sm:$0x1] }
  0x42   : > { %10372 = vst [vmem:[#allocation13_spill] sm:$0xff] %v7018_v40 }
  0x43   : > { %v908_v22 = vshll.u32 %v7026_v56, 16  ;;  %v893_v26 = vshll.u32 %v7035_v5, 16 }
  0x44   : > { %1009 = vrot.lane.b32.xlu2 %v839_v51, %s6764_s23  ;;  %v875_v51 = vrot.slane %v873_v20, 1  ;;  %v901_v20 = vshrl.u32 %v6473_v36, 16 }
  0x45   : > { %v895_v55 = vrot.slane %v893_v26, 1  ;;  %v6476_v26 = vld [vmem:[%s6826_s22 + $0x100] sm:$0xff]  }
  0x46   : > { %1007 = vrot.lane.b32.xlu1 %v836_v60, %s6764_s23  ;;  %v272_v60 = vld [vmem:[%s6826_s22 + $0xe8] sm:$0xf]  ;;  %v7038_v6 = vor.u32 %v875_v51, %v871_v49  ;;  %v7054_v49 = vld [vmem:[%s6826_s22 + $0xe0] sm:$0xff]   ;;  %v906_v51 = vor.u32 %v905_v21, %v901_v20  ;;  %v7068_v20 = vunpack.c.l.b16 %v278_v12  ;;  %v684_v21 = vunpack.c.l.b16 %v298_v57 }
  0x47   : > { %1005 = vrot.lane.b32.xlu0 %v824_v1, %s6764_s23  ;;  %v296_v1 = vld [vmem:[%s6826_s22 + $0xec] sm:$0x1]  ;;  %v7042_v2 = vunpack.c.l.b16 %v272_v60  ;;  %v918_v60 = vshll.u32 %v7054_v49, 16  ;;  %v948_v57 = vshll.u32 %v6476_v26, 16  ;;  %v946_v40 = vshrl.u32 %v6476_v26, 16 }
  0x48   : > { %v682_v17 = vunpack.c.l.b16 %v296_v1  ;;  %v275_v1 = vld [vmem:[%s6826_s22 + $0xf8] sm:$0xf]  ;;  %10374 = vst [vmem:[#allocation15_spill] sm:$0xff] %v7068_v20  ;;  %v7079_v12 = vpack.c.b16 %v684_v21, %v7068_v20  ;;  %v685_v20 = vunpack.c.l.b16 %v299_v24 }
  0x49   : > { %10373 = vst [vmem:[#allocation14_spill] sm:$0xff] %v7042_v2  ;;  %v920_v31 = vrot.slane %v918_v60, 1  ;;  %v950_v50 = vrot.slane %v948_v57, 1 }
  0x4a   : > { %v7051_v36 = vpack.c.b16 %v682_v17, %v7042_v2  ;;  %v916_v2 = vshrl.u32 %v7054_v49, 16 }
  0x4b   : > { %v951_v24 = vor.u32 %v950_v50, %v946_v40 }
  0x4c   : > { %1015 = vrot.lane.b32.xlu2 %v866_v28, %s6764_s23  ;;  %v881_v28 = vsel %vm704_vm0, %v7038_v6, %v880_v54  ;;  %v897_v54 = vshrl.u32 %v7035_v5, 16  ;;  %v923_v16 = vshll.u32 %v7051_v36, 16 }
  0x4e   : > { %1013 = vrot.lane.b32.xlu1 %v854_v34, %s6764_s23  ;;  %v886_v34 = vshrl.u32 %v7029_v58, 16 }
  0x4f   : > { %1011 = vrot.lane.b32.xlu0 %v851_v52, %s6764_s23  ;;  %v910_v52 = vrot.slane %v908_v22, 1  ;;  %v899_v22 = vor.u32 %v897_v54, %v895_v55  ;;  %v7082_v54 = vld [vmem:[%s6826_s22 + $0xf0] sm:$0xff]  }
  0x51   : > { %v911_v17 = vsel %vm704_vm0, %v906_v51, %v910_v52  ;;  %v927_v51 = vshrl.u32 %v7051_v36, 16 }
  0x54   : > { %1021 = vrot.lane.b32.xlu2 %v884_v13, %s6764_s23  ;;  %v7064_v13 = vor.u32 %v890_v41, %v886_v34  ;;  %v925_v41 = vrot.slane %v923_v16, 1 }
  0x56   : > { %1019 = vrot.lane.b32.xlu1 %v881_v28, %s6764_s23  ;;  %v7071_v28 = vunpack.c.l.b16 %v275_v1  ;;  %v896_v34 = vsel %vm704_vm0, %v7064_v13, %v895_v55  ;;  %v281_v1 = vld [vmem:[%s6826_s22 + $0x118] sm:$0xf]  ;;  %v912_v55 = vshrl.u32 %v7026_v56, 16  ;;  %v929_v16 = vor.u32 %v927_v51, %v925_v41 }
  0x57   : > { %1017 = vrot.lane.b32.xlu0 %v869_v33, %s6764_s23  ;;  %v683_v33 = vunpack.c.l.b16 %v297_v8  ;;  %v7091_v8 = vor.u32 %v920_v31, %v916_v2  ;;  %v7095_v21 = vunpack.c.l.b16 %v281_v1  ;;  %v931_v2 = vshrl.u32 %v7082_v54, 16  ;;  %v7107_v1 = vld [vmem:[%s6826_s22 + $0x110] sm:$0xff]  }
  0x58   : > { %10375 = vst [vmem:[#allocation16_spill] sm:$0xff] %v7071_v28  ;;  %v914_v31 = vor.u32 %v912_v55, %v910_v52  ;;  %v963_v52 = vshll.u32 %v7107_v1, 16  ;;  %v961_v40 = vshrl.u32 %v7107_v1, 16 }
  0x59   : > { %v7088_v60 = vpack.c.b16 %v683_v33, %v7071_v28  ;;  %10376 = vst [vmem:[#allocation17_spill] sm:$0xff] %v7095_v21  ;;  %v7104_v28 = vpack.c.b16 %v685_v20, %v7095_v21  ;;  %v6515_v21 = vld [vmem:[%s6826_s22] sm:$0xe] }
  0x5b   : > { %v938_v33 = vshll.u32 %v7088_v60, 16  ;;  %v968_v20 = vshll.u32 %v7104_v28, 16 }
  0x5c   : > { %1027 = vrot.lane.b32.xlu2 %v911_v17, %s6764_s23  ;;  %v933_v17 = vshll.u32 %v7082_v54, 16 }
  0x5d   : > { %v940_v57 = vrot.slane %v938_v33, 1  ;;  %v970_v33 = vrot.slane %v968_v20, 1 }
  0x5e   : > { %1025 = vrot.lane.b32.xlu1 %v899_v22, %s6764_s23  ;;  %v953_v22 = vshll.u32 %v7079_v12, 16  ;;  %v935_v51 = vrot.slane %v933_v17, 1  ;;  %v965_v17 = vrot.slane %v963_v52, 1 }
  0x5f   : > { %1023 = vrot.lane.b32.xlu0 %v896_v34, %s6764_s23  ;;  %v926_v34 = vsel %vm704_vm0, %v7091_v8, %v925_v41  ;;  %v942_v41 = vshrl.u32 %v7088_v60, 16 }
  0x60   : > { %v955_v26 = vrot.slane %v953_v22, 1  ;;  %v7113_v55 = vor.u32 %v935_v51, %v931_v2  ;;  %v6518_v2 = vld [vmem:[%s6826_s22 + $0x10] sm:$0xe]  ;;  %v7126_v51 = vor.u32 %v965_v17, %v961_v40  ;;  %v1103_v17 = vrot.slane %v6856_v32, 1 }
  0x61   : > { %v944_v50 = vor.u32 %v942_v41, %v940_v57  ;;  %v1109_v32 = vrot.slane %v6841_v15, 1  ;;  %v1112_v15 = vrot.slane %v6882_v61, 1  ;;  %v1118_v61 = vrot.slane %v6896_v9, 1 }
  0x62   : > { %v941_v22 = vsel %vm704_vm0, %v7113_v55, %v940_v57  ;;  %v971_v57 = vsel %vm704_vm0, %v7126_v51, %v970_v33 }
  0x64   : > { %1033 = vrot.lane.b32.xlu2 %v929_v16, %s6764_s23  ;;  %v956_v16 = vsel %vm704_vm0, %v951_v24, %v955_v26  ;;  %v957_v24 = vshrl.u32 %v7079_v12, 16 }
  0x66   : > { %1031 = vrot.lane.b32.xlu1 %v926_v34, %s6764_s23  ;;  %v972_v34 = vshrl.u32 %v7104_v28, 16  ;;  %v959_v20 = vor.u32 %v957_v24, %v955_v26  ;;  %v6520_v26 = vld [vmem:[%s6826_s22 + $0x20] sm:$0xf0] }
  0x67   : > { %1029 = vrot.lane.b32.xlu0 %v914_v31, %s6764_s23  ;;  %v6517_v31 = vld [vmem:[%s6826_s22 + $0x10] sm:$0xf0]  ;;  %v6526_v24 = vld [vmem:[%s6826_s22 + $0x40] sm:$0xf0] }
  0x68   : > { %v974_v41 = vor.u32 %v972_v34, %v970_v33  ;;  %v6519_v52 = vor.u32 %v6518_v2, %v6517_v31  ;;  %v6521_v33 = vld [vmem:[%s6826_s22 + $0x20] sm:$0xe] }
  0x69   : > { %v6522_v31 = vor.u32 %v6521_v33, %v6520_v26 }
  0x6a   : > { %v1105_v53 = vrot.slane %v6519_v52, 1 }
  0x6b   : > { %v1108_v52 = vrot.slane %v6522_v31, 1  ;;  %v6530_v31 = vld [vmem:[%s6826_s22 + $0x50] sm:$0xe] }
  0x6c   : > { %1039 = vrot.lane.b32.xlu2 %v956_v16, %s6764_s23  ;;  %v6514_v16 = vld [vmem:[%s6826_s22] sm:$0xf0] }
  0x6e   : > { %1037 = vrot.lane.b32.xlu1 %v944_v50, %s6764_s23  ;;  %v6516_v50 = vor.u32 %v6515_v21, %v6514_v16  ;;  %v6523_v16 = vld [vmem:[%s6826_s22 + $0x30] sm:$0xf0] }
  0x6f   : > { %1035 = vrot.lane.b32.xlu0 %v941_v22, %s6764_s23  ;;  %v1106_v22 = vrot.slane %v6851_v29, 1 }
  0x70   : > { %v1102_v34 = vrot.slane %v6516_v50, 1 }
  0x71   : > { %v1107_v21 = vsel %vm1101_vm1, %v1105_v53, %v1106_v22 }
  0x72   : > { %v1104_v29 = vsel %vm1101_vm1, %v1102_v34, %v1103_v17  ;;  %v1115_v34 = vrot.slane %v6863_v43, 1 }
  0x74   : > { %1045 = vrot.lane.b32.xlu2 %v974_v41, %s6764_s23  ;;  %v6527_v41 = vld [vmem:[%s6826_s22 + $0x40] sm:$0xe] }
  0x75   : > { %v6528_v53 = vor.u32 %v6527_v41, %v6526_v24 }
  0x76   : > { %1043 = vrot.lane.b32.xlu1 %v971_v57, %s6764_s23  ;;  %v7136_v40 = vpop.permute.xlu2 %983  ;;  %v6524_v57 = vld [vmem:[%s6826_s22 + $0x30] sm:$0xe] }
  0x77   : > { %10377 = vst [vmem:[#allocation18_spill] sm:$0xff] %v7136_v40  ;;  %1041 = vrot.lane.b32.xlu0 %v959_v20, %s6764_s23  ;;  %v1110_v20 = vsel %vm1101_vm1, %v1108_v52, %v1109_v32  ;;  %v6525_v50 = vor.u32 %v6524_v57, %v6523_v16 }
  0x79   : > { %v1111_v33 = vrot.slane %v6525_v50, 1  ;;  %v6533_v50 = vld [vmem:[%s6826_s22 + $0x60] sm:$0xe] }
  0x7b   : > { %v1113_v43 = vsel %vm1101_vm1, %v1111_v33, %v1112_v15 }
  0x7c   : > { %1160 = vrot.lane.b32.xlu2 %v1107_v21, %s6765_s24  ;;  %v6529_v21 = vld [vmem:[%s6826_s22 + $0x50] sm:$0xf0] }
  0x7d   : > { %v6531_v24 = vor.u32 %v6530_v31, %v6529_v21  ;;  %v1124_v21 = vrot.slane %v6920_v37, 1 }
  0x7e   : > { %1158 = vrot.lane.b32.xlu1 %v1103_v17, %s6765_s24  ;;  %v7146_v2 = vpop.permute.xlu2 %991  ;;  %v1114_v17 = vrot.slane %v6528_v53, 1 }
  0x7f   : > { %10378 = vst [vmem:[#allocation19_spill] sm:$0xff] %v7146_v2  ;;  %1156 = vrot.lane.b32.xlu0 %v1104_v29, %s6765_s24  ;;  %v1117_v52 = vrot.slane %v6531_v24, 1  ;;  %v5959_v2 = vld [vmem:[%s6826_s22 + $0x128] sm:$0xf] }
  0x80   : > { %v1116_v29 = vsel %vm1101_vm1, %v1114_v17, %v1115_v34 }
  0x81   : > { %v1119_v17 = vsel %vm1101_vm1, %v1117_v52, %v1118_v61 }
  0x84   : > { %1166 = vrot.lane.b32.xlu2 %v1109_v32, %s6765_s24  ;;  %v6535_v32 = vld [vmem:[%s6826_s22 + $0x70] sm:$0xf0] }
  0x86   : > { %1164 = vrot.lane.b32.xlu1 %v1110_v20, %s6765_s24  ;;  %v7158_v26 = vpop.permute.xlu2 %985  ;;  %v6532_v20 = vld [vmem:[%s6826_s22 + $0x60] sm:$0xf0] }
  0x87   : > { %10379 = vst [vmem:[#allocation20_spill] sm:$0xff] %v7158_v26  ;;  %1162 = vrot.lane.b32.xlu0 %v1106_v22, %s6765_s24  ;;  %v6536_v22 = vld [vmem:[%s6826_s22 + $0x70] sm:$0xe] }
  0x88   : > { %v6537_v57 = vor.u32 %v6536_v22, %v6535_v32  ;;  %v6539_v32 = vld [vmem:[%s6826_s22 + $0x80] sm:$0xe] }
  0x8a   : > { %v1123_v33 = vrot.slane %v6537_v57, 1  ;;  %v6544_v57 = vld [vmem:[%s6826_s22 + $0xa0] sm:$0xf0] }
  0x8c   : > { %1172 = vrot.lane.b32.xlu2 %v1116_v29, %s6765_s24  ;;  %v1121_v29 = vrot.slane %v6929_v42, 1  ;;  %v1125_v37 = vsel %vm1101_vm1, %v1123_v33, %v1124_v21  ;;  %v6545_v42 = vld [vmem:[%s6826_s22 + $0xa0] sm:$0xe] }
  0x8d   : > { %v6546_v33 = vor.u32 %v6545_v42, %v6544_v57  ;;  %v1130_v57 = vrot.slane %v6982_v46, 1  ;;  %v6554_v46 = vld [vmem:[%s6826_s22 + $0xd0] sm:$0xe] }
  0x8e   : > { %1170 = vrot.lane.b32.xlu1 %v1112_v15, %s6765_s24  ;;  %v7168_v41 = vpop.permute.xlu2 %997  ;;  %v6534_v15 = vor.u32 %v6533_v50, %v6532_v20  ;;  %v1127_v20 = vrot.slane %v6945_v62, 1 }
  0x8f   : > { %10380 = vst [vmem:[#allocation21_spill] sm:$0xff] %v7168_v41  ;;  %1168 = vrot.lane.b32.xlu0 %v1113_v43, %s6765_s24  ;;  %v6538_v43 = vld [vmem:[%s6826_s22 + $0x80] sm:$0xf0] }
  0x90   : > { %v7174_v53 = vpop.permute.xlu1 %979  ;;  %v1120_v24 = vrot.slane %v6534_v15, 1 }
  0x91   : > { %v7176_v16 = vpop.permute.xlu0 %975 }
  0x92   : > { %v1122_v52 = vsel %vm1101_vm1, %v1120_v24, %v1121_v29  ;;  %v6542_v24 = vld [vmem:[%s6826_s22 + $0x90] sm:$0xe] }
  0x94   : > { %1178 = vrot.lane.b32.xlu2 %v1118_v61, %s6765_s24  ;;  %v6540_v61 = vor.u32 %v6539_v32, %v6538_v43  ;;  %v6541_v43 = vld [vmem:[%s6826_s22 + $0x90] sm:$0xf0] }
  0x95   : > { %v6543_v32 = vor.u32 %v6542_v24, %v6541_v43  ;;  %v6553_v24 = vld [vmem:[%s6826_s22 + $0xd0] sm:$0xf0] }
  0x96   : > { %1176 = vrot.lane.b32.xlu1 %v1119_v17, %s6765_s24  ;;  %v7184_v9 = vpop.permute.xlu2 %1003  ;;  %v1126_v50 = vrot.slane %v6540_v61, 1 }
  0x97   : > { %10381 = vst [vmem:[#allocation22_spill] sm:$0xff] %v7184_v9  ;;  %1174 = vrot.lane.b32.xlu0 %v1115_v34, %s6765_s24  ;;  %v1129_v42 = vrot.slane %v6543_v32, 1  ;;  %v5935_v9 = vld [vmem:[%s6826_s22 + $0xa8] sm:$0xf] }
  0x98   : > { %v7187_v31 = vpop.permute.xlu1 %981 }
  0x99   : > { %v7192_v22 = vpop.permute.xlu0 %987  ;;  %v1131_v43 = vsel %vm1101_vm1, %v1129_v42, %v1130_v57  ;;  %v6551_v42 = vld [vmem:[%s6826_s22 + $0xc0] sm:$0xe] }
  0x9a   : > { %10382 = vst [vmem:[#allocation23_spill] sm:$0xff] %v7192_v22 }
  0x9c   : > { %1184 = vrot.lane.b32.xlu2 %v1125_v37, %s6765_s24  ;;  %v1132_v37 = vrot.slane %v6546_v33, 1 }
  0x9e   : > { %1182 = vrot.lane.b32.xlu1 %v1121_v29, %s6765_s24  ;;  %v7198_v34 = vpop.permute.xlu2 %1009  ;;  %v1128_v29 = vsel %vm1101_vm1, %v1126_v50, %v1127_v20  ;;  %v6547_v50 = vld [vmem:[%s6826_s22 + $0xb0] sm:$0xf0] }
  0x9f   : > { %10383 = vst [vmem:[#allocation24_spill] sm:$0xff] %v7198_v34  ;;  %1180 = vrot.lane.b32.xlu0 %v1122_v52, %s6765_s24  ;;  %v1133_v52 = vrot.slane %v6973_v35, 1  ;;  %v6548_v34 = vld [vmem:[%s6826_s22 + $0xb0] sm:$0xe] }
  0xa0   : > { %v7204_v17 = vpop.permute.xlu1 %989  ;;  %v6549_v33 = vor.u32 %v6548_v34, %v6547_v50  ;;  %v6555_v34 = vor.u32 %v6554_v46, %v6553_v24  ;;  %v6550_v50 = vld [vmem:[%s6826_s22 + $0xc0] sm:$0xf0]  ;;  %v1139_v24 = vrot.slane %v7035_v5, 1  ;;  %v6563_v5 = vld [vmem:[%s6826_s22 + $0x100] sm:$0xe] }
  0xa1   : > { %10384 = vst [vmem:[#allocation25_spill] sm:$0xff] %v7204_v17  ;;  %v7206_v15 = vpop.permute.xlu0 %977  ;;  %v1134_v35 = vsel %vm1101_vm1, %v1132_v37, %v1133_v52  ;;  %v5962_v17 = vld [vmem:[%s6826_s22 + $0x3c] sm:$0x1] }
  0xa2   : > { %v1135_v32 = vrot.slane %v6549_v33, 1 }
  0xa4   : > { %1190 = vrot.lane.b32.xlu2 %v1127_v20, %s6765_s24 }
  0xa6   : > { %1188 = vrot.lane.b32.xlu1 %v1128_v29, %s6765_s24  ;;  %v7214_v62 = vpop.permute.xlu2 %1015  ;;  %v1136_v29 = vrot.slane %v6998_v59, 1 }
  0xa7   : > { %10385 = vst [vmem:[#allocation26_spill] sm:$0xff] %v7214_v62  ;;  %1186 = vrot.lane.b32.xlu0 %v1124_v21, %s6765_s24 }
  0xa8   : > { %v7217_v61 = vpop.permute.xlu1 %995 }
  0xa9   : > { %10386 = vst [vmem:[#allocation27_spill] sm:$0xff] %v7217_v61  ;;  %v7222_v20 = vpop.permute.xlu0 %993  ;;  %v5960_v61 = vld [vmem:[%s6826_s22 + $0x1c] sm:$0x1] }
  0xaa   : > { %10387 = vst [vmem:[#allocation28_spill] sm:$0xff] %v7222_v20 }
  0xac   : > { %1196 = vrot.lane.b32.xlu2 %v1134_v35, %s6765_s24  ;;  %v6552_v35 = vor.u32 %v6551_v42, %v6550_v50  ;;  %v6562_v42 = vld [vmem:[%s6826_s22 + $0x100] sm:$0xf0] }
  0xae   : > { %1194 = vrot.lane.b32.xlu1 %v1130_v57, %s6765_s24  ;;  %v7228_v21 = vpop.permute.xlu2 %1021  ;;  %v1137_v57 = vsel %vm1101_vm1, %v1135_v32, %v1136_v29  ;;  %v1138_v46 = vrot.slane %v6552_v35, 1  ;;  %v6556_v32 = vld [vmem:[%s6826_s22 + $0xe0] sm:$0xf0] }
  0xaf   : > { %10388 = vst [vmem:[#allocation29_spill] sm:$0xff] %v7228_v21  ;;  %1192 = vrot.lane.b32.xlu0 %v1131_v43, %s6765_s24  ;;  %v1141_v21 = vrot.slane %v6555_v34, 1  ;;  %v1142_v43 = vrot.slane %v7026_v56, 1  ;;  %v6558_v34 = vor.u32 %v6557_v18, %v6556_v32  ;;  %v6564_v18 = vor.u32 %v6563_v5, %v6562_v42  ;;  %v6559_v32 = vld [vmem:[%s6826_s22 + $0xf0] sm:$0xf0] }
  0xb0   : > { %v7234_v23 = vpop.permute.xlu1 %1001  ;;  %v1140_v50 = vsel %vm1101_vm1, %v1138_v46, %v1139_v24  ;;  %v6560_v46 = vld [vmem:[%s6826_s22 + $0xf0] sm:$0xe]  ;;  %v1148_v42 = vrot.slane %v7088_v60, 1  ;;  %v1154_v60 = vrot.slane %v7104_v28, 1 }
  0xb1   : > { %10389 = vst [vmem:[#allocation30_spill] sm:$0xff] %v7234_v23  ;;  %v7236_v37 = vpop.permute.xlu0 %999  ;;  %v1143_v56 = vsel %vm1101_vm1, %v1141_v21, %v1142_v43  ;;  %v1144_v35 = vrot.slane %v6558_v34, 1 }
  0xb2   : > { %10390 = vst [vmem:[#allocation31_spill] sm:$0xff] %v7236_v37 }
  0xb4   : > { %1202 = vrot.lane.b32.xlu2 %v1136_v29, %s6765_s24 }
  0xb6   : > { %1200 = vrot.lane.b32.xlu1 %v1137_v57, %s6765_s24  ;;  %v7244_v59 = vpop.permute.xlu2 %1027  ;;  %v1145_v57 = vrot.slane %v7051_v36, 1 }
  0xb7   : > { %10391 = vst [vmem:[#allocation32_spill] sm:$0xff] %v7244_v59  ;;  %1198 = vrot.lane.b32.xlu0 %v1133_v52, %s6765_s24 }
  0xb8   : > { %v7247_v33 = vpop.permute.xlu1 %1007 }
  0xb9   : > { %10392 = vst [vmem:[#allocation33_spill] sm:$0xff] %v7247_v33  ;;  %v7252_v29 = vpop.permute.xlu0 %1005 }
  0xba   : > { %10393 = vst [vmem:[#allocation34_spill] sm:$0xff] %v7252_v29 }
  0xbc   : > { %1208 = vrot.lane.b32.xlu2 %v1143_v56, %s6765_s24  ;;  %v6561_v56 = vor.u32 %v6560_v46, %v6559_v32 }
  0xbe   : > { %1206 = vrot.lane.b32.xlu1 %v1139_v24, %s6765_s24  ;;  %v7258_v52 = vpop.permute.xlu2 %1033  ;;  %v1146_v24 = vsel %vm1101_vm1, %v1144_v35, %v1145_v57  ;;  %v1147_v5 = vrot.slane %v6561_v56, 1  ;;  %v6566_v35 = vld [vmem:[%s6826_s22 + $0x110] sm:$0xe] }
  0xbf   : > { %10394 = vst [vmem:[#allocation35_spill] sm:$0xff] %v7258_v52  ;;  %1204 = vrot.lane.b32.xlu0 %v1140_v50, %s6765_s24  ;;  %v1150_v52 = vrot.slane %v6564_v18, 1  ;;  %v1151_v50 = vrot.slane %v7079_v12, 1 }
  0xc0   : > { %v7264_v59 = vpop.permute.xlu1 %1013  ;;  %v1149_v12 = vsel %vm1101_vm1, %v1147_v5, %v1148_v42 }
  0xc1   : > { %10395 = vst [vmem:[#allocation36_spill] sm:$0xff] %v7264_v59  ;;  %v7266_v21 = vpop.permute.xlu0 %1011  ;;  %v6565_v59 = vld [vmem:[%s6826_s22 + $0x110] sm:$0xf0] }
  0xc2   : > { %10396 = vst [vmem:[#allocation37_spill] sm:$0xff] %v7266_v21  ;;  %v6567_v18 = vor.u32 %v6566_v35, %v6565_v59  ;;  %v7310_v35 = vld [vmem:[%s6826_s22 + $0x20] sm:$0xff]  }
  0xc4   : > { %1214 = vrot.lane.b32.xlu2 %v1145_v57, %s6765_s24  ;;  %v1152_v57 = vsel %vm1101_vm1, %v1150_v52, %v1151_v50  ;;  %v1153_v32 = vrot.slane %v6567_v18, 1 }
  0xc6   : > { %1212 = vrot.lane.b32.xlu1 %v1146_v24, %s6765_s24  ;;  %v7274_v36 = vpop.permute.xlu2 %1039  ;;  %v1155_v59 = vsel %vm1101_vm1, %v1153_v32, %v1154_v60  ;;  %v5908_v24 = vld [vmem:[%s6826_s22 + $0x18] sm:$0xf] }
  0xc7   : > { %10397 = vst [vmem:[#allocation38_spill] sm:$0xff] %v7274_v36  ;;  %1210 = vrot.lane.b32.xlu0 %v1142_v43, %s6765_s24  ;;  %v5917_v36 = vld [vmem:[%s6826_s22 + $0x48] sm:$0xf] }
  0xc8   : > { %v7277_v34 = vpop.permute.xlu1 %1019 }
  0xc9   : > { %10398 = vst [vmem:[#allocation39_spill] sm:$0xff] %v7277_v34  ;;  %v7282_v21 = vpop.permute.xlu0 %1017  ;;  %v5932_v34 = vld [vmem:[%s6826_s22 + $0x98] sm:$0xf] }
  0xca   : > { %10399 = vst [vmem:[#allocation40_spill] sm:$0xff] %v7282_v21 }
  0xcc   : > { %1220 = vrot.lane.b32.xlu2 %v1152_v57, %s6765_s24  ;;  %v5914_v57 = vld [vmem:[%s6826_s22 + $0x38] sm:$0xf] }
  0xce   : > { %1218 = vrot.lane.b32.xlu1 %v1148_v42, %s6765_s24  ;;  %v7288_v43 = vpop.permute.xlu2 %1045  ;;  %v7302_v42 = vunpack.c.l.b16 %v5908_v24 }
  0xcf   : > { %10400 = vst [vmem:[#allocation41_spill] sm:$0xff] %v7288_v43  ;;  %1216 = vrot.lane.b32.xlu0 %v1149_v12, %s6765_s24  ;;  %v7318_v12 = vld [vmem:[%s6826_s22 + $0x10] sm:$0xff]  }
  0xd0   : > { %v7292_v46 = vpop.permute.xlu1 %1025  ;;  %v1337_v18 = vpack.c.b16 %v7302_v42, %v7302_v42 }
  0xd1   : > { %10401 = vst [vmem:[#allocation42_spill] sm:$0xff] %v7292_v46  ;;  %v7294_v52 = vpop.permute.xlu0 %1023 }
  0xd2   : > { %10402 = vst [vmem:[#allocation43_spill] sm:$0xff] %v7294_v52  ;;  %v5926_v52 = vld [vmem:[%s6826_s22 + $0x78] sm:$0xf] }
  0xd3   : > { %v7383_v33 = vunpack.c.l.b16 %v5926_v52  ;;  %v5929_v52 = vld [vmem:[%s6826_s22 + $0x88] sm:$0xf] }
  0xd4   : > { %1226 = vrot.lane.b32.xlu2 %v1154_v60, %s6765_s24  ;;  %v7320_v60 = vunpack.c.l.b16 %v5914_v57 }
  0xd5   : > { %v1349_v62 = vpack.c.b16 %v7383_v33, %v7383_v33 }
  0xd6   : > { %1224 = vrot.lane.b32.xlu1 %v1155_v59, %s6765_s24  ;;  %v7300_v56 = vpop.permute.xlu2 %1160  ;;  %v1341_v43 = vpack.c.b16 %v7320_v60, %v7320_v60 }
  0xd7   : > { %1222 = vrot.lane.b32.xlu0 %v1151_v50, %s6765_s24  ;;  %v5911_v50 = vld [vmem:[%s6826_s22 + $0x28] sm:$0xf] }
  0xd8   : > { %v7305_v28 = vpop.permute.xlu1 %1031  ;;  %v7328_v59 = vunpack.c.l.b16 %v5911_v50 }
  0xd9   : > { %10403 = vst [vmem:[#allocation44_spill] sm:$0xff] %v7305_v28  ;;  %v7307_v5 = vpop.permute.xlu0 %1029  ;;  %v7344_v28 = vunpack.c.l.b16 %v5917_v36  ;;  %v5920_v36 = vld [vmem:[%s6826_s22 + $0x58] sm:$0xf] }
  0xda   : > { %10404 = vst [vmem:[#allocation45_spill] sm:$0xff] %v7307_v5 }
  0xdb   : > { %v1343_v46 = vpack.c.b16 %v7344_v28, %v7344_v28 }
  0xdc   : > { %1376 = vrot.lane.b32.xlu2 %v7310_v35, %s6766_s25 }
  0xde   : > { %1374 = vrot.lane.b32.xlu1 %v1337_v18, %s6766_s25  ;;  %v7324_v32 = vpop.permute.xlu2 %1166  ;;  %v1339_v18 = vpack.c.b16 %v7328_v59, %v7328_v59 }
  0xdf   : > { %10405 = vst [vmem:[#allocation46_spill] sm:$0xff] %v7324_v32  ;;  %1372 = vrot.lane.b32.xlu0 %v7318_v12, %s6766_s25 }
  0xe0   : > { %v7330_v24 = vpop.permute.xlu1 %1037 }
  0xe1   : > { %10406 = vst [vmem:[#allocation47_spill] sm:$0xff] %v7330_v24  ;;  %v7334_v57 = vpop.permute.xlu0 %1035 }
  0xe2   : > { %10407 = vst [vmem:[#allocation48_spill] sm:$0xff] %v7334_v57  ;;  %v5923_v57 = vld [vmem:[%s6826_s22 + $0x68] sm:$0xf] }
  0xe4   : > { %1382 = vrot.lane.b32.xlu2 %v1341_v43, %s6766_s25  ;;  %v7357_v43 = vld [vmem:[%s6826_s22 + $0x40] sm:$0xff]  }
  0xe6   : > { %1380 = vrot.lane.b32.xlu1 %v6866_v44, %s6766_s25  ;;  %v7342_v50 = vpop.permute.xlu2 %1172  ;;  %v7359_v44 = vunpack.c.l.b16 %v5923_v57 }
  0xe7   : > { %10408 = vst [vmem:[#allocation49_spill] sm:$0xff] %v7342_v50  ;;  %1378 = vrot.lane.b32.xlu0 %v1339_v18, %s6766_s25 }
  0xe8   : > { %v7347_v24 = vpop.permute.xlu1 %1043 }
  0xe9   : > { %10409 = vst [vmem:[#allocation50_spill] sm:$0xff] %v7347_v24  ;;  %v7349_v5 = vpop.permute.xlu0 %1041 }
  0xea   : > { %10410 = vst [vmem:[#allocation51_spill] sm:$0xff] %v7349_v5  ;;  %v7367_v5 = vunpack.c.l.b16 %v5920_v36 }
  0xec   : > { %1388 = vrot.lane.b32.xlu2 %v6899_v10, %s6766_s25  ;;  %v1347_v10 = vpack.c.b16 %v7359_v44, %v7359_v44 }
  0xee   : > { %1386 = vrot.lane.b32.xlu1 %v1343_v46, %s6766_s25  ;;  %v7363_v18 = vpop.permute.xlu2 %1178  ;;  %v1345_v46 = vpack.c.b16 %v7367_v5, %v7367_v5 }
  0xef   : > { %10411 = vst [vmem:[#allocation52_spill] sm:$0xff] %v7363_v18  ;;  %1384 = vrot.lane.b32.xlu0 %v7357_v43, %s6766_s25  ;;  %v5941_v18 = vld [vmem:[%s6826_s22 + $0xc8] sm:$0xf] }
  0xf0   : > { %v7369_v24 = vpop.permute.xlu1 %1158 }
  0xf1   : > { %v7373_v57 = vpop.permute.xlu0 %1156 }
  0xf4   : > { %1394 = vrot.lane.b32.xlu2 %v1347_v10, %s6766_s25  ;;  %v7396_v10 = vld [vmem:[%s6826_s22 + $0x70] sm:$0xff]  }
  0xf6   : > { %1392 = vrot.lane.b32.xlu1 %v6923_v39, %s6766_s25  ;;  %v7381_v36 = vpop.permute.xlu2 %1184  ;;  %v7398_v39 = vunpack.c.l.b16 %v5932_v34 }
  0xf7   : > { %10412 = vst [vmem:[#allocation53_spill] sm:$0xff] %v7381_v36  ;;  %1390 = vrot.lane.b32.xlu0 %v1345_v46, %s6766_s25  ;;  %v7406_v36 = vunpack.c.l.b16 %v5929_v52 }
  0xf8   : > { %v7386_v29 = vpop.permute.xlu1 %1164 }
  0xf9   : > { %10413 = vst [vmem:[#allocation54_spill] sm:$0xff] %v7386_v29  ;;  %v7388_v21 = vpop.permute.xlu0 %1162  ;;  %v5963_v29 = vld [vmem:[%s6826_s22 + $0x4c] sm:$0x1] }
  0xfc   : > { %1400 = vrot.lane.b32.xlu2 %v6948_v63, %s6766_s25  ;;  %v1353_v63 = vpack.c.b16 %v7398_v39, %v7398_v39 }
  0xfe   : > { %1398 = vrot.lane.b32.xlu1 %v1349_v62, %s6766_s25  ;;  %v7402_v46 = vpop.permute.xlu2 %1190  ;;  %v1351_v62 = vpack.c.b16 %v7406_v36, %v7406_v36 }
  0xff   : > { %10414 = vst [vmem:[#allocation55_spill] sm:$0xff] %v7402_v46  ;;  %1396 = vrot.lane.b32.xlu0 %v7396_v10, %s6766_s25  ;;  %v7422_v46 = vunpack.c.l.b16 %v5935_v9  ;;  %v5938_v9 = vld [vmem:[%s6826_s22 + $0xb8] sm:$0xf] }
 0x100   : > { %v7408_v23 = vpop.permute.xlu1 %1170 }
 0x101   : > { %10415 = vst [vmem:[#allocation56_spill] sm:$0xff] %v7408_v23  ;;  %v7412_v34 = vpop.permute.xlu0 %1168  ;;  %v1355_v41 = vpack.c.b16 %v7422_v46, %v7422_v46 }
 0x102   : > { %10416 = vst [vmem:[#allocation57_spill] sm:$0xff] %v7412_v34 }
 0x104   : > { %1406 = vrot.lane.b32.xlu2 %v1353_v63, %s6766_s25  ;;  %v7435_v63 = vld [vmem:[%s6826_s22 + $0xa0] sm:$0xff]  }
 0x106   : > { %1404 = vrot.lane.b32.xlu1 %v6976_v38, %s6766_s25  ;;  %v7420_v52 = vpop.permute.xlu2 %1196  ;;  %v7437_v38 = vunpack.c.l.b16 %v5941_v18 }
 0x107   : > { %10417 = vst [vmem:[#allocation58_spill] sm:$0xff] %v7420_v52  ;;  %1402 = vrot.lane.b32.xlu0 %v1351_v62, %s6766_s25  ;;  %v7445_v52 = vunpack.c.l.b16 %v5938_v9 }
 0x108   : > { %v7425_v27 = vpop.permute.xlu1 %1176 }
 0x109   : > { %10418 = vst [vmem:[#allocation59_spill] sm:$0xff] %v7425_v27  ;;  %v7427_v37 = vpop.permute.xlu0 %1174 }
 0x10a   : > { %10419 = vst [vmem:[#allocation60_spill] sm:$0xff] %v7427_v37  ;;  %v5944_v37 = vld [vmem:[%s6826_s22 + $0xd8] sm:$0xf] }
 0x10c   : > { %1412 = vrot.lane.b32.xlu2 %v7001_v7, %s6766_s25  ;;  %v1359_v7 = vpack.c.b16 %v7437_v38, %v7437_v38 }
 0x10e   : > { %1410 = vrot.lane.b32.xlu1 %v1355_v41, %s6766_s25  ;;  %v7441_v62 = vpop.permute.xlu2 %1202  ;;  %v1357_v41 = vpack.c.b16 %v7445_v52, %v7445_v52 }
 0x10f   : > { %10420 = vst [vmem:[#allocation61_spill] sm:$0xff] %v7441_v62  ;;  %1408 = vrot.lane.b32.xlu0 %v7435_v63, %s6766_s25  ;;  %v7461_v62 = vunpack.c.l.b16 %v5944_v37  ;;  %v5947_v37 = vld [vmem:[%s6826_s22 + $0xe8] sm:$0xf] }
 0x110   : > { %v7447_v0 = vpop.permute.xlu1 %1182 }
 0x111   : > { %10421 = vst [vmem:[#allocation62_spill] sm:$0xff] %v7447_v0  ;;  %v7451_v18 = vpop.permute.xlu0 %1180  ;;  %v1361_v20 = vpack.c.b16 %v7461_v62, %v7461_v62 }
 0x112   : > { %10422 = vst [vmem:[#allocation63_spill] sm:$0xff] %v7451_v18  ;;  %v5950_v18 = vld [vmem:[%s6826_s22 + $0xf8] sm:$0xf] }
 0x114   : > { %1418 = vrot.lane.b32.xlu2 %v1359_v7, %s6766_s25  ;;  %v7476_v7 = vunpack.c.l.b16 %v5950_v18 }
 0x116   : > { %1416 = vrot.lane.b32.xlu1 %v7029_v58, %s6766_s25  ;;  %v7459_v9 = vpop.permute.xlu2 %1208  ;;  %v7474_v58 = vld [vmem:[%s6826_s22 + $0xd0] sm:$0xff]  }
 0x117   : > { %10423 = vst [vmem:[#allocation64_spill] sm:$0xff] %v7459_v9  ;;  %1414 = vrot.lane.b32.xlu0 %v1357_v41, %s6766_s25  ;;  %v7484_v9 = vunpack.c.l.b16 %v5947_v37 }
 0x118   : > { %v7464_v0 = vpop.permute.xlu1 %1188 }
 0x119   : > { %10424 = vst [vmem:[#allocation65_spill] sm:$0xff] %v7464_v0  ;;  %v7466_v27 = vpop.permute.xlu0 %1186  ;;  %v1363_v18 = vpack.c.b16 %v7484_v9, %v7484_v9 }
 0x11a   : > { %10425 = vst [vmem:[#allocation66_spill] sm:$0xff] %v7466_v27 }
 0x11c   : > { %1424 = vrot.lane.b32.xlu2 %v7054_v49, %s6766_s25  ;;  %v1365_v49 = vpack.c.b16 %v7476_v7, %v7476_v7 }
 0x11e   : > { %1422 = vrot.lane.b32.xlu1 %v1361_v20, %s6766_s25  ;;  %v7480_v41 = vpop.permute.xlu2 %1214  ;;  %v5953_v20 = vld [vmem:[%s6826_s22 + $0x108] sm:$0xf] }
 0x11f   : > { %10426 = vst [vmem:[#allocation67_spill] sm:$0xff] %v7480_v41  ;;  %1420 = vrot.lane.b32.xlu0 %v7474_v58, %s6766_s25  ;;  %v5961_v41 = vld [vmem:[%s6826_s22 + $0x2c] sm:$0x1] }
 0x120   : > { %v7486_v0 = vpop.permute.xlu1 %1194  ;;  %v1463_v30 = vunpack.c.l.b16 %v5961_v41 }
 0x121   : > { %10427 = vst [vmem:[#allocation68_spill] sm:$0xff] %v7486_v0  ;;  %v7490_v27 = vpop.permute.xlu0 %1192  ;;  %v7501_v0 = vunpack.c.l.b16 %v5953_v20  ;;  %v7517_v20 = vunpack.c.l.b16 %v5959_v2  ;;  %v1501_v2 = vshll.u32 %v7318_v12, 16 }
 0x122   : > { %10428 = vst [vmem:[#allocation69_spill] sm:$0xff] %v7490_v27  ;;  %v7523_v41 = vpack.c.b16 %v1463_v30, %v7328_v59 }
 0x123   : > { %v1367_v23 = vpack.c.b16 %v7501_v0, %v7501_v0  ;;  %v1371_v30 = vpack.c.b16 %v7517_v20, %v7517_v20  ;;  %v1503_v34 = vrot.slane %v1501_v2, 1 }
 0x124   : > { %1430 = vrot.lane.b32.xlu2 %v1365_v49, %s6766_s25  ;;  %v1462_v49 = vunpack.c.l.b16 %v5960_v61 }
 0x126   : > { %1428 = vrot.lane.b32.xlu1 %v7082_v54, %s6766_s25  ;;  %v7499_v37 = vpop.permute.xlu2 %1220  ;;  %v7515_v54 = vld [vmem:[%s6826_s22 + $0x100] sm:$0xff]   ;;  %v7526_v61 = vpack.c.b16 %v1462_v49, %v7302_v42  ;;  %v1514_v42 = vshrl.u32 %v7310_v35, 16  ;;  %v1521_v49 = vshll.u32 %v7523_v41, 16 }
 0x127   : > { %10429 = vst [vmem:[#allocation70_spill] sm:$0xff] %v7499_v37  ;;  %1426 = vrot.lane.b32.xlu0 %v1363_v18, %s6766_s25  ;;  %v5956_v37 = vld [vmem:[%s6826_s22 + $0x118] sm:$0xf]  ;;  %v1516_v18 = vshll.u32 %v7310_v35, 16 }
 0x128   : > { %v7505_v27 = vpop.permute.xlu1 %1200  ;;  %v1510_v3 = vshrl.u32 %v7526_v61, 16 }
 0x129   : > { %10430 = vst [vmem:[#allocation71_spill] sm:$0xff] %v7505_v27  ;;  %v7507_v50 = vpop.permute.xlu0 %1198  ;;  %v1464_v27 = vunpack.c.l.b16 %v5962_v17  ;;  %v1518_v59 = vrot.slane %v1516_v18, 1  ;;  %v1523_v18 = vrot.slane %v1521_v49, 1 }
 0x12a   : > { %10431 = vst [vmem:[#allocation72_spill] sm:$0xff] %v7507_v50 }
 0x12b   : > { %v7552_v32 = vpack.c.b16 %v1464_v27, %v7320_v60  ;;  %v1519_v35 = vor.u32 %v1518_v59, %v1514_v42  ;;  %v1465_v59 = vunpack.c.l.b16 %v5963_v29 }
 0x12c   : > { %1436 = vrot.lane.b32.xlu2 %v7107_v1, %s6766_s25  ;;  %v7533_v1 = vunpack.c.l.b16 %v5956_v37  ;;  %v1506_v37 = vshll.u32 %v7526_v61, 16 }
 0x12d   : > { %v1536_v60 = vshll.u32 %v7552_v32, 16  ;;  %v1524_v42 = vsel %vm704_vm0, %v1519_v35, %v1523_v18 }
 0x12e   : > { %1434 = vrot.lane.b32.xlu1 %v1367_v23, %s6766_s25  ;;  %v7529_v50 = vpop.permute.xlu2 %1226  ;;  %v1369_v17 = vpack.c.b16 %v7533_v1, %v7533_v1  ;;  %v1508_v26 = vrot.slane %v1506_v37, 1 }
 0x12f   : > { %10432 = vst [vmem:[#allocation73_spill] sm:$0xff] %v7529_v50  ;;  %1432 = vrot.lane.b32.xlu0 %v7515_v54, %s6766_s25  ;;  %v7546_v50 = vld [vmem:[%s6826_s22 + $0x120] sm:$0xff]   ;;  %v1538_v40 = vrot.slane %v1536_v60, 1 }
 0x130   : > { %v7536_v48 = vpop.permute.xlu1 %1206  ;;  %v1512_v49 = vor.u32 %v1510_v3, %v1508_v26  ;;  %v1525_v3 = vshrl.u32 %v7523_v41, 16 }
 0x131   : > { %10433 = vst [vmem:[#allocation74_spill] sm:$0xff] %v7536_v48  ;;  %v7541_v23 = vpop.permute.xlu0 %1204  ;;  %v1499_v48 = vshrl.u32 %v7318_v12, 16 }
 0x132   : > { %10434 = vst [vmem:[#allocation75_spill] sm:$0xff] %v7541_v23  ;;  %v5964_v23 = vld [vmem:[%s6826_s22 + $0x5c] sm:$0x1] }
 0x133   : > { %v1504_v12 = vor.u32 %v1503_v34, %v1499_v48  ;;  %v1466_v2 = vunpack.c.l.b16 %v5964_v23  ;;  %v5965_v48 = vld [vmem:[%s6826_s22 + $0x6c] sm:$0x1]  ;;  %v7577_v23 = vpack.c.b16 %v1465_v59, %v7344_v28  ;;  %v1527_v59 = vor.u32 %v1525_v3, %v1523_v18 }
 0x134   : > { %1442 = vrot.lane.b32.xlu2 %v1371_v30, %s6766_s25  ;;  %v1467_v29 = vunpack.c.l.b16 %v5965_v48  ;;  %v5967_v48 = vld [vmem:[%s6826_s22 + $0x8c] sm:$0x1] }
 0x135   : > { %v1509_v37 = vsel %vm704_vm0, %v1504_v12, %v1508_v26  ;;  %v7574_v34 = vpack.c.b16 %v1466_v2, %v7367_v5  ;;  %v1546_v26 = vshll.u32 %v7357_v43, 16  ;;  %v1551_v2 = vshll.u32 %v7577_v23, 16 }
 0x136   : > { %1440 = vrot.lane.b32.xlu1 %v7546_v50, %s6766_s25  ;;  %v7558_v22 = vpop.permute.xlu2 %1376  ;;  %v1469_v18 = vunpack.c.l.b16 %v5967_v48 }
 0x137   : > { %1438 = vrot.lane.b32.xlu0 %v1369_v17, %s6766_s25  ;;  %v1540_v17 = vshrl.u32 %v7552_v32, 16  ;;  %v1566_v28 = vshll.u32 %v7574_v34, 16 }
 0x138   : > { %v7563_v27 = vpop.permute.xlu1 %1212 }
 0x139   : > { %10435 = vst [vmem:[#allocation76_spill] sm:$0xff] %v7563_v27  ;;  %v7566_v30 = vpop.permute.xlu0 %1210  ;;  %v1542_v60 = vor.u32 %v1540_v17, %v1538_v40  ;;  %v7595_v27 = vpack.c.b16 %v1467_v29, %v7359_v44  ;;  %v1568_v17 = vrot.slane %v1566_v28, 1 }
 0x13a   : > { %10436 = vst [vmem:[#allocation77_spill] sm:$0xff] %v7566_v30  ;;  %v1555_v30 = vshrl.u32 %v7577_v23, 16 }
 0x13b   : > { %v1581_v44 = vshll.u32 %v7595_v27, 16 }
 0x13c   : > { %1772 = vrot.lane.b32.xlu2 %v1524_v42, %s6767_s26  ;;  %v1539_v42 = vsel %vm704_vm0, %v6889_v4, %v1538_v40  ;;  %v5966_v4 = vld [vmem:[%s6826_s22 + $0x7c] sm:$0x1] }
 0x13d   : > { %v1468_v29 = vunpack.c.l.b16 %v5966_v4 }
 0x13e   : > { %1770 = vrot.lane.b32.xlu1 %v1512_v49, %s6767_s26  ;;  %v7580_v35 = vpop.permute.xlu2 %1382  ;;  %v1544_v49 = vshrl.u32 %v7357_v43, 16 }
 0x13f   : > { %1768 = vrot.lane.b32.xlu0 %v1509_v37, %s6767_s26  ;;  %v1548_v37 = vrot.slane %v1546_v26, 1  ;;  %v1569_v26 = vsel %vm704_vm0, %v6932_v45, %v1568_v17  ;;  %v1570_v45 = vshrl.u32 %v7574_v34, 16 }
 0x140   : > { %v7585_v12 = vpop.permute.xlu1 %1218 }
 0x141   : > { %10437 = vst [vmem:[#allocation78_spill] sm:$0xff] %v7585_v12  ;;  %v7587_v5 = vpop.permute.xlu0 %1216  ;;  %v1549_v40 = vor.u32 %v1548_v37, %v1544_v49  ;;  %v7617_v49 = vpack.c.b16 %v1469_v18, %v7406_v36  ;;  %v7620_v37 = vpack.c.b16 %v1468_v29, %v7383_v33  ;;  %v1589_v29 = vshrl.u32 %v7396_v10, 16 }
 0x142   : > { %10438 = vst [vmem:[#allocation79_spill] sm:$0xff] %v7587_v5  ;;  %v1553_v5 = vrot.slane %v1551_v2, 1  ;;  %v1583_v2 = vrot.slane %v1581_v44, 1 }
 0x143   : > { %v1611_v33 = vshll.u32 %v7617_v49, 16  ;;  %v1596_v44 = vshll.u32 %v7620_v37, 16 }
 0x144   : > { %1778 = vrot.lane.b32.xlu2 %v1542_v60, %s6767_s26  ;;  %v1557_v60 = vor.u32 %v1555_v30, %v1553_v5  ;;  %v1554_v28 = vsel %vm704_vm0, %v1549_v40, %v1553_v5  ;;  %v1591_v30 = vshll.u32 %v7396_v10, 16  ;;  %v1584_v18 = vsel %vm704_vm0, %v6958_v14, %v1583_v2  ;;  %v5969_v14 = vld [vmem:[%s6826_s22 + $0xac] sm:$0x1] }
 0x146   : > { %1776 = vrot.lane.b32.xlu1 %v1539_v42, %s6767_s26  ;;  %v7600_v12 = vpop.permute.xlu2 %1388  ;;  %v1585_v42 = vshrl.u32 %v7595_v27, 16 }
 0x147   : > { %10439 = vst [vmem:[#allocation80_spill] sm:$0xff] %v7600_v12  ;;  %1774 = vrot.lane.b32.xlu0 %v1527_v59, %s6767_s26  ;;  %v5968_v59 = vld [vmem:[%s6826_s22 + $0x9c] sm:$0x1] }
 0x148   : > { %v7605_v43 = vpop.permute.xlu1 %1224  ;;  %v1470_v5 = vunpack.c.l.b16 %v5968_v59  ;;  %v1587_v40 = vor.u32 %v1585_v42, %v1583_v2  ;;  %v1613_v42 = vrot.slane %v1611_v33, 1  ;;  %v5970_v59 = vld [vmem:[%s6826_s22 + $0xbc] sm:$0x1] }
 0x149   : > { %10440 = vst [vmem:[#allocation81_spill] sm:$0xff] %v7605_v43  ;;  %v7608_v3 = vpop.permute.xlu0 %1222  ;;  %v1598_v43 = vrot.slane %v1596_v44, 1  ;;  %v1472_v2 = vunpack.c.l.b16 %v5970_v59 }
 0x14a   : > { %10441 = vst [vmem:[#allocation82_spill] sm:$0xff] %v7608_v3 }
 0x14c   : > { %1784 = vrot.lane.b32.xlu2 %v1569_v26, %s6767_s26  ;;  %v1572_v26 = vor.u32 %v1570_v45, %v1568_v17 }
 0x14e   : > { %1782 = vrot.lane.b32.xlu1 %v1557_v60, %s6767_s26  ;;  %v7623_v48 = vpop.permute.xlu2 %1394  ;;  %v1593_v60 = vrot.slane %v1591_v30, 1  ;;  %v1614_v30 = vsel %vm704_vm0, %v6985_v47, %v1613_v42  ;;  %v1615_v47 = vshrl.u32 %v7617_v49, 16 }
 0x14f   : > { %10442 = vst [vmem:[#allocation83_spill] sm:$0xff] %v7623_v48  ;;  %1780 = vrot.lane.b32.xlu0 %v1554_v28, %s6767_s26  ;;  %v7638_v28 = vpack.c.b16 %v1470_v5, %v7398_v39  ;;  %v1600_v48 = vshrl.u32 %v7620_v37, 16  ;;  %v1471_v5 = vunpack.c.l.b16 %v5969_v14 }
 0x150   : > { %v7628_v4 = vpop.permute.xlu1 %1374  ;;  %v1594_v10 = vor.u32 %v1593_v60, %v1589_v29  ;;  %v7660_v29 = vpack.c.b16 %v1472_v2, %v7445_v52 }
 0x151   : > { %v7630_v36 = vpop.permute.xlu0 %1372  ;;  %v1626_v39 = vshll.u32 %v7638_v28, 16  ;;  %v7663_v60 = vpack.c.b16 %v1471_v5, %v7422_v46  ;;  %v1634_v5 = vshrl.u32 %v7435_v63, 16 }
 0x152   : > { %v1599_v33 = vsel %vm704_vm0, %v1594_v10, %v1598_v43  ;;  %v1656_v46 = vshll.u32 %v7660_v29, 16 }
 0x153   : > { %v1628_v44 = vrot.slane %v1626_v39, 1  ;;  %v1641_v39 = vshll.u32 %v7663_v60, 16  ;;  %v1645_v12 = vshrl.u32 %v7663_v60, 16 }
 0x154   : > { %1790 = vrot.lane.b32.xlu2 %v1587_v40, %s6767_s26  ;;  %v1602_v40 = vor.u32 %v1600_v48, %v1598_v43  ;;  %v1636_v43 = vshll.u32 %v7435_v63, 16 }
 0x155   : > { %v1629_v2 = vsel %vm704_vm0, %v7011_v25, %v1628_v44  ;;  %v5972_v25 = vld [vmem:[%s6826_s22 + $0xdc] sm:$0x1] }
 0x156   : > { %1788 = vrot.lane.b32.xlu1 %v1584_v18, %s6767_s26  ;;  %v7643_v3 = vpop.permute.xlu2 %1400  ;;  %v1630_v18 = vshrl.u32 %v7638_v28, 16 }
 0x157   : > { %10443 = vst [vmem:[#allocation84_spill] sm:$0xff] %v7643_v3  ;;  %1786 = vrot.lane.b32.xlu0 %v1572_v26, %s6767_s26  ;;  %v5971_v26 = vld [vmem:[%s6826_s22 + $0xcc] sm:$0x1]  ;;  %v1643_v3 = vrot.slane %v1641_v39, 1 }
 0x158   : > { %v7648_v17 = vpop.permute.xlu1 %1380  ;;  %v1473_v48 = vunpack.c.l.b16 %v5971_v26  ;;  %v1632_v10 = vor.u32 %v1630_v18, %v1628_v44  ;;  %v1658_v18 = vrot.slane %v1656_v46, 1  ;;  %v5973_v26 = vld [vmem:[%s6826_s22 + $0xec] sm:$0x1] }
 0x159   : > { %v7651_v45 = vpop.permute.xlu0 %1378  ;;  %v1475_v44 = vunpack.c.l.b16 %v5973_v26 }
 0x15c   : > { %1796 = vrot.lane.b32.xlu2 %v1614_v30, %s6767_s26  ;;  %v1617_v30 = vor.u32 %v1615_v47, %v1613_v42 }
 0x15e   : > { %1794 = vrot.lane.b32.xlu1 %v1602_v40, %s6767_s26  ;;  %v7666_v59 = vpop.permute.xlu2 %1406  ;;  %v1638_v40 = vrot.slane %v1636_v43, 1  ;;  %v1659_v43 = vsel %vm704_vm0, %v7038_v6, %v1658_v18  ;;  %v1660_v6 = vshrl.u32 %v7660_v29, 16 }
 0x15f   : > { %10444 = vst [vmem:[#allocation85_spill] sm:$0xff] %v7666_v59  ;;  %1792 = vrot.lane.b32.xlu0 %v1599_v33, %s6767_s26  ;;  %v7681_v33 = vpack.c.b16 %v1473_v48, %v7437_v38  ;;  %v1474_v48 = vunpack.c.l.b16 %v5972_v25 }
 0x160   : > { %v7671_v14 = vpop.permute.xlu1 %1386  ;;  %v1639_v63 = vor.u32 %v1638_v40, %v1634_v5  ;;  %v7703_v5 = vpack.c.b16 %v1475_v44, %v7484_v9 }
 0x161   : > { %v7673_v52 = vpop.permute.xlu0 %1384  ;;  %v1671_v38 = vshll.u32 %v7681_v33, 16  ;;  %v7706_v40 = vpack.c.b16 %v1474_v48, %v7461_v62  ;;  %v1679_v48 = vshrl.u32 %v7474_v58, 16 }
 0x162   : > { %v1644_v46 = vsel %vm704_vm0, %v1639_v63, %v1643_v3  ;;  %v1701_v62 = vshll.u32 %v7703_v5, 16 }
 0x163   : > { %v1673_v39 = vrot.slane %v1671_v38, 1  ;;  %v1686_v38 = vshll.u32 %v7706_v40, 16 }
 0x164   : > { %1802 = vrot.lane.b32.xlu2 %v1632_v10, %s6767_s26  ;;  %v1647_v10 = vor.u32 %v1645_v12, %v1643_v3  ;;  %v1681_v12 = vshll.u32 %v7474_v58, 16 }
 0x165   : > { %v1674_v44 = vsel %vm704_vm0, %v7064_v13, %v1673_v39  ;;  %v5975_v13 = vld [vmem:[%s6826_s22 + $0x10c] sm:$0x1] }
 0x166   : > { %1800 = vrot.lane.b32.xlu1 %v1629_v2, %s6767_s26  ;;  %v7686_v59 = vpop.permute.xlu2 %1412  ;;  %v1675_v2 = vshrl.u32 %v7681_v33, 16 }
 0x167   : > { %10445 = vst [vmem:[#allocation86_spill] sm:$0xff] %v7686_v59  ;;  %1798 = vrot.lane.b32.xlu0 %v1617_v30, %s6767_s26  ;;  %v5974_v30 = vld [vmem:[%s6826_s22 + $0xfc] sm:$0x1]  ;;  %v1688_v59 = vrot.slane %v1686_v38, 1 }
 0x168   : > { %v7691_v42 = vpop.permute.xlu1 %1392  ;;  %v1476_v3 = vunpack.c.l.b16 %v5974_v30  ;;  %v1677_v63 = vor.u32 %v1675_v2, %v1673_v39  ;;  %v1703_v2 = vrot.slane %v1701_v62, 1  ;;  %v5976_v30 = vld [vmem:[%s6826_s22 + $0x11c] sm:$0x1] }
 0x169   : > { %v7694_v47 = vpop.permute.xlu0 %1390  ;;  %v1478_v39 = vunpack.c.l.b16 %v5976_v30 }
 0x16a   : > { %10446 = vst [vmem:[#allocation87_spill] sm:$0xff] %v7694_v47 }
 0x16c   : > { %1808 = vrot.lane.b32.xlu2 %v1659_v43, %s6767_s26  ;;  %v1662_v43 = vor.u32 %v1660_v6, %v1658_v18 }
 0x16e   : > { %1806 = vrot.lane.b32.xlu1 %v1647_v10, %s6767_s26  ;;  %v7709_v26 = vpop.permute.xlu2 %1418  ;;  %v1683_v10 = vrot.slane %v1681_v12, 1  ;;  %v1704_v12 = vsel %vm704_vm0, %v7091_v8, %v1703_v2  ;;  %v1705_v8 = vshrl.u32 %v7703_v5, 16 }
 0x16f   : > { %10447 = vst [vmem:[#allocation88_spill] sm:$0xff] %v7709_v26  ;;  %1804 = vrot.lane.b32.xlu0 %v1644_v46, %s6767_s26  ;;  %v7724_v46 = vpack.c.b16 %v1476_v3, %v7476_v7  ;;  %v1477_v3 = vunpack.c.l.b16 %v5975_v13 }
 0x170   : > { %v7714_v25 = vpop.permute.xlu1 %1398  ;;  %v1684_v58 = vor.u32 %v1683_v10, %v1679_v48  ;;  %v7746_v48 = vpack.c.b16 %v1478_v39, %v7533_v1 }
 0x171   : > { %10448 = vst [vmem:[#allocation89_spill] sm:$0xff] %v7714_v25  ;;  %v7716_v9 = vpop.permute.xlu0 %1396  ;;  %v1690_v25 = vshrl.u32 %v7706_v40, 16  ;;  %v1716_v7 = vshll.u32 %v7724_v46, 16  ;;  %v7749_v10 = vpack.c.b16 %v1477_v3, %v7501_v0  ;;  %v1724_v3 = vshrl.u32 %v7515_v54, 16 }
 0x172   : > { %10449 = vst [vmem:[#allocation90_spill] sm:$0xff] %v7716_v9  ;;  %v1689_v62 = vsel %vm704_vm0, %v1684_v58, %v1688_v59  ;;  %v1746_v1 = vshll.u32 %v7746_v48, 16 }
 0x173   : > { %v1718_v38 = vrot.slane %v1716_v7, 1  ;;  %v1731_v0 = vshll.u32 %v7749_v10, 16 }
 0x174   : > { %1814 = vrot.lane.b32.xlu2 %v1677_v63, %s6767_s26  ;;  %v1692_v63 = vor.u32 %v1690_v25, %v1688_v59  ;;  %v1726_v59 = vshll.u32 %v7515_v54, 16 }
 0x175   : > { %v1719_v39 = vsel %vm704_vm0, %v7113_v55, %v1718_v38 }
 0x176   : > { %1812 = vrot.lane.b32.xlu1 %v1674_v44, %s6767_s26  ;;  %v7729_v26 = vpop.permute.xlu2 %1424  ;;  %v1720_v44 = vshrl.u32 %v7724_v46, 16 }
 0x177   : > { %10450 = vst [vmem:[#allocation91_spill] sm:$0xff] %v7729_v26  ;;  %1810 = vrot.lane.b32.xlu0 %v1662_v43, %s6767_s26  ;;  %v5977_v43 = vld [vmem:[%s6826_s22 + $0x12c] sm:$0x1]  ;;  %v1756_v26 = vshll.u32 %v7546_v50, 16 }
 0x178   : > { %v7734_v18 = vpop.permute.xlu1 %1404  ;;  %v1479_v25 = vunpack.c.l.b16 %v5977_v43  ;;  %v1722_v58 = vor.u32 %v1720_v44, %v1718_v38  ;;  %v1748_v43 = vrot.slane %v1746_v1, 1 }
 0x179   : > { %10451 = vst [vmem:[#allocation92_spill] sm:$0xff] %v7734_v18  ;;  %v7737_v6 = vpop.permute.xlu0 %1402 }
 0x17a   : > { %10452 = vst [vmem:[#allocation93_spill] sm:$0xff] %v7737_v6  ;;  %v1749_v38 = vsel %vm704_vm0, %v7126_v51, %v1748_v43 }
 0x17c   : > { %1820 = vrot.lane.b32.xlu2 %v1704_v12, %s6767_s26  ;;  %v1707_v12 = vor.u32 %v1705_v8, %v1703_v2 }
 0x17e   : > { %1818 = vrot.lane.b32.xlu1 %v1692_v63, %s6767_s26  ;;  %v7752_v30 = vpop.permute.xlu2 %1430  ;;  %v1728_v63 = vrot.slane %v1726_v59, 1  ;;  %v1754_v59 = vshrl.u32 %v7546_v50, 16  ;;  %v1750_v50 = vshrl.u32 %v7746_v48, 16 }
 0x17f   : > { %10453 = vst [vmem:[#allocation94_spill] sm:$0xff] %v7752_v30  ;;  %1816 = vrot.lane.b32.xlu0 %v1689_v62, %s6767_s26  ;;  %v7767_v62 = vpack.c.b16 %v1479_v25, %v7517_v20  ;;  %v1733_v30 = vrot.slane %v1731_v0, 1  ;;  %v1758_v25 = vrot.slane %v1756_v26, 1 }
 0x180   : > { %v7757_v13 = vpop.permute.xlu1 %1410  ;;  %v1729_v55 = vor.u32 %v1728_v63, %v1724_v3  ;;  %v6572_v3 = vld [vmem:[%s6826_s22 + $0x20] sm:$0xe] }
 0x181   : > { %10454 = vst [vmem:[#allocation95_spill] sm:$0xff] %v7757_v13  ;;  %v7759_v7 = vpop.permute.xlu0 %1408  ;;  %v1735_v13 = vshrl.u32 %v7749_v10, 16  ;;  %v1761_v20 = vshll.u32 %v7767_v62, 16  ;;  %v1765_v0 = vshrl.u32 %v7767_v62, 16  ;;  %v1759_v51 = vor.u32 %v1758_v25, %v1754_v59 }
 0x182   : > { %10455 = vst [vmem:[#allocation96_spill] sm:$0xff] %v7759_v7 }
 0x183   : > { %v1737_v8 = vor.u32 %v1735_v13, %v1733_v30  ;;  %v1763_v1 = vrot.slane %v1761_v20, 1  ;;  %v6569_v20 = vld [vmem:[%s6826_s22 + $0x10] sm:$0xe] }
 0x184   : > { %1826 = vrot.lane.b32.xlu2 %v1722_v58, %s6767_s26  ;;  %v1734_v58 = vsel %vm704_vm0, %v1729_v55, %v1733_v30  ;;  %v6568_v55 = vld [vmem:[%s6826_s22 + $0x10] sm:$0xf0] }
 0x185   : > { %v1767_v13 = vor.u32 %v1765_v0, %v1763_v1  ;;  %v6570_v59 = vor.u32 %v6569_v20, %v6568_v55  ;;  %v6581_v20 = vld [vmem:[%s6826_s22 + $0x50] sm:$0xe] }
 0x186   : > { %1824 = vrot.lane.b32.xlu1 %v1719_v39, %s6767_s26  ;;  %v7771_v44 = vpop.permute.xlu2 %1436 }
 0x187   : > { %10456 = vst [vmem:[#allocation97_spill] sm:$0xff] %v7771_v44  ;;  %1822 = vrot.lane.b32.xlu0 %v1707_v12, %s6767_s26  ;;  %v6571_v12 = vld [vmem:[%s6826_s22 + $0x20] sm:$0xf0]  ;;  %v6584_v44 = vld [vmem:[%s6826_s22 + $0x60] sm:$0xe] }
 0x188   : > { %v7776_v54 = vpop.permute.xlu1 %1416  ;;  %v6573_v30 = vor.u32 %v6572_v3, %v6571_v12  ;;  %v1895_v3 = vrot.slane %v7526_v61, 1  ;;  %v6580_v61 = vld [vmem:[%s6826_s22 + $0x50] sm:$0xf0] }
 0x189   : > { %10457 = vst [vmem:[#allocation98_spill] sm:$0xff] %v7776_v54  ;;  %v7779_v2 = vpop.permute.xlu0 %1414 }
 0x18a   : > { %10458 = vst [vmem:[#allocation99_spill] sm:$0xff] %v7779_v2  ;;  %v1897_v25 = vrot.slane %v6573_v30, 1 }
 0x18c   : > { %1832 = vrot.lane.b32.xlu2 %v1749_v38, %s6767_s26  ;;  %v1764_v38 = vsel %vm704_vm0, %v1759_v51, %v1763_v1  ;;  %v1894_v1 = vrot.slane %v6570_v59, 1  ;;  %v6575_v51 = vld [vmem:[%s6826_s22 + $0x30] sm:$0xe] }
 0x18e   : > { %1830 = vrot.lane.b32.xlu1 %v1737_v8, %s6767_s26  ;;  %v7788_v39 = vpop.permute.xlu2 %1442  ;;  %v1752_v8 = vor.u32 %v1750_v50, %v1748_v43  ;;  %v6574_v43 = vld [vmem:[%s6826_s22 + $0x30] sm:$0xf0]  ;;  %v1896_v30 = vsel %vm1101_vm1, %v1894_v1, %v1895_v3  ;;  %v6578_v1 = vld [vmem:[%s6826_s22 + $0x40] sm:$0xe] }
 0x18f   : > { %10459 = vst [vmem:[#allocation100_spill] sm:$0xff] %v7788_v39  ;;  %1828 = vrot.lane.b32.xlu0 %v1734_v58, %s6767_s26  ;;  %v1898_v58 = vrot.slane %v7523_v41, 1 }
 0x190   : > { %v7794_v26 = vpop.permute.xlu1 %1422 }
 0x191   : > { %10460 = vst [vmem:[#allocation101_spill] sm:$0xff] %v7794_v26  ;;  %v7796_v63 = vpop.permute.xlu0 %1420  ;;  %v1899_v41 = vsel %vm1101_vm1, %v1897_v25, %v1898_v58 }
 0x192   : > { %10461 = vst [vmem:[#allocation102_spill] sm:$0xff] %v7796_v63  ;;  %v6611_v63 = vld [vmem:[%s6826_s22 + $0xf0] sm:$0xe] }
 0x194   : > { %1838 = vrot.lane.b32.xlu2 %v1767_v13, %s6767_s26  ;;  %v6576_v13 = vor.u32 %v6575_v51, %v6574_v43  ;;  %v6582_v43 = vor.u32 %v6581_v20, %v6580_v61  ;;  %v6577_v51 = vld [vmem:[%s6826_s22 + $0x40] sm:$0xf0]  ;;  %v1904_v61 = vrot.slane %v7577_v23, 1  ;;  %v6590_v23 = vld [vmem:[%s6826_s22 + $0x80] sm:$0xe] }
 0x196   : > { %1836 = vrot.lane.b32.xlu1 %v1764_v38, %s6767_s26  ;;  %v7804_v0 = vpop.permute.xlu2 %1772  ;;  %v1901_v38 = vrot.slane %v7552_v32, 1  ;;  %v1906_v39 = vrot.slane %v6582_v43, 1 }
 0x197   : > { %1834 = vrot.lane.b32.xlu0 %v1752_v8, %s6767_s26  ;;  %v1900_v8 = vrot.slane %v6576_v13, 1 }
 0x198   : > { %v7807_v12 = vpop.permute.xlu1 %1428 }
 0x199   : > { %10462 = vst [vmem:[#allocation103_spill] sm:$0xff] %v7807_v12  ;;  %v7812_v50 = vpop.permute.xlu0 %1426 }
 0x19a   : > { %10463 = vst [vmem:[#allocation104_spill] sm:$0xff] %v7812_v50  ;;  %v6602_v50 = vld [vmem:[%s6826_s22 + $0xc0] sm:$0xe] }
 0x19c   : > { %1952 = vrot.lane.b32.xlu2 %v1899_v41, %s6768_s27  ;;  %v6579_v41 = vor.u32 %v6578_v1, %v6577_v51  ;;  %v6589_v1 = vld [vmem:[%s6826_s22 + $0x80] sm:$0xf0] }
 0x19e   : > { %1950 = vrot.lane.b32.xlu1 %v1895_v3, %s6768_s27  ;;  %v7818_v55 = vpop.permute.xlu2 %1778  ;;  %v1902_v3 = vsel %vm1101_vm1, %v1900_v8, %v1901_v38  ;;  %v1903_v20 = vrot.slane %v6579_v41, 1  ;;  %v6583_v8 = vld [vmem:[%s6826_s22 + $0x60] sm:$0xf0] }
 0x19f   : > { %1948 = vrot.lane.b32.xlu0 %v1896_v30, %s6768_s27  ;;  %v1907_v30 = vrot.slane %v7574_v34, 1  ;;  %v6585_v43 = vor.u32 %v6584_v44, %v6583_v8  ;;  %v6591_v44 = vor.u32 %v6590_v23, %v6589_v1  ;;  %v6586_v8 = vld [vmem:[%s6826_s22 + $0x70] sm:$0xf0]  ;;  %v1913_v1 = vrot.slane %v7620_v37, 1  ;;  %v6599_v37 = vld [vmem:[%s6826_s22 + $0xb0] sm:$0xe] }
 0x1a0   : > { %v7824_v59 = vpop.permute.xlu1 %1434  ;;  %v1905_v51 = vsel %vm1101_vm1, %v1903_v20, %v1904_v61  ;;  %v6587_v20 = vld [vmem:[%s6826_s22 + $0x70] sm:$0xe] }
 0x1a1   : > { %10464 = vst [vmem:[#allocation105_spill] sm:$0xff] %v7824_v59  ;;  %v7826_v25 = vpop.permute.xlu0 %1432  ;;  %v1908_v34 = vsel %vm1101_vm1, %v1906_v39, %v1907_v30  ;;  %v1909_v41 = vrot.slane %v6585_v43, 1  ;;  %v6593_v59 = vld [vmem:[%s6826_s22 + $0x90] sm:$0xe] }
 0x1a2   : > { %10465 = vst [vmem:[#allocation106_spill] sm:$0xff] %v7826_v25 }
 0x1a4   : > { %1958 = vrot.lane.b32.xlu2 %v1901_v38, %s6768_s27 }
 0x1a6   : > { %1956 = vrot.lane.b32.xlu1 %v1902_v3, %s6768_s27  ;;  %v7834_v32 = vpop.permute.xlu2 %1784  ;;  %v1910_v3 = vrot.slane %v7595_v27, 1 }
 0x1a7   : > { %1954 = vrot.lane.b32.xlu0 %v1898_v58, %s6768_s27 }
 0x1a8   : > { %v7837_v13 = vpop.permute.xlu1 %1440 }
 0x1a9   : > { %10466 = vst [vmem:[#allocation107_spill] sm:$0xff] %v7837_v13  ;;  %v7842_v38 = vpop.permute.xlu0 %1438  ;;  %v1915_v13 = vrot.slane %v6591_v44, 1 }
 0x1aa   : > { %10467 = vst [vmem:[#allocation108_spill] sm:$0xff] %v7842_v38 }
 0x1ac   : > { %1964 = vrot.lane.b32.xlu2 %v1908_v34, %s6768_s27  ;;  %v6588_v34 = vor.u32 %v6587_v20, %v6586_v8  ;;  %v6598_v20 = vld [vmem:[%s6826_s22 + $0xb0] sm:$0xf0] }
 0x1ae   : > { %1962 = vrot.lane.b32.xlu1 %v1904_v61, %s6768_s27  ;;  %v7848_v58 = vpop.permute.xlu2 %1790  ;;  %v1911_v61 = vsel %vm1101_vm1, %v1909_v41, %v1910_v3  ;;  %v1912_v23 = vrot.slane %v6588_v34, 1  ;;  %v6592_v41 = vld [vmem:[%s6826_s22 + $0x90] sm:$0xf0] }
 0x1af   : > { %10468 = vst [vmem:[#allocation109_spill] sm:$0xff] %v7848_v58  ;;  %1960 = vrot.lane.b32.xlu0 %v1905_v51, %s6768_s27  ;;  %v1916_v51 = vrot.slane %v7617_v49, 1  ;;  %v6594_v44 = vor.u32 %v6593_v59, %v6592_v41  ;;  %v6600_v59 = vor.u32 %v6599_v37, %v6598_v20  ;;  %v6595_v41 = vld [vmem:[%s6826_s22 + $0xa0] sm:$0xf0]  ;;  %v1922_v20 = vrot.slane %v7663_v60, 1 }
 0x1b0   : > { %v7854_v38 = vpop.permute.xlu1 %1770  ;;  %v1914_v8 = vsel %vm1101_vm1, %v1912_v23, %v1913_v1  ;;  %v6596_v23 = vld [vmem:[%s6826_s22 + $0xa0] sm:$0xe] }
 0x1b1   : > { %v7856_v39 = vpop.permute.xlu0 %1768  ;;  %v1917_v49 = vsel %vm1101_vm1, %v1915_v13, %v1916_v51  ;;  %v1918_v34 = vrot.slane %v6594_v44, 1  ;;  %v1924_v12 = vrot.slane %v6600_v59, 1  ;;  %v6608_v60 = vld [vmem:[%s6826_s22 + $0xe0] sm:$0xe] }
 0x1b4   : > { %1970 = vrot.lane.b32.xlu2 %v1910_v3, %s6768_s27 }
 0x1b6   : > { %1968 = vrot.lane.b32.xlu1 %v1911_v61, %s6768_s27  ;;  %v7864_v27 = vpop.permute.xlu2 %1796  ;;  %v1919_v61 = vrot.slane %v7638_v28, 1 }
 0x1b7   : > { %10469 = vst [vmem:[#allocation110_spill] sm:$0xff] %v7864_v27  ;;  %1966 = vrot.lane.b32.xlu0 %v1907_v30, %s6768_s27 }
 0x1b8   : > { %v7867_v43 = vpop.permute.xlu1 %1776 }
 0x1b9   : > { %v7872_v3 = vpop.permute.xlu0 %1774 }
 0x1bc   : > { %1976 = vrot.lane.b32.xlu2 %v1917_v49, %s6768_s27  ;;  %v6597_v49 = vor.u32 %v6596_v23, %v6595_v41  ;;  %v6607_v23 = vld [vmem:[%s6826_s22 + $0xe0] sm:$0xf0] }
 0x1be   : > { %1974 = vrot.lane.b32.xlu1 %v1913_v1, %s6768_s27  ;;  %v7878_v30 = vpop.permute.xlu2 %1802  ;;  %v1920_v1 = vsel %vm1101_vm1, %v1918_v34, %v1919_v61  ;;  %v1921_v37 = vrot.slane %v6597_v49, 1  ;;  %v6601_v34 = vld [vmem:[%s6826_s22 + $0xc0] sm:$0xf0] }
 0x1bf   : > { %10470 = vst [vmem:[#allocation111_spill] sm:$0xff] %v7878_v30  ;;  %1972 = vrot.lane.b32.xlu0 %v1914_v8, %s6768_s27  ;;  %v1925_v8 = vrot.slane %v7660_v29, 1  ;;  %v6603_v59 = vor.u32 %v6602_v50, %v6601_v34  ;;  %v6609_v50 = vor.u32 %v6608_v60, %v6607_v23  ;;  %v6604_v34 = vld [vmem:[%s6826_s22 + $0xd0] sm:$0xf0]  ;;  %v1931_v23 = vrot.slane %v7706_v40, 1 }
 0x1c0   : > { %v7884_v25 = vpop.permute.xlu1 %1782  ;;  %v1923_v41 = vsel %vm1101_vm1, %v1921_v37, %v1922_v20  ;;  %v6605_v37 = vld [vmem:[%s6826_s22 + $0xd0] sm:$0xe] }
 0x1c1   : > { %v7886_v13 = vpop.permute.xlu0 %1780  ;;  %v1926_v29 = vsel %vm1101_vm1, %v1924_v12, %v1925_v8  ;;  %v1927_v49 = vrot.slane %v6603_v59, 1  ;;  %v1933_v30 = vrot.slane %v6609_v50, 1  ;;  %v6617_v40 = vld [vmem:[%s6826_s22 + $0x110] sm:$0xe] }
 0x1c4   : > { %1982 = vrot.lane.b32.xlu2 %v1919_v61, %s6768_s27 }
 0x1c6   : > { %1980 = vrot.lane.b32.xlu1 %v1920_v1, %s6768_s27  ;;  %v7894_v28 = vpop.permute.xlu2 %1808  ;;  %v1928_v1 = vrot.slane %v7681_v33, 1 }
 0x1c7   : > { %10471 = vst [vmem:[#allocation112_spill] sm:$0xff] %v7894_v28  ;;  %1978 = vrot.lane.b32.xlu0 %v1916_v51, %s6768_s27  ;;  %v6053_v28 = vld [vmem:[%s6826_s22 + $0x5c] sm:$0x1] }
 0x1c8   : > { %v7897_v44 = vpop.permute.xlu1 %1788 }
 0x1c9   : > { %10472 = vst [vmem:[#allocation113_spill] sm:$0xff] %v7897_v44  ;;  %v7902_v61 = vpop.permute.xlu0 %1786  ;;  %v615_v44 = vpack.c.b16 %v6844_v19, %v6844_v19 }
 0x1ca   : > { %10473 = vst [vmem:[#allocation114_spill] sm:$0xff] %v7902_v61 }
 0x1cc   : > { %1988 = vrot.lane.b32.xlu2 %v1926_v29, %s6768_s27  ;;  %v6606_v29 = vor.u32 %v6605_v37, %v6604_v34  ;;  %v6616_v37 = vld [vmem:[%s6826_s22 + $0x110] sm:$0xf0] }
 0x1ce   : > { %1986 = vrot.lane.b32.xlu1 %v1922_v20, %s6768_s27  ;;  %v7908_v51 = vpop.permute.xlu2 %1814  ;;  %v1929_v20 = vsel %vm1101_vm1, %v1927_v49, %v1928_v1  ;;  %v1930_v60 = vrot.slane %v6606_v29, 1  ;;  %v6610_v49 = vld [vmem:[%s6826_s22 + $0xf0] sm:$0xf0] }
 0x1cf   : > { %10474 = vst [vmem:[#allocation115_spill] sm:$0xff] %v7908_v51  ;;  %1984 = vrot.lane.b32.xlu0 %v1923_v41, %s6768_s27  ;;  %v1934_v41 = vrot.slane %v7703_v5, 1  ;;  %v6612_v50 = vor.u32 %v6611_v63, %v6610_v49  ;;  %v6618_v63 = vor.u32 %v6617_v40, %v6616_v37  ;;  %v6613_v49 = vld [vmem:[%s6826_s22 + $0x100] sm:$0xf0]  ;;  %v1940_v40 = vrot.slane %v7749_v10, 1  ;;  %v6497_v51 = vld [vmem:[%s6826_s22 + $0x30] sm:$0xff]  }
 0x1d0   : > { %v7914_v26 = vpop.permute.xlu1 %1794  ;;  %v1932_v34 = vsel %vm1101_vm1, %v1930_v60, %v1931_v23  ;;  %v6614_v60 = vld [vmem:[%s6826_s22 + $0x100] sm:$0xe] }
 0x1d1   : > { %10475 = vst [vmem:[#allocation116_spill] sm:$0xff] %v7914_v26  ;;  %v7916_v12 = vpop.permute.xlu0 %1792  ;;  %v1935_v5 = vsel %vm1101_vm1, %v1933_v30, %v1934_v41  ;;  %v1936_v29 = vrot.slane %v6612_v50, 1 }
 0x1d2   : > { %10476 = vst [vmem:[#allocation117_spill] sm:$0xff] %v7916_v12 }
 0x1d4   : > { %1994 = vrot.lane.b32.xlu2 %v1928_v1, %s6768_s27 }
 0x1d6   : > { %1992 = vrot.lane.b32.xlu1 %v1929_v20, %s6768_s27  ;;  %v7924_v33 = vpop.permute.xlu2 %1820  ;;  %v1937_v20 = vrot.slane %v7724_v46, 1  ;;  %v1943_v46 = vrot.slane %v7746_v48, 1  ;;  %v5998_v48 = vld [vmem:[%s6826_s22 + $0x28] sm:$0xf] }
 0x1d7   : > { %10477 = vst [vmem:[#allocation118_spill] sm:$0xff] %v7924_v33  ;;  %1990 = vrot.lane.b32.xlu0 %v1925_v8, %s6768_s27 }
 0x1d8   : > { %v7927_v59 = vpop.permute.xlu1 %1800 }
 0x1d9   : > { %10478 = vst [vmem:[#allocation119_spill] sm:$0xff] %v7927_v59  ;;  %v7932_v1 = vpop.permute.xlu0 %1798 }
 0x1da   : > { %10479 = vst [vmem:[#allocation120_spill] sm:$0xff] %v7932_v1 }
 0x1dc   : > { %2000 = vrot.lane.b32.xlu2 %v1935_v5, %s6768_s27  ;;  %v6615_v5 = vor.u32 %v6614_v60, %v6613_v49  ;;  %v2076_v60 = vunpack.c.l.b16 %v5998_v48 }
 0x1de   : > { %1998 = vrot.lane.b32.xlu1 %v1931_v23, %s6768_s27  ;;  %v7938_v8 = vpop.permute.xlu2 %1826  ;;  %v1938_v23 = vsel %vm1101_vm1, %v1936_v29, %v1937_v20  ;;  %v6619_v29 = vld [vmem:[%s6826_s22 + $0x120] sm:$0xf0] }
 0x1df   : > { %10480 = vst [vmem:[#allocation121_spill] sm:$0xff] %v7938_v8  ;;  %1996 = vrot.lane.b32.xlu0 %v1932_v34, %s6768_s27  ;;  %v1942_v34 = vrot.slane %v6618_v63, 1  ;;  %v1939_v8 = vrot.slane %v6615_v5, 1  ;;  %v6050_v63 = vld [vmem:[%s6826_s22 + $0x2c] sm:$0x1] }
 0x1e0   : > { %v7944_v33 = vpop.permute.xlu1 %1806 }
 0x1e1   : > { %10481 = vst [vmem:[#allocation122_spill] sm:$0xff] %v7944_v33  ;;  %v7946_v30 = vpop.permute.xlu0 %1804  ;;  %v6620_v33 = vld [vmem:[%s6826_s22 + $0x120] sm:$0xe] }
 0x1e2   : > { %10482 = vst [vmem:[#allocation123_spill] sm:$0xff] %v7946_v30  ;;  %v6621_v49 = vor.u32 %v6620_v33, %v6619_v29  ;;  %v6622_v33 = vld [vmem:[%s6826_s22 + $0x20] sm:$0xf0]  ;;  %v6623_v29 = vld [vmem:[%s6826_s22 + $0x20] sm:$0xe] }
 0x1e3   : > { %v6624_v48 = vor.u32 %v6623_v29, %v6622_v33  ;;  %v6001_v29 = vld [vmem:[%s6826_s22 + $0x38] sm:$0xf] }
 0x1e4   : > { %2006 = vrot.lane.b32.xlu2 %v1937_v20, %s6768_s27  ;;  %v1944_v20 = vsel %vm1101_vm1, %v1942_v34, %v1943_v46  ;;  %v1945_v5 = vrot.slane %v6621_v49, 1  ;;  %v1946_v34 = vrot.slane %v7767_v62, 1 }
 0x1e6   : > { %2004 = vrot.lane.b32.xlu1 %v1938_v23, %s6768_s27  ;;  %v7954_v50 = vpop.permute.xlu2 %1832  ;;  %v2254_v23 = vunpack.c.l.b16 %v6050_v63 }
 0x1e7   : > { %10483 = vst [vmem:[#allocation124_spill] sm:$0xff] %v7954_v50  ;;  %2002 = vrot.lane.b32.xlu0 %v1934_v41, %s6768_s27  ;;  %v1941_v41 = vsel %vm1101_vm1, %v1939_v8, %v1940_v40  ;;  %v6496_v50 = vld [vmem:[%s6826_s22 + $0x20] sm:$0xff]   ;;  %v1947_v8 = vsel %vm1101_vm1, %v1945_v5, %v1946_v34 }
 0x1e8   : > { %v7957_v37 = vpop.permute.xlu1 %1812  ;;  %v2293_v59 = vshll.u32 %v6496_v50, 16 }
 0x1e9   : > { %10484 = vst [vmem:[#allocation125_spill] sm:$0xff] %v7957_v37  ;;  %v7962_v30 = vpop.permute.xlu0 %1810 }
 0x1ea   : > { %10485 = vst [vmem:[#allocation126_spill] sm:$0xff] %v7962_v30  ;;  %v2295_v63 = vrot.slane %v2293_v59, 1 }
 0x1ec   : > { %2012 = vrot.lane.b32.xlu2 %v1944_v20, %s6768_s27  ;;  %v2272_v20 = vpack.c.b16 %v2254_v23, %v2076_v60 }
 0x1ee   : > { %2010 = vrot.lane.b32.xlu1 %v1940_v40, %s6768_s27  ;;  %v7971_v10 = vpop.permute.xlu2 %1838  ;;  %v2291_v40 = vshrl.u32 %v6496_v50, 16  ;;  %v2298_v49 = vshll.u32 %v2272_v20, 16  ;;  %v2687_v23 = vrot.slane %v2272_v20, 1 }
 0x1ef   : > { %10486 = vst [vmem:[#allocation127_spill] sm:$0xff] %v7971_v10  ;;  %2008 = vrot.lane.b32.xlu0 %v1941_v41, %s6768_s27  ;;  %v2686_v41 = vrot.slane %v6624_v48, 1 }
 0x1f0   : > { %v7975_v7 = vpop.permute.xlu1 %1818  ;;  %v2296_v10 = vor.u32 %v2295_v63, %v2291_v40  ;;  %v2300_v33 = vrot.slane %v2298_v49, 1  ;;  %v6625_v63 = vld [vmem:[%s6826_s22 + $0x30] sm:$0xf0]  ;;  %v6626_v49 = vld [vmem:[%s6826_s22 + $0x30] sm:$0xe] }
 0x1f1   : > { %10487 = vst [vmem:[#allocation128_spill] sm:$0xff] %v7975_v7  ;;  %v7979_v18 = vpop.permute.xlu0 %1816  ;;  %v2688_v7 = vsel %vm1101_vm1, %v2686_v41, %v2687_v23 }
 0x1f2   : > { %10488 = vst [vmem:[#allocation129_spill] sm:$0xff] %v7979_v18  ;;  %v2302_v18 = vshrl.u32 %v2272_v20, 16  ;;  %v6627_v20 = vor.u32 %v6626_v49, %v6625_v63 }
 0x1f4   : > { %2164 = vrot.lane.b32.xlu2 %v6496_v50, %s6769_s28  ;;  %v6051_v50 = vld [vmem:[%s6826_s22 + $0x3c] sm:$0x1]  ;;  %v2304_v41 = vor.u32 %v2302_v18, %v2300_v33  ;;  %v2689_v37 = vrot.slane %v6627_v20, 1 }
 0x1f5   : > { %v2255_v48 = vunpack.c.l.b16 %v6051_v50  ;;  %v2306_v50 = vshrl.u32 %v6497_v51, 16 }
 0x1f6   : > { %2016 = vrot.lane.b32.xlu1 %v1947_v8, %s6768_s27  ;;  %v7984_v62 = vpop.permute.xlu2 %1952  ;;  %v2301_v8 = vsel %vm704_vm0, %v2296_v10, %v2300_v33 }
 0x1f7   : > { %2014 = vrot.lane.b32.xlu0 %v1943_v46, %s6768_s27  ;;  %v2079_v46 = vunpack.c.l.b16 %v6001_v29  ;;  %v2129_v29 = vpack.c.b16 %v2076_v60, %v2076_v60 }
 0x1f8   : > { %v7987_v5 = vpop.permute.xlu1 %1824 }
 0x1f9   : > { %10489 = vst [vmem:[#allocation130_spill] sm:$0xff] %v7987_v5  ;;  %v7989_v59 = vpop.permute.xlu0 %1822 }
 0x1fa   : > { %10490 = vst [vmem:[#allocation131_spill] sm:$0xff] %v7989_v59  ;;  %v2273_v59 = vpack.c.b16 %v2255_v48, %v2079_v46 }
 0x1fc   : > { %2018 = vrot.lane.b32.xlu2 %v1946_v34, %s6768_s27  ;;  %v2308_v34 = vshll.u32 %v6497_v51, 16  ;;  %v2313_v1 = vshll.u32 %v2273_v59, 16  ;;  %v2690_v6 = vrot.slane %v2273_v59, 1 }
 0x1fe   : > { %2740 = vrot.lane.b32.xlu1 %v2688_v7, %s6770_s29  ;;  %v7998_v40 = vpop.permute.xlu2 %1958  ;;  %v2310_v7 = vrot.slane %v2308_v34, 1  ;;  %v2315_v48 = vrot.slane %v2313_v1, 1  ;;  %v2691_v63 = vsel %vm1101_vm1, %v2689_v37, %v2690_v6  ;;  %v6052_v1 = vld [vmem:[%s6826_s22 + $0x4c] sm:$0x1]  ;;  %v6004_v37 = vld [vmem:[%s6826_s22 + $0x48] sm:$0xf] }
 0x1ff   : > { %2560 = vrot.lane.b32.xlu0 %v2301_v8, %s6771_s30 }
 0x200   : > { %v8003_v5 = vpop.permute.xlu1 %1830  ;;  %v2311_v18 = vor.u32 %v2310_v7, %v2306_v50  ;;  %v2131_v50 = vpack.c.b16 %v2079_v46, %v2079_v46  ;;  %v2256_v7 = vunpack.c.l.b16 %v6052_v1  ;;  %v6499_v46 = vld [vmem:[%s6826_s22 + $0x50] sm:$0xff]  }
 0x201   : > { %10491 = vst [vmem:[#allocation132_spill] sm:$0xff] %v8003_v5  ;;  %v8005_v10 = vpop.permute.xlu0 %1828 }
 0x202   : > { %10492 = vst [vmem:[#allocation133_spill] sm:$0xff] %v8005_v10  ;;  %v2316_v49 = vsel %vm704_vm0, %v2311_v18, %v2315_v48  ;;  %v2082_v18 = vunpack.c.l.b16 %v6004_v37  ;;  %v6007_v10 = vld [vmem:[%s6826_s22 + $0x58] sm:$0xf] }
 0x204   : > { %2562 = vrot.lane.b32.xlu2 %v2304_v41, %s6771_s30  ;;  %v2317_v41 = vshrl.u32 %v2273_v59, 16 }
 0x206   : > { %2168 = vrot.lane.b32.xlu1 %v6497_v51, %s6769_s28  ;;  %v8009_v8 = vpop.permute.xlu2 %1964 }
 0x207   : > { %2166 = vrot.lane.b32.xlu0 %v2129_v29, %s6769_s28  ;;  %v2319_v29 = vor.u32 %v2317_v41, %v2315_v48 }
 0x208   : > { %v8012_v33 = vpop.permute.xlu1 %1836 }
 0x209   : > { %10493 = vst [vmem:[#allocation134_spill] sm:$0xff] %v8012_v33  ;;  %v8014_v60 = vpop.permute.xlu0 %1834 }
 0x20a   : > { %10494 = vst [vmem:[#allocation135_spill] sm:$0xff] %v8014_v60  ;;  %v2274_v60 = vpack.c.b16 %v2256_v7, %v2082_v18 }
 0x20c   : > { %2744 = vrot.lane.b32.xlu2 %v2691_v63, %s6770_s29  ;;  %v6628_v63 = vld [vmem:[%s6826_s22 + $0x40] sm:$0xf0]  ;;  %v2693_v2 = vrot.slane %v2274_v60, 1 }
 0x20e   : > { %2742 = vrot.lane.b32.xlu1 %v2687_v23, %s6770_s29  ;;  %v8020_v51 = vpop.permute.xlu2 %1970  ;;  %v6498_v23 = vld [vmem:[%s6826_s22 + $0x40] sm:$0xff]  }
 0x20f   : > { %10495 = vst [vmem:[#allocation136_spill] sm:$0xff] %v8020_v51  ;;  %2564 = vrot.lane.b32.xlu0 %v2316_v49, %s6771_s30  ;;  %v6629_v49 = vld [vmem:[%s6826_s22 + $0x40] sm:$0xe]  ;;  %v2323_v33 = vshll.u32 %v6498_v23, 16  ;;  %v2321_v5 = vshrl.u32 %v6498_v23, 16 }
 0x210   : > { %v8023_v34 = vpop.permute.xlu1 %1950  ;;  %v6630_v1 = vor.u32 %v6629_v49, %v6628_v63 }
 0x211   : > { %v8026_v20 = vpop.permute.xlu0 %1948  ;;  %v2325_v37 = vrot.slane %v2323_v33, 1 }
 0x212   : > { %v2692_v30 = vrot.slane %v6630_v1, 1 }
 0x213   : > { %v2326_v7 = vor.u32 %v2325_v37, %v2321_v5  ;;  %v2257_v5 = vunpack.c.l.b16 %v6053_v28  ;;  %v2332_v37 = vshrl.u32 %v2274_v60, 16 }
 0x214   : > { %2746 = vrot.lane.b32.xlu2 %v2690_v6, %s6770_s29  ;;  %v2133_v6 = vpack.c.b16 %v2082_v18, %v2082_v18  ;;  %v2085_v18 = vunpack.c.l.b16 %v6007_v10  ;;  %v2694_v54 = vsel %vm1101_vm1, %v2692_v30, %v2693_v2  ;;  %v2338_v30 = vshll.u32 %v6499_v46, 16 }
 0x216   : > { %2566 = vrot.lane.b32.xlu1 %v2319_v29, %s6771_s30  ;;  %v8032_v59 = vpop.permute.xlu2 %1976  ;;  %v2328_v29 = vshll.u32 %v2274_v60, 16  ;;  %v2275_v26 = vpack.c.b16 %v2257_v5, %v2085_v18  ;;  %v2336_v60 = vshrl.u32 %v6499_v46, 16  ;;  %v2340_v9 = vrot.slane %v2338_v30, 1 }
 0x217   : > { %10496 = vst [vmem:[#allocation137_spill] sm:$0xff] %v8032_v59  ;;  %2170 = vrot.lane.b32.xlu0 %v2131_v50, %s6769_s28  ;;  %v2135_v59 = vpack.c.b16 %v2085_v18, %v2085_v18 }
 0x218   : > { %v8037_v48 = vpop.permute.xlu1 %1956  ;;  %v2330_v63 = vrot.slane %v2328_v29, 1  ;;  %v6631_v29 = vld [vmem:[%s6826_s22 + $0x50] sm:$0xf0]  ;;  %v2696_v51 = vrot.slane %v2275_v26, 1 }
 0x219   : > { %v8039_v41 = vpop.permute.xlu0 %1954 }
 0x21a   : > { %v2331_v1 = vsel %vm704_vm0, %v2326_v7, %v2330_v63  ;;  %v2334_v7 = vor.u32 %v2332_v37, %v2330_v63  ;;  %v2341_v63 = vor.u32 %v2340_v9, %v2336_v60  ;;  %v6016_v60 = vld [vmem:[%s6826_s22 + $0x88] sm:$0xf] }
 0x21c   : > { %2176 = vrot.lane.b32.xlu2 %v6499_v46, %s6769_s28 }
 0x21e   : > { %2174 = vrot.lane.b32.xlu1 %v2133_v6, %s6769_s28  ;;  %v8045_v50 = vpop.permute.xlu2 %1982  ;;  %v6010_v6 = vld [vmem:[%s6826_s22 + $0x68] sm:$0xf] }
 0x21f   : > { %10497 = vst [vmem:[#allocation138_spill] sm:$0xff] %v8045_v50  ;;  %2172 = vrot.lane.b32.xlu0 %v6498_v23, %s6769_s28  ;;  %v2088_v10 = vunpack.c.l.b16 %v6010_v6  ;;  %v6632_v50 = vld [vmem:[%s6826_s22 + $0x50] sm:$0xe]  ;;  %v2343_v6 = vshll.u32 %v2275_v26, 16 }
 0x220   : > { %v8048_v49 = vpop.permute.xlu1 %1962 }
 0x221   : > { %v8050_v33 = vpop.permute.xlu0 %1960  ;;  %v2137_v28 = vpack.c.b16 %v2088_v10, %v2088_v10 }
 0x224   : > { %2748 = vrot.lane.b32.xlu2 %v2694_v54, %s6770_s29  ;;  %v6633_v54 = vor.u32 %v6632_v50, %v6631_v29  ;;  %v2345_v50 = vrot.slane %v2343_v6, 1  ;;  %v6054_v29 = vld [vmem:[%s6826_s22 + $0x6c] sm:$0x1]  ;;  %v8092_v6 = vld [vmem:[%s6826_s22 + $0x70] sm:$0xff]  }
 0x226   : > { %2568 = vrot.lane.b32.xlu1 %v2331_v1, %s6771_s30  ;;  %v8058_v23 = vpop.permute.xlu2 %1988  ;;  %v6500_v1 = vld [vmem:[%s6826_s22 + $0x60] sm:$0xff]   ;;  %v2346_v37 = vsel %vm704_vm0, %v2341_v63, %v2345_v50  ;;  %v8094_v63 = vunpack.c.l.b16 %v6016_v60 }
 0x227   : > { %10498 = vst [vmem:[#allocation139_spill] sm:$0xff] %v8058_v23  ;;  %2178 = vrot.lane.b32.xlu0 %v2135_v59, %s6769_s28  ;;  %v2695_v23 = vrot.slane %v6633_v54, 1  ;;  %v2258_v54 = vunpack.c.l.b16 %v6054_v29 }
 0x228   : > { %v8063_v27 = vpop.permute.xlu1 %1968 }
 0x229   : > { %10499 = vst [vmem:[#allocation140_spill] sm:$0xff] %v8063_v27  ;;  %v8065_v12 = vpop.permute.xlu0 %1966  ;;  %v2697_v5 = vsel %vm1101_vm1, %v2695_v23, %v2696_v51  ;;  %v6637_v27 = vld [vmem:[%s6826_s22 + $0x70] sm:$0xf0] }
 0x22a   : > { %10500 = vst [vmem:[#allocation141_spill] sm:$0xff] %v8065_v12 }
 0x22c   : > { %2570 = vrot.lane.b32.xlu2 %v2334_v7, %s6771_s30  ;;  %v2347_v7 = vshrl.u32 %v2275_v26, 16  ;;  %v2353_v26 = vshll.u32 %v6500_v1, 16 }
 0x22e   : > { %2182 = vrot.lane.b32.xlu1 %v2137_v28, %s6769_s28  ;;  %v8070_v59 = vpop.permute.xlu2 %1994  ;;  %v2349_v23 = vor.u32 %v2347_v7, %v2345_v50  ;;  %v2351_v7 = vshrl.u32 %v6500_v1, 16  ;;  %v2355_v60 = vrot.slane %v2353_v26, 1 }
 0x22f   : > { %10501 = vst [vmem:[#allocation142_spill] sm:$0xff] %v8070_v59  ;;  %2180 = vrot.lane.b32.xlu0 %v6500_v1, %s6769_s28 }
 0x230   : > { %v8073_v18 = vpop.permute.xlu1 %1974  ;;  %v2356_v1 = vor.u32 %v2355_v60, %v2351_v7  ;;  %v6022_v60 = vld [vmem:[%s6826_s22 + $0xa8] sm:$0xf] }
 0x231   : > { %10502 = vst [vmem:[#allocation143_spill] sm:$0xff] %v8073_v18  ;;  %v8075_v46 = vpop.permute.xlu0 %1972 }
 0x232   : > { %10503 = vst [vmem:[#allocation144_spill] sm:$0xff] %v8075_v46  ;;  %v6635_v46 = vld [vmem:[%s6826_s22 + $0x60] sm:$0xe] }
 0x234   : > { %2752 = vrot.lane.b32.xlu2 %v2697_v5, %s6770_s29  ;;  %v8097_v5 = vpack.c.b16 %v2258_v54, %v2088_v10  ;;  %v8112_v54 = vld [vmem:[%s6826_s22 + $0x80] sm:$0xff]  }
 0x236   : > { %2750 = vrot.lane.b32.xlu1 %v2693_v2, %s6770_s29  ;;  %v8082_v30 = vpop.permute.xlu2 %2000  ;;  %v6013_v2 = vld [vmem:[%s6826_s22 + $0x78] sm:$0xf]  ;;  %v2358_v10 = vshll.u32 %v8097_v5, 16 }
 0x237   : > { %10504 = vst [vmem:[#allocation145_spill] sm:$0xff] %v8082_v30  ;;  %2572 = vrot.lane.b32.xlu0 %v2346_v37, %s6771_s30  ;;  %v2091_v50 = vunpack.c.l.b16 %v6013_v2  ;;  %v3508_v2 = vld [vmem:[%s10335_s1 + $0x10] sm:$0x3] }
 0x238   : > { %v8085_v9 = vpop.permute.xlu1 %1980  ;;  %v2360_v26 = vrot.slane %v2358_v10, 1  ;;  %v6634_v10 = vld [vmem:[%s6826_s22 + $0x60] sm:$0xf0] }
 0x239   : > { %10505 = vst [vmem:[#allocation146_spill] sm:$0xff] %v8085_v9  ;;  %v8087_v28 = vpop.permute.xlu0 %1978 }
 0x23a   : > { %10506 = vst [vmem:[#allocation147_spill] sm:$0xff] %v8087_v28  ;;  %v6055_v28 = vld [vmem:[%s6826_s22 + $0x7c] sm:$0x1]  ;;  %v2361_v7 = vsel %vm704_vm0, %v2356_v1, %v2360_v26  ;;  %v6636_v1 = vor.u32 %v6635_v46, %v6634_v10  ;;  %v2699_v10 = vrot.slane %v8097_v5, 1 }
 0x23c   : > { %2754 = vrot.lane.b32.xlu2 %v2696_v51, %s6770_s29  ;;  %v2141_v51 = vpack.c.b16 %v8094_v63, %v8094_v63 }
 0x23e   : > { %2574 = vrot.lane.b32.xlu1 %v2349_v23, %s6771_s30  ;;  %v8100_v37 = vpop.permute.xlu2 %2006  ;;  %v2139_v23 = vpack.c.b16 %v2091_v50, %v2091_v50 }
 0x23f   : > { %10507 = vst [vmem:[#allocation148_spill] sm:$0xff] %v8100_v37  ;;  %2184 = vrot.lane.b32.xlu0 %v8092_v6, %s6769_s28  ;;  %v6019_v37 = vld [vmem:[%s6826_s22 + $0x98] sm:$0xf] }
 0x240   : > { %v8104_v29 = vpop.permute.xlu1 %1986  ;;  %v8123_v9 = vunpack.c.l.b16 %v6019_v37 }
 0x241   : > { %10508 = vst [vmem:[#allocation149_spill] sm:$0xff] %v8104_v29  ;;  %v8108_v30 = vpop.permute.xlu0 %1984  ;;  %v3545_v29 = vunpack.c.l.b16 %v3508_v2 }
 0x242   : > { %10509 = vst [vmem:[#allocation150_spill] sm:$0xff] %v8108_v30  ;;  %v2143_v37 = vpack.c.b16 %v8123_v9, %v8123_v9 }
 0x243   : > { %v3548_v59 = vpack.c.b16 %v3545_v29, %v3545_v29  ;;  %v6240_v29 = vld [vmem:[%s10335_s1 + $0x8] sm:$0xff] }
 0x244   : > { %2190 = vrot.lane.b32.xlu2 %v2141_v51, %s6769_s28 }
 0x245   : > { %v3635_v51 = vsel %vm3633_vm2, %v3548_v59, 0  ;;  %v8143_v59 = vld [vmem:[%s6826_s22 + $0x90] sm:$0xff]  }
 0x246   : > { %2188 = vrot.lane.b32.xlu1 %v8112_v54, %s6769_s28  ;;  %v8121_v30 = vpop.permute.xlu2 %2012  ;;  %3642 = vmatpush.bf16.msra.mxu0 %v3635_v51 }
 0x247   : > { %10510 = vst [vmem:[#allocation151_spill] sm:$0xff] %v8121_v30  ;;  %2186 = vrot.lane.b32.xlu0 %v2139_v23, %s6769_s28  ;;  %6676 = vmatpush.bf16.msra.mxu3 %v3635_v51  ;;  %v2259_v23 = vunpack.c.l.b16 %v6055_v28  ;;  %v8145_v30 = vunpack.c.l.b16 %v6022_v60  ;;  %v6239_v28 = vld [vmem:[%s10335_s1] sm:$0xff]  ;;  %v2698_v60 = vrot.slane %v6636_v1, 1 }
 0x248   : > { %v8127_v18 = vpop.permute.xlu1 %1992 }
 0x249   : > { %10511 = vst [vmem:[#allocation152_spill] sm:$0xff] %v8127_v18  ;;  %v8130_v2 = vpop.permute.xlu0 %1990  ;;  %v2368_v18 = vshll.u32 %v8092_v6, 16  ;;  %v2145_v46 = vpack.c.b16 %v8145_v30, %v8145_v30 }
 0x24a   : > { %10512 = vst [vmem:[#allocation153_spill] sm:$0xff] %v8130_v2  ;;  %3643 = vmatpush.bf16.msra.mxu0 %v6240_v29  ;;  %v8151_v2 = vpack.c.b16 %v2259_v23, %v2091_v50  ;;  %v2366_v50 = vshrl.u32 %v8092_v6, 16  ;;  %v8167_v23 = vld [vmem:[%s6826_s22 + $0xa0] sm:$0xff]   ;;  %v2362_v6 = vshrl.u32 %v8097_v5, 16 }
 0x24b   : > { %6677 = vmatpush.bf16.msra.mxu3 %v6240_v29  ;;  %v2370_v29 = vrot.slane %v2368_v18, 1 }
 0x24c   : > { %2576 = vrot.lane.b32.xlu2 %v2361_v7, %s6771_s30  ;;  %v2373_v58 = vshll.u32 %v8151_v2, 16  ;;  %v2364_v61 = vor.u32 %v2362_v6, %v2360_v26  ;;  %v2702_v26 = vrot.slane %v8151_v2, 1 }
 0x24e   : > { %2194 = vrot.lane.b32.xlu1 %v2143_v37, %s6769_s28  ;;  %v8148_v51 = vpop.permute.xlu2 %2164  ;;  %3644 = vmatpush.bf16.msra.mxu0 %v6239_v28 }
 0x24f   : > { %2192 = vrot.lane.b32.xlu0 %v8143_v59, %s6769_s28  ;;  %6678 = vmatpush.bf16.msra.mxu3 %v6239_v28  ;;  %v2375_v28 = vrot.slane %v2373_v58, 1 }
 0x250   : > { %v8158_v7 = vpop.permute.xlu1 %1998 }
 0x251   : > { %10513 = vst [vmem:[#allocation154_spill] sm:$0xff] %v8158_v7  ;;  %v8163_v37 = vpop.permute.xlu0 %1996  ;;  %v2700_v7 = vsel %vm1101_vm1, %v2698_v60, %v2699_v10 }
 0x252   : > { %10514 = vst [vmem:[#allocation155_spill] sm:$0xff] %v8163_v37  ;;  %v2371_v37 = vor.u32 %v2370_v29, %v2366_v50  ;;  %v2377_v50 = vshrl.u32 %v8151_v2, 16 }
 0x254   : > { %2198 = vrot.lane.b32.xlu2 %v2145_v46, %s6769_s28  ;;  %v6638_v46 = vld [vmem:[%s6826_s22 + $0x70] sm:$0xe]  ;;  %v2376_v60 = vsel %vm704_vm0, %v2371_v37, %v2375_v28 }
 0x255   : > { %v6639_v29 = vor.u32 %v6638_v46, %v6637_v27  ;;  %v6025_v27 = vld [vmem:[%s6826_s22 + $0xb8] sm:$0xf]  ;;  %v6056_v46 = vld [vmem:[%s6826_s22 + $0x8c] sm:$0x1] }
 0x256   : > { %2196 = vrot.lane.b32.xlu1 %v8167_v23, %s6769_s28  ;;  %v8174_v1 = vpop.permute.xlu2 %2018 }
 0x257   : > { %10515 = vst [vmem:[#allocation156_spill] sm:$0xff] %v8174_v1  ;;  %2756 = vrot.lane.b32.xlu0 %v2700_v7, %s6770_s29  ;;  %v2379_v7 = vor.u32 %v2377_v50, %v2375_v28  ;;  %v2701_v1 = vrot.slane %v6639_v29, 1  ;;  %v8206_v28 = vunpack.c.l.b16 %v6025_v27  ;;  %v8215_v50 = vld [vmem:[%s6826_s22 + $0xc0] sm:$0xff]  }
 0x258   : > { %v8178_v18 = vpop.permute.xlu1 %2004 }
 0x259   : > { %10516 = vst [vmem:[#allocation157_spill] sm:$0xff] %v8178_v18  ;;  %v8180_v12 = vpop.permute.xlu0 %2002  ;;  %v2703_v6 = vsel %vm1101_vm1, %v2701_v1, %v2702_v26  ;;  %v6031_v1 = vld [vmem:[%s6826_s22 + $0xd8] sm:$0xf]  ;;  %v2147_v29 = vpack.c.b16 %v8206_v28, %v8206_v28 }
 0x25a   : > { %10517 = vst [vmem:[#allocation158_spill] sm:$0xff] %v8180_v12 }
 0x25c   : > { %2758 = vrot.lane.b32.xlu2 %v2699_v10, %s6770_s29  ;;  %v8197_v10 = vld [vmem:[%s6826_s22 + $0xb0] sm:$0xff]  }
 0x25e   : > { %2580 = vrot.lane.b32.xlu1 %v2376_v60, %s6771_s30  ;;  %v8188_v58 = vpop.permute.xlu2 %2562 }
 0x25f   : > { %2578 = vrot.lane.b32.xlu0 %v2364_v61, %s6771_s30 }
 0x260   : > { %v8191_v5 = vpop.permute.xlu1 %2010 }
 0x261   : > { %10518 = vst [vmem:[#allocation159_spill] sm:$0xff] %v8191_v5  ;;  %v8194_v37 = vpop.permute.xlu0 %2008  ;;  %v6028_v5 = vld [vmem:[%s6826_s22 + $0xc8] sm:$0xf] }
 0x262   : > { %10519 = vst [vmem:[#allocation160_spill] sm:$0xff] %v8194_v37 }
 0x264   : > { %2582 = vrot.lane.b32.xlu2 %v2379_v7, %s6771_s30  ;;  %v6722_v7 = vld [vmem:[%s6826_s22] sm:$0xff]  }
 0x265   : > { %v2814_v27 = vsel %vm2812_vm3, %v6722_v7, %v7176_v16  ;;  %v6057_v7 = vld [vmem:[%s6826_s22 + $0x9c] sm:$0x1] }
 0x266   : > { %2200 = vrot.lane.b32.xlu1 %v8197_v10, %s6769_s28  ;;  %v8204_v61 = vpop.permute.xlu2 %2744  ;;  %v2261_v18 = vunpack.c.l.b16 %v6057_v7  ;;  %v2381_v7 = vshrl.u32 %v8112_v54, 16 }
 0x267   : > { %2760 = vrot.lane.b32.xlu0 %v2703_v6, %s6770_s29  ;;  %v2905_v6 = vsel %vm2903_vm4, %v2814_v27, %v7373_v57  ;;  %v6640_v27 = vld [vmem:[%s6826_s22 + $0x80] sm:$0xf0] }
 0x268   : > { %v8209_v2 = vpop.permute.xlu1 %2016  ;;  %v2978_v37 = vsel %vm10360_vm5, %v2905_v6, %v7630_v36  ;;  %v8241_v36 = vunpack.c.l.b16 %v6028_v5  ;;  %v6641_v6 = vld [vmem:[%s6826_s22 + $0x80] sm:$0xe] }
 0x269   : > { %10520 = vst [vmem:[#allocation161_spill] sm:$0xff] %v8209_v2  ;;  %v8212_v60 = vpop.permute.xlu0 %2014  ;;  %v2260_v2 = vunpack.c.l.b16 %v6056_v46  ;;  %v3051_v16 = vsel %vm3049_vm6, %v2978_v37, %v7856_v39  ;;  %v2383_v39 = vshll.u32 %v8112_v54, 16  ;;  %v6642_v12 = vor.u32 %v6641_v6, %v6640_v27 }
 0x26a   : > { %10521 = vst [vmem:[#allocation162_spill] sm:$0xff] %v8212_v60  ;;  %v8227_v60 = vunpack.c.l.b16 %v6031_v1  ;;  %v3124_v46 = vsel %vm10357_vm7, %v3051_v16, %v8026_v20  ;;  %v2149_v16 = vpack.c.b16 %v8241_v36, %v8241_v36 }
 0x26b   : > { %v8244_v1 = vpack.c.b16 %v2260_v2, %v8094_v63  ;;  %v3197_v20 = vsel %vm3195_vm8, %v3124_v46, %v8148_v51  ;;  %v8256_v2 = vld [vmem:[%s6826_s22 + $0xd0] sm:$0xff]   ;;  %v2385_v47 = vrot.slane %v2383_v39, 1  ;;  %v8267_v46 = vpack.c.b16 %v2261_v18, %v8123_v9 }
 0x26c   : > { %2204 = vrot.lane.b32.xlu2 %v8215_v50, %s6769_s28  ;;  %v2704_v19 = vrot.slane %v6642_v12, 1  ;;  %v2817_v39 = vsel %vm2812_vm3, %v615_v44, %v7206_v15 }
 0x26d   : > { %v2388_v51 = vshll.u32 %v8244_v1, 16  ;;  %v2705_v54 = vrot.slane %v8244_v1, 1  ;;  %v2907_v18 = vsel %vm2903_vm4, %v2817_v39, %v7369_v24  ;;  %v2403_v12 = vshll.u32 %v8267_v46, 16  ;;  %v6723_v24 = vld [vmem:[%s6826_s22 + $0x10] sm:$0xff]  }
 0x26e   : > { %2202 = vrot.lane.b32.xlu1 %v2147_v29, %s6769_s28  ;;  %v8236_v57 = vpop.permute.xlu2 %2746  ;;  %v2151_v29 = vpack.c.b16 %v8227_v60, %v8227_v60  ;;  %v2819_v44 = vsel %vm2812_vm3, %v6723_v24, %v7174_v53 }
 0x26f   : > { %2762 = vrot.lane.b32.xlu0 %v2702_v26, %s6770_s29  ;;  %v2390_v9 = vrot.slane %v2388_v51, 1 }
 0x270   : > { %v2741_v37 = vpop.permute.xlu1 %2740 }
 0x271   : > { %v2561_v26 = vpop.permute.xlu0 %2560 }
 0x272   : > { %v3270_v5 = vsel %vm10356_vm9, %v3197_v20, %v2561_v26  ;;  %v2396_v20 = vshrl.u32 %v8143_v59, 16 }
 0x273   : > { %v3343_v63 = vsel %vm3341_vm10, %v3270_v5, %v2741_v37  ;;  %v2398_v37 = vshll.u32 %v8143_v59, 16 }
 0x274   : > { %6094 = vmatmul.msk.bf16.vlgmr.msra.gmra.mxu0 %vm10355_vm11, %v3343_v63  ;;  %2210 = vrot.lane.b32.xlu2 %v2151_v29, %s6769_s28  ;;  %v2386_v29 = vor.u32 %v2385_v47, %v2381_v7  ;;  %v8282_v63 = vld [vmem:[%s6826_s22 + $0xe0] sm:$0xff]   ;;  %v2706_v47 = vsel %vm1101_vm1, %v2704_v19, %v2705_v54  ;;  %v6034_v7 = vld [vmem:[%s6826_s22 + $0xe8] sm:$0xf]  ;;  %v8304_v19 = vrot.slane %v2403_v12, 1 }
 0x275   : > { %v2400_v26 = vrot.slane %v2398_v37, 1 }
 0x276   : > { %2208 = vrot.lane.b32.xlu1 %v8256_v2, %s6769_s28  ;;  %v8272_v27 = vpop.permute.xlu2 %2176 }
 0x277   : > { %2206 = vrot.lane.b32.xlu0 %v2149_v16, %s6769_s28  ;;  %v2980_v16 = vsel %vm10360_vm5, %v2907_v18, %v7628_v4  ;;  %v2391_v4 = vsel %vm704_vm0, %v2386_v29, %v2390_v9  ;;  %v2401_v51 = vor.u32 %v2400_v26, %v2396_v20  ;;  %v2392_v29 = vshrl.u32 %v8244_v1, 16  ;;  %v6058_v20 = vld [vmem:[%s6826_s22 + $0xac] sm:$0x1] }
 0x278   : > { %v2169_v6 = vpop.permute.xlu1 %2168  ;;  %v3053_v15 = vsel %vm3049_vm6, %v2980_v16, %v7854_v38  ;;  %v2909_v38 = vsel %vm2903_vm4, %v2819_v44, %v7300_v56  ;;  %v617_v56 = vpack.c.b16 %v6837_v11, %v6837_v11  ;;  %v8319_v26 = vunpack.c.l.b16 %v6034_v7 }
 0x279   : > { %v2167_v5 = vpop.permute.xlu0 %2166  ;;  %v3126_v59 = vsel %vm10357_vm7, %v3053_v15, %v8023_v34  ;;  %v2982_v53 = vsel %vm10360_vm5, %v2909_v38, %v7558_v22  ;;  %v6060_v34 = vld [vmem:[%s6826_s22 + $0xcc] sm:$0x1]  ;;  %v6643_v15 = vld [vmem:[%s6826_s22 + $0x90] sm:$0xf0]  ;;  %v2394_v38 = vor.u32 %v2392_v29, %v2390_v9  ;;  %v2411_v9 = vshrl.u32 %v8167_v23, 16 }
 0x27a   : > { %v3199_v37 = vsel %vm3195_vm8, %v3126_v59, %v2167_v5  ;;  %v3055_v18 = vsel %vm3049_vm6, %v2982_v53, %v7804_v0  ;;  %v2413_v5 = vshll.u32 %v8167_v23, 16  ;;  %v2264_v11 = vunpack.c.l.b16 %v6060_v34 }
 0x27b   : > { %v3128_v22 = vsel %vm10357_vm7, %v3055_v18, %v7984_v62  ;;  %v3272_v16 = vsel %vm10356_vm9, %v3199_v37, %v8188_v58  ;;  %v2406_v59 = vsel %vm704_vm0, %v2401_v51, %v8304_v19  ;;  %v2822_v53 = vsel %vm2812_vm3, %v617_v56, %v7187_v31 }
 0x27c   : > { %2212 = vrot.lane.b32.xlu2 %v8282_v63, %s6769_s28  ;;  %v3201_v24 = vsel %vm3195_vm8, %v3128_v22, %v2169_v6  ;;  %v2153_v6 = vpack.c.b16 %v8319_v26, %v8319_v26  ;;  %v2911_v51 = vsel %vm2903_vm4, %v2822_v53, %v7388_v21  ;;  %v2415_v29 = vrot.slane %v2413_v5, 1  ;;  %v6059_v22 = vld [vmem:[%s6826_s22 + $0xbc] sm:$0x1] }
 0x27d   : > { %v2443_v31 = vshll.u32 %v8215_v50, 16  ;;  %v2984_v56 = vsel %vm10360_vm5, %v2911_v51, %v7651_v45  ;;  %v2708_v5 = vrot.slane %v8267_v46, 1 }
 0x27e   : > { %2764 = vrot.lane.b32.xlu1 %v2706_v47, %s6770_s29  ;;  %v8310_v39 = vpop.permute.xlu2 %2748  ;;  %v6644_v47 = vld [vmem:[%s6826_s22 + $0x90] sm:$0xe]  ;;  %v3057_v23 = vsel %vm3049_vm6, %v2984_v56, %v7872_v3  ;;  %v6652_v56 = vld [vmem:[%s6826_s22 + $0xc0] sm:$0xf0] }
 0x27f   : > { %2584 = vrot.lane.b32.xlu0 %v2391_v4, %s6771_s30  ;;  %v2262_v4 = vunpack.c.l.b16 %v6058_v20  ;;  %v6645_v37 = vor.u32 %v6644_v47, %v6643_v15  ;;  %v3130_v45 = vsel %vm10357_vm7, %v3057_v23, %v8039_v41  ;;  %v2445_v15 = vrot.slane %v2443_v31, 1 }
 0x280   : > { %v2743_v12 = vpop.permute.xlu1 %2742 }
 0x281   : > { %v3345_v0 = vsel %vm3341_vm10, %v3272_v16, %v2743_v12  ;;  %v2565_v44 = vpop.permute.xlu0 %2564  ;;  %v8353_v18 = vpack.c.b16 %v2262_v4, %v8145_v30  ;;  %v2416_v12 = vor.u32 %v2415_v29, %v2411_v9  ;;  %v2441_v16 = vshrl.u32 %v8215_v50, 16 }
 0x282   : > { %v3452_v7 = vunpack.c.l.b16 %v3345_v0  ;;  %v3274_v62 = vsel %vm10356_vm9, %v3201_v24, %v2565_v44  ;;  %v2428_v24 = vshll.u32 %v8197_v10, 16  ;;  %v2263_v0 = vunpack.c.l.b16 %v6059_v22 }
 0x283   : > { %v8337_v58 = vsel %vm3341_vm10, %v3274_v62, %v8204_v61  ;;  %v8348_v61 = vpack.c.b16 %v2264_v11, %v8241_v36  ;;  %v2707_v36 = vrot.slane %v6645_v37, 1  ;;  %v8368_v11 = vld [vmem:[%s6826_s22 + $0xf0] sm:$0xff]  }
 0x284   : > { %v3453_v34 = vunpack.c.l.b16 %v8337_v58  ;;  %2588 = vrot.lane.b32.xlu2 %v2406_v59, %s6771_s30  ;;  %v2418_v59 = vshll.u32 %v8353_v18, 16  ;;  %v2430_v53 = vrot.slane %v2428_v24, 1  ;;  %v6656_v24 = vld [vmem:[%s6826_s22 + $0xd0] sm:$0xe] }
 0x285   : > { %v2448_v3 = vshll.u32 %v8348_v61, 16  ;;  %v2709_v41 = vsel %vm1101_vm1, %v2707_v36, %v2708_v5  ;;  %v6037_v36 = vld [vmem:[%s6826_s22 + $0xf8] sm:$0xf] }
 0x286   : > { %2586 = vrot.lane.b32.xlu1 %v2394_v38, %s6771_s30  ;;  %v3510_v21 = vpack.c.b16 %v3453_v34, %v3452_v7  ;;  %v8356_v20 = vpop.permute.xlu2 %2570  ;;  %v8378_v50 = vrot.slane %v2418_v59, 1  ;;  %v2446_v7 = vor.u32 %v2445_v15, %v2441_v16  ;;  %v2426_v38 = vshrl.u32 %v8197_v10, 16 }
 0x287   : > { %2214 = vrot.lane.b32.xlu0 %v2153_v6, %s6769_s28  ;;  %v2450_v62 = vrot.slane %v2448_v3, 1  ;;  %v8382_v6 = vpack.c.b16 %v2263_v0, %v8206_v28  ;;  %v2407_v34 = vshrl.u32 %v8267_v46, 16  ;;  %v6061_v28 = vld [vmem:[%s6826_s22 + $0xdc] sm:$0x1]  ;;  %v6655_v3 = vld [vmem:[%s6826_s22 + $0xd0] sm:$0xf0] }
 0x288   : > { %6095 = vmatmul.msk.bf16.gmra.mxu0 %vm10355_vm11, %v3510_v21  ;;  %v2567_v30 = vpop.permute.xlu1 %2566  ;;  %v8389_v51 = vsel %vm704_vm0, %v2416_v12, %v8378_v50  ;;  %v6653_v21 = vld [vmem:[%s6826_s22 + $0xc0] sm:$0xe]  ;;  %v2431_v23 = vor.u32 %v2430_v53, %v2426_v38  ;;  %v2456_v53 = vshrl.u32 %v8256_v2, 16 }
 0x289   : > { %v2171_v47 = vpop.permute.xlu0 %2170  ;;  %v2451_v31 = vsel %vm704_vm0, %v2446_v7, %v2450_v62  ;;  %v2433_v1 = vshll.u32 %v8382_v6, 16  ;;  %v2409_v46 = vor.u32 %v2407_v34, %v8304_v19  ;;  %v6657_v7 = vor.u32 %v6656_v24, %v6655_v3 }
 0x28a   : > { %v3203_v44 = vsel %vm3195_vm8, %v3130_v45, %v2171_v47  ;;  %v2452_v45 = vshrl.u32 %v8348_v61, 16  ;;  %v8414_v47 = vunpack.c.l.b16 %v6037_v36  ;;  %v6646_v36 = vld [vmem:[%s6826_s22 + $0xa0] sm:$0xf0] }
 0x28b   : > { %v3276_v4 = vsel %vm10356_vm9, %v3203_v44, %v2567_v30  ;;  %v6654_v30 = vor.u32 %v6653_v21, %v6652_v56  ;;  %v8409_v12 = vrot.slane %v2433_v1, 1 }
 0x28c   : > { %2216 = vrot.lane.b32.xlu2 %v8368_v11, %s6769_s28  ;;  %v3349_v10 = vsel %vm3341_vm10, %v3276_v4, %v8236_v57  ;;  %v3454_v57 = vunpack.c.h.b16 %v8337_v58  ;;  %v2458_v58 = vshll.u32 %v8256_v2, 16  ;;  %v2454_v44 = vor.u32 %v2452_v45, %v2450_v62  ;;  %v10523_v2 = vld [vmem:[#allocation54_spill] sm:$0xff] }
 0x28d   : > { %v3455_v22 = vunpack.c.l.b16 %v3349_v10  ;;  %v8420_v19 = vsel %vm704_vm0, %v2431_v23, %v8409_v12  ;;  %v2716_v59 = vrot.slane %v6654_v30, 1  ;;  %v2155_v38 = vpack.c.b16 %v8414_v47, %v8414_v47  ;;  %v10524_v45 = vld [vmem:[#allocation2_spill] sm:$0xff] }
 0x28e   : > { %2768 = vrot.lane.b32.xlu1 %v2709_v41, %s6770_s29  ;;  %v8385_v37 = vpop.permute.xlu2 %2752  ;;  %v2717_v41 = vrot.slane %v8348_v61, 1  ;;  %v2460_v34 = vrot.slane %v2458_v58, 1  ;;  %v2719_v10 = vrot.slane %v6657_v7, 1  ;;  %v619_v30 = vpack.c.b16 %v10524_v45, %v10524_v45 }
 0x28f   : > { %2766 = vrot.lane.b32.xlu0 %v2705_v54, %s6770_s29  ;;  %v2265_v54 = vunpack.c.l.b16 %v6061_v28  ;;  %v3511_v16 = vpack.c.b16 %v3455_v22, %v3454_v57  ;;  %v6724_v28 = vld [vmem:[%s6826_s22 + $0x20] sm:$0xff]  }
 0x290   : > { %v8398_v9 = vpop.permute.xlu1 %2174  ;;  %v2461_v1 = vor.u32 %v2460_v34, %v2456_v53  ;;  %v6647_v57 = vld [vmem:[%s6826_s22 + $0xa0] sm:$0xe]  ;;  %v6725_v34 = vld [vmem:[%s6826_s22 + $0x30] sm:$0xff]  }
 0x291   : > { %v2173_v29 = vpop.permute.xlu0 %2172  ;;  %v8425_v0 = vpack.c.b16 %v2265_v54, %v8227_v60  ;;  %v2718_v60 = vsel %vm1101_vm1, %v2716_v59, %v2717_v41 }
 0x293   : > { %v2463_v62 = vshll.u32 %v8425_v0, 16  ;;  %v2720_v61 = vrot.slane %v8425_v0, 1 }
 0x294   : > { %2600 = vrot.lane.b32.xlu2 %v2451_v31, %s6771_s30  ;;  %v10522_v31 = vld [vmem:[#allocation18_spill] sm:$0xff] }
 0x295   : > { %v2824_v56 = vsel %vm2812_vm3, %v6724_v28, %v10522_v31  ;;  %v2721_v24 = vsel %vm1101_vm1, %v2719_v10, %v2720_v61  ;;  %v10527_v10 = vld [vmem:[#allocation46_spill] sm:$0xff] }
 0x296   : > { %2770 = vrot.lane.b32.xlu1 %v2708_v5, %s6770_s29  ;;  %v8412_v15 = vpop.permute.xlu2 %2754  ;;  %v2913_v23 = vsel %vm2903_vm4, %v2824_v56, %v10523_v2  ;;  %v2711_v2 = vrot.slane %v8353_v18, 1 }
 0x297   : > { %2590 = vrot.lane.b32.xlu0 %v2409_v46, %s6771_s30  ;;  %v2986_v22 = vsel %vm10360_vm5, %v2913_v23, %v7648_v17  ;;  %v2465_v46 = vrot.slane %v2463_v62, 1 }
 0x298   : > { %6096 = vmatmul.msk.bf16.gmra.mxu0 %vm10355_vm11, %v3511_v16  ;;  %v2569_v5 = vpop.permute.xlu1 %2568  ;;  %v3059_v16 = vsel %vm3049_vm6, %v2986_v22, %v7867_v43  ;;  %v2467_v43 = vshrl.u32 %v8425_v0, 16 }
 0x299   : > { %v8429_v4 = vpop.permute.xlu0 %2178  ;;  %v3132_v17 = vsel %vm10357_vm7, %v3059_v16, %v8037_v48  ;;  %v2466_v7 = vsel %vm704_vm0, %v2461_v1, %v2465_v46  ;;  %v6062_v16 = vld [vmem:[%s6826_s22 + $0xec] sm:$0x1] }
 0x29a   : > { %v3205_v58 = vsel %vm3195_vm8, %v3132_v17, %v2173_v29  ;;  %v2469_v1 = vor.u32 %v2467_v43, %v2465_v46  ;;  %v6649_v17 = vld [vmem:[%s6826_s22 + $0xb0] sm:$0xf0]  ;;  %v2266_v43 = vunpack.c.l.b16 %v6062_v16 }
 0x29b   : > { %v3278_v59 = vsel %vm10356_vm9, %v3205_v58, %v2569_v5  ;;  %v10528_v5 = vld [vmem:[#allocation57_spill] sm:$0xff] }
 0x29c   : > { %2602 = vrot.lane.b32.xlu2 %v2454_v44, %s6771_s30  ;;  %v6648_v44 = vor.u32 %v6647_v57, %v6646_v36  ;;  %v3351_v31 = vsel %vm3341_vm10, %v3278_v59, %v8310_v39 }
 0x29e   : > { %2218 = vrot.lane.b32.xlu1 %v2155_v38, %s6769_s28  ;;  %v8442_v21 = vpop.permute.xlu2 %2190  ;;  %v10525_v38 = vld [vmem:[#allocation20_spill] sm:$0xff]  ;;  %v2710_v56 = vrot.slane %v6648_v44, 1 }
 0x29f   : > { %2780 = vrot.lane.b32.xlu0 %v2718_v60, %s6770_s29  ;;  %v2827_v53 = vsel %vm2812_vm3, %v619_v30, %v10525_v38  ;;  %v10526_v60 = vld [vmem:[#allocation23_spill] sm:$0xff]  ;;  %v2422_v30 = vshrl.u32 %v8353_v18, 16  ;;  %v10529_v44 = vld [vmem:[#allocation4_spill] sm:$0xff] }
 0x2a0   : > { %v8449_v54 = vpop.permute.xlu1 %2182  ;;  %v2829_v62 = vsel %vm2812_vm3, %v6725_v34, %v10526_v60  ;;  %v2915_v48 = vsel %vm2903_vm4, %v2827_v53, %v10527_v10  ;;  %v621_v59 = vpack.c.b16 %v10529_v44, %v10529_v44  ;;  %v2437_v53 = vshrl.u32 %v8382_v6, 16  ;;  %v10530_v34 = vld [vmem:[#allocation25_spill] sm:$0xff] }
 0x2a1   : > { %v8457_v3 = vpop.permute.xlu0 %2180  ;;  %v2917_v28 = vsel %vm2903_vm4, %v2829_v62, %v10528_v5  ;;  %v2988_v23 = vsel %vm10360_vm5, %v2915_v48, %v7580_v35  ;;  %v2424_v38 = vor.u32 %v2422_v30, %v8378_v50  ;;  %v2473_v62 = vshll.u32 %v8282_v63, 16  ;;  %v6658_v50 = vld [vmem:[%s6826_s22 + $0xe0] sm:$0xf0]  ;;  %v6659_v5 = vld [vmem:[%s6826_s22 + $0xe0] sm:$0xe] }
 0x2a2   : > { %v2990_v22 = vsel %vm10360_vm5, %v2917_v28, %v7673_v52  ;;  %v3061_v36 = vsel %vm3049_vm6, %v2988_v23, %v7818_v55  ;;  %v2712_v55 = vsel %vm1101_vm1, %v2710_v56, %v2711_v2  ;;  %v2832_v60 = vsel %vm2812_vm3, %v621_v59, %v10530_v34  ;;  %v10531_v28 = vld [vmem:[#allocation56_spill] sm:$0xff] }
 0x2a3   : > { %v3063_v57 = vsel %vm3049_vm6, %v2990_v22, %v7886_v13  ;;  %v3134_v45 = vsel %vm10357_vm7, %v3061_v36, %v7998_v40  ;;  %v2919_v0 = vsel %vm2903_vm4, %v2832_v60, %v10531_v28  ;;  %v2714_v56 = vrot.slane %v8382_v6, 1  ;;  %v6063_v22 = vld [vmem:[%s6826_s22 + $0xfc] sm:$0x1] }
 0x2a4   : > { %2784 = vrot.lane.b32.xlu2 %v2721_v24, %s6770_s29  ;;  %v3136_v35 = vsel %vm10357_vm7, %v3063_v57, %v8050_v33  ;;  %v3207_v46 = vsel %vm3195_vm8, %v3134_v45, %v8398_v9  ;;  %v2992_v23 = vsel %vm10360_vm5, %v2919_v0, %v7671_v14  ;;  %v2471_v6 = vshrl.u32 %v8282_v63, 16 }
 0x2a5   : > { %v3209_v52 = vsel %vm3195_vm8, %v3136_v35, %v8272_v27  ;;  %v3280_v40 = vsel %vm10356_vm9, %v3207_v46, %v8356_v20  ;;  %v6650_v20 = vld [vmem:[%s6826_s22 + $0xb0] sm:$0xe]  ;;  %v2267_v45 = vunpack.c.l.b16 %v6063_v22 }
 0x2a6   : > { %2782 = vrot.lane.b32.xlu1 %v2717_v41, %s6770_s29  ;;  %v8477_v29 = vpop.permute.xlu2 %2576  ;;  %v10534_v22 = vld [vmem:[#allocation80_spill] sm:$0xff] }
 0x2a7   : > { %2604 = vrot.lane.b32.xlu0 %v2466_v7, %s6771_s30  ;;  %v8569_v63 = vpack.c.b16 %v2267_v45, %v8414_v47  ;;  %v2486_v47 = vshrl.u32 %v8368_v11, 16 }
 0x2a8   : > { %6097 = vmatmul.msk.bf16.gmra.mxu0 %vm10355_vm11, %v3351_v31  ;;  %v2751_v41 = vpop.permute.xlu1 %2750 }
 0x2a9   : > { %v2573_v39 = vpop.permute.xlu0 %2572  ;;  %v3353_v27 = vsel %vm3341_vm10, %v3280_v40, %v2751_v41  ;;  %v2439_v41 = vor.u32 %v2437_v53, %v8409_v12  ;;  %v2493_v18 = vshll.u32 %v8569_v63, 16  ;;  %v2497_v34 = vshrl.u32 %v8569_v63, 16 }
 0x2aa   : > { %v3282_v13 = vsel %vm10356_vm9, %v3209_v52, %v2573_v39  ;;  %v3458_v7 = vunpack.c.l.b16 %v3353_v27  ;;  %v2475_v39 = vrot.slane %v2473_v62, 1  ;;  %v6726_v62 = vld [vmem:[%s6826_s22 + $0x40] sm:$0xff]  }
 0x2ab   : > { %v8515_v9 = vsel %vm3341_vm10, %v3282_v13, %v8385_v37  ;;  %v2495_v59 = vrot.slane %v2493_v18, 1 }
 0x2ac   : > { %2606 = vrot.lane.b32.xlu2 %v2469_v1, %s6771_s30  ;;  %v3459_v37 = vunpack.c.l.b16 %v8515_v9  ;;  %v3065_v1 = vsel %vm3049_vm6, %v2992_v23, %v7884_v25 }
 0x2ad   : > { %v3138_v57 = vsel %vm10357_vm7, %v3065_v1, %v8048_v49  ;;  %v2488_v49 = vshll.u32 %v8368_v11, 16  ;;  %v2499_v28 = vor.u32 %v2497_v34, %v2495_v59 }
 0x2ae   : > { %2772 = vrot.lane.b32.xlu1 %v2712_v55, %s6770_s29  ;;  %v8510_v33 = vpop.permute.xlu2 %2198  ;;  %v3513_v10 = vpack.c.b16 %v3459_v37, %v3458_v7  ;;  %v3211_v14 = vsel %vm3195_vm8, %v3138_v57, %v8429_v4  ;;  %v2476_v55 = vor.u32 %v2475_v39, %v2471_v6  ;;  %v6040_v57 = vld [vmem:[%s6826_s22 + $0x108] sm:$0xf] }
 0x2af   : > { %2592 = vrot.lane.b32.xlu0 %v8389_v51, %s6771_s30  ;;  %v6651_v51 = vor.u32 %v6650_v20, %v6649_v17  ;;  %v2490_v17 = vrot.slane %v2488_v49, 1  ;;  %v10535_v6 = vld [vmem:[#allocation3_spill] sm:$0xff]  ;;  %v10537_v49 = vld [vmem:[#allocation28_spill] sm:$0xff] }
 0x2b0   : > { %v2575_v24 = vpop.permute.xlu1 %2574  ;;  %v623_v39 = vpack.c.b16 %v10535_v6, %v10535_v6 }
 0x2b1   : > { %v8523_v58 = vpop.permute.xlu0 %2184  ;;  %v2713_v31 = vrot.slane %v6651_v51, 1  ;;  %v3284_v12 = vsel %vm10356_vm9, %v3211_v14, %v2575_v24  ;;  %v2491_v44 = vor.u32 %v2490_v17, %v2486_v47  ;;  %v8645_v47 = vld [vmem:[%s6826_s22 + $0x110] sm:$0xff]   ;;  %v6064_v17 = vld [vmem:[%s6826_s22 + $0x10c] sm:$0x1] }
 0x2b2   : > { %v3357_v4 = vsel %vm3341_vm10, %v3284_v12, %v8412_v15  ;;  %v2118_v12 = vunpack.c.l.b16 %v6040_v57  ;;  %v6665_v57 = vld [vmem:[%s6826_s22 + $0x100] sm:$0xe] }
 0x2b3   : > { %v2715_v35 = vsel %vm1101_vm1, %v2713_v31, %v2714_v56  ;;  %v3461_v24 = vunpack.c.l.b16 %v3357_v4  ;;  %v10533_v31 = vld [vmem:[#allocation49_spill] sm:$0xff] }
 0x2b4   : > { %2786 = vrot.lane.b32.xlu2 %v2720_v61, %s6770_s29  ;;  %v2284_v61 = vpack.c.b16 %v2266_v43, %v8319_v26  ;;  %v6660_v26 = vor.u32 %v6659_v5, %v6658_v50  ;;  %v6661_v43 = vld [vmem:[%s6826_s22 + $0xf0] sm:$0xf0] }
 0x2b6   : > { %2596 = vrot.lane.b32.xlu1 %v8420_v19, %s6771_s30  ;;  %v8538_v48 = vpop.permute.xlu2 %2758  ;;  %v2478_v52 = vshll.u32 %v2284_v61, 16  ;;  %v2722_v25 = vrot.slane %v6660_v26, 1  ;;  %v2723_v46 = vrot.slane %v2284_v61, 1  ;;  %v2482_v7 = vshrl.u32 %v2284_v61, 16  ;;  %v8613_v26 = vld [vmem:[%s6826_s22 + $0x100] sm:$0xff]  }
 0x2b7   : > { %2594 = vrot.lane.b32.xlu0 %v2424_v38, %s6771_s30  ;;  %v6662_v38 = vld [vmem:[%s6826_s22 + $0xf0] sm:$0xe]  ;;  %v2726_v61 = vrot.slane %v8569_v63, 1  ;;  %v2837_v63 = vsel %vm2812_vm3, %v623_v39, %v10537_v49 }
 0x2b8   : > { %6098 = vmatmul.msk.bf16.gmra.mxu0 %vm10355_vm11, %v3513_v10  ;;  %v8551_v19 = vpop.permute.xlu1 %2188  ;;  %v2480_v13 = vrot.slane %v2478_v52, 1  ;;  %v2724_v16 = vsel %vm1101_vm1, %v2722_v25, %v2723_v46  ;;  %v6663_v60 = vor.u32 %v6662_v38, %v6661_v43  ;;  %v10532_v10 = vld [vmem:[#allocation19_spill] sm:$0xff]  ;;  %v6727_v25 = vld [vmem:[%s6826_s22 + $0x50] sm:$0xff]  }
 0x2b9   : > { %v8556_v36 = vpop.permute.xlu0 %2186  ;;  %v2834_v50 = vsel %vm2812_vm3, %v6726_v62, %v10532_v10  ;;  %v10543_v38 = vld [vmem:[#allocation140_spill] sm:$0xff]  ;;  %v6043_v62 = vld [vmem:[%s6826_s22 + $0x118] sm:$0xf] }
 0x2ba   : > { %v2481_v15 = vsel %vm704_vm0, %v2476_v55, %v2480_v13  ;;  %v2484_v53 = vor.u32 %v2482_v7, %v2480_v13  ;;  %v2725_v0 = vrot.slane %v6663_v60, 1  ;;  %v10539_v13 = vld [vmem:[#allocation60_spill] sm:$0xff] }
 0x2bc   : > { %2598 = vrot.lane.b32.xlu2 %v2439_v41, %s6771_s30 }
 0x2be   : > { %2776 = vrot.lane.b32.xlu1 %v2715_v35, %s6770_s29  ;;  %v8576_v40 = vpop.permute.xlu2 %2582  ;;  %v2727_v35 = vsel %vm1101_vm1, %v2725_v0, %v2726_v61 }
 0x2bf   : > { %2774 = vrot.lane.b32.xlu0 %v2711_v2, %s6770_s29  ;;  %v3460_v2 = vunpack.c.h.b16 %v8515_v9  ;;  %v2496_v9 = vsel %vm704_vm0, %v2491_v44, %v2495_v59  ;;  %v2157_v44 = vpack.c.b16 %v2118_v12, %v2118_v12  ;;  %v10541_v59 = vld [vmem:[#allocation113_spill] sm:$0xff] }
 0x2c0   : > { %v8578_v27 = vpop.permute.xlu1 %2194 }
 0x2c1   : > { %v8580_v30 = vpop.permute.xlu0 %2192  ;;  %v3514_v20 = vpack.c.b16 %v3461_v24, %v3460_v2  ;;  %v10540_v2 = vld [vmem:[#allocation87_spill] sm:$0xff] }
 0x2c4   : > { %2788 = vrot.lane.b32.xlu2 %v2724_v16, %s6770_s29  ;;  %v2923_v16 = vsel %vm2903_vm4, %v2837_v63, %v10539_v13 }
 0x2c6   : > { %2608 = vrot.lane.b32.xlu1 %v2481_v15, %s6771_s30  ;;  %v8595_v51 = vpop.permute.xlu2 %2204  ;;  %v6046_v15 = vld [vmem:[%s6826_s22 + $0x128] sm:$0xf] }
 0x2c7   : > { %2778 = vrot.lane.b32.xlu0 %v2714_v56, %s6770_s29  ;;  %v2921_v56 = vsel %vm2903_vm4, %v2834_v50, %v10533_v31  ;;  %v8663_v60 = vunpack.c.l.b16 %v6046_v15 }
 0x2c8   : > { %6099 = vmatmul.msk.bf16.gmra.mxu0 %vm10355_vm11, %v3514_v20  ;;  %v8591_v11 = vpop.permute.xlu1 %2196  ;;  %v2994_v41 = vsel %vm10360_vm5, %v2921_v56, %v10534_v22  ;;  %v2996_v20 = vsel %vm10360_vm5, %v2923_v16, %v10540_v2  ;;  %v6065_v56 = vld [vmem:[%s6826_s22 + $0x11c] sm:$0x1]  ;;  %v10547_v2 = vld [vmem:[#allocation52_spill] sm:$0xff] }
 0x2c9   : > { %v2757_v37 = vpop.permute.xlu0 %2756  ;;  %v3067_v1 = vsel %vm3049_vm6, %v2994_v41, %v7834_v32  ;;  %v2121_v41 = vunpack.c.l.b16 %v6043_v62  ;;  %v10550_v62 = vld [vmem:[#allocation136_spill] sm:$0xff] }
 0x2ca   : > { %v3140_v14 = vsel %vm10357_vm7, %v3067_v1, %v8009_v8 }
 0x2cb   : > { %v3213_v32 = vsel %vm3195_vm8, %v3140_v14, %v8457_v3  ;;  %v2269_v14 = vunpack.c.l.b16 %v6065_v56 }
 0x2cc   : > { %2790 = vrot.lane.b32.xlu2 %v2723_v46, %s6770_s29  ;;  %v3286_v52 = vsel %vm10356_vm9, %v3213_v32, %v8477_v29  ;;  %v10536_v46 = vld [vmem:[#allocation27_spill] sm:$0xff] }
 0x2cd   : > { %v3359_v8 = vsel %vm3341_vm10, %v3286_v52, %v2757_v37  ;;  %v2839_v55 = vsel %vm2812_vm3, %v6727_v25, %v10536_v46  ;;  %v10538_v29 = vld [vmem:[#allocation59_spill] sm:$0xff]  ;;  %v10542_v37 = vld [vmem:[#allocation114_spill] sm:$0xff]  ;;  %v2501_v46 = vshrl.u32 %v8613_v26, 16  ;;  %v8701_v63 = vpack.c.b16 %v2269_v14, %v2121_v41  ;;  %v6668_v14 = vld [vmem:[%s6826_s22 + $0x110] sm:$0xe] }
 0x2ce   : > { %2612 = vrot.lane.b32.xlu1 %v2496_v9, %s6771_s30  ;;  %v8620_v45 = vpop.permute.xlu2 %2210  ;;  %v2925_v4 = vsel %vm2903_vm4, %v2839_v55, %v10538_v29  ;;  %v3069_v43 = vsel %vm3049_vm6, %v2996_v20, %v10542_v37  ;;  %v8695_v52 = vld [vmem:[%s6826_s22 + $0x120] sm:$0xff]   ;;  %v8720_v37 = vld [vmem:[%s6826_s22 + $0x130] sm:$0xff]  }
 0x2cf   : > { %2610 = vrot.lane.b32.xlu0 %v2484_v53, %s6771_s30  ;;  %v2998_v18 = vsel %vm10360_vm5, %v2925_v4, %v7691_v42  ;;  %v10544_v53 = vld [vmem:[#allocation141_spill] sm:$0xff]  ;;  %v2268_v42 = vunpack.c.l.b16 %v6064_v17 }
 0x2d0   : > { %v2581_v5 = vpop.permute.xlu1 %2580  ;;  %v3071_v7 = vsel %vm3049_vm6, %v2998_v18, %v10541_v59  ;;  %v3142_v34 = vsel %vm10357_vm7, %v3069_v43, %v10544_v53  ;;  %v2523_v43 = vshll.u32 %v8701_v63, 16  ;;  %v10549_v53 = vld [vmem:[#allocation109_spill] sm:$0xff] }
 0x2d1   : > { %v2579_v23 = vpop.permute.xlu0 %2578  ;;  %v3144_v9 = vsel %vm10357_vm7, %v3071_v7, %v10543_v38  ;;  %v3215_v10 = vsel %vm3195_vm8, %v3142_v34, %v8449_v54  ;;  %v2503_v54 = vshll.u32 %v8613_v26, 16  ;;  %v8681_v1 = vpack.c.b16 %v2268_v42, %v2118_v12  ;;  %v10548_v38 = vld [vmem:[#allocation83_spill] sm:$0xff] }
 0x2d2   : > { %v3217_v50 = vsel %vm3195_vm8, %v3144_v9, %v8523_v58  ;;  %v3288_v0 = vsel %vm10356_vm9, %v3215_v10, %v2579_v23  ;;  %v6664_v23 = vld [vmem:[%s6826_s22 + $0x100] sm:$0xf0]  ;;  %v2159_v12 = vpack.c.b16 %v2121_v41, %v2121_v41  ;;  %v8736_v56 = vrot.slane %v2523_v43, 1 }
 0x2d3   : > { %v3361_v6 = vsel %vm3341_vm10, %v3288_v0, %v8538_v48  ;;  %v2505_v55 = vrot.slane %v2503_v54, 1  ;;  %v2508_v49 = vshll.u32 %v8681_v1, 16  ;;  %v2518_v48 = vshll.u32 %v8645_v47, 16 }
 0x2d4   : > { %2614 = vrot.lane.b32.xlu2 %v2499_v28, %s6771_s30  ;;  %v3290_v28 = vsel %vm10356_vm9, %v3217_v50, %v2581_v5  ;;  %v2161_v5 = vpack.c.b16 %v8663_v60, %v8663_v60  ;;  %v3464_v25 = vunpack.c.l.b16 %v3361_v6  ;;  %v2729_v13 = vrot.slane %v8681_v1, 1  ;;  %v6049_v50 = vld [vmem:[%s6826_s22 + $0x138] sm:$0xf]  ;;  %v6667_v6 = vld [vmem:[%s6826_s22 + $0x110] sm:$0xf0] }
 0x2d5   : > { %v2510_v18 = vrot.slane %v2508_v49, 1  ;;  %v2520_v59 = vrot.slane %v2518_v48, 1  ;;  %v2512_v54 = vshrl.u32 %v8681_v1, 16  ;;  %v6772_v49 = vmov 0.0|0.0  }
 0x2d6   : > { %2220 = vrot.lane.b32.xlu1 %v8613_v26, %s6769_s28  ;;  %v8672_v31 = vpop.permute.xlu2 %2212  ;;  %v10546_v26 = vld [vmem:[#allocation21_spill] sm:$0xff]  ;;  %v4277_v48 = vunpack.c.l.b16 %v6772_v49 }
 0x2d7   : > { %2792 = vrot.lane.b32.xlu0 %v2727_v35, %s6770_s29 }
 0x2d8   : > { %6100 = vmatmul.msk.bf16.gmra.mxu0 %vm10355_vm11, %v3359_v8  ;;  %v8638_v3 = vpop.permute.xlu1 %2200  ;;  %v6666_v8 = vor.u32 %v6665_v57, %v6664_v23  ;;  %v8744_v23 = vunpack.c.l.b16 %v6049_v50 }
 0x2d9   : > { %v2761_v24 = vpop.permute.xlu0 %2760 }
 0x2da   : > { %v8677_v22 = vsel %vm3341_vm10, %v3290_v28, %v2761_v24  ;;  %v2728_v4 = vrot.slane %v6666_v8, 1  ;;  %v2506_v24 = vor.u32 %v2505_v55, %v2501_v46  ;;  %v2163_v1 = vpack.c.b16 %v8744_v23, %v8744_v23 }
 0x2db   : > { %v3465_v35 = vunpack.c.l.b16 %v8677_v22  ;;  %v3466_v8 = vunpack.c.h.b16 %v8677_v22  ;;  %v2732_v55 = vrot.slane %v8701_v63, 1 }
 0x2dc   : > { %2224 = vrot.lane.b32.xlu2 %v8645_v47, %s6769_s28  ;;  %v2730_v42 = vsel %vm1101_vm1, %v2728_v4, %v2729_v13  ;;  %v2511_v10 = vsel %vm704_vm0, %v2506_v24, %v2510_v18 }
 0x2dd   : > { %v3516_v29 = vpack.c.b16 %v3465_v35, %v3464_v25 }
 0x2de   : > { %2222 = vrot.lane.b32.xlu1 %v2157_v44, %s6769_s28  ;;  %v8709_v17 = vpop.permute.xlu2 %2588  ;;  %v2516_v44 = vshrl.u32 %v8645_v47, 16 }
 0x2df   : > { %2794 = vrot.lane.b32.xlu0 %v2726_v61, %s6770_s29  ;;  %v10545_v61 = vld [vmem:[#allocation5_spill] sm:$0xff] }
 0x2e0   : > { %v8683_v58 = vpop.permute.xlu1 %2202  ;;  %v625_v32 = vpack.c.b16 %v10545_v61, %v10545_v61  ;;  %v2521_v0 = vor.u32 %v2520_v59, %v2516_v44  ;;  %v10552_v59 = vld [vmem:[#allocation63_spill] sm:$0xff] }
 0x2e1   : > { %v2763_v39 = vpop.permute.xlu0 %2762 }
 0x2e2   : > { %v2842_v16 = vsel %vm2812_vm3, %v625_v32, %v10546_v26  ;;  %v2526_v61 = vsel %vm704_vm0, %v2521_v0, %v8736_v56 }
 0x2e3   : > { %v2927_v20 = vsel %vm2903_vm4, %v2842_v16, %v10547_v2  ;;  %v8765_v16 = vpack.c.b16 %v4277_v48, %v4277_v48  ;;  %v6728_v2 = vld [vmem:[%s6826_s22 + $0x60] sm:$0xff]   ;;  %v10559_v48 = vld [vmem:[#allocation53_spill] sm:$0xff] }
 0x2e4   : > { %2230 = vrot.lane.b32.xlu2 %v2161_v5, %s6769_s28  ;;  %v3000_v9 = vsel %vm10360_vm5, %v2927_v20, %v10548_v38  ;;  %v10551_v20 = vld [vmem:[#allocation31_spill] sm:$0xff] }
 0x2e5   : > { %v3073_v34 = vsel %vm3049_vm6, %v3000_v9, %v10549_v53  ;;  %v2844_v44 = vsel %vm2812_vm3, %v6728_v2, %v10551_v20  ;;  %v4374_v38 = vshrl.u32 %v8765_v16, 16  ;;  %v10553_v53 = vld [vmem:[#allocation90_spill] sm:$0xff]  ;;  %v10561_v2 = vld [vmem:[#allocation84_spill] sm:$0xff] }
 0x2e6   : > { %2228 = vrot.lane.b32.xlu1 %v8695_v52, %s6769_s28  ;;  %v3146_v47 = vsel %vm10357_vm7, %v3073_v34, %v10550_v62  ;;  %v2929_v43 = vsel %vm2903_vm4, %v2844_v44, %v10552_v59  ;;  %v10554_v62 = vld [vmem:[#allocation117_spill] sm:$0xff] }
 0x2e7   : > { %2226 = vrot.lane.b32.xlu0 %v2159_v12, %s6769_s28  ;;  %v3219_v28 = vsel %vm3195_vm8, %v3146_v47, %v8556_v36  ;;  %v2514_v12 = vor.u32 %v2512_v54, %v2510_v18  ;;  %v4376_v18 = vshll.u32 %v8765_v16, 16  ;;  %v3002_v34 = vsel %vm10360_vm5, %v2929_v43, %v10553_v53  ;;  %v10562_v44 = vld [vmem:[#allocation89_spill] sm:$0xff]  ;;  %v6730_v43 = vld [vmem:[%s6826_s22 + $0xa0] sm:$0xff]  }
 0x2e8   : > { %6101 = vmatmul.msk.bf16.gmra.mxu0 %vm10355_vm11, %v3516_v29  ;;  %v8712_v15 = vpop.permute.xlu1 %2208  ;;  %v3292_v41 = vsel %vm10356_vm9, %v3219_v28, %v8576_v40  ;;  %v8750_v40 = vpop.permute.xlu2 %2216  ;;  %v3075_v47 = vsel %vm3049_vm6, %v3002_v34, %v10554_v62  ;;  %v10555_v28 = vld [vmem:[#allocation144_spill] sm:$0xff]  ;;  %v10564_v53 = vld [vmem:[#allocation110_spill] sm:$0xff] }
 0x2e9   : > { %v8717_v7 = vpop.permute.xlu0 %2206  ;;  %v3365_v5 = vsel %vm3341_vm10, %v3292_v41, %v2763_v39  ;;  %v6669_v39 = vor.u32 %v6668_v14, %v6667_v6  ;;  %v4378_v9 = vrot.slane %v4376_v18, 1  ;;  %v3148_v0 = vsel %vm10357_vm7, %v3075_v47, %v10555_v28  ;;  %v10565_v62 = vld [vmem:[#allocation116_spill] sm:$0xff]  ;;  %v10566_v28 = vld [vmem:[#allocation58_spill] sm:$0xff] }
 0x2ea   : > { %v3467_v32 = vunpack.c.l.b16 %v3365_v5  ;;  %v3221_v41 = vsel %vm3195_vm8, %v3148_v0, %v8551_v19  ;;  %v10556_v5 = vld [vmem:[#allocation7_spill] sm:$0xff] }
 0x2eb   : > { %v2731_v46 = vrot.slane %v6669_v39, 1  ;;  %v4379_v50 = vor.u32 %v4378_v9, %v4374_v38  ;;  %v627_v6 = vpack.c.b16 %v10556_v5, %v10556_v5  ;;  %v10557_v39 = vld [vmem:[#allocation22_spill] sm:$0xff] }
 0x2ec   : > { %2232 = vrot.lane.b32.xlu2 %v8720_v37, %s6769_s28  ;;  %v3517_v25 = vpack.c.b16 %v3467_v32, %v3466_v8  ;;  %v10558_v8 = vld [vmem:[#allocation30_spill] sm:$0xff] }
 0x2ed   : > { %v2733_v22 = vsel %vm1101_vm1, %v2731_v46, %v2732_v55  ;;  %v8788_v54 = vsel %vm704_vm0, %v4379_v50, %v4378_v9  ;;  %v10563_v38 = vld [vmem:[#allocation26_spill] sm:$0xff] }
 0x2ee   : > { %2796 = vrot.lane.b32.xlu1 %v2730_v42, %s6770_s29  ;;  %v2864_v9 = vsel %vm2812_vm3, %v6730_v43, %v10563_v38 }
 0x2ef   : > { %2616 = vrot.lane.b32.xlu0 %v2511_v10, %s6771_s30  ;;  %v2945_v0 = vsel %vm2903_vm4, %v2864_v9, %v10566_v28  ;;  %v10576_v28 = vld [vmem:[#allocation34_spill] sm:$0xff] }
 0x2f0   : > { %v2765_v57 = vpop.permute.xlu1 %2764  ;;  %v8767_v24 = vpop.permute.xlu2 %2600 }
 0x2f1   : > { %v3646_v36 = vpop.f32.mrf.mxu0  ;;  %v2585_v35 = vpop.permute.xlu0 %2584 }
 0x2f2   : > { %v3294_v14 = vsel %vm10356_vm9, %v3221_v41, %v2585_v35  ;;  %v3854_v36 = vlaneseq  ;;  %v10567_v41 = vld [vmem:[#allocation137_spill] sm:$0xff] }
 0x2f3   : > { %v3367_v19 = vsel %vm3341_vm10, %v3294_v14, %v2765_v57 }
 0x2f4   : > { %2620 = vrot.lane.b32.xlu2 %v2526_v61, %s6771_s30  ;;  %v3855_v49 = vshrl.u32 %v3854_v36, 7 }
 0x2f6   : > { %2618 = vrot.lane.b32.xlu1 %v2514_v12, %s6771_s30  ;;  %v2527_v12 = vshrl.u32 %v8701_v63, 16  ;;  %v8834_v36 = vadd.s32 4294967295, %v3855_v49  ;;  %v10605_v63 = vld [vmem:[#allocation69_spill] sm:$0xff] }
 0x2f7   : > { %2234 = vrot.lane.b32.xlu0 %v2163_v1, %s6769_s28  ;;  %v6729_v1 = vld [vmem:[%s6826_s22 + $0x70] sm:$0xff]  }
 0x2f8   : > { %6102 = vmatmul.msk.bf16.gmra.mxu0 %vm10355_vm11, %v3517_v25  ;;  %v2587_v29 = vpop.permute.xlu1 %2586  ;;  %v8795_v32 = vpop.permute.xlu2 %2602  ;;  %v2849_v35 = vsel %vm2812_vm3, %v6729_v1, %v10557_v39  ;;  %v2847_v25 = vsel %vm2812_vm3, %v627_v6, %v10558_v8  ;;  %v2529_v50 = vor.u32 %v2527_v12, %v8736_v56  ;;  %v10568_v6 = vld [vmem:[#allocation143_spill] sm:$0xff]  ;;  %v10570_v39 = vld [vmem:[#allocation9_spill] sm:$0xff]  ;;  %v10571_v8 = vld [vmem:[#allocation112_spill] sm:$0xff]  ;;  %vm3915_vm12 = vcmp.ge.s32.totalorder %v8834_v36, 0 }
 0x2f9   : > { %v3648_v4 = vpop.f32.mrf.mxu0  ;;  %v8760_v26 = vpop.permute.xlu0 %2214 }
 0x2fa   : > { %v2933_v4 = vsel %vm2903_vm4, %v2849_v35, %v10559_v48  ;;  %v635_v35 = vpack.c.b16 %v10570_v39, %v10570_v39 }
 0x2fb   : > { %v3006_v20 = vsel %vm10360_vm5, %v2933_v4, %v10561_v2 }
 0x2fc   : > { %4565 = vrot.lane.b32.xlu2 %v8788_v54, %s6765_s24  ;;  %v3079_v34 = vsel %vm3049_vm6, %v3006_v20, %v10564_v53  ;;  %v10573_v20 = vld [vmem:[#allocation6_spill] sm:$0xff]  ;;  %v6731_v53 = vld [vmem:[%s6826_s22 + $0xb0] sm:$0xff]  }
 0x2fd   : > { %v3152_v5 = vsel %vm10357_vm7, %v3079_v34, %v10567_v41  ;;  %v10574_v34 = vld [vmem:[#allocation39_spill] sm:$0xff] }
 0x2fe   : > { %2800 = vrot.lane.b32.xlu1 %v2733_v22, %s6770_s29  ;;  %v10560_v22 = vld [vmem:[#allocation62_spill] sm:$0xff]  ;;  %v3225_v56 = vsel %vm3195_vm8, %v3152_v5, %v8580_v30  ;;  %v10578_v5 = vld [vmem:[#allocation72_spill] sm:$0xff] }
 0x2ff   : > { %2798 = vrot.lane.b32.xlu0 %v2729_v13, %s6770_s29  ;;  %v4597_v13 = vrot.slane %v8765_v16, 1  ;;  %v2931_v57 = vsel %vm2903_vm4, %v2847_v25, %v10560_v22  ;;  %v3298_v48 = vsel %vm10356_vm9, %v3225_v56, %v8709_v17  ;;  %v10572_v22 = vld [vmem:[#allocation139_spill] sm:$0xff] }
 0x300   : > { %v2769_v42 = vpop.permute.xlu1 %2768  ;;  %v3004_v59 = vsel %vm10360_vm5, %v2931_v57, %v10562_v44  ;;  %v629_v44 = vpack.c.b16 %v10573_v20, %v10573_v20  ;;  %v10581_v56 = vld [vmem:[#allocation99_spill] sm:$0xff] }
 0x301   : > { %v2767_v10 = vpop.permute.xlu0 %2766  ;;  %v3077_v47 = vsel %vm3049_vm6, %v3004_v59, %v10565_v62  ;;  %v2785_v59 = vpop.permute.xlu2 %2784  ;;  %v2869_v62 = vsel %vm2812_vm3, %v6731_v53, %v10574_v34 }
 0x302   : > { %v3150_v14 = vsel %vm10357_vm7, %v3077_v47, %v10568_v6  ;;  %v10575_v47 = vld [vmem:[#allocation40_spill] sm:$0xff] }
 0x303   : > { %v3223_v1 = vsel %vm3195_vm8, %v3150_v14, %v8442_v21  ;;  %v8852_v21 = vsel %vm3341_vm10, %v3298_v48, %v2769_v42  ;;  %v10579_v14 = vld [vmem:[#allocation66_spill] sm:$0xff] }
 0x304   : > { %v3296_v4 = vsel %vm10356_vm9, %v3223_v1, %v2587_v29 }
 0x305   : > { %v3651_v61 = vpop.f32.mrf.mxu0  ;;  %v3369_v30 = vsel %vm3341_vm10, %v3296_v4, %v2767_v10  ;;  %v3471_v10 = vunpack.c.l.b16 %v8852_v21 }
 0x306   : > { %v10569_v61 = vld [vmem:[#allocation86_spill] sm:$0xff]  ;;  %v3470_v38 = vunpack.c.l.b16 %v3369_v30 }
 0x307   : > { %4645 = vrot.lane.b32.xlu0 %v4597_v13, %s6767_s26 }
 0x308   : > { %6103 = vmatmul.msk.bf16.gmra.mxu0 %vm10355_vm11, %v3367_v19  ;;  %v8808_v46 = vpop.permute.xlu1 %2770  ;;  %v3018_v19 = vsel %vm10360_vm5, %v2945_v0, %v10569_v61  ;;  %v10577_v0 = vld [vmem:[#allocation71_spill] sm:$0xff] }
 0x309   : > { %v8814_v18 = vpop.permute.xlu0 %2590  ;;  %v3091_v25 = vsel %vm3049_vm6, %v3018_v19, %v10571_v8  ;;  %v2949_v41 = vsel %vm2903_vm4, %v2869_v62, %v10577_v0  ;;  %v10580_v19 = vld [vmem:[#allocation98_spill] sm:$0xff] }
 0x30a   : > { %v3164_v57 = vsel %vm10357_vm7, %v3091_v25, %v10572_v22  ;;  %v3022_v1 = vsel %vm10360_vm5, %v2949_v41, %v10580_v19  ;;  %v10582_v8 = vld [vmem:[#allocation126_spill] sm:$0xff]  ;;  %v3519_v22 = vpack.c.b16 %v3471_v10, %v3470_v38  ;;  %v10588_v38 = vld [vmem:[#allocation147_spill] sm:$0xff] }
 0x30b   : > { %v3237_v17 = vsel %vm3195_vm8, %v3164_v57, %v8595_v51  ;;  %v2867_v51 = vsel %vm2812_vm3, %v635_v35, %v10575_v47  ;;  %v3857_v35 = vadd.s32 16, %v3855_v49  ;;  %v10583_v57 = vld [vmem:[#allocation93_spill] sm:$0xff] }
 0x30c   : > { %v3310_v42 = vsel %vm10356_vm9, %v3237_v17, %v8767_v24  ;;  %v2852_v24 = vsel %vm2812_vm3, %v629_v44, %v10576_v28  ;;  %v2947_v6 = vsel %vm2903_vm4, %v2867_v51, %v10578_v5  ;;  %v10585_v44 = vld [vmem:[#allocation153_spill] sm:$0xff] }
 0x30d   : > { %v3653_v12 = vpop.f32.mrf.mxu0  ;;  %v2935_v61 = vsel %vm2903_vm4, %v2852_v24, %v10579_v14  ;;  %v8908_v28 = vadd.s32 4294967295, %v3857_v35  ;;  %v2607_v24 = vpop.permute.xlu2 %2606 }
 0x30e   : > { %v3784_v2 = vmax.f32 %v3653_v12, 0.0  ;;  %v3020_v12 = vsel %vm10360_vm5, %v2947_v6, %v10581_v56  ;;  %v3008_v30 = vsel %vm10360_vm5, %v2935_v61, %v10583_v57  ;;  %v10590_v57 = vld [vmem:[#allocation29_spill] sm:$0xff] }
 0x30f   : > { %2622 = vrot.lane.b32.xlu0 %v2529_v50, %s6771_s30  ;;  %v3093_v25 = vsel %vm3049_vm6, %v3020_v12, %v10582_v8  ;;  %vm3974_vm13 = vcmp.lt.s32.totalorder %v8908_v28, 16 }
 0x310   : > { %v8861_v29 = vpop.permute.xlu1 %2218  ;;  %v4140_v50 = vsel %vm3915_vm12, %v3784_v2, 0.0  ;;  %v10584_v2 = vld [vmem:[#allocation125_spill] sm:$0xff]  ;;  %v3166_v17 = vsel %vm10357_vm7, %v3093_v25, %v10585_v44 }
 0x311   : > { %v2781_v43 = vpop.permute.xlu0 %2780  ;;  %v4194_v48 = vpack.c.bf16 %v4140_v50, %v4140_v50  ;;  %v3095_v20 = vsel %vm3049_vm6, %v3022_v1, %v10584_v2  ;;  %v3239_v53 = vsel %vm3195_vm8, %v3166_v17, %v8717_v7 }
 0x312   : > { %v3383_v9 = vsel %vm3341_vm10, %v3310_v42, %v2781_v43  ;;  %v10586_v42 = vld [vmem:[#allocation120_spill] sm:$0xff]  ;;  %v3312_v51 = vsel %vm10356_vm9, %v3239_v53, %v8795_v32 }
 0x313   : > { %6109 = vmatmul.msk.bf16.vlgmr.msra.gmra.mxu3 %vm10355_vm11, %v3383_v9  ;;  %v3081_v43 = vsel %vm3049_vm6, %v3008_v30, %v10586_v42  ;;  %v10587_v9 = vld [vmem:[#allocation152_spill] sm:$0xff]  ;;  %v4279_v0 = vunpack.c.l.b16 %v4194_v48  ;;  %v3472_v30 = vunpack.c.h.b16 %v8852_v21  ;;  %v10593_v21 = vld [vmem:[#allocation115_spill] sm:$0xff] }
 0x314   : > { %v3168_v49 = vsel %vm10357_vm7, %v3095_v20, %v10587_v9  ;;  %v3154_v62 = vsel %vm10357_vm7, %v3081_v43, %v10588_v38  ;;  %v10591_v20 = vld [vmem:[#allocation61_spill] sm:$0xff]  ;;  %v10592_v9 = vld [vmem:[#allocation88_spill] sm:$0xff] }
 0x315   : > { %v3656_v39 = vpop.f32.mrf.mxu0  ;;  %v3241_v47 = vsel %vm3195_vm8, %v3168_v49, %v8712_v15  ;;  %v3227_v6 = vsel %vm3195_vm8, %v3154_v62, %v8578_v27  ;;  %v2787_v2 = vpop.permute.xlu2 %2786 }
 0x316   : > { %v3785_v4 = vmax.f32 %v3656_v39, 0.0  ;;  %v3300_v15 = vsel %vm10356_vm9, %v3227_v6, %v8814_v18 }
 0x317   : > { %v3373_v27 = vsel %vm3341_vm10, %v3300_v15, %v8808_v46 }
 0x318   : > { %v4195_v34 = vpack.c.bf16 %v3785_v4, %v3785_v4  ;;  %6104 = vmatmul.msk.bf16.gmra.mxu0 %vm10355_vm11, %v3519_v22  ;;  %v2783_v10 = vpop.permute.xlu1 %2782  ;;  %v3473_v4 = vunpack.c.l.b16 %v3373_v27  ;;  %v6066_v27 = vld [vmem:[%s6826_s22 + $0x12c] sm:$0x1] }
 0x319   : > { %v2605_v50 = vpop.permute.xlu0 %2604  ;;  %v3385_v7 = vsel %vm3341_vm10, %v3312_v51, %v2783_v10 }
 0x31a   : > { %v4280_v41 = vunpack.c.l.b16 %v4195_v34  ;;  %v3314_v5 = vsel %vm10356_vm9, %v3241_v47, %v2605_v50  ;;  %v3482_v61 = vunpack.c.l.b16 %v3385_v7  ;;  %v3520_v53 = vpack.c.b16 %v3473_v4, %v3472_v30 }
 0x31b   : > { %v8915_v14 = vsel %vm3341_vm10, %v3314_v5, %v2785_v59  ;;  %v10589_v59 = vld [vmem:[#allocation11_spill] sm:$0xff]  ;;  %v2533_v30 = vshll.u32 %v8695_v52, 16 }
 0x31c   : > { %v8919_v32 = vpack.c.b16 %v4280_v41, %v4279_v0  ;;  %v3483_v19 = vunpack.c.l.b16 %v8915_v14  ;;  %v637_v12 = vpack.c.b16 %v10589_v59, %v10589_v59  ;;  %v10594_v0 = vld [vmem:[#allocation142_spill] sm:$0xff] }
 0x31d   : > { %v3658_v1 = vpop.f32.mrf.mxu0 }
 0x31e   : > { %v3786_v56 = vmax.f32 %v3658_v1, 0.0  ;;  %4682 = vrot.lane.b32.xlu1 %v8919_v32, %s6769_s28  ;;  %v3525_v25 = vpack.c.b16 %v3483_v19, %v3482_v61  ;;  %v4388_v48 = vshll.u32 %v8919_v32, 16  ;;  %v2872_v46 = vsel %vm2812_vm3, %v637_v12, %v10590_v57 }
 0x31f   : > { %v2951_v44 = vsel %vm2903_vm4, %v2872_v46, %v10591_v20  ;;  %v4600_v34 = vrot.slane %v8919_v32, 1  ;;  %v4386_v47 = vshrl.u32 %v8919_v32, 16  ;;  %v2270_v46 = vunpack.c.l.b16 %v6066_v27  ;;  %v10597_v20 = vld [vmem:[#allocation92_spill] sm:$0xff]  ;;  %v6734_v27 = vld [vmem:[%s6826_s22 + $0xc0] sm:$0xff]  }
 0x320   : > { %v4142_v18 = vsel %vm3974_vm13, %v3786_v56, 0.0  ;;  %v8931_v39 = vpop.permute.xlu1 %2772  ;;  %v4390_v43 = vrot.slane %v4388_v48, 1  ;;  %v3024_v49 = vsel %vm10360_vm5, %v2951_v44, %v10592_v9  ;;  %v10599_v9 = vld [vmem:[#allocation119_spill] sm:$0xff] }
 0x321   : > { %v4196_v35 = vpack.c.bf16 %v4142_v18, %v4142_v18  ;;  %v8933_v8 = vpop.permute.xlu0 %2592  ;;  %v3097_v51 = vsel %vm3049_vm6, %v3024_v49, %v10593_v21  ;;  %v6732_v18 = vld [vmem:[%s6826_s22 + $0x80] sm:$0xff]  }
 0x322   : > { %v3170_v41 = vsel %vm10357_vm7, %v3097_v51, %v10594_v0  ;;  %v4391_v15 = vor.u32 %v4390_v43, %v4386_v47  ;;  %v8992_v51 = vpack.c.b16 %v2270_v46, %v8663_v60  ;;  %v2531_v0 = vshrl.u32 %v8695_v52, 16  ;;  %v6733_v60 = vld [vmem:[%s6826_s22 + $0x90] sm:$0xff]  }
 0x323   : > { %v4342_v22 = vunpack.c.l.b16 %v4196_v35  ;;  %6110 = vmatmul.msk.bf16.gmra.mxu3 %vm10355_vm11, %v3525_v25  ;;  %v3243_v61 = vsel %vm3195_vm8, %v3170_v41, %v8620_v45  ;;  %v3484_v45 = vunpack.c.h.b16 %v8915_v14  ;;  %v10595_v35 = vld [vmem:[#allocation33_spill] sm:$0xff]  ;;  %v2535_v41 = vrot.slane %v2533_v30, 1  ;;  %v10608_v30 = vld [vmem:[#allocation96_spill] sm:$0xff] }
 0x324   : > { %v3316_v19 = vsel %vm10356_vm9, %v3243_v61, %v2607_v24  ;;  %v2854_v25 = vsel %vm2812_vm3, %v6732_v18, %v10595_v35  ;;  %v8976_v24 = vpop.permute.xlu2 %2598  ;;  %v10601_v61 = vld [vmem:[#allocation24_spill] sm:$0xff] }
 0x325   : > { %v4358_v17 = vpack.c.b16 %v4342_v22, %v4342_v22  ;;  %v3661_v42 = vpop.f32.mrf.mxu0  ;;  %v3389_v59 = vsel %vm3341_vm10, %v3316_v19, %v2787_v2  ;;  %v10596_v22 = vld [vmem:[#allocation65_spill] sm:$0xff]  ;;  %v2536_v35 = vor.u32 %v2535_v41, %v2531_v0  ;;  %v10613_v41 = vld [vmem:[#allocation138_spill] sm:$0xff] }
 0x326   : > { %v3787_v62 = vmax.f32 %v3661_v42, 0.0  ;;  %v2937_v57 = vsel %vm2903_vm4, %v2854_v25, %v10596_v22  ;;  %v3485_v2 = vunpack.c.l.b16 %v3389_v59  ;;  %v10598_v42 = vld [vmem:[#allocation8_spill] sm:$0xff]  ;;  %v10603_v59 = vld [vmem:[#allocation43_spill] sm:$0xff] }
 0x327   : > { %v4393_v10 = vshll.u32 %v4358_v17, 16  ;;  %v4601_v38 = vrot.slane %v4358_v17, 1  ;;  %v3010_v44 = vsel %vm10360_vm5, %v2937_v57, %v10597_v20  ;;  %v631_v43 = vpack.c.b16 %v10598_v42, %v10598_v42  ;;  %v10607_v57 = vld [vmem:[#allocation85_spill] sm:$0xff]  ;;  %v10609_v42 = vld [vmem:[#allocation102_spill] sm:$0xff] }
 0x328   : > { %6105 = vmatmul.msk.bf16.gmra.mxu0 %vm10355_vm11, %v3520_v53  ;;  %v8949_v50 = vpop.permute.xlu1 %2596  ;;  %v4143_v1 = vsel %vm3915_vm12, %v3787_v62, 0.0  ;;  %v3083_v49 = vsel %vm3049_vm6, %v3010_v44, %v10599_v9 }
 0x329   : > { %v4395_v7 = vrot.slane %v4393_v10, 1  ;;  %v8953_v5 = vpop.permute.xlu0 %2594  ;;  %v8956_v6 = vsel %vm1101_vm1, %v4600_v34, %v4601_v38  ;;  %v4197_v48 = vpack.c.bf16 %v4143_v1, %v4143_v1  ;;  %v3526_v34 = vpack.c.b16 %v3485_v2, %v3484_v45  ;;  %v10600_v10 = vld [vmem:[#allocation146_spill] sm:$0xff]  ;;  %v10602_v1 = vld [vmem:[#allocation37_spill] sm:$0xff] }
 0x32a   : > { %4764 = vrot.lane.b32.xlu1 %v8956_v6, %s6773_s11  ;;  %v3156_v38 = vsel %vm10357_vm7, %v3083_v49, %v10600_v10  ;;  %v2859_v52 = vsel %vm2812_vm3, %v6733_v60, %v10602_v1  ;;  %v2874_v45 = vsel %vm2812_vm3, %v6734_v27, %v10603_v59  ;;  %v10610_v10 = vld [vmem:[#allocation111_spill] sm:$0xff]  ;;  %v10615_v1 = vld [vmem:[#allocation13_spill] sm:$0xff] }
 0x32b   : > { %v8966_v56 = vsel %vm704_vm0, %v4391_v15, %v4395_v7  ;;  %v4281_v62 = vunpack.c.l.b16 %v4197_v48  ;;  %v3229_v21 = vsel %vm3195_vm8, %v3156_v38, %v8591_v11  ;;  %v2857_v11 = vsel %vm2812_vm3, %v631_v43, %v10601_v61  ;;  %v10614_v61 = vld [vmem:[#allocation150_spill] sm:$0xff]  ;;  %v10616_v27 = vld [vmem:[#allocation155_spill] sm:$0xff] }
 0x32c   : > { %4729 = vrot.lane.b32.xlu2 %v8966_v56, %s6770_s29  ;;  %v3302_v7 = vsel %vm10356_vm9, %v3229_v21, %v8933_v8  ;;  %v2538_v48 = vshll.u32 %v8992_v51, 16  ;;  %v2789_v20 = vpop.permute.xlu2 %2788  ;;  %v10612_v21 = vld [vmem:[#allocation129_spill] sm:$0xff] }
 0x32d   : > { %v3663_v12 = vpop.f32.mrf.mxu0  ;;  %v3375_v25 = vsel %vm3341_vm10, %v3302_v7, %v8931_v39 }
 0x32e   : > { %v3788_v4 = vmax.f32 %v3663_v12, 0.0  ;;  %v10604_v12 = vld [vmem:[#allocation55_spill] sm:$0xff] }
 0x32f   : > { %v2939_v8 = vsel %vm2903_vm4, %v2857_v11, %v10604_v12 }
 0x330   : > { %v4198_v14 = vpack.c.bf16 %v3788_v4, %v3788_v4  ;;  %v2777_v17 = vpop.permute.xlu1 %2776  ;;  %v10606_v4 = vld [vmem:[#allocation75_spill] sm:$0xff]  ;;  %v3012_v46 = vsel %vm10360_vm5, %v2939_v8, %v10607_v57 }
 0x331   : > { %v2775_v53 = vpop.permute.xlu0 %2774  ;;  %v2953_v22 = vsel %vm2903_vm4, %v2874_v45, %v10606_v4  ;;  %v3085_v38 = vsel %vm3049_vm6, %v3012_v46, %v10610_v10 }
 0x332   : > { %v4282_v47 = vunpack.c.l.b16 %v4198_v14  ;;  %v3026_v39 = vsel %vm10360_vm5, %v2953_v22, %v10609_v42  ;;  %v3158_v7 = vsel %vm10357_vm7, %v3085_v38, %v10613_v41  ;;  %v6735_v42 = vld [vmem:[%s6826_s22 + $0xd0] sm:$0xff]   ;;  %v10621_v41 = vld [vmem:[#allocation74_spill] sm:$0xff] }
 0x333   : > { %6111 = vmatmul.msk.bf16.gmra.mxu3 %vm10355_vm11, %v3526_v34  ;;  %v9034_v34 = vrot.slane %v2538_v48, 1  ;;  %v3099_v0 = vsel %vm3049_vm6, %v3026_v39, %v10612_v21  ;;  %v3231_v45 = vsel %vm3195_vm8, %v3158_v7, %v8510_v33  ;;  %v10617_v39 = vld [vmem:[#allocation32_spill] sm:$0xff] }
 0x334   : > { %v8998_v15 = vpack.c.b16 %v4282_v47, %v4281_v62  ;;  %2802 = vrot.lane.b32.xlu2 %v2732_v55, %s6770_s29  ;;  %v2941_v55 = vsel %vm2903_vm4, %v2859_v52, %v10605_v63  ;;  %v10611_v62 = vld [vmem:[#allocation123_spill] sm:$0xff]  ;;  %v639_v52 = vpack.c.b16 %v10615_v1, %v10615_v1  ;;  %v3172_v59 = vsel %vm10357_vm7, %v3099_v0, %v10616_v27  ;;  %v10620_v21 = vld [vmem:[#allocation64_spill] sm:$0xff]  ;;  %v10624_v27 = vld [vmem:[#allocation118_spill] sm:$0xff] }
 0x335   : > { %v3666_v19 = vpop.f32.mrf.mxu0  ;;  %v3014_v2 = vsel %vm10360_vm5, %v2941_v55, %v10608_v30  ;;  %v9048_v60 = vsel %vm704_vm0, %v2536_v35, %v9034_v34 }
 0x336   : > { %v3789_v18 = vmax.f32 %v3666_v19, 0.0  ;;  %4801 = vrot.lane.b32.xlu0 %v8998_v15, %s6774_s12  ;;  %v4400_v49 = vshll.u32 %v8998_v15, 16  ;;  %v3087_v47 = vsel %vm3049_vm6, %v3014_v2, %v10611_v62  ;;  %v4398_v22 = vshrl.u32 %v8998_v15, 16  ;;  %v2791_v2 = vpop.permute.xlu2 %2790  ;;  %v10619_v62 = vld [vmem:[#allocation10_spill] sm:$0xff] }
 0x337   : > { %v3160_v11 = vsel %vm10357_vm7, %v3087_v47, %v10614_v61  ;;  %v633_v47 = vpack.c.b16 %v10619_v62, %v10619_v62  ;;  %v10622_v61 = vld [vmem:[#allocation91_spill] sm:$0xff]  ;;  %v10632_v62 = vld [vmem:[#allocation149_spill] sm:$0xff] }
 0x338   : > { %v4145_v44 = vsel %vm3974_vm13, %v3789_v18, 0.0  ;;  %6106 = vmatmul.msk.bf16.gmra.mxu0 %vm10355_vm11, %v3375_v25  ;;  %v2609_v14 = vpop.permute.xlu1 %2608  ;;  %v3233_v12 = vsel %vm3195_vm8, %v3160_v11, %v8638_v3  ;;  %v3304_v18 = vsel %vm10356_vm9, %v3231_v45, %v8953_v5  ;;  %v4402_v35 = vrot.slane %v4400_v49, 1  ;;  %v10618_v49 = vld [vmem:[#allocation42_spill] sm:$0xff]  ;;  %v10625_v45 = vld [vmem:[#allocation128_spill] sm:$0xff] }
 0x339   : > { %v4199_v43 = vpack.c.bf16 %v4145_v44, %v4145_v44  ;;  %v9031_v9 = vpop.permute.xlu0 %2778  ;;  %v3306_v8 = vsel %vm10356_vm9, %v3233_v12, %v8949_v50  ;;  %v3245_v25 = vsel %vm3195_vm8, %v3172_v59, %v8672_v31  ;;  %v3377_v33 = vsel %vm3341_vm10, %v3304_v18, %v2775_v53 }
 0x33a   : > { %v9065_v48 = vsel %vm3341_vm10, %v3306_v8, %v2777_v17  ;;  %v4603_v3 = vrot.slane %v8998_v15, 1  ;;  %v3318_v5 = vsel %vm10356_vm9, %v3245_v25, %v2609_v14  ;;  %v4403_v53 = vor.u32 %v4402_v35, %v4398_v22  ;;  %v10627_v35 = vld [vmem:[#allocation154_spill] sm:$0xff] }
 0x33b   : > { %v4343_v19 = vunpack.c.l.b16 %v4199_v43  ;;  %v3476_v44 = vunpack.c.l.b16 %v3377_v33  ;;  %v3391_v14 = vsel %vm3341_vm10, %v3318_v5, %v2789_v20  ;;  %v2879_v43 = vsel %vm2812_vm3, %v6735_v42, %v10617_v39  ;;  %v10630_v42 = vld [vmem:[#allocation95_spill] sm:$0xff] }
 0x33c   : > { %v2877_v10 = vsel %vm2812_vm3, %v639_v52, %v10618_v49  ;;  %v2957_v0 = vsel %vm2903_vm4, %v2879_v43, %v10620_v21 }
 0x33d   : > { %v4359_v63 = vpack.c.b16 %v4343_v19, %v4343_v19  ;;  %v3668_v55 = vpop.f32.mrf.mxu0  ;;  %v2955_v20 = vsel %vm2903_vm4, %v2877_v10, %v10621_v41  ;;  %v3030_v11 = vsel %vm10360_vm5, %v2957_v0, %v10622_v61  ;;  %v10623_v19 = vld [vmem:[#allocation101_spill] sm:$0xff] }
 0x33e   : > { %4567 = vrot.lane.b32.xlu0 %v8966_v56, %s6765_s24  ;;  %v3790_v57 = vmax.f32 %v3668_v55, 0.0  ;;  %v3477_v56 = vunpack.c.l.b16 %v9065_v48  ;;  %v3028_v1 = vsel %vm10360_vm5, %v2955_v20, %v10623_v19  ;;  %v3103_v59 = vsel %vm3049_vm6, %v3030_v11, %v10624_v27 }
 0x33f   : > { %v4405_v50 = vshll.u32 %v4359_v63, 16  ;;  %v4604_v4 = vrot.slane %v4359_v63, 1  ;;  %v3101_v12 = vsel %vm3049_vm6, %v3028_v1, %v10625_v45  ;;  %v10626_v63 = vld [vmem:[#allocation145_spill] sm:$0xff] }
 0x340   : > { %v2613_v46 = vpop.permute.xlu1 %2612  ;;  %v4146_v7 = vsel %vm3915_vm12, %v3790_v57, 0.0  ;;  %v3522_v8 = vpack.c.b16 %v3477_v56, %v3476_v44  ;;  %v3176_v55 = vsel %vm10357_vm7, %v3103_v59, %v10626_v63  ;;  %v3174_v25 = vsel %vm10357_vm7, %v3101_v12, %v10627_v35  ;;  %v10634_v12 = vld [vmem:[#allocation45_spill] sm:$0xff] }
 0x341   : > { %v4407_v31 = vrot.slane %v4405_v50, 1  ;;  %v2611_v30 = vpop.permute.xlu0 %2610  ;;  %v9074_v17 = vsel %vm1101_vm1, %v4603_v3, %v4604_v4  ;;  %v4200_v33 = vpack.c.bf16 %v4146_v7, %v4146_v7  ;;  %v10628_v3 = vld [vmem:[#allocation36_spill] sm:$0xff]  ;;  %v3249_v4 = vsel %vm3195_vm8, %v3176_v55, %v8750_v40 }
 0x342   : > { %4883 = vrot.lane.b32.xlu2 %v9074_v17, %s6775_s13  ;;  %v2862_v50 = vsel %vm2812_vm3, %v633_v47, %v10628_v3  ;;  %v3247_v5 = vsel %vm3195_vm8, %v3174_v25, %v8760_v26  ;;  %v3322_v56 = vsel %vm10356_vm9, %v3249_v4, %v2613_v46  ;;  %v10631_v26 = vld [vmem:[#allocation122_spill] sm:$0xff]  ;;  %v2615_v47 = vpop.permute.xlu2 %2614  ;;  %v10633_v7 = vld [vmem:[#allocation12_spill] sm:$0xff]  ;;  %v3478_v25 = vunpack.c.h.b16 %v9065_v48 }
 0x343   : > { %6112 = vmatmul.msk.bf16.gmra.mxu3 %vm10355_vm11, %v3391_v14  ;;  %v9087_v38 = vsel %vm704_vm0, %v4403_v53, %v4407_v31  ;;  %v10629_v31 = vld [vmem:[#allocation68_spill] sm:$0xff]  ;;  %v3320_v44 = vsel %vm10356_vm9, %v3247_v5, %v2611_v30  ;;  %v4283_v10 = vunpack.c.l.b16 %v4200_v33  ;;  %v641_v61 = vpack.c.b16 %v10633_v7, %v10633_v7  ;;  %v10637_v33 = vld [vmem:[#allocation131_spill] sm:$0xff] }
 0x344   : > { %4848 = vrot.lane.b32.xlu1 %v9087_v38, %s6776_s14  ;;  %v2943_v53 = vsel %vm2903_vm4, %v2862_v50, %v10629_v31  ;;  %v3393_v30 = vsel %vm3341_vm10, %v3320_v44, %v2791_v2  ;;  %v10636_v55 = vld [vmem:[#allocation104_spill] sm:$0xff]  ;;  %v6670_v44 = vld [vmem:[%s6826_s22 + $0x120] sm:$0xf0] }
 0x345   : > { %v3671_v52 = vpop.f32.mrf.mxu0  ;;  %v3016_v39 = vsel %vm10360_vm5, %v2943_v53, %v10630_v42  ;;  %v3488_v1 = vunpack.c.l.b16 %v3393_v30 }
 0x346   : > { %v3791_v18 = vmax.f32 %v3671_v52, 0.0  ;;  %4731 = vrot.lane.b32.xlu0 %v9087_v38, %s6770_s29  ;;  %v3089_v49 = vsel %vm3049_vm6, %v3016_v39, %v10631_v26 }
 0x347   : > { %v3162_v46 = vsel %vm10357_vm7, %v3089_v49, %v10632_v62 }
 0x348   : > { %v4201_v22 = vpack.c.bf16 %v3791_v18, %v3791_v18  ;;  %6107 = vmatmul.msk.bf16.gmra.mxu0 %vm10355_vm11, %v3522_v8  ;;  %v9120_v57 = vpop.permute.xlu1 %2220  ;;  %v3235_v21 = vsel %vm3195_vm8, %v3162_v46, %v8683_v58  ;;  %v2882_v8 = vsel %vm2812_vm3, %v641_v61, %v10634_v12 }
 0x349   : > { %v2793_v14 = vpop.permute.xlu0 %2792  ;;  %v3308_v11 = vsel %vm10356_vm9, %v3235_v21, %v8976_v24 }
 0x34a   : > { %v4284_v40 = vunpack.c.l.b16 %v4201_v22  ;;  %v9129_v43 = vsel %vm3341_vm10, %v3322_v56, %v2793_v14  ;;  %4684 = vrot.lane.b32.xlu2 %v8998_v15, %s6769_s28  ;;  %v3381_v2 = vsel %vm3341_vm10, %v3308_v11, %v9031_v9  ;;  %v10635_v9 = vld [vmem:[#allocation77_spill] sm:$0xff]  ;;  %v10638_v22 = vld [vmem:[#allocation158_spill] sm:$0xff]  ;;  %v9172_v53 = vpop.permute.xlu2 %2224  ;;  %v2735_v11 = vrot.slane %v8992_v51, 1 }
 0x34b   : > { %v3489_v41 = vunpack.c.l.b16 %v9129_v43  ;;  %v3479_v24 = vunpack.c.l.b16 %v3381_v2  ;;  %v2959_v18 = vsel %vm2903_vm4, %v2882_v8, %v10635_v9  ;;  %v6671_v14 = vld [vmem:[%s6826_s22 + $0x120] sm:$0xe]  ;;  %v2542_v8 = vshrl.u32 %v8992_v51, 16 }
 0x34c   : > { %4647 = vrot.lane.b32.xlu1 %v8956_v6, %s6767_s26  ;;  %v9142_v0 = vpack.c.b16 %v4284_v40, %v4283_v10  ;;  %v3032_v35 = vsel %vm10360_vm5, %v2959_v18, %v10636_v55  ;;  %v6672_v21 = vor.u32 %v6671_v14, %v6670_v44  ;;  %v2548_v9 = vshll.u32 %v8720_v37, 16 }
 0x34d   : > { %v3673_v20 = vpop.f32.mrf.mxu0  ;;  %v3528_v59 = vpack.c.b16 %v3489_v41, %v3488_v1  ;;  %v3105_v3 = vsel %vm3049_vm6, %v3032_v35, %v10637_v33  ;;  %v3523_v56 = vpack.c.b16 %v3479_v24, %v3478_v25  ;;  %v6736_v33 = vld [vmem:[%s6826_s22 + $0xe0] sm:$0xff]  }
 0x34e   : > { %v3792_v19 = vmax.f32 %v3673_v20, 0.0  ;;  %v4412_v45 = vshll.u32 %v9142_v0, 16  ;;  %v3178_v31 = vsel %vm10357_vm7, %v3105_v3, %v10638_v22  ;;  %v4410_v40 = vshrl.u32 %v9142_v0, 16  ;;  %v10639_v3 = vld [vmem:[#allocation44_spill] sm:$0xff] }
 0x34f   : > { %v3251_v48 = vsel %vm3195_vm8, %v3178_v31, %v8861_v29  ;;  %v4606_v46 = vrot.slane %v9142_v0, 1  ;;  %v2734_v61 = vrot.slane %v6672_v21, 1 }
 0x350   : > { %v4148_v6 = vsel %vm3974_vm13, %v3792_v19, 0.0  ;;  %v9153_v58 = vpop.permute.xlu1 %2222  ;;  %v4414_v5 = vrot.slane %v4412_v45, 1  ;;  %v3324_v26 = vsel %vm10356_vm9, %v3251_v48, %v2615_v47  ;;  %v6067_v19 = vld [vmem:[%s6826_s22 + $0x13c] sm:$0x1] }
 0x351   : > { %v4202_v52 = vpack.c.bf16 %v4148_v6, %v4148_v6  ;;  %v2795_v27 = vpop.permute.xlu0 %2794 }
 0x352   : > { %4803 = vrot.lane.b32.xlu2 %v9142_v0, %s6774_s12  ;;  %v4415_v30 = vor.u32 %v4414_v5, %v4410_v40  ;;  %v3397_v29 = vsel %vm3341_vm10, %v3324_v26, %v2795_v27  ;;  %v9202_v6 = vpop.permute.xlu2 %2230  ;;  %v2550_v5 = vrot.slane %v2548_v9, 1 }
 0x353   : > { %v4344_v63 = vunpack.c.l.b16 %v4202_v52  ;;  %6113 = vmatmul.msk.bf16.gmra.mxu3 %vm10355_vm11, %v3528_v59  ;;  %v3491_v20 = vunpack.c.l.b16 %v3397_v29  ;;  %v2271_v52 = vunpack.c.l.b16 %v6067_v19  ;;  %v2736_v59 = vsel %vm1101_vm1, %v2734_v61, %v2735_v11  ;;  %v10644_v61 = vld [vmem:[#allocation14_spill] sm:$0xff] }
 0x354   : > { %4766 = vrot.lane.b32.xlu1 %v9074_v17, %s6773_s11  ;;  %v643_v19 = vpack.c.b16 %v10644_v61, %v10644_v61 }
 0x355   : > { %v4360_v50 = vpack.c.b16 %v4344_v63, %v4344_v63  ;;  %v3676_v4 = vpop.f32.mrf.mxu0  ;;  %v9218_v18 = vpack.c.b16 %v2271_v52, %v8744_v23 }
 0x356   : > { %v3793_v2 = vmax.f32 %v3676_v4, 0.0  ;;  %v2546_v4 = vshrl.u32 %v8720_v37, 16 }
 0x357   : > { %v4417_v42 = vshll.u32 %v4360_v50, 16  ;;  %v4607_v39 = vrot.slane %v4360_v50, 1  ;;  %v2884_v50 = vsel %vm2812_vm3, %v6736_v33, %v10639_v3  ;;  %v2553_v23 = vshll.u32 %v9218_v18, 16  ;;  %v10649_v3 = vld [vmem:[#allocation106_spill] sm:$0xff] }
 0x358   : > { %6108 = vmatmul.msk.bf16.gmra.mxu0 %vm10355_vm11, %v3523_v56  ;;  %v9181_v49 = vpop.permute.xlu1 %2228  ;;  %v4149_v45 = vsel %vm3915_vm12, %v3793_v2, 0.0  ;;  %v10640_v56 = vld [vmem:[#allocation76_spill] sm:$0xff] }
 0x359   : > { %v4419_v10 = vrot.slane %v4417_v42, 1  ;;  %v9183_v62 = vpop.permute.xlu0 %2226  ;;  %v9190_v41 = vsel %vm1101_vm1, %v4606_v46, %v4607_v39  ;;  %v4203_v63 = vpack.c.bf16 %v4149_v45, %v4149_v45  ;;  %v2961_v44 = vsel %vm2903_vm4, %v2884_v50, %v10640_v56  ;;  %v10642_v39 = vld [vmem:[#allocation130_spill] sm:$0xff]  ;;  %v10645_v45 = vld [vmem:[#allocation48_spill] sm:$0xff] }
 0x35a   : > { %2624 = vrot.lane.b32.xlu2 %v9048_v60, %s6771_s30  ;;  %v3490_v60 = vunpack.c.h.b16 %v9129_v43  ;;  %v9230_v14 = vpop.permute.xlu2 %2232 }
 0x35b   : > { %v9193_v47 = vsel %vm704_vm0, %v4415_v30, %v4419_v10  ;;  %v4285_v22 = vunpack.c.l.b16 %v4203_v63  ;;  %v10643_v10 = vld [vmem:[#allocation157_spill] sm:$0xff]  ;;  %v2551_v30 = vor.u32 %v2550_v5, %v2546_v4 }
 0x35c   : > { %4885 = vrot.lane.b32.xlu1 %v9190_v41, %s6775_s13  ;;  %4850 = vrot.lane.b32.xlu0 %v9193_v47, %s6776_s14  ;;  %v3529_v27 = vpack.c.b16 %v3491_v20, %v3490_v60  ;;  %v6673_v60 = vld [vmem:[%s6826_s22 + $0x130] sm:$0xf0] }
 0x35d   : > { %v3678_v7 = vpop.f32.mrf.mxu0 }
 0x35e   : > { %v3794_v1 = vmax.f32 %v3678_v7, 0.0  ;;  %v9249_v7 = vrot.slane %v2553_v23, 1 }
 0x360   : > { %v2797_v12 = vpop.permute.xlu1 %2796  ;;  %v4204_v43 = vpack.c.bf16 %v3794_v1, %v3794_v1  ;;  %v6674_v1 = vld [vmem:[%s6826_s22 + $0x130] sm:$0xe]  ;;  %v2556_v9 = vsel %vm704_vm0, %v2551_v30, %v9249_v7 }
 0x361   : > { %v2617_v24 = vpop.permute.xlu0 %2616  ;;  %v6675_v63 = vor.u32 %v6674_v1, %v6673_v60 }
 0x362   : > { %4649 = vrot.lane.b32.xlu2 %v9074_v17, %s6767_s26  ;;  %v2544_v17 = vor.u32 %v2542_v8, %v9034_v34  ;;  %v4286_v25 = vunpack.c.l.b16 %v4204_v43  ;;  %v10641_v34 = vld [vmem:[#allocation103_spill] sm:$0xff]  ;;  %v2621_v23 = vpop.permute.xlu2 %2620 }
 0x363   : > { %6114 = vmatmul.msk.bf16.gmra.mxu3 %vm10355_vm11, %v3529_v27  ;;  %v3034_v48 = vsel %vm10360_vm5, %v2961_v44, %v10641_v34  ;;  %v2737_v56 = vrot.slane %v6675_v63, 1  ;;  %v2738_v44 = vrot.slane %v9218_v18, 1  ;;  %v10652_v34 = vld [vmem:[#allocation121_spill] sm:$0xff] }
 0x364   : > { %4569 = vrot.lane.b32.xlu1 %v9087_v38, %s6765_s24  ;;  %2804 = vrot.lane.b32.xlu0 %v2736_v59, %s6770_s29  ;;  %v9235_v37 = vpack.c.b16 %v4286_v25, %v4285_v22  ;;  %v3107_v40 = vsel %vm3049_vm6, %v3034_v48, %v10642_v39  ;;  %v6737_v59 = vld [vmem:[%s6826_s22 + $0xf0] sm:$0xff]   ;;  %v10648_v25 = vld [vmem:[#allocation67_spill] sm:$0xff]  ;;  %v10651_v22 = vld [vmem:[#allocation133_spill] sm:$0xff] }
 0x365   : > { %v3681_v55 = vpop.f32.mrf.mxu0  ;;  %v3180_v46 = vsel %vm10357_vm7, %v3107_v40, %v10643_v10  ;;  %v2889_v8 = vsel %vm2812_vm3, %v6737_v59, %v10645_v45  ;;  %v10654_v40 = vld [vmem:[#allocation148_spill] sm:$0xff]  ;;  %v2739_v45 = vsel %vm1101_vm1, %v2737_v56, %v2738_v44 }
 0x366   : > { %v3795_v35 = vmax.f32 %v3681_v55, 0.0  ;;  %v3253_v2 = vsel %vm3195_vm8, %v3180_v46, %v9120_v57  ;;  %v4424_v27 = vshll.u32 %v9235_v37, 16  ;;  %v10646_v55 = vld [vmem:[#allocation35_spill] sm:$0xff] }
 0x367   : > { %v3326_v52 = vsel %vm10356_vm9, %v3253_v2, %v2617_v24  ;;  %v10647_v57 = vld [vmem:[#allocation79_spill] sm:$0xff] }
 0x368   : > { %v4151_v38 = vsel %vm3974_vm13, %v3795_v35, 0.0  ;;  %v2619_v26 = vpop.permute.xlu1 %2618  ;;  %v2887_v35 = vsel %vm2812_vm3, %v643_v19, %v10646_v55  ;;  %v3399_v24 = vsel %vm3341_vm10, %v3326_v52, %v2797_v12  ;;  %v4426_v4 = vrot.slane %v4424_v27, 1 }
 0x369   : > { %v4205_v31 = vpack.c.bf16 %v4151_v38, %v4151_v38  ;;  %v9247_v29 = vpop.permute.xlu0 %2234  ;;  %v2963_v33 = vsel %vm2903_vm4, %v2887_v35, %v10648_v25  ;;  %v10650_v38 = vld [vmem:[#allocation94_spill] sm:$0xff]  ;;  %v4422_v12 = vshrl.u32 %v9235_v37, 16 }
 0x36a   : > { %2626 = vrot.lane.b32.xlu2 %v2544_v17, %s6771_s30  ;;  %v2965_v17 = vsel %vm2903_vm4, %v2889_v8, %v10647_v57  ;;  %v3036_v5 = vsel %vm10360_vm5, %v2963_v33, %v10650_v38 }
 0x36b   : > { %v4345_v42 = vunpack.c.l.b16 %v4205_v31  ;;  %v3038_v50 = vsel %vm10360_vm5, %v2965_v17, %v10649_v3  ;;  %v3109_v48 = vsel %vm3049_vm6, %v3036_v5, %v10652_v34  ;;  %v4427_v19 = vor.u32 %v4426_v4, %v4422_v12  ;;  %v5183_v4 = vld [vmem:[%s10336_s2 + $0x20] sm:$0xf] }
 0x36c   : > { %4733 = vrot.lane.b32.xlu1 %v9193_v47, %s6770_s29  ;;  %4686 = vrot.lane.b32.xlu0 %v9142_v0, %s6769_s28  ;;  %v3111_v31 = vsel %vm3049_vm6, %v3038_v50, %v10651_v22  ;;  %v3182_v10 = vsel %vm10357_vm7, %v3109_v48, %v10654_v40  ;;  %v4609_v50 = vrot.slane %v9235_v37, 1  ;;  %v5601_v38 = vunpack.c.l.b16 %v5183_v4  ;;  %v10656_v48 = vld [vmem:[#allocation47_spill] sm:$0xff] }
 0x36d   : > { %v9245_v21 = vpack.c.b16 %v4345_v42, %v4345_v42  ;;  %v3683_v20 = vpop.f32.mrf.mxu0  ;;  %v10653_v42 = vld [vmem:[#allocation160_spill] sm:$0xff]  ;;  %v3255_v60 = vsel %vm3195_vm8, %v3182_v10, %v9153_v58  ;;  %v6244_v10 = vld [vmem:[%s10336_s2 + $0x18] sm:$0xff]  ;;  %v6242_v4 = vld [vmem:[%s10336_s2 + $0x8] sm:$0xff] }
 0x36e   : > { %v3184_v39 = vsel %vm10357_vm7, %v3111_v31, %v10653_v42  ;;  %v3796_v1 = vmax.f32 %v3683_v20, 0.0  ;;  %v3328_v52 = vsel %vm10356_vm9, %v3255_v60, %v2619_v26  ;;  %v9316_v26 = vpop.permute.xlu2 %4565  ;;  %v10655_v31 = vld [vmem:[#allocation16_spill] sm:$0xff] }
 0x36f   : > { %v4429_v43 = vshll.u32 %v9245_v21, 16  ;;  %v3257_v46 = vsel %vm3195_vm8, %v3184_v39, %v9172_v53  ;;  %v4610_v35 = vrot.slane %v9245_v21, 1  ;;  %v10657_v39 = vld [vmem:[#allocation78_spill] sm:$0xff] }
 0x370   : > { %v2801_v30 = vpop.permute.xlu1 %2800  ;;  %v3330_v2 = vsel %vm10356_vm9, %v3257_v46, %v2621_v23  ;;  %v4152_v58 = vsel %vm3915_vm12, %v3796_v1, 0.0  ;;  %v645_v23 = vpack.c.b16 %v10655_v31, %v10655_v31  ;;  %v10658_v46 = vld [vmem:[#allocation105_spill] sm:$0xff]  ;;  %v10660_v1 = vld [vmem:[#allocation159_spill] sm:$0xff] }
 0x371   : > { %v4431_v51 = vrot.slane %v4429_v43, 1  ;;  %v2799_v61 = vpop.permute.xlu0 %2798  ;;  %v9306_v53 = vsel %vm3341_vm10, %v3330_v2, %v2801_v30  ;;  %v4206_v57 = vpack.c.bf16 %v4152_v58, %v4152_v58  ;;  %v9332_v22 = vsel %vm1101_vm1, %v4609_v50, %v4610_v35 }
 0x372   : > { %2806 = vrot.lane.b32.xlu2 %v2735_v11, %s6770_s29  ;;  %v3401_v8 = vsel %vm3341_vm10, %v3328_v52, %v2799_v61  ;;  %v3495_v20 = vunpack.c.l.b16 %v9306_v53  ;;  %v2892_v42 = vsel %vm2812_vm3, %v645_v23, %v10656_v48  ;;  %v10659_v61 = vld [vmem:[#allocation132_spill] sm:$0xff]  ;;  %v6241_v23 = vld [vmem:[%s10336_s2] sm:$0xff] }
 0x373   : > { %6115 = vmatmul.msk.bf16.gmra.mxu3 %vm10355_vm11, %v3399_v24  ;;  %v9300_v59 = vsel %vm704_vm0, %v4427_v19, %v4431_v51  ;;  %v3494_v43 = vunpack.c.l.b16 %v3401_v8  ;;  %v4287_v21 = vunpack.c.l.b16 %v4206_v57  ;;  %v5606_v51 = vpack.c.b16 %v5601_v38, %v5601_v38 }
 0x374   : > { %4768 = vrot.lane.b32.xlu1 %v9190_v41, %s6773_s11  ;;  %2628 = vrot.lane.b32.xlu0 %v2556_v9, %s6771_s30 }
 0x375   : > { %v3686_v11 = vpop.f32.mrf.mxu0  ;;  %v3531_v3 = vpack.c.b16 %v3495_v20, %v3494_v43  ;;  %v5646_v56 = vsel %vm5644_vm14, %v5606_v51, 0  ;;  %v6243_v20 = vld [vmem:[%s10336_s2 + $0x10] sm:$0xff]  ;;  %vm5281_vm14 = vcmask 1046532  }
 0x376   : > { %v3797_v27 = vmax.f32 %v3686_v11, 0.0  ;;  %5651 = vmatpush.bf16.msra.mxu2 %v5646_v56  ;;  %6679 = vmatpush.bf16.msrb.mxu3 %v5646_v56 }
 0x378   : > { %v4207_v9 = vpack.c.bf16 %v3797_v27, %v3797_v27 }
 0x379   : > { %v9322_v25 = vpop.permute.xlu0 %4645 }
 0x37a   : > { %4852 = vrot.lane.b32.xlu2 %v9300_v59, %s6776_s14  ;;  %v4288_v24 = vunpack.c.l.b16 %v4207_v9  ;;  %5652 = vmatpush.bf16.msra.mxu2 %v6244_v10 }
 0x37b   : > { %6680 = vmatpush.bf16.msrb.mxu3 %v6244_v10 }
 0x37c   : > { %2808 = vrot.lane.b32.xlu0 %v2739_v45, %s6770_s29  ;;  %4805 = vrot.lane.b32.xlu1 %v9235_v37, %s6774_s12  ;;  %v9340_v11 = vpack.c.b16 %v4288_v24, %v4287_v21 }
 0x37d   : > { %v3688_v63 = vpop.f32.mrf.mxu0 }
 0x37e   : > { %v3798_v55 = vmax.f32 %v3688_v63, 0.0  ;;  %v4436_v40 = vshll.u32 %v9340_v11, 16  ;;  %v4612_v35 = vrot.slane %v9340_v11, 1  ;;  %v4434_v57 = vshrl.u32 %v9340_v11, 16  ;;  %5653 = vmatpush.bf16.msra.mxu2 %v6243_v20 }
 0x37f   : > { %6681 = vmatpush.bf16.msrb.mxu3 %v6243_v20 }
 0x380   : > { %v4154_v17 = vsel %vm3974_vm13, %v3798_v55, 0.0  ;;  %v4438_v58 = vrot.slane %v4436_v40, 1  ;;  %v6126_v40 = vld [vmem:[%s6826_s22 + $0x28] sm:$0x1] }
 0x381   : > { %v4208_v33 = vpack.c.bf16 %v4154_v17, %v4154_v17  ;;  %v2623_v60 = vpop.permute.xlu0 %2622 }
 0x382   : > { %4651 = vrot.lane.b32.xlu2 %v9190_v41, %s6767_s26  ;;  %v4439_v50 = vor.u32 %v4438_v58, %v4434_v57  ;;  %5654 = vmatpush.bf16.msra.mxu2 %v6242_v4 }
 0x383   : > { %v4346_v5 = vunpack.c.l.b16 %v4208_v33  ;;  %6116 = vmatmul.msk.bf16.gmra.mxu3 %vm10355_vm11, %v3531_v3 }
 0x384   : > { %4571 = vrot.lane.b32.xlu1 %v9193_v47, %s6765_s24  ;;  %4887 = vrot.lane.b32.xlu0 %v9332_v22, %s6775_s13  ;;  %v2967_v47 = vsel %vm2903_vm4, %v2892_v42, %v10657_v39  ;;  %v6124_v42 = vld [vmem:[%s6826_s22 + $0x20] sm:$0xe] }
 0x385   : > { %v3691_v41 = vpop.f32.mrf.mxu0  ;;  %v4362_v34 = vpack.c.b16 %v4346_v5, %v4346_v5  ;;  %v3040_v30 = vsel %vm10360_vm5, %v2967_v47, %v10658_v46  ;;  %6682 = vmatpush.bf16.msrb.mxu3 %v6242_v4  ;;  %v6172_v10 = vrot.slane %v6124_v42, 9 }
 0x386   : > { %v9342_v12 = vpop.permute.xlu2 %4729  ;;  %v3113_v19 = vsel %vm3049_vm6, %v3040_v30, %v10659_v61  ;;  %v3799_v17 = vmax.f32 %v3691_v41, 0.0  ;;  %v6125_v41 = vld [vmem:[%s6826_s22 + $0x24] sm:$0xf]  ;;  %5655 = vmatpush.bf16.msra.mxu2 %v6241_v23  ;;  %v5395_v61 = vld [vmem:[%s10337_s3] sm:$0x3] }
 0x387   : > { %v4441_v2 = vshll.u32 %v4362_v34, 16  ;;  %v3186_v52 = vsel %vm10357_vm7, %v3113_v19, %v10660_v1  ;;  %v4613_v45 = vrot.slane %v4362_v34, 1  ;;  %v5285_v34 = vrot.slane %v6125_v41, 5 }
 0x388   : > { %v3259_v27 = vsel %vm3195_vm8, %v3186_v52, %v9183_v62  ;;  %v3496_v62 = vunpack.c.h.b16 %v9306_v53  ;;  %v4155_v53 = vsel %vm3915_vm12, %v3799_v17, 0.0  ;;  %v5493_v52 = vsel %vm3633_vm2, %v5395_v61, 0 }
 0x389   : > { %v3332_v43 = vsel %vm10356_vm9, %v3259_v27, %v2623_v60  ;;  %v4443_v63 = vrot.slane %v4441_v2, 1  ;;  %v9375_v3 = vsel %vm1101_vm1, %v4612_v35, %v4613_v45  ;;  %v4209_v56 = vpack.c.bf16 %v4155_v53, %v4155_v53  ;;  %6683 = vmatpush.bf16.msrb.mxu3 %v6241_v23  ;;  %5502 = vmatpush.bf16.msra.mxu1 %v5493_v52 }
 0x38a   : > { %4770 = vrot.lane.b32.xlu2 %v9332_v22, %s6773_s11  ;;  %v5287_v2 = vrot.slane %v5285_v34, 4  ;;  %v5288_v60 = vrot.slane %v6126_v40, 5  ;;  %vm5043_vm2 = vcmask 326656   ;;  %vm10359_vm9 = vcmask 523264  }
 0x38b   : > { %v9383_v21 = vsel %vm704_vm0, %v4439_v50, %v4443_v63  ;;  %v4289_v46 = vunpack.c.l.b16 %v4209_v56  ;;  %v4916_v56 = vsel %vm2903_vm4, %v8765_v16, %v9316_v26  ;;  %vm10358_vm7 = vcmask 588800  }
 0x38c   : > { %4688 = vrot.lane.b32.xlu0 %v9235_v37, %s6769_s28  ;;  %4735 = vrot.lane.b32.xlu1 %v9300_v59, %s6770_s29 }
 0x38d   : > { %v3693_v8 = vpop.f32.mrf.mxu0 }
 0x38e   : > { %v2803_v9 = vpop.permute.xlu2 %2802  ;;  %v3800_v33 = vmax.f32 %v3693_v8, 0.0 }
 0x38f   : > { %v3405_v55 = vsel %vm3341_vm10, %v3332_v43, %v2803_v9 }
 0x390   : > { %v3497_v24 = vunpack.c.l.b16 %v3405_v55  ;;  %v4210_v5 = vpack.c.bf16 %v3800_v33, %v3800_v33  ;;  %v4683_v33 = vpop.permute.xlu1 %4682 }
 0x392   : > { %4889 = vrot.lane.b32.xlu2 %v9375_v3, %s6775_s13  ;;  %v3532_v38 = vpack.c.b16 %v3497_v24, %v3496_v62  ;;  %v4290_v39 = vunpack.c.l.b16 %v4210_v5 }
 0x394   : > { %4807 = vrot.lane.b32.xlu0 %v9340_v11, %s6774_s12  ;;  %4854 = vrot.lane.b32.xlu1 %v9383_v21, %s6776_s14  ;;  %v9418_v45 = vpack.c.b16 %v4290_v39, %v4289_v46 }
 0x395   : > { %6117 = vmatmul.msk.bf16.gmra.mxu3 %vm10355_vm11, %v3532_v38  ;;  %v3696_v31 = vpop.f32.mrf.mxu0  ;;  %vm9405_vm11 = vmor %vm5280_vm15, %vm5281_vm14  ;;  %vm5076_vm15 = vcmask 392192   ;;  %vm5109_vm14 = vcmask 457728  }
 0x396   : > { %v3801_v51 = vmax.f32 %v3696_v31, 0.0  ;;  %v5286_v27 = vsel %vm9405_vm11, %v6172_v10, %v5285_v34  ;;  %v5289_v58 = vsel %vm9405_vm11, %v5287_v2, %v5288_v60  ;;  %v4448_v55 = vshll.u32 %v9418_v45, 16  ;;  %v9426_v35 = vpop.f32.mrf.mxu3  ;;  %v6127_v60 = vld [vmem:[%s6826_s22 + $0x30] sm:$0xe] }
 0x397   : > { %v5396_v20 = vunpack.c.l.b16 %v5286_v27  ;;  %v5397_v43 = vunpack.c.l.b16 %v5289_v58  ;;  %v4446_v5 = vshrl.u32 %v9418_v45, 16  ;;  %v4615_v23 = vrot.slane %v9418_v45, 1  ;;  %v6129_v58 = vld [vmem:[%s6826_s22 + $0x38] sm:$0x1] }
 0x398   : > { %v4157_v48 = vsel %vm3974_vm13, %v3801_v51, 0.0  ;;  %v4450_v24 = vrot.slane %v4448_v55, 1 }
 0x399   : > { %v4211_v47 = vpack.c.bf16 %v4157_v48, %v4157_v48 }
 0x39a   : > { %4690 = vrot.lane.b32.xlu2 %v9340_v11, %s6769_s28  ;;  %v4451_v51 = vor.u32 %v4450_v24, %v4446_v5 }
 0x39b   : > { %v4347_v30 = vunpack.c.l.b16 %v4211_v47  ;;  %v4948_v47 = vsel %vm3049_vm6, %v4916_v56, %v9322_v25 }
 0x39c   : > { %v9409_v1 = vpop.permute.xlu2 %4883  ;;  %4573 = vrot.lane.b32.xlu0 %v9300_v59, %s6765_s24  ;;  %4653 = vrot.lane.b32.xlu1 %v9332_v22, %s6767_s26  ;;  %v5428_v59 = vpack.c.b16 %v5397_v43, %v5396_v20  ;;  %v4765_v40 = vpop.permute.xlu1 %4764  ;;  %v4980_v52 = vsel %vm3195_vm8, %v4948_v47, %v4683_v33  ;;  %v6173_v20 = vrot.slane %v6127_v60, 9 }
 0x39d   : > { %v3698_v8 = vpop.f32.mrf.mxu0  ;;  %v4363_v9 = vpack.c.b16 %v4347_v30, %v4347_v30  ;;  %v6128_v30 = vld [vmem:[%s6826_s22 + $0x34] sm:$0xf]  ;;  %v5012_v55 = vsel %vm3341_vm10, %v4980_v52, %v9342_v12 }
 0x39e   : > { %v3802_v63 = vmax.f32 %v3698_v8, 0.0  ;;  %6188 = vmatmul.msk.bf16.vlgmr.msra.gmra.mxu1 %vm2812_vm3, %v5428_v59  ;;  %v9459_v10 = vpop.f32.mrf.mxu3  ;;  %v5292_v61 = vrot.slane %v6128_v30, 5  ;;  %v5295_v59 = vrot.slane %v6129_v58, 5 }
 0x39f   : > { %v4453_v22 = vshll.u32 %v4363_v9, 16  ;;  %v4616_v38 = vrot.slane %v4363_v9, 1 }
 0x3a0   : > { %v4158_v57 = vsel %vm3915_vm12, %v3802_v63, 0.0  ;;  %v5294_v25 = vrot.slane %v5292_v61, 4  ;;  %v5293_v63 = vsel %vm9405_vm11, %v6173_v20, %v5292_v61 }
 0x3a1   : > { %v4455_v4 = vrot.slane %v4453_v22, 1  ;;  %v4212_v53 = vpack.c.bf16 %v4158_v57, %v4158_v57  ;;  %v9444_v48 = vsel %vm1101_vm1, %v4615_v23, %v4616_v38  ;;  %v5398_v57 = vunpack.c.l.b16 %v5293_v63 }
 0x3a2   : > { %4809 = vrot.lane.b32.xlu2 %v9418_v45, %s6774_s12 }
 0x3a3   : > { %v4291_v34 = vunpack.c.l.b16 %v4212_v53  ;;  %v9447_v42 = vsel %vm704_vm0, %v4451_v51, %v4455_v4  ;;  %v5296_v4 = vsel %vm9405_vm11, %v5294_v25, %v5295_v59 }
 0x3a4   : > { %v9430_v62 = vpop.permute.xlu2 %4684  ;;  %4737 = vrot.lane.b32.xlu0 %v9383_v21, %s6770_s29  ;;  %4772 = vrot.lane.b32.xlu1 %v9375_v3, %s6773_s11  ;;  %v5399_v53 = vunpack.c.l.b16 %v5296_v4 }
 0x3a5   : > { %v3701_v17 = vpop.f32.mrf.mxu0 }
 0x3a6   : > { %v3803_v50 = vmax.f32 %v3701_v17, 0.0  ;;  %v5045_v17 = vsel %vm5043_vm2, %v5012_v55, %v4765_v40  ;;  %v9486_v23 = vpop.f32.mrf.mxu3  ;;  %v5429_v56 = vpack.c.b16 %v5399_v53, %v5398_v57 }
 0x3a8   : > { %v4213_v31 = vpack.c.bf16 %v3803_v50, %v3803_v50  ;;  %v4802_v43 = vpop.permute.xlu0 %4801 }
 0x3a9   : > { %v5078_v12 = vsel %vm5076_vm15, %v5045_v17, %v4802_v43 }
 0x3aa   : > { %v4292_v41 = vunpack.c.l.b16 %v4213_v31  ;;  %4575 = vrot.lane.b32.xlu2 %v9383_v21, %s6765_s24 }
 0x3ac   : > { %v9449_v39 = vpop.permute.xlu2 %4803  ;;  %4891 = vrot.lane.b32.xlu1 %v9444_v48, %s6775_s13  ;;  %4856 = vrot.lane.b32.xlu0 %v9447_v42, %s6776_s14  ;;  %v9455_v21 = vpack.c.b16 %v4292_v41, %v4291_v34 }
 0x3ad   : > { %v3703_v26 = vpop.f32.mrf.mxu0 }
 0x3ae   : > { %v3804_v46 = vmax.f32 %v3703_v26, 0.0  ;;  %v4460_v8 = vshll.u32 %v9455_v21, 16  ;;  %6189 = vmatmul.msk.bf16.gmra.mxu1 %vm2812_vm3, %v5429_v56  ;;  %v9506_v58 = vpop.f32.mrf.mxu3 }
 0x3b0   : > { %v4160_v2 = vsel %vm3974_vm13, %v3804_v46, 0.0  ;;  %v4462_v50 = vrot.slane %v4460_v8, 1  ;;  %v4618_v8 = vrot.slane %v9455_v21, 1 }
 0x3b1   : > { %v4214_v27 = vpack.c.bf16 %v4160_v2, %v4160_v2 }
 0x3b2   : > { %4739 = vrot.lane.b32.xlu2 %v9447_v42, %s6770_s29 }
 0x3b3   : > { %v4348_v9 = vunpack.c.l.b16 %v4214_v27 }
 0x3b4   : > { %v9474_v22 = vpop.permute.xlu2 %2624  ;;  %4692 = vrot.lane.b32.xlu1 %v9418_v45, %s6769_s28  ;;  %4655 = vrot.lane.b32.xlu0 %v9375_v3, %s6767_s26  ;;  %v4458_v3 = vshrl.u32 %v9455_v21, 16 }
 0x3b5   : > { %v4364_v24 = vpack.c.b16 %v4348_v9, %v4348_v9  ;;  %v3706_v33 = vpop.f32.mrf.mxu0 }
 0x3b6   : > { %v4849_v38 = vpop.permute.xlu1 %4848  ;;  %v3805_v51 = vmax.f32 %v3706_v33, 0.0  ;;  %v4463_v26 = vor.u32 %v4462_v50, %v4458_v3  ;;  %v9530_v53 = vpop.f32.mrf.mxu3 }
 0x3b7   : > { %v4465_v5 = vshll.u32 %v4364_v24, 16  ;;  %v5111_v31 = vsel %vm5109_vm14, %v5078_v12, %v4849_v38  ;;  %v4619_v60 = vrot.slane %v4364_v24, 1 }
 0x3b8   : > { %v5144_v41 = vsel %vm10359_vm9, %v5111_v31, %v9409_v1  ;;  %v4161_v40 = vsel %vm3915_vm12, %v3805_v51, 0.0  ;;  %v4568_v1 = vpop.permute.xlu0 %4567 }
 0x3b9   : > { %v4467_v34 = vrot.slane %v4465_v5, 1  ;;  %6220 = vmatmul.msk.bf16.vlgmr.msra.gmra.mxu2 %vm10358_vm7, %v5144_v41  ;;  %v4215_v52 = vpack.c.bf16 %v4161_v40, %v4161_v40  ;;  %v9509_v43 = vsel %vm1101_vm1, %v4618_v8, %v4619_v60  ;;  %v4918_v9 = vsel %vm2903_vm4, %v8919_v32, %v4568_v1 }
 0x3bb   : > { %v9493_v47 = vsel %vm704_vm0, %v4463_v26, %v4467_v34  ;;  %v4293_v25 = vunpack.c.l.b16 %v4215_v52 }
 0x3bc   : > { %v9497_v46 = vpop.permute.xlu2 %4649  ;;  %4774 = vrot.lane.b32.xlu0 %v9444_v48, %s6773_s11  ;;  %4811 = vrot.lane.b32.xlu1 %v9455_v21, %s6774_s12 }
 0x3bd   : > { %4858 = vrot.lane.b32.xlu2 %v9493_v47, %s6776_s14  ;;  %v3708_v30 = vpop.f32.mrf.mxu0 }
 0x3be   : > { %v3806_v61 = vmax.f32 %v3708_v30, 0.0  ;;  %v4648_v2 = vpop.permute.xlu1 %4647 }
 0x3bf   : > { %v4950_v55 = vsel %vm3049_vm6, %v4918_v9, %v4648_v2  ;;  %v10663_v2 = vld [vmem:[#allocation38_spill] sm:$0xff]  ;;  %v10665_v9 = vld [vmem:[#allocation97_spill] sm:$0xff] }
 0x3c0   : > { %v4216_v27 = vpack.c.bf16 %v3806_v61, %v3806_v61  ;;  %v4732_v33 = vpop.permute.xlu0 %4731  ;;  %v4982_v32 = vsel %vm3195_vm8, %v4950_v55, %v9430_v62  ;;  %v6738_v61 = vld [vmem:[%s6826_s22 + $0x100] sm:$0xff]  }
 0x3c1   : > { %v5014_v38 = vsel %vm3341_vm10, %v4982_v32, %v4732_v33  ;;  %v2894_v60 = vsel %vm2812_vm3, %v6738_v61, %v10663_v2 }
 0x3c2   : > { %v4294_v20 = vunpack.c.l.b16 %v4216_v27 }
 0x3c4   : > { %v9513_v63 = vpop.permute.xlu2 %2626  ;;  %4577 = vrot.lane.b32.xlu1 %v9447_v42, %s6765_s24  ;;  %4893 = vrot.lane.b32.xlu0 %v9509_v43, %s6775_s13  ;;  %v9519_v59 = vpack.c.b16 %v4294_v20, %v4293_v25  ;;  %v10664_v20 = vld [vmem:[#allocation70_spill] sm:$0xff] }
 0x3c5   : > { %4657 = vrot.lane.b32.xlu2 %v9444_v48, %s6767_s26  ;;  %v3711_v57 = vpop.f32.mrf.mxu0  ;;  %v2969_v25 = vsel %vm2903_vm4, %v2894_v60, %v10664_v20 }
 0x3c6   : > { %v3807_v17 = vmax.f32 %v3711_v57, 0.0  ;;  %v4767_v24 = vpop.permute.xlu1 %4766  ;;  %v4472_v4 = vshll.u32 %v9519_v59, 16  ;;  %v4470_v26 = vshrl.u32 %v9519_v59, 16  ;;  %v3042_v55 = vsel %vm10360_vm5, %v2969_v25, %v10665_v9 }
 0x3c7   : > { %v5047_v48 = vsel %vm5043_vm2, %v5014_v38, %v4767_v24  ;;  %v6131_v38 = vld [vmem:[%s6826_s22 + $0x44] sm:$0xf] }
 0x3c8   : > { %v4163_v42 = vsel %vm3974_vm13, %v3807_v17, 0.0  ;;  %v4474_v3 = vrot.slane %v4472_v4, 1  ;;  %v5080_v56 = vsel %vm5076_vm15, %v5047_v48, %v9449_v39  ;;  %v4621_v39 = vrot.slane %v9519_v59, 1  ;;  %v10666_v17 = vld [vmem:[#allocation124_spill] sm:$0xff] }
 0x3c9   : > { %v4217_v50 = vpack.c.bf16 %v4163_v42, %v4163_v42  ;;  %v3115_v24 = vsel %vm3049_vm6, %v3042_v55, %v10666_v17 }
 0x3ca   : > { %v4475_v8 = vor.u32 %v4474_v3, %v4470_v26  ;;  %v6130_v26 = vld [vmem:[%s6826_s22 + $0x40] sm:$0xe] }
 0x3cb   : > { %v4349_v12 = vunpack.c.l.b16 %v4217_v50  ;;  %v10667_v50 = vld [vmem:[#allocation151_spill] sm:$0xff]  ;;  %v6174_v61 = vrot.slane %v6130_v26, 9 }
 0x3cc   : > { %v9533_v5 = vpop.permute.xlu2 %2806  ;;  %4694 = vrot.lane.b32.xlu0 %v9455_v21, %s6769_s28  ;;  %4741 = vrot.lane.b32.xlu1 %v9493_v47, %s6770_s29  ;;  %v10673_v26 = vld [vmem:[#allocation51_spill] sm:$0xff] }
 0x3cd   : > { %v4365_v62 = vpack.c.b16 %v4349_v12, %v4349_v12  ;;  %4776 = vrot.lane.b32.xlu2 %v9509_v43, %s6773_s11  ;;  %v3713_v31 = vpop.f32.mrf.mxu0 }
 0x3ce   : > { %v4886_v51 = vpop.permute.xlu1 %4885  ;;  %v4851_v34 = vpop.permute.xlu0 %4850  ;;  %v3808_v1 = vmax.f32 %v3713_v31, 0.0 }
 0x3cf   : > { %v4477_v41 = vshll.u32 %v4365_v62, 16  ;;  %v4622_v40 = vrot.slane %v4365_v62, 1  ;;  %v5113_v30 = vsel %vm5109_vm14, %v5080_v56, %v4851_v34  ;;  %v9578_v62 = vpop.f32.mrf.mxu3 }
 0x3d0   : > { %v5146_v27 = vsel %vm10359_vm9, %v5113_v30, %v4886_v51  ;;  %v4164_v33 = vsel %vm3915_vm12, %v3808_v1, 0.0  ;;  %v5299_v51 = vrot.slane %v6131_v38, 5  ;;  %vm10669_vm9 = vcmask 228352  }
 0x3d1   : > { %v4479_v52 = vrot.slane %v4477_v41, 1  ;;  %6221 = vmatmul.msk.bf16.gmra.mxu2 %vm10358_vm7, %v5146_v27  ;;  %v9567_v42 = vsel %vm1101_vm1, %v4621_v39, %v4622_v40  ;;  %vm10668_vm7 = vcmask 162816   ;;  %v4218_v56 = vpack.c.bf16 %v4164_v33, %v4164_v33  ;;  %v6132_v40 = vld [vmem:[%s6826_s22 + $0x48] sm:$0x1] }
 0x3d2   : > { %v3188_v4 = vsel %vm10668_vm7, %v3115_v24, %v10667_v50  ;;  %vm10670_vm7 = vcmask 293888   ;;  %v5302_v2 = vrot.slane %v6132_v40, 5  ;;  %v10671_v24 = vld [vmem:[#allocation15_spill] sm:$0xff]  ;;  %v3813_v38 = vmax.f32 %v9486_v23, 0.0 }
 0x3d3   : > { %v9556_v57 = vsel %vm704_vm0, %v4475_v8, %v4479_v52  ;;  %v3261_v48 = vsel %vm3195_vm8, %v3188_v4, %v9181_v49  ;;  %v5301_v49 = vrot.slane %v5299_v51, 4  ;;  %v5300_v52 = vsel %vm9405_vm11, %v6174_v61, %v5299_v51  ;;  %v10675_v61 = vld [vmem:[#allocation82_spill] sm:$0xff] }
 0x3d4   : > { %v9562_v32 = vpop.permute.xlu2 %4852  ;;  %4813 = vrot.lane.b32.xlu0 %v9519_v59, %s6774_s12  ;;  %4860 = vrot.lane.b32.xlu1 %v9556_v57, %s6776_s14  ;;  %v3334_v41 = vsel %vm10669_vm9, %v3261_v48, %v9474_v22  ;;  %v4295_v27 = vunpack.c.l.b16 %v4218_v56  ;;  %v5400_v8 = vunpack.c.l.b16 %v5300_v52  ;;  %v647_v33 = vpack.c.b16 %v10671_v24, %v10671_v24  ;;  %v10672_v56 = vld [vmem:[#allocation50_spill] sm:$0xff] }
 0x3d5   : > { %4895 = vrot.lane.b32.xlu2 %v9567_v42, %s6775_s13  ;;  %v3716_v12 = vpop.f32.mrf.mxu0  ;;  %v5303_v22 = vsel %vm9405_vm11, %v5301_v49, %v5302_v2  ;;  %v3812_v51 = vmax.f32 %v9459_v10, 0.0  ;;  %v4169_v2 = vsel %vm3974_vm13, %v3813_v38, 0.0  ;;  %v10678_v24 = vld [vmem:[#allocation134_spill] sm:$0xff]  ;;  %vm10681_vm9 = vcmask 162816  }
 0x3d6   : > { %v3809_v31 = vmax.f32 %v3716_v12, 0.0  ;;  %v9580_v3 = vpop.permute.xlu1 %4569  ;;  %v2805_v34 = vpop.permute.xlu0 %2804  ;;  %v5401_v25 = vunpack.c.l.b16 %v5303_v22  ;;  %v3811_v12 = vmax.f32 %v9426_v35, 0.0  ;;  %v2897_v40 = vsel %vm2812_vm3, %v647_v33, %v10673_v26 }
 0x3d7   : > { %v3407_v30 = vsel %vm3341_vm10, %v3334_v41, %v2805_v34  ;;  %v9608_v4 = vpop.f32.mrf.mxu3  ;;  %v6739_v41 = vld [vmem:[%s6826_s22 + $0x110] sm:$0xff]   ;;  %v2971_v23 = vsel %vm2903_vm4, %v2897_v40, %v10675_v61  ;;  %v10680_v40 = vld [vmem:[#allocation162_spill] sm:$0xff] }
 0x3d8   : > { %v4219_v1 = vpack.c.bf16 %v3809_v31, %v3809_v31  ;;  %6118 = vmatmul.msk.bf16.gmra.mxu3 %vm10670_vm7, %v3407_v30  ;;  %v2899_v34 = vsel %vm2812_vm3, %v6739_v41, %v10672_v56  ;;  %v10674_v30 = vld [vmem:[#allocation81_spill] sm:$0xff]  ;;  %v4167_v10 = vsel %vm3915_vm12, %v3811_v12, 0.0  ;;  %v6133_v61 = vld [vmem:[%s6826_s22 + $0x50] sm:$0xe]  ;;  %vm10683_vm7 = vmmov %vm10681_vm9 }
 0x3d9   : > { %v2973_v35 = vsel %vm2903_vm4, %v2899_v34, %v10674_v30  ;;  %v4221_v56 = vpack.c.bf16 %v4167_v10, %v4167_v10  ;;  %v4223_v34 = vpack.c.bf16 %v4169_v2, %v4169_v2  ;;  %v4920_v2 = vsel %vm2903_vm4, %v8998_v15, %v9580_v3  ;;  %v10682_v3 = vld [vmem:[#allocation161_spill] sm:$0xff] }
 0x3da   : > { %v4296_v60 = vunpack.c.l.b16 %v4219_v1 }
 0x3dc   : > { %v9592_v20 = vpop.permute.xlu2 %4651  ;;  %4579 = vrot.lane.b32.xlu0 %v9493_v47, %s6765_s24  ;;  %4659 = vrot.lane.b32.xlu1 %v9509_v43, %s6767_s26  ;;  %v9598_v39 = vpack.c.b16 %v4296_v60, %v4295_v27  ;;  %v5430_v47 = vpack.c.b16 %v5401_v25, %v5400_v8  ;;  %v10676_v27 = vld [vmem:[#allocation107_spill] sm:$0xff]  ;;  %v10677_v8 = vld [vmem:[#allocation108_spill] sm:$0xff] }
 0x3dd   : > { %4696 = vrot.lane.b32.xlu2 %v9519_v59, %s6769_s28  ;;  %v3718_v9 = vpop.f32.mrf.mxu0  ;;  %v3046_v22 = vsel %vm10360_vm5, %v2973_v35, %v10676_v27  ;;  %v3044_v25 = vsel %vm10360_vm5, %v2971_v23, %v10677_v8  ;;  %v6135_v23 = vld [vmem:[%s6826_s22 + $0x58] sm:$0x1]  ;;  %vm10688_vm5 = vcmask 588800  }
 0x3de   : > { %v3810_v55 = vmax.f32 %v3718_v9, 0.0  ;;  %v9602_v17 = vpop.permute.xlu1 %4733  ;;  %v9606_v50 = vpop.permute.xlu0 %4686  ;;  %v4484_v31 = vshll.u32 %v9598_v39, 16  ;;  %6190 = vmatmul.msk.bf16.gmra.mxu1 %vm2812_vm3, %v5430_v47  ;;  %v4222_v9 = vpack.c.bf16 %v3812_v51, %v3812_v51  ;;  %v3119_v33 = vsel %vm3049_vm6, %v3046_v22, %v10678_v24 }
 0x3df   : > { %v4482_v38 = vshrl.u32 %v9598_v39, 16  ;;  %v4624_v30 = vrot.slane %v9598_v39, 1  ;;  %v9653_v27 = vpop.f32.mrf.mxu3  ;;  %v6175_v22 = vrot.slane %v6133_v61, 9  ;;  %v5309_v24 = vrot.slane %v6135_v23, 5 }
 0x3e0   : > { %v4166_v43 = vsel %vm3974_vm13, %v3810_v55, 0.0  ;;  %v4486_v52 = vrot.slane %v4484_v31, 1  ;;  %v10679_v31 = vld [vmem:[#allocation135_spill] sm:$0xff] }
 0x3e1   : > { %v4220_v48 = vpack.c.bf16 %v4166_v43, %v4166_v43  ;;  %v3117_v41 = vsel %vm3049_vm6, %v3044_v25, %v10679_v31 }
 0x3e2   : > { %v3190_v51 = vsel %vm10681_vm9, %v3117_v41, %v10680_v40  ;;  %v4487_v35 = vor.u32 %v4486_v52, %v4482_v38  ;;  %vm10684_vm9 = vcmask 228352   ;;  %v4952_v40 = vsel %vm3049_vm6, %v4920_v2, %v9497_v46 }
 0x3e3   : > { %v4350_v1 = vunpack.c.l.b16 %v4220_v48  ;;  %v6134_v48 = vld [vmem:[%s6826_s22 + $0x54] sm:$0xf]  ;;  %v3263_v10 = vsel %vm3195_vm8, %v3190_v51, %v9202_v6 }
 0x3e4   : > { %v9626_v49 = vpop.permute.xlu2 %4770  ;;  %4743 = vrot.lane.b32.xlu0 %v9556_v57, %s6770_s29  ;;  %4778 = vrot.lane.b32.xlu1 %v9567_v42, %s6773_s11  ;;  %v5306_v26 = vrot.slane %v6134_v48, 5  ;;  %v3336_v48 = vsel %vm10684_vm9, %v3263_v10, %v9513_v63  ;;  %v4984_v63 = vsel %vm3195_vm8, %v4952_v40, %v9606_v50 }
 0x3e5   : > { %v4366_v60 = vpack.c.b16 %v4350_v1, %v4350_v1  ;;  %4815 = vrot.lane.b32.xlu2 %v9598_v39, %s6774_s12  ;;  %v5016_v46 = vsel %vm3341_vm10, %v4984_v63, %v9602_v17 }
 0x3e6   : > { %v4769_v55 = vpop.permute.xlu1 %4768  ;;  %v2629_v12 = vpop.permute.xlu0 %2628  ;;  %v5308_v8 = vrot.slane %v5306_v26, 4  ;;  %v5307_v6 = vsel %vm9405_vm11, %v6175_v22, %v5306_v26  ;;  %v3409_v26 = vsel %vm3341_vm10, %v3336_v48, %v9533_v5 }
 0x3e7   : > { %v4489_v47 = vshll.u32 %v4366_v60, 16  ;;  %v4625_v43 = vrot.slane %v4366_v60, 1  ;;  %v4298_v60 = vunpack.c.l.b16 %v4222_v9  ;;  %v4351_v9 = vunpack.c.l.b16 %v4223_v34 }
 0x3e8   : > { %v5310_v15 = vsel %vm9405_vm11, %v5308_v8, %v5309_v24  ;;  %v5402_v31 = vunpack.c.l.b16 %v5307_v6  ;;  %v5049_v50 = vsel %vm5043_vm2, %v5016_v46, %v4769_v55  ;;  %v3816_v6 = vmax.f32 %v9578_v62, 0.0 }
 0x3e9   : > { %v4491_v1 = vrot.slane %v4489_v47, 1  ;;  %v9661_v25 = vsel %vm1101_vm1, %v4624_v30, %v4625_v43  ;;  %v4297_v47 = vunpack.c.l.b16 %v4221_v56  ;;  %v3192_v43 = vsel %vm10683_vm7, %v3119_v33, %v10682_v3  ;;  %vm10685_vm7 = vmmov %vm10684_vm9 }
 0x3ea   : > { %v5403_v41 = vunpack.c.l.b16 %v5310_v15  ;;  %v3265_v56 = vsel %vm3195_vm8, %v3192_v43, %v9230_v14  ;;  %v4367_v30 = vpack.c.b16 %v4351_v9, %v4351_v9  ;;  %v3500_v14 = vunpack.c.l.b16 %v3409_v26 }
 0x3eb   : > { %v9664_v52 = vsel %vm704_vm0, %v4487_v35, %v4491_v1  ;;  %v9684_v34 = vpack.c.b16 %v4298_v60, %v4297_v47  ;;  %v3338_v51 = vsel %vm10685_vm7, %v3265_v56, %v2629_v12  ;;  %v9702_v60 = vpop.f32.mrf.mxu3  ;;  %vm10686_vm9 = vcmask 293888   ;;  %v6137_v56 = vld [vmem:[%s6826_s22 + $0x64] sm:$0xf] }
 0x3ec   : > { %v9666_v38 = vpop.permute.xlu2 %4889  ;;  %4897 = vrot.lane.b32.xlu1 %v9661_v25, %s6775_s13  ;;  %4862 = vrot.lane.b32.xlu0 %v9664_v52, %s6776_s14  ;;  %v5431_v1 = vpack.c.b16 %v5403_v41, %v5402_v31  ;;  %v4501_v12 = vshll.u32 %v4367_v30, 16  ;;  %v3814_v9 = vmax.f32 %v9506_v58, 0.0  ;;  %vm10687_vm7 = vcmask 523264  }
 0x3ed   : > { %4581 = vrot.lane.b32.xlu2 %v9556_v57, %s6765_s24  ;;  %v4496_v5 = vshll.u32 %v9684_v34, 16  ;;  %v4494_v2 = vshrl.u32 %v9684_v34, 16  ;;  %v3815_v15 = vmax.f32 %v9530_v53, 0.0  ;;  %v4628_v26 = vrot.slane %v4367_v30, 1 }
 0x3ee   : > { %v4806_v33 = vpop.permute.xlu1 %4805  ;;  %v2809_v57 = vpop.permute.xlu0 %2808  ;;  %6191 = vmatmul.msk.bf16.gmra.mxu1 %vm2812_vm3, %v5431_v1  ;;  %v4503_v47 = vrot.slane %v4501_v12, 1  ;;  %v4170_v43 = vsel %vm3915_vm12, %v3814_v9, 0.0  ;;  %v4627_v1 = vrot.slane %v9684_v34, 1 }
 0x3ef   : > { %v9694_v35 = vsel %vm3341_vm10, %v3338_v51, %v2809_v57  ;;  %v5082_v22 = vsel %vm5076_vm15, %v5049_v50, %v4806_v33  ;;  %v4498_v55 = vrot.slane %v4496_v5, 1  ;;  %v4225_v53 = vpack.c.bf16 %v3815_v15, %v3815_v15 }
 0x3f0   : > { %v3501_v61 = vunpack.c.l.b16 %v9694_v35  ;;  %v5115_v10 = vsel %vm5109_vm14, %v5082_v22, %v9562_v32  ;;  %v4172_v32 = vsel %vm3974_vm13, %v3816_v6, 0.0  ;;  %v4224_v40 = vpack.c.bf16 %v4170_v43, %v4170_v43 }
 0x3f1   : > { %v4499_v3 = vor.u32 %v4498_v55, %v4494_v2  ;;  %v4226_v33 = vpack.c.bf16 %v4172_v32, %v4172_v32  ;;  %v5313_v51 = vrot.slane %v6137_v56, 5  ;;  %v9749_v30 = vsel %vm1101_vm1, %v4627_v1, %v4628_v26 }
 0x3f2   : > { %v3534_v23 = vpack.c.b16 %v3501_v61, %v3500_v14  ;;  %v6136_v14 = vld [vmem:[%s6826_s22 + $0x60] sm:$0xe]  ;;  %v6138_v61 = vld [vmem:[%s6826_s22 + $0x68] sm:$0x1]  ;;  %v4299_v12 = vunpack.c.l.b16 %v4224_v40  ;;  %v3817_v26 = vmax.f32 %v9608_v4, 0.0 }
 0x3f3   : > { %v9731_v58 = vsel %vm704_vm0, %v4499_v3, %v4503_v47  ;;  %v9739_v31 = vpop.f32.mrf.mxu3  ;;  %v6176_v5 = vrot.slane %v6136_v14, 9  ;;  %v5315_v50 = vrot.slane %v5313_v51, 4  ;;  %v4352_v22 = vunpack.c.l.b16 %v4226_v33 }
 0x3f4   : > { %v9705_v8 = vpop.permute.xlu2 %4690  ;;  %4698 = vrot.lane.b32.xlu1 %v9598_v39, %s6769_s28  ;;  %4661 = vrot.lane.b32.xlu0 %v9567_v42, %s6767_s26  ;;  %v4173_v4 = vsel %vm3915_vm12, %v3817_v26, 0.0 }
 0x3f5   : > { %4745 = vrot.lane.b32.xlu2 %v9664_v52, %s6770_s29  ;;  %6119 = vmatmul.msk.bf16.gmra.mxu3 %vm10686_vm9, %v3534_v23  ;;  %v5316_v23 = vrot.slane %v6138_v61, 5  ;;  %v4368_v6 = vpack.c.b16 %v4352_v22, %v4352_v22  ;;  %vm10690_vm9 = vcmask 588800  }
 0x3f6   : > { %v4572_v17 = vpop.permute.xlu1 %4571  ;;  %v4888_v24 = vpop.permute.xlu0 %4887 }
 0x3f7   : > { %v5148_v42 = vsel %vm10687_vm7, %v5115_v10, %v4888_v24  ;;  %v4922_v62 = vsel %vm2903_vm4, %v9142_v0, %v4572_v17  ;;  %v4300_v0 = vunpack.c.l.b16 %v4225_v53  ;;  %v5314_v17 = vsel %vm9405_vm11, %v6176_v5, %v5313_v51 }
 0x3f8   : > { %6222 = vmatmul.msk.bf16.gmra.mxu2 %vm10688_vm5, %v5148_v42  ;;  %v4954_v57 = vsel %vm3049_vm6, %v4922_v62, %v9592_v20  ;;  %v5317_v55 = vsel %vm9405_vm11, %v5315_v50, %v5316_v23  ;;  %v5404_v24 = vunpack.c.l.b16 %v5314_v17  ;;  %vm10689_vm5 = vmmov %vm10687_vm7  ;;  %v4513_v62 = vshll.u32 %v4368_v6, 16 }
 0x3f9   : > { %v9760_v10 = vpack.c.b16 %v4300_v0, %v4299_v12  ;;  %v5405_v47 = vunpack.c.l.b16 %v5317_v55  ;;  %v3819_v51 = vmax.f32 %v9702_v60, 0.0  ;;  %v4227_v50 = vpack.c.bf16 %v4173_v4, %v4173_v4  ;;  %v6140_v55 = vld [vmem:[%s6826_s22 + $0x74] sm:$0xf]  ;;  %vm10691_vm7 = vmmov %vm10689_vm5 }
 0x3fa   : > { %v4515_v56 = vrot.slane %v4513_v62, 1 }
 0x3fb   : > { %v5432_v15 = vpack.c.b16 %v5405_v47, %v5404_v24  ;;  %v9768_v3 = vpop.f32.mrf.mxu3  ;;  %v4508_v53 = vshll.u32 %v9760_v10, 16  ;;  %v4506_v33 = vshrl.u32 %v9760_v10, 16  ;;  %v4630_v0 = vrot.slane %v9760_v10, 1 }
 0x3fc   : > { %v9726_v48 = vpop.permute.xlu2 %4809  ;;  %4817 = vrot.lane.b32.xlu1 %v9684_v34, %s6774_s12  ;;  %4780 = vrot.lane.b32.xlu0 %v9661_v25, %s6773_s11  ;;  %v4175_v5 = vsel %vm3974_vm13, %v3819_v51, 0.0 }
 0x3fd   : > { %4864 = vrot.lane.b32.xlu2 %v9731_v58, %s6776_s14  ;;  %v4229_v12 = vpack.c.bf16 %v4175_v5, %v4175_v5  ;;  %v3821_v5 = vmax.f32 %v9768_v3, 0.0 }
 0x3fe   : > { %v4736_v41 = vpop.permute.xlu1 %4735  ;;  %v4689_v63 = vpop.permute.xlu0 %4688  ;;  %6192 = vmatmul.msk.bf16.gmra.mxu1 %vm2812_vm3, %v5432_v15 }
 0x3ff   : > { %v4986_v46 = vsel %vm3195_vm8, %v4954_v57, %v4689_v63  ;;  %v4631_v63 = vrot.slane %v4368_v6, 1  ;;  %v3818_v57 = vmax.f32 %v9653_v27, 0.0  ;;  %v4301_v6 = vunpack.c.l.b16 %v4227_v50 }
 0x400   : > { %v5018_v20 = vsel %vm3341_vm10, %v4986_v46, %v4736_v41  ;;  %v4353_v15 = vunpack.c.l.b16 %v4229_v12 }
 0x401   : > { %v9802_v27 = vsel %vm1101_vm1, %v4630_v0, %v4631_v63 }
 0x403   : > { %v3748_v14 = vpop.f32.mrf.mxu3 }
 0x404   : > { %4583 = vrot.lane.b32.xlu1 %v9664_v52, %s6765_s24  ;;  %4899 = vrot.lane.b32.xlu0 %v9749_v30, %s6775_s13  ;;  %v9762_v2 = vpop.permute.xlu2 %4575  ;;  %v5051_v52 = vsel %vm5043_vm2, %v5018_v20, %v9626_v49  ;;  %v4510_v49 = vrot.slane %v4508_v53, 1 }
 0x405   : > { %4663 = vrot.lane.b32.xlu2 %v9661_v25, %s6767_s26 }
 0x406   : > { %v4855_v9 = vpop.permute.xlu1 %4854  ;;  %v4808_v42 = vpop.permute.xlu0 %4807  ;;  %v4511_v1 = vor.u32 %v4510_v49, %v4506_v33  ;;  %v4369_v33 = vpack.c.b16 %v4353_v15, %v4353_v15 }
 0x407   : > { %v5084_v43 = vsel %vm5076_vm15, %v5051_v52, %v4808_v42  ;;  %v6139_v52 = vld [vmem:[%s6826_s22 + $0x70] sm:$0xe]  ;;  %v6141_v42 = vld [vmem:[%s6826_s22 + $0x78] sm:$0x1] }
 0x408   : > { %v5117_v32 = vsel %vm5109_vm14, %v5084_v43, %v4855_v9  ;;  %v9795_v46 = vsel %vm704_vm0, %v4511_v1, %v4515_v56  ;;  %v5320_v9 = vrot.slane %v6140_v55, 5  ;;  %v6177_v43 = vrot.slane %v6139_v52, 9 }
 0x409   : > { %v5150_v25 = vsel %vm10689_vm5, %v5117_v32, %v9666_v38  ;;  %v5323_v53 = vrot.slane %v6141_v42, 5  ;;  %v3820_v1 = vmax.f32 %v9739_v31, 0.0  ;;  %vm10692_vm5 = vmmov %vm10690_vm9  ;;  %v4634_v12 = vrot.slane %v4369_v33, 1 }
 0x40a   : > { %6223 = vmatmul.msk.bf16.gmra.mxu2 %vm10690_vm9, %v5150_v25  ;;  %v5322_v32 = vrot.slane %v5320_v9, 4  ;;  %v5321_v49 = vsel %vm9405_vm11, %v6177_v43, %v5320_v9  ;;  %v4926_v9 = vsel %vm2903_vm4, %v9340_v11, %v9762_v2  ;;  %v6143_v43 = vld [vmem:[%s6826_s22 + $0x84] sm:$0xf]  ;;  %v6142_v11 = vld [vmem:[%s6826_s22 + $0x80] sm:$0xe]  ;;  %vm10693_vm9 = vmmov %vm10691_vm7 }
 0x40b   : > { %v9817_v25 = vpop.f32.mrf.mxu3  ;;  %v5406_v26 = vunpack.c.l.b16 %v5321_v49  ;;  %v6144_v2 = vld [vmem:[%s6826_s22 + $0x88] sm:$0x1] }
 0x40c   : > { %4747 = vrot.lane.b32.xlu1 %v9731_v58, %s6770_s29  ;;  %4700 = vrot.lane.b32.xlu0 %v9684_v34, %s6769_s28  ;;  %v9784_v40 = vpop.permute.xlu2 %4739 }
 0x40d   : > { %4782 = vrot.lane.b32.xlu2 %v9749_v30, %s6773_s11 }
 0x40e   : > { %v4654_v41 = vpop.permute.xlu1 %4653  ;;  %v4574_v38 = vpop.permute.xlu0 %4573 }
 0x40f   : > { %v4924_v61 = vsel %vm2903_vm4, %v9235_v37, %v4574_v38  ;;  %v4228_v37 = vpack.c.bf16 %v3818_v57, %v3818_v57 }
 0x410   : > { %v4956_v60 = vsel %vm3049_vm6, %v4924_v61, %v4654_v41  ;;  %v5324_v41 = vsel %vm9405_vm11, %v5322_v32, %v5323_v53  ;;  %v3822_v61 = vmax.f32 %v3748_v14, 0.0  ;;  %v4231_v14 = vpack.c.bf16 %v3821_v5, %v3821_v5 }
 0x411   : > { %v4988_v20 = vsel %vm3195_vm8, %v4956_v60, %v9705_v8  ;;  %v4302_v24 = vunpack.c.l.b16 %v4228_v37  ;;  %v5407_v38 = vunpack.c.l.b16 %v5324_v41  ;;  %v4525_v37 = vshll.u32 %v4369_v33, 16 }
 0x412   : > { %v4178_v31 = vsel %vm3974_vm13, %v3822_v61, 0.0  ;;  %v4304_v42 = vunpack.c.l.b16 %v4231_v14  ;;  %v5330_v33 = vrot.slane %v6144_v2, 5 }
 0x413   : > { %v9824_v8 = vpack.c.b16 %v4302_v24, %v4301_v6  ;;  %v5433_v57 = vpack.c.b16 %v5407_v38, %v5406_v26  ;;  %v9853_v60 = vpop.f32.mrf.mxu3  ;;  %v6178_v26 = vrot.slane %v6142_v11, 9 }
 0x414   : > { %4866 = vrot.lane.b32.xlu1 %v9795_v46, %s6776_s14  ;;  %4819 = vrot.lane.b32.xlu0 %v9760_v10, %s6774_s12 }
 0x415   : > { %4901 = vrot.lane.b32.xlu2 %v9802_v27, %s6775_s13  ;;  %v4520_v4 = vshll.u32 %v9824_v8, 16  ;;  %6193 = vmatmul.msk.bf16.gmra.mxu1 %vm2812_vm3, %v5433_v57  ;;  %v4518_v55 = vshrl.u32 %v9824_v8, 16  ;;  %v4633_v6 = vrot.slane %v9824_v8, 1 }
 0x416   : > { %v4773_v23 = vpop.permute.xlu1 %4772  ;;  %v4738_v17 = vpop.permute.xlu0 %4737 }
 0x417   : > { %v9809_v22 = vpop.permute.xlu2 %4858  ;;  %v5020_v47 = vsel %vm3341_vm10, %v4988_v20, %v4738_v17  ;;  %v4522_v3 = vrot.slane %v4520_v4, 1  ;;  %v9865_v32 = vsel %vm1101_vm1, %v4633_v6, %v4634_v12 }
 0x418   : > { %v5053_v62 = vsel %vm5043_vm2, %v5020_v47, %v4773_v23  ;;  %v4527_v23 = vrot.slane %v4525_v37, 1  ;;  %v4232_v47 = vpack.c.bf16 %v4178_v31, %v4178_v31 }
 0x419   : > { %v4523_v52 = vor.u32 %v4522_v3, %v4518_v55 }
 0x41a   : > { %v4354_v41 = vunpack.c.l.b16 %v4232_v47 }
 0x41b   : > { %v9868_v53 = vsel %vm704_vm0, %v4523_v52, %v4527_v23  ;;  %v3756_v4 = vpop.f32.mrf.mxu3  ;;  %v5504_v6 = vpop.f32.mrf.mxu1 }
 0x41c   : > { %4665 = vrot.lane.b32.xlu1 %v9749_v30, %s6767_s26  ;;  %4585 = vrot.lane.b32.xlu0 %v9731_v58, %s6765_s24  ;;  %v5086_v58 = vsel %vm5076_vm15, %v5053_v62, %v9726_v48  ;;  %v4176_v48 = vsel %vm3915_vm12, %v3820_v1, 0.0  ;;  %v5327_v62 = vrot.slane %v6143_v43, 5  ;;  %v3825_v12 = vmax.f32 %v3756_v4, 0.0 }
 0x41d   : > { %4702 = vrot.lane.b32.xlu2 %v9760_v10, %s6769_s28  ;;  %v4230_v24 = vpack.c.bf16 %v4176_v48, %v4176_v48 }
 0x41e   : > { %v4892_v56 = vpop.permute.xlu1 %4891  ;;  %v4857_v30 = vpop.permute.xlu0 %4856  ;;  %v5329_v38 = vrot.slane %v5327_v62, 4  ;;  %v5328_v1 = vsel %vm9405_vm11, %v6178_v26, %v5327_v62  ;;  %v4181_v62 = vsel %vm3974_vm13, %v3825_v12, 0.0 }
 0x41f   : > { %v9832_v63 = vpop.permute.xlu2 %4657  ;;  %v5119_v51 = vsel %vm5109_vm14, %v5086_v58, %v4857_v30  ;;  %v4303_v49 = vunpack.c.l.b16 %v4230_v24  ;;  %v5408_v5 = vunpack.c.l.b16 %v5328_v1  ;;  %v4235_v2 = vpack.c.bf16 %v4181_v62, %v4181_v62 }
 0x420   : > { %v5152_v0 = vsel %vm10691_vm7, %v5119_v51, %v4892_v56  ;;  %v5331_v61 = vsel %vm9405_vm11, %v5329_v38, %v5330_v33  ;;  %vm10694_vm7 = vmmov %vm10692_vm5 }
 0x421   : > { %6224 = vmatmul.msk.bf16.gmra.mxu2 %vm10692_vm5, %v5152_v0  ;;  %v9879_v58 = vpack.c.b16 %v4304_v42, %v4303_v49  ;;  %v4370_v0 = vpack.c.b16 %v4354_v41, %v4354_v41  ;;  %v5409_v37 = vunpack.c.l.b16 %v5331_v61  ;;  %v3824_v42 = vmax.f32 %v9853_v60, 0.0  ;;  %vm10695_vm5 = vmmov %vm10693_vm9 }
 0x423   : > { %v4532_v31 = vshll.u32 %v9879_v58, 16  ;;  %v5434_v3 = vpack.c.b16 %v5409_v37, %v5408_v5  ;;  %v4537_v14 = vshll.u32 %v4370_v0, 16  ;;  %v4530_v52 = vshrl.u32 %v9879_v58, 16 }
 0x424   : > { %4784 = vrot.lane.b32.xlu1 %v9802_v27, %s6773_s11  ;;  %4749 = vrot.lane.b32.xlu0 %v9795_v46, %s6770_s29  ;;  %v4234_v49 = vpack.c.bf16 %v3824_v42, %v3824_v42  ;;  %v4637_v26 = vrot.slane %v4370_v0, 1  ;;  %v4636_v4 = vrot.slane %v9879_v58, 1  ;;  %v4355_v5 = vunpack.c.l.b16 %v4235_v2  ;;  %v5506_v0 = vpop.f32.mrf.mxu1 }
 0x425   : > { %4821 = vrot.lane.b32.xlu2 %v9824_v8, %s6774_s12  ;;  %6194 = vmatmul.msk.bf16.gmra.mxu1 %vm2812_vm3, %v5434_v3  ;;  %v4534_v23 = vrot.slane %v4532_v31, 1  ;;  %v4539_v47 = vrot.slane %v4537_v14, 1  ;;  %v6145_v3 = vld [vmem:[%s6826_s22 + $0x90] sm:$0xe]  ;;  %v6147_v14 = vld [vmem:[%s6826_s22 + $0x98] sm:$0x1] }
 0x426   : > { %v4693_v50 = vpop.permute.xlu1 %4692  ;;  %v4656_v20 = vpop.permute.xlu0 %4655  ;;  %v4306_v1 = vunpack.c.l.b16 %v4234_v49  ;;  %v9941_v31 = vsel %vm1101_vm1, %v4636_v4, %v4637_v26 }
 0x427   : > { %v9855_v17 = vpop.permute.xlu2 %4776  ;;  %v4958_v15 = vsel %vm3049_vm6, %v4926_v9, %v4656_v20  ;;  %v3823_v9 = vmax.f32 %v9817_v25, 0.0  ;;  %v4535_v43 = vor.u32 %v4534_v23, %v4530_v52  ;;  %v6179_v23 = vrot.slane %v6145_v3, 9 }
 0x428   : > { %v4990_v56 = vsel %vm3195_vm8, %v4958_v15, %v4693_v50  ;;  %v9908_v15 = vpop.f32.mrf.mxu3 }
 0x429   : > { %v9920_v25 = vsel %vm704_vm0, %v4535_v43, %v4539_v47 }
 0x42c   : > { %4903 = vrot.lane.b32.xlu1 %v9865_v32, %s6775_s13  ;;  %4868 = vrot.lane.b32.xlu0 %v9868_v53, %s6776_s14 }
 0x42d   : > { %4587 = vrot.lane.b32.xlu2 %v9795_v46, %s6765_s24  ;;  %v5022_v46 = vsel %vm3341_vm10, %v4990_v56, %v9784_v40 }
 0x42e   : > { %v4812_v30 = vpop.permute.xlu1 %4811  ;;  %v4775_v57 = vpop.permute.xlu0 %4774 }
 0x42f   : > { %v9881_v51 = vpop.permute.xlu2 %4895  ;;  %v5055_v48 = vsel %vm5043_vm2, %v5022_v46, %v4775_v57  ;;  %v6146_v46 = vld [vmem:[%s6826_s22 + $0x94] sm:$0xf] }
 0x430   : > { %v5088_v50 = vsel %vm5076_vm15, %v5055_v48, %v4812_v30  ;;  %v5334_v37 = vrot.slane %v6146_v46, 5  ;;  %v5509_v46 = vpop.f32.mrf.mxu1 }
 0x431   : > { %v5121_v24 = vsel %vm5109_vm14, %v5088_v50, %v9809_v22  ;;  %v4179_v22 = vsel %vm3915_vm12, %v3823_v9, 0.0  ;;  %v3761_v50 = vpop.f32.mrf.mxu3  ;;  %v4371_v9 = vpack.c.b16 %v4355_v5, %v4355_v5 }
 0x432   : > { %v4233_v38 = vpack.c.bf16 %v4179_v22, %v4179_v22  ;;  %v5336_v12 = vrot.slane %v5334_v37, 4 }
 0x434   : > { %4704 = vrot.lane.b32.xlu1 %v9824_v8, %s6769_s28  ;;  %4667 = vrot.lane.b32.xlu0 %v9802_v27, %s6767_s26  ;;  %v4305_v48 = vunpack.c.l.b16 %v4233_v38 }
 0x435   : > { %4751 = vrot.lane.b32.xlu2 %v9868_v53, %s6770_s29 }
 0x436   : > { %v4578_v40 = vpop.permute.xlu1 %4577  ;;  %v4894_v55 = vpop.permute.xlu0 %4893 }
 0x437   : > { %v9899_v20 = vpop.permute.xlu2 %4696  ;;  %v5154_v27 = vsel %vm10693_vm9, %v5121_v24, %v4894_v55  ;;  %v4928_v41 = vsel %vm2903_vm4, %v9418_v45, %v4578_v40  ;;  %v5337_v55 = vrot.slane %v6147_v14, 5  ;;  %v9950_v24 = vpack.c.b16 %v4306_v1, %v4305_v48  ;;  %vm10696_vm9 = vmmov %vm10694_vm7 }
 0x438   : > { %6225 = vmatmul.msk.bf16.gmra.mxu2 %vm10694_vm7, %v5154_v27  ;;  %v4960_v57 = vsel %vm3049_vm6, %v4928_v41, %v9832_v63  ;;  %v4640_v1 = vrot.slane %v4371_v9, 1  ;;  %vm10697_vm7 = vmmov %vm10695_vm5 }
 0x439   : > { %v4544_v41 = vshll.u32 %v9950_v24, 16  ;;  %v3763_v26 = vpop.f32.mrf.mxu3  ;;  %v4639_v48 = vrot.slane %v9950_v24, 1 }
 0x43a   : > { %v3828_v4 = vmax.f32 %v3763_v26, 0.0 }
 0x43b   : > { %v9990_v14 = vsel %vm1101_vm1, %v4639_v48, %v4640_v1 }
 0x43c   : > { %4786 = vrot.lane.b32.xlu0 %v9865_v32, %s6773_s11  ;;  %4823 = vrot.lane.b32.xlu1 %v9879_v58, %s6774_s12  ;;  %v5657_v60 = vpop.f32.mrf.mxu2 }
 0x43d   : > { %4870 = vrot.lane.b32.xlu2 %v9920_v25, %s6776_s14  ;;  %v5658_v11 = vadd.f32 %v5657_v60, %v5504_v6  ;;  %v5335_v6 = vsel %vm9405_vm11, %v6179_v23, %v5334_v37 }
 0x43e   : > { %v4742_v56 = vpop.permute.xlu1 %4741  ;;  %v4695_v45 = vpop.permute.xlu0 %4694  ;;  %v5410_v22 = vunpack.c.l.b16 %v5335_v6 }
 0x43f   : > { %v5737_v33 = vmax.f32 %v5658_v11, 0.0  ;;  %v9931_v30 = vpop.permute.xlu2 %4815  ;;  %v4992_v61 = vsel %vm3195_vm8, %v4960_v57, %v4695_v45  ;;  %v4542_v57 = vshrl.u32 %v9950_v24, 16 }
 0x440   : > { %v5024_v63 = vsel %vm3341_vm10, %v4992_v61, %v4742_v56  ;;  %v4549_v56 = vshll.u32 %v4371_v9, 16  ;;  %v3826_v61 = vmax.f32 %v9908_v15, 0.0 }
 0x441   : > { %5769 = vst.msk [vmem:[%s9929_s21] sm:$0xff] %vm2903_vm4, %v5737_v33  ;;  %v5057_v43 = vsel %vm5043_vm2, %v5024_v63, %v9855_v17  ;;  %v4546_v17 = vrot.slane %v4544_v41, 1  ;;  %v6150_v41 = vld [vmem:[%s6826_s22 + $0xa8] sm:$0x1] }
 0x442   : > { %v4551_v33 = vrot.slane %v4549_v56, 1  ;;  %v4182_v15 = vsel %vm3915_vm12, %v3826_v61, 0.0 }
 0x443   : > { %v4547_v5 = vor.u32 %v4546_v17, %v4542_v57  ;;  %v5344_v17 = vrot.slane %v6150_v41, 5 }
 0x444   : > { %4589 = vrot.lane.b32.xlu1 %v9868_v53, %s6765_s24  ;;  %4905 = vrot.lane.b32.xlu0 %v9941_v31, %s6775_s13  ;;  %v5659_v40 = vpop.f32.mrf.mxu2  ;;  %v5338_v53 = vsel %vm9405_vm11, %v5336_v12, %v5337_v55 }
 0x445   : > { %4669 = vrot.lane.b32.xlu2 %v9865_v32, %s6767_s26  ;;  %v5660_v47 = vadd.f32 %v5659_v40, %v5506_v0  ;;  %v5411_v60 = vunpack.c.l.b16 %v5338_v53  ;;  %v3827_v0 = vmax.f32 %v3761_v50, 0.0  ;;  %v9985_v3 = vsel %vm704_vm0, %v4547_v5, %v4551_v33 }
 0x446   : > { %v4861_v27 = vpop.permute.xlu1 %4860  ;;  %v4814_v62 = vpop.permute.xlu0 %4813  ;;  %v2557_v40 = vshrl.u32 %v9218_v18, 16 }
 0x447   : > { %v5738_v52 = vmax.f32 %v5660_v47, 0.0  ;;  %v9958_v42 = vpop.permute.xlu2 %4581  ;;  %v5090_v32 = vsel %vm5076_vm15, %v5057_v43, %v4814_v62  ;;  %v5435_v11 = vpack.c.b16 %v5411_v60, %v5410_v22  ;;  %v4237_v23 = vpack.c.bf16 %v3827_v0, %v3827_v0  ;;  %v6149_v43 = vld [vmem:[%s6826_s22 + $0xa4] sm:$0xf] }
 0x448   : > { %v5123_v49 = vsel %vm5109_vm14, %v5090_v32, %v4861_v27  ;;  %v4236_v27 = vpack.c.bf16 %v4182_v15, %v4182_v15  ;;  %v2559_v22 = vor.u32 %v2557_v40, %v9249_v7  ;;  %v5341_v60 = vrot.slane %v6149_v43, 5  ;;  %v6152_v43 = vld [vmem:[%s6826_s22 + $0xb4] sm:$0xf] }
 0x449   : > { %5770 = vst.msk [vmem:[%s9929_s21 + $0x8] sm:$0xff] %vm2903_vm4, %v5738_v52  ;;  %v5156_v2 = vsel %vm10695_vm5, %v5123_v49, %v9881_v51  ;;  %6195 = vmatmul.msk.bf16.gmra.mxu1 %vm2812_vm3, %v5435_v11  ;;  %v4308_v32 = vunpack.c.l.b16 %v4237_v23  ;;  %v6148_v49 = vld [vmem:[%s6826_s22 + $0xa0] sm:$0xe]  ;;  %v5511_v11 = vpop.f32.mrf.mxu1  ;;  %vm10698_vm5 = vmmov %vm10696_vm9 }
 0x44a   : > { %6226 = vmatmul.msk.bf16.gmra.mxu2 %vm10696_vm9, %v5156_v2  ;;  %v6180_v2 = vrot.slane %v6148_v49, 9  ;;  %v5343_v56 = vrot.slane %v5341_v60, 4  ;;  %v4307_v26 = vunpack.c.l.b16 %v4236_v27  ;;  %v6153_v49 = vld [vmem:[%s6826_s22 + $0xb8] sm:$0x1]  ;;  %vm10700_vm9 = vmmov %vm10698_vm5 }
 0x44c   : > { %4706 = vrot.lane.b32.xlu0 %v9879_v58, %s6769_s28  ;;  %4753 = vrot.lane.b32.xlu1 %v9920_v25, %s6770_s29  ;;  %v10023_v57 = vpack.c.b16 %v4308_v32, %v4307_v26  ;;  %v6151_v32 = vld [vmem:[%s6826_s22 + $0xb0] sm:$0xe] }
 0x44d   : > { %4788 = vrot.lane.b32.xlu2 %v9941_v31, %s6773_s11 }
 0x44e   : > { %v4660_v38 = vpop.permute.xlu1 %4659  ;;  %v4580_v51 = vpop.permute.xlu0 %4579 }
 0x44f   : > { %v9977_v45 = vpop.permute.xlu2 %4745  ;;  %v4930_v37 = vsel %vm2903_vm4, %v9455_v21, %v4580_v51  ;;  %v4184_v21 = vsel %vm3974_vm13, %v3828_v4, 0.0  ;;  %v5345_v51 = vsel %vm9405_vm11, %v5343_v56, %v5344_v17  ;;  %v5351_v56 = vrot.slane %v6153_v49, 5  ;;  %v6155_v49 = vld [vmem:[%s6826_s22 + $0xc4] sm:$0xf] }
 0x450   : > { %v4962_v50 = vsel %vm3049_vm6, %v4930_v37, %v4660_v38  ;;  %v4238_v6 = vpack.c.bf16 %v4184_v21, %v4184_v21 }
 0x451   : > { %v4994_v52 = vsel %vm3195_vm8, %v4962_v50, %v9899_v20  ;;  %v5342_v20 = vsel %vm9405_vm11, %v6180_v2, %v5341_v60 }
 0x452   : > { %v4356_v38 = vunpack.c.l.b16 %v4238_v6  ;;  %v4554_v6 = vshrl.u32 %v10023_v57, 16 }
 0x454   : > { %4825 = vrot.lane.b32.xlu0 %v9950_v24, %s6774_s12  ;;  %4872 = vrot.lane.b32.xlu1 %v9985_v3, %s6776_s14  ;;  %v5662_v63 = vpop.f32.mrf.mxu2  ;;  %v4372_v37 = vpack.c.b16 %v4356_v38, %v4356_v38 }
 0x455   : > { %4907 = vrot.lane.b32.xlu2 %v9990_v14, %s6775_s13  ;;  %v5663_v12 = vadd.f32 %v5662_v63, %v5509_v46  ;;  %v5412_v46 = vunpack.c.l.b16 %v5342_v20  ;;  %v4556_v63 = vshll.u32 %v10023_v57, 16 }
 0x456   : > { %v4779_v55 = vpop.permute.xlu1 %4778  ;;  %v4744_v9 = vpop.permute.xlu0 %4743  ;;  %v4561_v40 = vshll.u32 %v4372_v37, 16  ;;  %v4643_v17 = vrot.slane %v4372_v37, 1 }
 0x457   : > { %v10002_v47 = vpop.permute.xlu2 %4864  ;;  %v5739_v53 = vmax.f32 %v5663_v12, 0.0  ;;  %v5026_v62 = vsel %vm3341_vm10, %v4994_v52, %v4744_v9  ;;  %v4558_v23 = vrot.slane %v4556_v63, 1 }
 0x458   : > { %v5059_v33 = vsel %vm5043_vm2, %v5026_v62, %v4779_v55  ;;  %v4563_v9 = vrot.slane %v4561_v40, 1 }
 0x459   : > { %5771 = vst.msk [vmem:[%s9929_s21 + $0x10] sm:$0xff] %vm2903_vm4, %v5739_v53  ;;  %v4932_v53 = vsel %vm2903_vm4, %v9519_v59, %v9958_v42  ;;  %v4559_v52 = vor.u32 %v4558_v23, %v4554_v6  ;;  %v6181_v42 = vrot.slane %v6151_v32, 9 }
 0x45b   : > { %v3766_v1 = vpop.f32.mrf.mxu3  ;;  %v10056_v60 = vsel %vm704_vm0, %v4559_v52, %v4563_v9 }
 0x45c   : > { %4591 = vrot.lane.b32.xlu0 %v9920_v25, %s6765_s24  ;;  %4671 = vrot.lane.b32.xlu1 %v9941_v31, %s6767_s26  ;;  %v5664_v7 = vpop.f32.mrf.mxu2  ;;  %v5413_v25 = vunpack.c.l.b16 %v5345_v51  ;;  %v5092_v31 = vsel %vm5076_vm15, %v5059_v33, %v9931_v30  ;;  %v3829_v18 = vmax.f32 %v3766_v1, 0.0 }
 0x45d   : > { %2630 = vrot.lane.b32.xlu2 %v2559_v22, %s6771_s30  ;;  %v5665_v61 = vadd.f32 %v5664_v7, %v5511_v11  ;;  %v5348_v22 = vrot.slane %v6152_v43, 5 }
 0x45e   : > { %v4898_v4 = vpop.permute.xlu1 %4897  ;;  %v4863_v0 = vpop.permute.xlu0 %4862  ;;  %v5436_v21 = vpack.c.b16 %v5413_v25, %v5412_v46  ;;  %v4185_v41 = vsel %vm3915_vm12, %v3829_v18, 0.0  ;;  %vm10699_vm12 = vmmov %vm10697_vm7 }
 0x45f   : > { %v10025_v5 = vpop.permute.xlu2 %4663  ;;  %v5740_v48 = vmax.f32 %v5665_v61, 0.0  ;;  %v5125_v15 = vsel %vm5109_vm14, %v5092_v31, %v4863_v0  ;;  %v5350_v2 = vrot.slane %v5348_v22, 4  ;;  %v5349_v7 = vsel %vm9405_vm11, %v6181_v42, %v5348_v22 }
 0x460   : > { %v5158_v50 = vsel %vm10697_vm7, %v5125_v15, %v4898_v4  ;;  %6196 = vmatmul.msk.bf16.gmra.mxu1 %vm2812_vm3, %v5436_v21  ;;  %v5414_v1 = vunpack.c.l.b16 %v5349_v7  ;;  %v4239_v36 = vpack.c.bf16 %v4185_v41, %v4185_v41  ;;  %v4642_v4 = vrot.slane %v10023_v57, 1 }
 0x461   : > { %5772 = vst.msk [vmem:[%s9929_s21 + $0x18] sm:$0xff] %vm2903_vm4, %v5740_v48  ;;  %6227 = vmatmul.msk.bf16.gmra.mxu2 %vm10698_vm5, %v5158_v50  ;;  %v5352_v51 = vsel %vm9405_vm11, %v5350_v2, %v5351_v56  ;;  %v5355_v41 = vrot.slane %v6155_v49, 5  ;;  %v6154_v56 = vld [vmem:[%s6826_s22 + $0xc0] sm:$0xe]  ;;  %v6159_v49 = vld [vmem:[%s6826_s22 + $0xd8] sm:$0x1] }
 0x462   : > { %v5415_v46 = vunpack.c.l.b16 %v5352_v51  ;;  %v10076_v31 = vsel %vm1101_vm1, %v4642_v4, %v4643_v17  ;;  %v6156_v17 = vld [vmem:[%s6826_s22 + $0xc8] sm:$0x1]  ;;  %v6182_v7 = vrot.slane %v6154_v56, 9 }
 0x463   : > { %v3768_v27 = vpop.f32.mrf.mxu3 }
 0x464   : > { %4708 = vrot.lane.b32.xlu0 %v9950_v24, %s6769_s28  ;;  %2810 = vrot.lane.b32.xlu1 %v2738_v44, %s6770_s29  ;;  %v3830_v62 = vmax.f32 %v3768_v27, 0.0  ;;  %v5437_v0 = vpack.c.b16 %v5415_v46, %v5414_v1  ;;  %v5358_v1 = vrot.slane %v6156_v17, 5  ;;  %v5356_v46 = vsel %vm9405_vm11, %v6182_v7, %v5355_v41 }
 0x465   : > { %4755 = vrot.lane.b32.xlu2 %v9985_v3, %s6770_s29 }
 0x466   : > { %v4699_v30 = vpop.permute.xlu1 %4698  ;;  %v4662_v55 = vpop.permute.xlu0 %4661  ;;  %v4240_v26 = vpack.c.bf16 %v3830_v62, %v3830_v62 }
 0x467   : > { %v10043_v12 = vpop.permute.xlu2 %4782  ;;  %v4964_v44 = vsel %vm3049_vm6, %v4932_v53, %v4662_v55 }
 0x468   : > { %v4996_v59 = vsel %vm3195_vm8, %v4964_v44, %v4699_v30  ;;  %v4680_v25 = vunpack.c.l.b16 %v4240_v26 }
 0x469   : > { %v5028_v20 = vsel %vm3341_vm10, %v4996_v59, %v9977_v45  ;;  %v4679_v45 = vunpack.c.l.b16 %v4239_v36 }
 0x46b   : > { %v10086_v15 = vpack.c.b16 %v4680_v25, %v4679_v45  ;;  %v5416_v45 = vunpack.c.l.b16 %v5356_v46 }
 0x46c   : > { %4790 = vrot.lane.b32.xlu0 %v9990_v14, %s6773_s11  ;;  %4827 = vrot.lane.b32.xlu1 %v10023_v57, %s6774_s12 }
 0x46d   : > { %4874 = vrot.lane.b32.xlu2 %v10056_v60, %s6776_s14  ;;  %v4720_v9 = vshll.u32 %v10086_v15, 16 }
 0x46e   : > { %v4818_v11 = vpop.permute.xlu1 %4817  ;;  %v4781_v33 = vpop.permute.xlu0 %4780 }
 0x46f   : > { %v10065_v38 = vpop.permute.xlu2 %4901  ;;  %v5061_v61 = vsel %vm5043_vm2, %v5028_v20, %v4781_v33  ;;  %v4722_v43 = vrot.slane %v4720_v9, 1  ;;  %v5357_v20 = vrot.slane %v5355_v41, 4  ;;  %v5365_v41 = vrot.slane %v6159_v49, 5 }
 0x470   : > { %v5094_v37 = vsel %vm5076_vm15, %v5061_v61, %v4818_v11  ;;  %6197 = vmatmul.msk.bf16.gmra.mxu1 %vm2812_vm3, %v5437_v0 }
 0x471   : > { %v5127_v50 = vsel %vm5109_vm14, %v5094_v37, %v10002_v47  ;;  %v5359_v37 = vsel %vm9405_vm11, %v5357_v20, %v5358_v1 }
 0x474   : > { %4593 = vrot.lane.b32.xlu1 %v9985_v3, %s6765_s24  ;;  %4909 = vrot.lane.b32.xlu0 %v10076_v31, %s6775_s13  ;;  %v5514_v3 = vpop.f32.mrf.mxu1 }
 0x475   : > { %4595 = vrot.lane.b32.xlu2 %v10056_v60, %s6765_s24 }
 0x476   : > { %v4584_v48 = vpop.permute.xlu1 %4583  ;;  %v4900_v21 = vpop.permute.xlu0 %4899 }
 0x477   : > { %v5160_v40 = vsel %vm10699_vm12, %v5127_v50, %v4900_v21  ;;  %v10091_v30 = vpop.permute.xlu2 %4702  ;;  %v4934_v47 = vsel %vm2903_vm4, %v9598_v39, %v4584_v48  ;;  %v5417_v21 = vunpack.c.l.b16 %v5359_v37 }
 0x478   : > { %v3771_v63 = vpop.f32.mrf.mxu3  ;;  %6228 = vmatmul.msk.bf16.gmra.mxu2 %vm10700_vm9, %v5160_v40  ;;  %v4966_v22 = vsel %vm3049_vm6, %v4934_v47, %v10025_v5 }
 0x479   : > { %v3831_v23 = vmax.f32 %v3771_v63, 0.0  ;;  %v4761_v63 = vrot.slane %v10086_v15, 1 }
 0x47b   : > { %v4187_v55 = vsel %vm3974_vm13, %v3831_v23, 0.0  ;;  %v5667_v6 = vpop.f32.mrf.mxu2  ;;  %vm10702_vm13 = vmmov %vm10698_vm5 }
 0x47c   : > { %v4241_v27 = vpack.c.bf16 %v4187_v55, %v4187_v55  ;;  %4675 = vrot.lane.b32.xlu1 %v10076_v31, %s6767_s26  ;;  %4673 = vrot.lane.b32.xlu0 %v9990_v14, %s6767_s26  ;;  %v5668_v53 = vadd.f32 %v5667_v6, %v5514_v3  ;;  %v4718_v14 = vshrl.u32 %v10086_v15, 16  ;;  %v5516_v42 = vpop.f32.mrf.mxu1 }
 0x47d   : > { %4710 = vrot.lane.b32.xlu2 %v10023_v57, %s6769_s28 }
 0x47e   : > { %v4715_v28 = vunpack.c.l.b16 %v4241_v27  ;;  %v4748_v18 = vpop.permute.xlu1 %4747  ;;  %v5741_v44 = vmax.f32 %v5668_v53, 0.0  ;;  %v4701_v52 = vpop.permute.xlu0 %4700  ;;  %v4723_v2 = vor.u32 %v4722_v43, %v4718_v14  ;;  %v6157_v14 = vld [vmem:[%s6826_s22 + $0xd0] sm:$0xe] }
 0x47f   : > { %v4998_v39 = vsel %vm3195_vm8, %v4966_v22, %v4701_v52  ;;  %v10112_v11 = vpop.permute.xlu2 %4821 }
 0x480   : > { %v4716_v62 = vpack.c.b16 %v4715_v28, %v4715_v28  ;;  %v3773_v32 = vpop.f32.mrf.mxu3  ;;  %5773 = vst.msk [vmem:[%s9929_s21 + $0x20] sm:$0xff] %vm2903_vm4, %v5741_v44  ;;  %v5030_v33 = vsel %vm3341_vm10, %v4998_v39, %v4748_v18 }
 0x482   : > { %v4725_v59 = vshll.u32 %v4716_v62, 16  ;;  %v4762_v36 = vrot.slane %v4716_v62, 1  ;;  %v6158_v62 = vld [vmem:[%s6826_s22 + $0xd4] sm:$0xf] }
 0x483   : > { %v5669_v5 = vpop.f32.mrf.mxu2  ;;  %v5362_v39 = vrot.slane %v6158_v62, 5 }
 0x484   : > { %v4727_v26 = vrot.slane %v4725_v59, 1  ;;  %4757 = vrot.lane.b32.xlu1 %v10056_v60, %s6770_s29  ;;  %4712 = vrot.lane.b32.xlu0 %v10086_v15, %s6769_s28  ;;  %v5670_v51 = vadd.f32 %v5669_v5, %v5516_v42  ;;  %v5063_v60 = vsel %vm5043_vm2, %v5030_v33, %v10043_v12  ;;  %v5519_v3 = vpop.f32.mrf.mxu1  ;;  %v5438_v12 = vpack.c.b16 %v5417_v21, %v5416_v45  ;;  %v6162_v21 = vld [vmem:[%s6826_s22 + $0xe8] sm:$0x1] }
 0x485   : > { %v4763_v23 = vsel %vm1101_vm1, %v4761_v63, %v4762_v36  ;;  %v6183_v59 = vrot.slane %v6157_v14, 9  ;;  %v5364_v42 = vrot.slane %v5362_v39, 4 }
 0x486   : > { %v4867_v61 = vpop.permute.xlu1 %4866  ;;  %v4728_v4 = vsel %vm704_vm0, %v4723_v2, %v4727_v26  ;;  %v5742_v25 = vmax.f32 %v5670_v51, 0.0  ;;  %v4820_v0 = vpop.permute.xlu0 %4819  ;;  %vm10701_vm0 = vmmov %vm10697_vm7  ;;  %6198 = vmatmul.msk.bf16.gmra.mxu1 %vm2812_vm3, %v5438_v12  ;;  %v5372_v12 = vrot.slane %v6162_v21, 5 }
 0x487   : > { %4759 = vrot.lane.b32.xlu2 %v4728_v4, %s6770_s29  ;;  %v5096_v48 = vsel %vm5076_vm15, %v5063_v60, %v4820_v0  ;;  %v4588_v55 = vpop.permute.xlu2 %4587  ;;  %vm10703_vm1 = vmmov %vm10701_vm0  ;;  %v6161_v60 = vld [vmem:[%s6826_s22 + $0xe4] sm:$0xf] }
 0x488   : > { %5774 = vst.msk [vmem:[%s9929_s21 + $0x28] sm:$0xff] %vm2903_vm4, %v5742_v25  ;;  %v5129_v50 = vsel %vm5109_vm14, %v5096_v48, %v4867_v61  ;;  %vm10704_vm7 = vmmov %vm10698_vm5  ;;  %v4938_v46 = vsel %vm2903_vm4, %v9760_v10, %v4588_v55  ;;  %v5369_v45 = vrot.slane %v6161_v60, 5  ;;  %v6160_v48 = vld [vmem:[%s6826_s22 + $0xe0] sm:$0xe]  ;;  %v10709_v60 = vld [vmem:[#allocation17_spill] sm:$0xff] }
 0x489   : > { %v5162_v40 = vsel %vm10701_vm0, %v5129_v50, %v10065_v38  ;;  %vm10705_vm5 = vmmov %vm10701_vm0 }
 0x48a   : > { %6229 = vmatmul.msk.bf16.gmra.mxu2 %vm10702_vm13, %v5162_v40  ;;  %v6184_v40 = vrot.slane %v6160_v48, 9  ;;  %vm10706_vm12 = vmmov %vm10704_vm7  ;;  %vm10713_vm13 = vcmask 97280  }
 0x48b   : > { %vm10707_vm9 = vmmov %vm10701_vm0 }
 0x48c   : > { %4792 = vrot.lane.b32.xlu0 %v10076_v31, %s6773_s11  ;;  %4794 = vrot.lane.b32.xlu1 %v4763_v23, %s6773_s11  ;;  %v5521_v31 = vpop.f32.mrf.mxu1  ;;  %v5370_v55 = vsel %vm9405_vm11, %v6184_v40, %v5369_v45  ;;  %vm10708_vm0 = vmmov %vm10704_vm7 }
 0x48d   : > { %v5672_v9 = vpop.f32.mrf.mxu2 }
 0x48e   : > { %v4666_v27 = vpop.permute.xlu1 %4665  ;;  %v5673_v6 = vadd.f32 %v5672_v9, %v5519_v3  ;;  %v4586_v38 = vpop.permute.xlu0 %4585  ;;  %v5371_v3 = vrot.slane %v5369_v45, 4 }
 0x48f   : > { %4829 = vrot.lane.b32.xlu2 %v10086_v15, %s6774_s12  ;;  %v4936_v53 = vsel %vm2903_vm4, %v9684_v34, %v4586_v38  ;;  %v4752_v44 = vpop.permute.xlu2 %4751 }
 0x490   : > { %v5743_v47 = vmax.f32 %v5673_v6, 0.0  ;;  %v4968_v28 = vsel %vm3049_vm6, %v4936_v53, %v4666_v27  ;;  %v5373_v27 = vsel %vm9405_vm11, %v5371_v3, %v5372_v12  ;;  %v10710_v12 = vld [vmem:[#allocation41_spill] sm:$0xff] }
 0x491   : > { %v5000_v34 = vsel %vm3195_vm8, %v4968_v28, %v10091_v30  ;;  %v5366_v30 = vsel %vm9405_vm11, %v5364_v42, %v5365_v41  ;;  %v5421_v53 = vunpack.c.l.b16 %v5373_v27 }
 0x492   : > { %5775 = vst.msk [vmem:[%s9929_s21 + $0x30] sm:$0xff] %vm2903_vm4, %v5743_v47  ;;  %v5419_v26 = vunpack.c.l.b16 %v5366_v30  ;;  %v5420_v47 = vunpack.c.l.b16 %v5370_v55 }
 0x494   : > { %4831 = vrot.lane.b32.xlu0 %v8765_v16, %s6774_s12  ;;  %4876 = vrot.lane.b32.xlu1 %v4728_v4, %s6776_s14  ;;  %v5524_v51 = vpop.f32.mrf.mxu1  ;;  %v5440_v28 = vpack.c.b16 %v5421_v53, %v5420_v47  ;;  %v10714_v47 = vld [vmem:[#allocation127_spill] sm:$0xff] }
 0x495   : > { %v5674_v15 = vpop.f32.mrf.mxu2 }
 0x496   : > { %v4785_v18 = vpop.permute.xlu1 %4784  ;;  %v5675_v52 = vadd.f32 %v5674_v15, %v5521_v31  ;;  %v4750_v43 = vpop.permute.xlu0 %4749 }
 0x497   : > { %4878 = vrot.lane.b32.xlu2 %v8788_v54, %s6776_s14  ;;  %v5032_v32 = vsel %vm3341_vm10, %v5000_v34, %v4750_v43  ;;  %v5363_v54 = vsel %vm9405_vm11, %v6183_v59, %v5362_v39  ;;  %v4871_v16 = vpop.permute.xlu2 %4870 }
 0x498   : > { %v5744_v22 = vmax.f32 %v5675_v52, 0.0  ;;  %v5065_v2 = vsel %vm5043_vm2, %v5032_v32, %v4785_v18  ;;  %v5418_v17 = vunpack.c.l.b16 %v5363_v54 }
 0x499   : > { %v5098_v33 = vsel %vm5076_vm15, %v5065_v2, %v10112_v11 }
 0x49a   : > { %5776 = vst.msk [vmem:[%s9929_s21 + $0x38] sm:$0xff] %vm2903_vm4, %v5744_v22  ;;  %v5439_v20 = vpack.c.b16 %v5419_v26, %v5418_v17 }
 0x49c   : > { %4911 = vrot.lane.b32.xlu0 %v4763_v23, %s6775_s13  ;;  %4913 = vrot.lane.b32.xlu1 %v4597_v13, %s6775_s13  ;;  %v5526_v37 = vpop.f32.mrf.mxu1 }
 0x49d   : > { %6199 = vmatmul.msk.bf16.gmra.mxu1 %vm2812_vm3, %v5439_v20  ;;  %v6164_v20 = vld [vmem:[%s6826_s22 + $0xf4] sm:$0xf] }
 0x49e   : > { %v4904_v56 = vpop.permute.xlu1 %4903  ;;  %v4869_v5 = vpop.permute.xlu0 %4868 }
 0x49f   : > { %v5131_v7 = vsel %vm5109_vm14, %v5098_v33, %v4869_v5  ;;  %v4670_v0 = vpop.permute.xlu2 %4669 }
 0x4a0   : > { %v5164_v13 = vsel %vm10703_vm1, %v5131_v7, %v4904_v56  ;;  %vm10716_vm1 = vcmask 162816  }
 0x4a1   : > { %6230 = vmatmul.msk.bf16.gmra.mxu2 %vm10704_vm7, %v5164_v13  ;;  %vm10717_vm7 = vcmask 228352  }
 0x4a4   : > { %v5677_v1 = vpop.f32.mrf.mxu2 }
 0x4a5   : > { %v5678_v36 = vadd.f32 %v5677_v1, %v5524_v51  ;;  %v5376_v51 = vrot.slane %v6164_v20, 5 }
 0x4a6   : > { %v4705_v61 = vpop.permute.xlu1 %4704  ;;  %v4668_v4 = vpop.permute.xlu0 %4667 }
 0x4a7   : > { %v5745_v11 = vmax.f32 %v5678_v36, 0.0  ;;  %v4970_v25 = vsel %vm3049_vm6, %v4938_v46, %v4668_v4  ;;  %v4789_v18 = vpop.permute.xlu2 %4788  ;;  %v6165_v4 = vld [vmem:[%s6826_s22 + $0xf8] sm:$0x1]  ;;  %v5378_v46 = vrot.slane %v5376_v51, 4 }
 0x4a8   : > { %v5002_v50 = vsel %vm3195_vm8, %v4970_v25, %v4705_v61  ;;  %v6163_v61 = vld [vmem:[%s6826_s22 + $0xf0] sm:$0xe]  ;;  %v5379_v25 = vrot.slane %v6165_v4, 5 }
 0x4a9   : > { %5777 = vst.msk [vmem:[%s9929_s21 + $0x40] sm:$0xff] %vm2903_vm4, %v5745_v11  ;;  %v5034_v38 = vsel %vm3341_vm10, %v5002_v50, %v4752_v44  ;;  %v5529_v44 = vpop.f32.mrf.mxu1  ;;  %v6185_v11 = vrot.slane %v6163_v61, 9 }
 0x4aa   : > { %v5380_v45 = vsel %vm9405_vm11, %v5378_v46, %v5379_v25 }
 0x4ac   : > { %v5679_v63 = vpop.f32.mrf.mxu2 }
 0x4ad   : > { %v5680_v23 = vadd.f32 %v5679_v63, %v5526_v37  ;;  %6200 = vmatmul.msk.bf16.gmra.mxu1 %vm2812_vm3, %v5440_v28  ;;  %v5377_v37 = vsel %vm9405_vm11, %v6185_v11, %v5376_v51  ;;  %v5423_v63 = vunpack.c.l.b16 %v5380_v45  ;;  %v10715_v28 = vld [vmem:[#allocation156_spill] sm:$0xff] }
 0x4ae   : > { %v4824_v9 = vpop.permute.xlu1 %4823  ;;  %v4787_v10 = vpop.permute.xlu0 %4786  ;;  %v5422_v50 = vunpack.c.l.b16 %v5377_v37 }
 0x4af   : > { %v5746_v6 = vmax.f32 %v5680_v23, 0.0  ;;  %v5067_v31 = vsel %vm5043_vm2, %v5034_v38, %v4787_v10  ;;  %v4908_v49 = vpop.permute.xlu2 %4907  ;;  %v10711_v10 = vld [vmem:[#allocation73_spill] sm:$0xff] }
 0x4b0   : > { %v5100_v15 = vsel %vm5076_vm15, %v5067_v31, %v4824_v9  ;;  %v5441_v9 = vpack.c.b16 %v5423_v63, %v5422_v50  ;;  %v6169_v50 = vld [vmem:[%s6826_s22 + $0x110] sm:$0xe]  ;;  %v6171_v63 = vld [vmem:[%s6826_s22 + $0x118] sm:$0x1] }
 0x4b1   : > { %5778 = vst.msk [vmem:[%s9929_s21 + $0x48] sm:$0xff] %vm2903_vm4, %v5746_v6  ;;  %v5133_v34 = vsel %vm5109_vm14, %v5100_v15, %v4871_v16  ;;  %v5531_v54 = vpop.f32.mrf.mxu1  ;;  %v10712_v6 = vld [vmem:[#allocation100_spill] sm:$0xff] }
 0x4b6   : > { %v4590_v52 = vpop.permute.xlu1 %4589  ;;  %v4906_v43 = vpop.permute.xlu0 %4905 }
 0x4b7   : > { %v5166_v62 = vsel %vm10705_vm5, %v5133_v34, %v4906_v43  ;;  %v4940_v32 = vsel %vm2903_vm4, %v9824_v8, %v4590_v52  ;;  %v2631_v16 = vpop.permute.xlu2 %2630  ;;  %vm10718_vm5 = vcmask 293888  }
 0x4b8   : > { %6231 = vmatmul.msk.bf16.gmra.mxu2 %vm10706_vm12, %v5166_v62  ;;  %v4972_v41 = vsel %vm3049_vm6, %v4940_v32, %v4670_v0  ;;  %v649_v0 = vpack.c.b16 %v10709_v60, %v10709_v60  ;;  %vm10719_vm12 = vmmov %vm10707_vm9 }
 0x4b9   : > { %v5534_v36 = vpop.f32.mrf.mxu1 }
 0x4ba   : > { %v2902_v23 = vsel %vm2812_vm3, %v649_v0, %v10710_v12 }
 0x4bb   : > { %v5682_v22 = vpop.f32.mrf.mxu2  ;;  %v2975_v55 = vsel %vm2903_vm4, %v2902_v23, %v10711_v10  ;;  %v5393_v23 = vrot.slane %v6171_v63, 5 }
 0x4bc   : > { %v5683_v39 = vadd.f32 %v5682_v22, %v5529_v44  ;;  %v3048_v38 = vsel %vm10713_vm13, %v2975_v55, %v10712_v6 }
 0x4bd   : > { %6201 = vmatmul.msk.bf16.gmra.mxu1 %vm2812_vm3, %v5441_v9  ;;  %v3121_v53 = vsel %vm3049_vm6, %v3048_v38, %v10714_v47 }
 0x4be   : > { %v4754_v14 = vpop.permute.xlu1 %4753  ;;  %v5747_v59 = vmax.f32 %v5683_v39, 0.0  ;;  %v4707_v42 = vpop.permute.xlu0 %4706  ;;  %v3194_v15 = vsel %vm10716_vm1, %v3121_v53, %v10715_v28  ;;  %v3502_v39 = vunpack.c.h.b16 %v9694_v35 }
 0x4bf   : > { %v5004_v2 = vsel %vm3195_vm8, %v4972_v41, %v4707_v42  ;;  %v4756_v31 = vpop.permute.xlu2 %4755  ;;  %v3267_v52 = vsel %vm3195_vm8, %v3194_v15, %v9247_v29  ;;  %v6166_v29 = vld [vmem:[%s6826_s22 + $0x100] sm:$0xe] }
 0x4c0   : > { %5779 = vst.msk [vmem:[%s9929_s21 + $0x50] sm:$0xff] %vm2903_vm4, %v5747_v59  ;;  %v5036_v30 = vsel %vm3341_vm10, %v5004_v2, %v4754_v14  ;;  %v3340_v43 = vsel %vm10717_vm7, %v3267_v52, %v2631_v16 }
 0x4c1   : > { %v5069_v33 = vsel %vm5043_vm2, %v5036_v30, %v4789_v18  ;;  %v5536_v18 = vpop.f32.mrf.mxu1  ;;  %v6186_v30 = vrot.slane %v6166_v29, 9 }
 0x4c3   : > { %v5684_v56 = vpop.f32.mrf.mxu2 }
 0x4c4   : > { %v5685_v8 = vadd.f32 %v5684_v56, %v5531_v54  ;;  %v6168_v54 = vld [vmem:[%s6826_s22 + $0x108] sm:$0x1] }
 0x4c6   : > { %v4873_v17 = vpop.permute.xlu1 %4872  ;;  %v5748_v26 = vmax.f32 %v5685_v8, 0.0  ;;  %v4826_v5 = vpop.permute.xlu0 %4825  ;;  %v5386_v8 = vrot.slane %v6168_v54, 5 }
 0x4c7   : > { %v5102_v7 = vsel %vm5076_vm15, %v5069_v33, %v4826_v5  ;;  %v4875_v35 = vpop.permute.xlu2 %4874 }
 0x4c8   : > { %5780 = vst.msk [vmem:[%s9929_s21 + $0x58] sm:$0xff] %vm2903_vm4, %v5748_v26  ;;  %v5135_v13 = vsel %vm5109_vm14, %v5102_v7, %v4873_v17 }
 0x4c9   : > { %v5168_v1 = vsel %vm10707_vm9, %v5135_v13, %v4908_v49  ;;  %v6167_v49 = vld [vmem:[%s6826_s22 + $0x104] sm:$0xf]  ;;  %vm10720_vm9 = vmmov %vm10708_vm0 }
 0x4ca   : > { %6232 = vmatmul.msk.bf16.gmra.mxu2 %vm10708_vm0, %v5168_v1  ;;  %v5383_v41 = vrot.slane %v6167_v49, 5 }
 0x4cc   : > { %v5385_v56 = vrot.slane %v5383_v41, 4 }
 0x4cd   : > { %v5687_v48 = vpop.f32.mrf.mxu2 }
 0x4ce   : > { %v4672_v21 = vpop.permute.xlu1 %4671  ;;  %v5688_v40 = vadd.f32 %v5687_v48, %v5534_v36  ;;  %v4592_v3 = vpop.permute.xlu0 %4591  ;;  %v5387_v33 = vsel %vm9405_vm11, %v5385_v56, %v5386_v8  ;;  %v6170_v48 = vld [vmem:[%s6826_s22 + $0x114] sm:$0xf] }
 0x4cf   : > { %v4942_v59 = vsel %vm2903_vm4, %v9879_v58, %v4592_v3  ;;  %v5384_v58 = vsel %vm9405_vm11, %v6186_v30, %v5383_v41  ;;  %v5425_v20 = vunpack.c.l.b16 %v5387_v33  ;;  %v5539_v36 = vpop.f32.mrf.mxu1  ;;  %v4596_v25 = vpop.permute.xlu2 %4595  ;;  %v6187_v3 = vrot.slane %v6169_v50, 9 }
 0x4d0   : > { %v5749_v27 = vmax.f32 %v5688_v40, 0.0  ;;  %v4974_v17 = vsel %vm3049_vm6, %v4942_v59, %v4672_v21  ;;  %v5424_v7 = vunpack.c.l.b16 %v5384_v58  ;;  %v5390_v21 = vrot.slane %v6170_v48, 5 }
 0x4d1   : > { %v4946_v49 = vsel %vm2903_vm4, %v10023_v57, %v4596_v25 }
 0x4d2   : > { %5781 = vst.msk [vmem:[%s9929_s21 + $0x60] sm:$0xff] %vm2903_vm4, %v5749_v27  ;;  %v5442_v51 = vpack.c.b16 %v5425_v20, %v5424_v7  ;;  %v5392_v12 = vrot.slane %v5390_v21, 4  ;;  %v5391_v10 = vsel %vm9405_vm11, %v6187_v3, %v5390_v21 }
 0x4d3   : > { %v5426_v38 = vunpack.c.l.b16 %v5391_v10 }
 0x4d4   : > { %6202 = vmatmul.msk.bf16.gmra.mxu1 %vm2812_vm3, %v5442_v51  ;;  %v5394_v55 = vsel %vm9405_vm11, %v5392_v12, %v5393_v23 }
 0x4d5   : > { %v5689_v34 = vpop.f32.mrf.mxu2  ;;  %v5427_v47 = vunpack.c.l.b16 %v5394_v55 }
 0x4d6   : > { %v2811_v62 = vpop.permute.xlu1 %2810  ;;  %v5690_v44 = vadd.f32 %v5689_v34, %v5536_v18  ;;  %v4709_v32 = vpop.permute.xlu0 %4708 }
 0x4d7   : > { %v3413_v22 = vsel %vm3341_vm10, %v3340_v43, %v2811_v62  ;;  %v5006_v26 = vsel %vm3195_vm8, %v4974_v17, %v4709_v32  ;;  %v5541_v40 = vpop.f32.mrf.mxu1  ;;  %v5443_v28 = vpack.c.b16 %v5427_v47, %v5426_v38  ;;  %v4711_v15 = vpop.permute.xlu2 %4710 }
 0x4d8   : > { %v3503_v14 = vunpack.c.l.b16 %v3413_v22  ;;  %v5750_v42 = vmax.f32 %v5690_v44, 0.0  ;;  %v5038_v13 = vsel %vm3341_vm10, %v5006_v26, %v4756_v31 }
 0x4da   : > { %v3535_v2 = vpack.c.b16 %v3503_v14, %v3502_v39  ;;  %5782 = vst.msk [vmem:[%s9929_s21 + $0x68] sm:$0xff] %vm2903_vm4, %v5750_v42 }
 0x4dc   : > { %6120 = vmatmul.msk.bf16.gmra.mxu3 %vm10718_vm5, %v3535_v2 }
 0x4de   : > { %v4828_v5 = vpop.permute.xlu1 %4827  ;;  %v4791_v16 = vpop.permute.xlu0 %4790 }
 0x4df   : > { %v5071_v1 = vsel %vm5043_vm2, %v5038_v13, %v4791_v16  ;;  %v5544_v43 = vpop.f32.mrf.mxu1 }
 0x4e0   : > { %v5104_v61 = vsel %vm5076_vm15, %v5071_v1, %v4828_v5 }
 0x4e1   : > { %v5137_v60 = vsel %vm5109_vm14, %v5104_v61, %v4875_v35  ;;  %v4760_v34 = vpop.permute.xlu2 %4759 }
 0x4e4   : > { %v5692_v4 = vpop.f32.mrf.mxu2  ;;  %6203 = vmatmul.msk.bf16.gmra.mxu1 %vm2812_vm3, %v5443_v28  ;;  %vm10721_vm3 = vmmov %vm10719_vm12 }
 0x4e5   : > { %v5693_v11 = vadd.f32 %v5692_v4, %v5539_v36 }
 0x4e6   : > { %v4594_v46 = vpop.permute.xlu1 %4593  ;;  %v4910_v0 = vpop.permute.xlu0 %4909 }
 0x4e7   : > { %v5751_v37 = vmax.f32 %v5693_v11, 0.0  ;;  %v5170_v45 = vsel %vm10719_vm12, %v5137_v60, %v4910_v0  ;;  %v5546_v39 = vpop.f32.mrf.mxu1  ;;  %v4944_v42 = vsel %vm2903_vm4, %v9950_v24, %v4594_v46 }
 0x4e8   : > { %6233 = vmatmul.msk.bf16.gmra.mxu2 %vm10720_vm9, %v5170_v45 }
 0x4e9   : > { %5783 = vst.msk [vmem:[%s9929_s21 + $0x70] sm:$0xff] %vm2903_vm4, %v5751_v37  ;;  %v4830_v14 = vpop.permute.xlu2 %4829 }
 0x4ec   : > { %v5694_v9 = vpop.f32.mrf.mxu2 }
 0x4ed   : > { %v5695_v27 = vadd.f32 %v5694_v9, %v5541_v40 }
 0x4ee   : > { %v4676_v6 = vpop.permute.xlu1 %4675  ;;  %v4674_v53 = vpop.permute.xlu0 %4673 }
 0x4ef   : > { %v5752_v31 = vmax.f32 %v5695_v27, 0.0  ;;  %v4978_v41 = vsel %vm3049_vm6, %v4946_v49, %v4676_v6  ;;  %v4976_v29 = vsel %vm3049_vm6, %v4944_v42, %v4674_v53  ;;  %v5549_v26 = vpop.f32.mrf.mxu1  ;;  %vm10722_vm6 = vmmov %vm10721_vm3 }
 0x4f0   : > { %v5008_v17 = vsel %vm3195_vm8, %v4976_v29, %v4711_v15 }
 0x4f1   : > { %5784 = vst.msk [vmem:[%s9929_s21 + $0x78] sm:$0xff] %vm2903_vm4, %v5752_v31  ;;  %v4879_v5 = vpop.permute.xlu2 %4878 }
 0x4f6   : > { %v4758_v18 = vpop.permute.xlu1 %4757  ;;  %v4713_v52 = vpop.permute.xlu0 %4712 }
 0x4f7   : > { %v5010_v54 = vsel %vm3195_vm8, %v4978_v41, %v4713_v52  ;;  %v5040_v57 = vsel %vm3341_vm10, %v5008_v17, %v4758_v18  ;;  %vm10723_vm8 = vmmov %vm10708_vm0  ;;  %v5551_v46 = vpop.f32.mrf.mxu1 }
 0x4f8   : > { %v5042_v35 = vsel %vm3341_vm10, %v5010_v54, %v4760_v34  ;;  %vm10724_vm10 = vmmov %vm10708_vm0 }
 0x4fb   : > { %v5697_v62 = vpop.f32.mrf.mxu2 }
 0x4fc   : > { %v5698_v19 = vadd.f32 %v5697_v62, %v5544_v43 }
 0x4fe   : > { %v4795_v44 = vpop.permute.xlu1 %4794  ;;  %v5753_v22 = vmax.f32 %v5698_v19, 0.0  ;;  %v4793_v32 = vpop.permute.xlu0 %4792 }
 0x4ff   : > { %v5075_v24 = vsel %vm5043_vm2, %v5042_v35, %v4795_v44  ;;  %v5073_v58 = vsel %vm5043_vm2, %v5040_v57, %v4793_v32 }
 0x500   : > { %5785 = vst.msk [vmem:[%s9929_s21 + $0x80] sm:$0xff] %vm2903_vm4, %v5753_v22  ;;  %v5106_v7 = vsel %vm5076_vm15, %v5073_v58, %v4830_v14 }
 0x503   : > { %v5699_v59 = vpop.f32.mrf.mxu2  ;;  %v5554_v37 = vpop.f32.mrf.mxu1 }
 0x504   : > { %v5700_v2 = vadd.f32 %v5699_v59, %v5546_v39 }
 0x506   : > { %v4877_v30 = vpop.permute.xlu1 %4876  ;;  %v5754_v56 = vmax.f32 %v5700_v2, 0.0  ;;  %v4832_v8 = vpop.permute.xlu0 %4831 }
 0x507   : > { %v5108_v33 = vsel %vm5076_vm15, %v5075_v24, %v4832_v8  ;;  %v5139_v51 = vsel %vm5109_vm14, %v5106_v7, %v4877_v30 }
 0x508   : > { %5786 = vst.msk [vmem:[%s9929_s21 + $0x88] sm:$0xff] %vm2903_vm4, %v5754_v56  ;;  %v5141_v20 = vsel %vm5109_vm14, %v5108_v33, %v4879_v5 }
 0x50b   : > { %v5556_v50 = vpop.f32.mrf.mxu1 }
 0x50d   : > { %v5702_v16 = vpop.f32.mrf.mxu2 }
 0x50e   : > { %v4914_v13 = vpop.permute.xlu1 %4913  ;;  %v5703_v1 = vadd.f32 %v5702_v16, %v5549_v26  ;;  %v4912_v61 = vpop.permute.xlu0 %4911 }
 0x50f   : > { %v5174_v36 = vsel %vm10721_vm3, %v5141_v20, %v4914_v13  ;;  %v5172_v4 = vsel %vm10722_vm6, %v5139_v51, %v4912_v61 }
 0x510   : > { %6235 = vmatmul.msk.bf16.vlgmr.msrb.gmra.mxu3 %vm10723_vm8, %v5174_v36  ;;  %v5755_v11 = vmax.f32 %v5703_v1, 0.0  ;;  %6234 = vmatmul.msk.bf16.gmra.mxu2 %vm10724_vm10, %v5172_v4 }
 0x512   : > { %5787 = vst.msk [vmem:[%s9929_s21 + $0x90] sm:$0xff] %vm2903_vm4, %v5755_v11 }
 0x515   : > { %v5704_v25 = vpop.f32.mrf.mxu2 }
 0x516   : > { %v5705_v60 = vadd.f32 %v5704_v25, %v5551_v46 }
 0x518   : > { %v5756_v0 = vmax.f32 %v5705_v60, 0.0 }
 0x51a   : > { %5788 = vst.msk [vmem:[%s9929_s21 + $0x98] sm:$0xff] %vm2903_vm4, %v5756_v0  ;;  %v5559_v12 = vpop.f32.mrf.mxu1 }
 0x522   : > { %v5561_v55 = vpop.f32.mrf.mxu1 }
 0x524   : > { %v5707_v45 = vpop.f32.mrf.mxu2 }
 0x525   : > { %v5708_v48 = vadd.f32 %v5707_v45, %v5554_v37 }
 0x527   : > { %v5757_v21 = vmax.f32 %v5708_v48, 0.0 }
 0x529   : > { %5789 = vst.msk [vmem:[%s9929_s21 + $0xa0] sm:$0xff] %vm2903_vm4, %v5757_v21 }
 0x52a   : > { %v5564_v47 = vpop.f32.mrf.mxu1 }
 0x52c   : > { %v5709_v63 = vpop.f32.mrf.mxu2 }
 0x52d   : > { %v5710_v40 = vadd.f32 %v5709_v63, %v5556_v50 }
 0x52f   : > { %v5758_v3 = vmax.f32 %v5710_v40, 0.0 }
 0x531   : > { %5790 = vst.msk [vmem:[%s9929_s21 + $0xa8] sm:$0xff] %vm2903_vm4, %v5758_v3 }
 0x532   : > { %v5566_v15 = vpop.f32.mrf.mxu1 }
 0x53a   : > { %v5569_v19 = vpop.f32.mrf.mxu1 }
 0x53b   : > { %v5712_v23 = vpop.f32.mrf.mxu2 }
 0x53c   : > { %v5713_v9 = vadd.f32 %v5712_v23, %v5559_v12 }
 0x53e   : > { %v5759_v10 = vmax.f32 %v5713_v9, 0.0 }
 0x540   : > { %5791 = vst.msk [vmem:[%s9929_s21 + $0xb0] sm:$0xff] %vm2903_vm4, %v5759_v10 }
 0x542   : > { %v5571_v39 = vpop.f32.mrf.mxu1 }
 0x543   : > { %v5714_v27 = vpop.f32.mrf.mxu2 }
 0x544   : > { %v5715_v6 = vadd.f32 %v5714_v27, %v5561_v55 }
 0x546   : > { %v5760_v38 = vmax.f32 %v5715_v6, 0.0 }
 0x548   : > { %5792 = vst.msk [vmem:[%s9929_s21 + $0xb8] sm:$0xff] %vm2903_vm4, %v5760_v38 }
 0x54d   : > { %v5717_v53 = vpop.f32.mrf.mxu2 }
 0x54e   : > { %v5718_v31 = vadd.f32 %v5717_v53, %v5564_v47 }
 0x550   : > { %v5761_v28 = vmax.f32 %v5718_v31, 0.0 }
 0x551   : > { %v5574_v42 = vpop.f32.mrf.mxu1 }
 0x552   : > { %5793 = vst.msk [vmem:[%s9929_s21 + $0xc0] sm:$0xff] %vm2903_vm4, %v5761_v28 }
 0x555   : > { %v5719_v18 = vpop.f32.mrf.mxu2 }
 0x556   : > { %v5720_v52 = vadd.f32 %v5719_v18, %v5566_v15 }
 0x558   : > { %v5762_v43 = vmax.f32 %v5720_v52, 0.0 }
 0x559   : > { %v5576_v41 = vpop.f32.mrf.mxu1 }
 0x55a   : > { %5794 = vst.msk [vmem:[%s9929_s21 + $0xc8] sm:$0xff] %vm2903_vm4, %v5762_v43 }
 0x55f   : > { %v3776_v34 = vpop.f32.mrf.mxu3 }
 0x561   : > { %v5579_v2 = vpop.f32.mrf.mxu1 }
 0x567   : > { %v3778_v62 = vpop.f32.mrf.mxu3 }
 0x569   : > { %v5581_v35 = vpop.f32.mrf.mxu1 }
 0x56b   : > { %v5722_v44 = vpop.f32.mrf.mxu2 }
 0x56c   : > { %v5723_v22 = vadd.f32 %v5722_v44, %v5569_v19 }
 0x56e   : > { %v5763_v32 = vmax.f32 %v5723_v22, 0.0 }
 0x570   : > { %5795 = vst.msk [vmem:[%s9929_s21 + $0xd0] sm:$0xff] %vm2903_vm4, %v5763_v32 }
 0x573   : > { %v5724_v14 = vpop.f32.mrf.mxu2 }
 0x574   : > { %v5725_v49 = vadd.f32 %v5724_v14, %v5571_v39 }
 0x576   : > { %v5764_v59 = vmax.f32 %v5725_v49, 0.0 }
 0x578   : > { %5796 = vst.msk [vmem:[%s9929_s21 + $0xd8] sm:$0xff] %vm2903_vm4, %v5764_v59 }
 0x593   : > { %v5732_v29 = vpop.f32.mrf.mxu3  ;;  %v5727_v54 = vpop.f32.mrf.mxu2 }
 0x594   : > { %v5733_v30 = vadd.f32 %v5732_v29, %v5579_v2  ;;  %v5728_v56 = vadd.f32 %v5727_v54, %v5574_v42 }
 0x596   : > { %v5767_v8 = vmax.f32 %v5733_v30, 0.0  ;;  %v5765_v17 = vmax.f32 %v5728_v56, 0.0 }
 0x598   : > { %5799 = vst.msk [vmem:[%s9929_s21 + $0xf0] sm:$0xff] %vm2903_vm4, %v5767_v8 }
 0x599   : > { %5797 = vst.msk [vmem:[%s9929_s21 + $0xe0] sm:$0xff] %vm2903_vm4, %v5765_v17 }
 0x59b   : > { %v5734_v57 = vpop.f32.mrf.mxu3  ;;  %v5729_v24 = vpop.f32.mrf.mxu2 }
 0x59c   : > { %v5735_v26 = vadd.f32 %v5734_v57, %v5581_v35  ;;  %v5730_v58 = vadd.f32 %v5729_v24, %v5576_v41 }
 0x59e   : > { %v5768_v33 = vmax.f32 %v5735_v26, 0.0  ;;  %v5766_v5 = vmax.f32 %v5730_v58, 0.0 }
 0x5a0   : > { %5800 = vst.msk [vmem:[%s9929_s21 + $0xf8] sm:$0xff] %vm2903_vm4, %v5768_v33 }
 0x5a1   : > { %5798 = vst.msk [vmem:[%s9929_s21 + $0xe8] sm:$0xff] %vm2903_vm4, %v5766_v5 }
 0x5a2 PF: > { %s14_s17 = sadd.s32 1, %s6762_s17   ;;  %s10725_s15 = smov %s6758_s16 }
 0x5a3   : > { %p11_p5 = scmp.ge.s32.totalorder %s14_s17, 4   ;;  %s10726_s16 = smov %s10728_s18 }
 0x5a5   :  { %13 = sbr.rel (!%p11_p5) target bundleno = 2 (0x2), region = 69 }

</bundles_post_ra>
